<compile_context>
chip_gen: v5e
topology: v5e:2x2
jax: 0.10.0
libtpu: 0.0.40
codegen_flags: <defaults>
</compile_context>

<pallas_src>
import jax
import jax.numpy as jnp
import numpy as np
from jax import lax
from jax.experimental import pallas as pl
from jax.experimental.pallas import tpu as pltpu

_EPS = 1e-5           # PyTorch BatchNorm1d default eps
_LEAKY_SLOPE = 0.01   # PyTorch LeakyReLU / F.leaky_relu default

# (Cout, Cin, kernel, pool) per block
_CFG = [
    (64, 1, 15, 3),
    (128, 64, 8, 3),
    (256, 128, 6, 2),
    (512, 256, 4, 2),
]


def _seq_lens(L):
    """[(in_len, conv_len, pool_len)] per block, per sample."""
    lens = []
    cur = L
    for (_, _, k, p) in _CFG:
        conv_len = cur - k + 1
        pool_len = conv_len // p
        lens.append((cur, conv_len, pool_len))
        cur = pool_len
    return lens


def _out_len(L):
    return _seq_lens(L)[-1][2]


# -----------------------------------------------------------------------------
# Host-side constant builders
# -----------------------------------------------------------------------------
def _pool_matrix_block1(conv_len, n):
    """(Lp, conv_len): row p averages conv positions [p*n, p*n+n)."""
    lp = conv_len // n
    P = np.zeros((lp, conv_len), np.float32)
    for p in range(lp):
        P[p, p * n:(p + 1) * n] = 1.0 / n
    return P


def _pool_matrix_stacked(bt, lin, k, n):
    """Pool matrix for samples stacked along rows.

    Input rows: sample s occupies rows [s*lin, (s+1)*lin); the conv over the
    stacked array yields bt*lin - k + 1 rows, of which row s*lin + t is a valid
    conv output for t <= lin - k (rows that straddle samples are garbage and are
    simply never selected here).  Output row (s, p) averages n valid rows.
    """
    conv_len = lin - k + 1
    lp = conv_len // n
    m = bt * lin - k + 1
    P = np.zeros((bt * lp, m), np.float32)
    for s in range(bt):
        for p in range(lp):
            r0 = s * lin + p * n
            P[s * lp + p, r0:r0 + n] = 1.0 / n
    return P


def _fold_params(params, weights_dtype):
    """Fold conv/BN params into kernel-friendly layouts (channels lane-dense)."""
    ops = {}
    # Block 1 (Cin == 1): per-tap VPU path, (K, Cout, 1) so w[k] is (Cout, 1).
    ops["w1"] = jnp.transpose(params["conv1_w"], (2, 0, 1)).astype(jnp.float32)  # (15, 64, 1)
    ops["b1"] = params["conv1_b"].astype(jnp.float32)[:, None]                   # (64, 1)
    # Blocks 2-4: im2col weights (K*Cin, Cout); columns of X_cat are k-major.
    for i in (2, 3, 4):
        co, ci, k, _ = _CFG[i - 1]
        w = params[f"conv{i}_w"].astype(weights_dtype)                            # (Cout, Cin, K)
        ops[f"w{i}"] = jnp.transpose(w, (2, 1, 0)).reshape(k * ci, co)            # (K*Cin, Cout)
        ops[f"b{i}"] = params[f"conv{i}_b"].astype(jnp.float32)[None, :]          # (1, Cout)
    # BatchNorm (eval, running stats) folded into per-channel scale/shift rows.
    for i in (1, 2, 3, 4):
        g = params[f"bn{i}_gamma"].astype(jnp.float32)
        beta = params[f"bn{i}_beta"].astype(jnp.float32)
        m = params[f"bn{i}_mean"].astype(jnp.float32)
        v = params[f"bn{i}_var"].astype(jnp.float32)
        inv = g / jnp.sqrt(v + _EPS)
        ops[f"s{i}"] = inv[None, :]                      # (1, C)
        ops[f"t{i}"] = (beta - m * inv)[None, :]         # (1, C)
    return ops


# -----------------------------------------------------------------------------
# Fused forward: one grid step == full CNNBlock forward for Bt samples.
# -----------------------------------------------------------------------------
def cnn_block_pallas(x, params, *, samples_per_step=None, weights_dtype=jnp.float32):
    """x: (B, 1, L) float32 -> (B, 512, L_out), eval-mode CNNBlock forward."""
    B, cin, L = x.shape
    assert cin == 1
    if samples_per_step is None:
        Bt = max(d for d in range(1, min(B, 8) + 1) if B % d == 0)
    else:
        Bt = samples_per_step
    assert B % Bt == 0
    G = B // Bt

    lens = _seq_lens(L)
    (_, M1, P1len) = lens[0]       # conv1 out len, pool1 out len (per sample)
    (_, _, P2len) = lens[1]
    (_, _, P3len) = lens[2]
    (_, _, Lf) = lens[3]
    assert Lf >= 1, "input length too short for this CNN stack"
    C1, C2, C3, C4 = (c[0] for c in _CFG)
    K1, K2, K3, K4 = (c[2] for c in _CFG)
    Cf = C4

    ops = _fold_params(params, weights_dtype)
    p1 = jnp.asarray(_pool_matrix_block1(M1, 3))                 # (P1len, M1)
    p2 = jnp.asarray(_pool_matrix_stacked(Bt, P1len, K2, 3))     # (Bt*P2len, Bt*P1len-K2+1)
    p3 = jnp.asarray(_pool_matrix_stacked(Bt, P2len, K3, 2))     # (Bt*P3len, Bt*P2len-K3+1)
    p4 = jnp.asarray(_pool_matrix_stacked(Bt, P3len, K4, 2))     # (Bt*Lf,    Bt*P3len-K4+1)

    def relu(v):
        return jnp.maximum(v, 0.0)

    def leaky(v):
        return jnp.where(v > 0, v, _LEAKY_SLOPE * v)

    def conv_pool_bn(h, w_ref, b_ref, p_ref, s_ref, t_ref, K, act):
        """One of blocks 2-4 on row-stacked samples: rows = length, lanes = channels."""
        R = h.shape[0]
        M = R - K + 1
        # im2col: one (M, K*Cin) x (K*Cin, Cout) MXU matmul per conv layer.
        xcat = jnp.concatenate([h[k:k + M, :] for k in range(K)], axis=1)
        w = w_ref[...]
        y = act(jnp.dot(xcat.astype(w.dtype), w, preferred_element_type=jnp.float32)
                + b_ref[...])
        # AvgPool (and drop of cross-sample garbage rows) as one matmul.
        pooled = jnp.dot(p_ref[...], y, preferred_element_type=jnp.float32)
        if act is leaky:
            pooled = act(pooled)   # avg of leaky outputs can be negative -> keep
        # (else: avg of ReLU outputs is already >= 0 -> outer ReLU is an identity)
        return relu(pooled * s_ref[...] + t_ref[...])   # folded BN + ReLU

    def kernel(x_ref,
               w1_ref, b1_ref, s1_ref, t1_ref, p1_ref,
               w2_ref, b2_ref, s2_ref, t2_ref, p2_ref,
               w3_ref, b3_ref, s3_ref, t3_ref, p3_ref,
               w4_ref, b4_ref, s4_ref, t4_ref, p4_ref,
               out_ref):
        # ---- block 1 (Cin == 1): per-tap VPU conv in (batch, Cout, length) form.
        x = x_ref[...].astype(jnp.float32)               # (Bt, 1, L)
        w1 = w1_ref[...]                                  # (K1, C1, 1)
        acc = w1[0] * x[:, :, 0:M1] + b1_ref[...]         # (Bt, C1, M1)
        for k in range(1, K1):
            acc = acc + w1[k] * x[:, :, k:k + M1]
        y1 = relu(acc)
        # AvgPool(3) + layout switch to (rows=length, lanes=channels) in one MXU
        # dot per sample (contracting both operands on their lane axes).
        p1m = p1_ref[...]                                 # (P1len, M1)
        rows = [lax.dot_general(p1m, y1[b], (((1,), (1,)), ((), ())),
                                preferred_element_type=jnp.float32)
                for b in range(Bt)]                       # each (P1len, C1)
        h = jnp.concatenate(rows, axis=0)                 # (Bt*P1len, C1)
        h = relu(h * s1_ref[...] + t1_ref[...])           # folded BN + ReLU

        # ---- blocks 2-4: samples stacked on rows, channels lane-dense.
        h = conv_pool_bn(h, w2_ref, b2_ref, p2_ref, s2_ref, t2_ref, K2, relu)
        h = conv_pool_bn(h, w3_ref, b3_ref, p3_ref, s3_ref, t3_ref, K3, relu)
        h = conv_pool_bn(h, w4_ref, b4_ref, p4_ref, s4_ref, t4_ref, K4, leaky)

        # TODO(synk): nn.Dropout train-mode random masking not implemented; eval-mode
        # (identity) semantics are used.
        out_ref[0] = h.astype(out_ref.dtype)              # (Bt*Lf, Cf) lane-dense store

    const_list = [ops["w1"], ops["b1"], ops["s1"], ops["t1"], p1,
                  ops["w2"], ops["b2"], ops["s2"], ops["t2"], p2,
                  ops["w3"], ops["b3"], ops["s3"], ops["t3"], p3,
                  ops["w4"], ops["b4"], ops["s4"], ops["t4"], p4]
    const_specs = [pl.BlockSpec(tuple(a.shape), lambda g, n=a.ndim: (0,) * n)
                   for a in const_list]

    out = pl.pallas_call(
        kernel,
        out_shape=jax.ShapeDtypeStruct((G, Bt * Lf, Cf), x.dtype),
        grid_spec=pltpu.PrefetchScalarGridSpec(
            num_scalar_prefetch=0,
            grid=(G,),
            in_specs=[pl.BlockSpec((Bt, 1, L), lambda g: (g, 0, 0))] + const_specs,
            out_specs=pl.BlockSpec((1, Bt * Lf, Cf), lambda g: (g, 0, 0)),
        ),
        compiler_params=pltpu.CompilerParams(
            dimension_semantics=("parallel",),          # batch split across TCs (v7x)
            vmem_limit_bytes=32 * 1024 * 1024),          # explicit budget, big headroom
    )(x, *const_list)

    # (G, Bt*Lf, Cf) -> (B, Lf, Cf) -> PyTorch contract (B, Cf, Lf).
    return jnp.transpose(out.reshape(B, Lf, Cf), (0, 2, 1))


# -----------------------------------------------------------------------------
# Pure-JAX reference (same eval-mode semantics) for correctness checking.
# -----------------------------------------------------------------------------
def cnn_block_ref(x, params):
    def conv(h, w, b):
        y = lax.conv_general_dilated(
            h, w, window_strides=(1,), padding="VALID",
            dimension_numbers=("NCH", "OIH", "NCH"),
            precision=lax.Precision.HIGHEST)
        return y + b[None, :, None]

    def pool(h, n):
        Bb, C, L = h.shape
        Lp = L // n
        return h[:, :, :Lp * n].reshape(Bb, C, Lp, n).mean(-1)

    def bn(h, i):
        g = params[f"bn{i}_gamma"][None, :, None]
        beta = params[f"bn{i}_beta"][None, :, None]
        m = params[f"bn{i}_mean"][None, :, None]
        v = params[f"bn{i}_var"][None, :, None]
        return (h - m) / jnp.sqrt(v + _EPS) * g + beta

    relu = jax.nn.relu
    lrelu = lambda v: jnp.where(v > 0, v, _LEAKY_SLOPE * v)

    h = relu(pool(relu(conv(x, params["conv1_w"], params["conv1_b"])), 3))
    h = relu(bn(h, 1))
    h = relu(pool(relu(conv(h, params["conv2_w"], params["conv2_b"])), 3))
    h = relu(bn(h, 2))
    h = relu(pool(relu(conv(h, params["conv3_w"], params["conv3_b"])), 2))
    h = relu(bn(h, 3))
    h = lrelu(pool(lrelu(conv(h, params["conv4_w"], params["conv4_b"])), 2))
    h = relu(bn(h, 4))
    return h  # dropout: identity in eval mode


# -----------------------------------------------------------------------------
# Deterministic parameter init (PyTorch layouts: W (Cout, Cin, K), b (Cout,))
# -----------------------------------------------------------------------------
def init_params(key):
    keys = jax.random.split(key, 24)
    it = iter(keys)
    p = {}
    for idx, (co, ci, k, _) in enumerate(_CFG, start=1):
        bound = 1.0 / np.sqrt(ci * k)
        p[f"conv{idx}_w"] = jax.random.uniform(next(it), (co, ci, k), jnp.float32, -bound, bound)
        p[f"conv{idx}_b"] = jax.random.uniform(next(it), (co,), jnp.float32, -bound, bound)
        p[f"bn{idx}_gamma"] = jax.random.uniform(next(it), (co,), jnp.float32, 0.5, 1.5)
        p[f"bn{idx}_beta"] = jax.random.uniform(next(it), (co,), jnp.float32, -0.2, 0.2)
        p[f"bn{idx}_mean"] = jax.random.uniform(next(it), (co,), jnp.float32, -0.2, 0.2)
        p[f"bn{idx}_var"] = jax.random.uniform(next(it), (co,), jnp.float32, 0.5, 1.5)
    return p


if __name__ == "__main__":
    B, L = 2, 256            # x: (batch=2, channels=1, length=256) -> out (2, 512, 3)

    key = jax.random.PRNGKey(0)
    k_x, k_p = jax.random.split(key)
    x = jax.random.normal(k_x, (B, 1, L), jnp.float32)
    params = init_params(k_p)

    ref = cnn_block_ref(x, params)

    fwd = jax.jit(cnn_block_pallas,
                  static_argnames=("samples_per_step", "weights_dtype"))

    # f32 path: strict check against the f32 reference.
    out = jax.block_until_ready(fwd(x, params))
    assert out.shape == ref.shape == (B, 512, _out_len(L))
    np.testing.assert_allclose(np.asarray(out), np.asarray(ref), atol=1e-3, rtol=1e-3)

    # bf16 conv-weight path (MXU-native on v6e/v7x), f32 accumulation; tolerance
    # loosened because the weights themselves are rounded to bf16.
    out_bf16 = jax.block_until_ready(fwd(x, params, weights_dtype=jnp.bfloat16))
    np.testing.assert_allclose(np.asarray(out_bf16), np.asarray(ref), atol=0.1, rtol=0.1)

    print("KERNEL_OK")
</pallas_src>

<mosaic_0001>
module attributes {stable_mosaic.version = 11 : i64} {
  func.func @kernel(%arg0: i32, %arg1: memref<2x1x256xf32, #tpu.memory_space<vmem>>, %arg2: memref<15x64x1xf32, #tpu.memory_space<vmem>>, %arg3: memref<64x1xf32, #tpu.memory_space<vmem>>, %arg4: memref<1x64xf32, #tpu.memory_space<vmem>>, %arg5: memref<1x64xf32, #tpu.memory_space<vmem>>, %arg6: memref<80x242xf32, #tpu.memory_space<vmem>>, %arg7: memref<512x128xf32, #tpu.memory_space<vmem>>, %arg8: memref<1x128xf32, #tpu.memory_space<vmem>>, %arg9: memref<1x128xf32, #tpu.memory_space<vmem>>, %arg10: memref<1x128xf32, #tpu.memory_space<vmem>>, %arg11: memref<48x153xf32, #tpu.memory_space<vmem>>, %arg12: memref<768x256xf32, #tpu.memory_space<vmem>>, %arg13: memref<1x256xf32, #tpu.memory_space<vmem>>, %arg14: memref<1x256xf32, #tpu.memory_space<vmem>>, %arg15: memref<1x256xf32, #tpu.memory_space<vmem>>, %arg16: memref<18x43xf32, #tpu.memory_space<vmem>>, %arg17: memref<1024x512xf32, #tpu.memory_space<vmem>>, %arg18: memref<1x512xf32, #tpu.memory_space<vmem>>, %arg19: memref<1x512xf32, #tpu.memory_space<vmem>>, %arg20: memref<1x512xf32, #tpu.memory_space<vmem>>, %arg21: memref<6x15xf32, #tpu.memory_space<vmem>>, %arg22: memref<1x6x512xf32, #tpu.memory_space<vmem>>) attributes {dimension_semantics = [#tpu.dimension_semantics<parallel>], iteration_bounds = array<i64: 1>, scalar_prefetch = 0 : i64, scratch_operands = 0 : i64, tpu.core_type = #tpu.core_type<tc>, window_params = [{transform_indices = @transform_0, window_bounds = array<i64: 2, 1, 256>}, {pipeline_mode = #tpu.pipeline_mode<synchronous>, transform_indices = @transform_1, window_bounds = array<i64: 15, 64, 1>}, {pipeline_mode = #tpu.pipeline_mode<synchronous>, transform_indices = @transform_2, window_bounds = array<i64: 64, 1>}, {pipeline_mode = #tpu.pipeline_mode<synchronous>, transform_indices = @transform_3, window_bounds = array<i64: 1, 64>}, {pipeline_mode = #tpu.pipeline_mode<synchronous>, transform_indices = @transform_4, window_bounds = array<i64: 1, 64>}, {pipeline_mode = #tpu.pipeline_mode<synchronous>, transform_indices = @transform_5, window_bounds = array<i64: 80, 242>}, {pipeline_mode = #tpu.pipeline_mode<synchronous>, transform_indices = @transform_6, window_bounds = array<i64: 512, 128>}, {pipeline_mode = #tpu.pipeline_mode<synchronous>, transform_indices = @transform_7, window_bounds = array<i64: 1, 128>}, {pipeline_mode = #tpu.pipeline_mode<synchronous>, transform_indices = @transform_8, window_bounds = array<i64: 1, 128>}, {pipeline_mode = #tpu.pipeline_mode<synchronous>, transform_indices = @transform_9, window_bounds = array<i64: 1, 128>}, {pipeline_mode = #tpu.pipeline_mode<synchronous>, transform_indices = @transform_10, window_bounds = array<i64: 48, 153>}, {pipeline_mode = #tpu.pipeline_mode<synchronous>, transform_indices = @transform_11, window_bounds = array<i64: 768, 256>}, {pipeline_mode = #tpu.pipeline_mode<synchronous>, transform_indices = @transform_12, window_bounds = array<i64: 1, 256>}, {pipeline_mode = #tpu.pipeline_mode<synchronous>, transform_indices = @transform_13, window_bounds = array<i64: 1, 256>}, {pipeline_mode = #tpu.pipeline_mode<synchronous>, transform_indices = @transform_14, window_bounds = array<i64: 1, 256>}, {pipeline_mode = #tpu.pipeline_mode<synchronous>, transform_indices = @transform_15, window_bounds = array<i64: 18, 43>}, {pipeline_mode = #tpu.pipeline_mode<synchronous>, transform_indices = @transform_16, window_bounds = array<i64: 1024, 512>}, {pipeline_mode = #tpu.pipeline_mode<synchronous>, transform_indices = @transform_17, window_bounds = array<i64: 1, 512>}, {pipeline_mode = #tpu.pipeline_mode<synchronous>, transform_indices = @transform_18, window_bounds = array<i64: 1, 512>}, {pipeline_mode = #tpu.pipeline_mode<synchronous>, transform_indices = @transform_19, window_bounds = array<i64: 1, 512>}, {pipeline_mode = #tpu.pipeline_mode<synchronous>, transform_indices = @transform_20, window_bounds = array<i64: 6, 15>}, {transform_indices = @transform_21, window_bounds = array<i64: 1, 6, 512>}]} {
    %c0 = arith.constant 0 : index
    %c0_0 = arith.constant 0 : index
    %c0_1 = arith.constant 0 : index
    %0 = vector.load %arg1[%c0, %c0_0, %c0_1] : memref<2x1x256xf32, #tpu.memory_space<vmem>>, vector<2x1x256xf32>
    %c0_2 = arith.constant 0 : index
    %c0_3 = arith.constant 0 : index
    %c0_4 = arith.constant 0 : index
    %1 = vector.load %arg2[%c0_2, %c0_3, %c0_4] : memref<15x64x1xf32, #tpu.memory_space<vmem>>, vector<15x64x1xf32>
    %2 = vector.extract_strided_slice %1 {offsets = [0, 0, 0], sizes = [1, 64, 1], strides = [1, 1, 1]} : vector<15x64x1xf32> to vector<1x64x1xf32>
    %3 = vector.shape_cast %2 : vector<1x64x1xf32> to vector<64x1xf32>
    %4 = vector.extract_strided_slice %0 {offsets = [0, 0, 0], sizes = [2, 1, 242], strides = [1, 1, 1]} : vector<2x1x256xf32> to vector<2x1x242xf32>
    %5 = vector.shape_cast %3 : vector<64x1xf32> to vector<1x64x1xf32>
    %6 = vector.broadcast %5 : vector<1x64x1xf32> to vector<2x64x242xf32>
    %7 = vector.broadcast %4 : vector<2x1x242xf32> to vector<2x64x242xf32>
    %8 = arith.mulf %6, %7 : vector<2x64x242xf32>
    %c0_5 = arith.constant 0 : index
    %c0_6 = arith.constant 0 : index
    %9 = vector.load %arg3[%c0_5, %c0_6] : memref<64x1xf32, #tpu.memory_space<vmem>>, vector<64x1xf32>
    %10 = vector.shape_cast %9 : vector<64x1xf32> to vector<1x64x1xf32>
    %11 = vector.broadcast %10 : vector<1x64x1xf32> to vector<2x64x242xf32>
    %12 = arith.addf %8, %11 : vector<2x64x242xf32>
    %13 = vector.extract_strided_slice %1 {offsets = [1, 0, 0], sizes = [1, 64, 1], strides = [1, 1, 1]} : vector<15x64x1xf32> to vector<1x64x1xf32>
    %14 = vector.shape_cast %13 : vector<1x64x1xf32> to vector<64x1xf32>
    %15 = vector.extract_strided_slice %0 {offsets = [0, 0, 1], sizes = [2, 1, 242], strides = [1, 1, 1]} : vector<2x1x256xf32> to vector<2x1x242xf32>
    %16 = vector.shape_cast %14 : vector<64x1xf32> to vector<1x64x1xf32>
    %17 = vector.broadcast %16 : vector<1x64x1xf32> to vector<2x64x242xf32>
    %18 = vector.broadcast %15 : vector<2x1x242xf32> to vector<2x64x242xf32>
    %19 = arith.mulf %17, %18 : vector<2x64x242xf32>
    %20 = arith.addf %12, %19 : vector<2x64x242xf32>
    %21 = vector.extract_strided_slice %1 {offsets = [2, 0, 0], sizes = [1, 64, 1], strides = [1, 1, 1]} : vector<15x64x1xf32> to vector<1x64x1xf32>
    %22 = vector.shape_cast %21 : vector<1x64x1xf32> to vector<64x1xf32>
    %23 = vector.extract_strided_slice %0 {offsets = [0, 0, 2], sizes = [2, 1, 242], strides = [1, 1, 1]} : vector<2x1x256xf32> to vector<2x1x242xf32>
    %24 = vector.shape_cast %22 : vector<64x1xf32> to vector<1x64x1xf32>
    %25 = vector.broadcast %24 : vector<1x64x1xf32> to vector<2x64x242xf32>
    %26 = vector.broadcast %23 : vector<2x1x242xf32> to vector<2x64x242xf32>
    %27 = arith.mulf %25, %26 : vector<2x64x242xf32>
    %28 = arith.addf %20, %27 : vector<2x64x242xf32>
    %29 = vector.extract_strided_slice %1 {offsets = [3, 0, 0], sizes = [1, 64, 1], strides = [1, 1, 1]} : vector<15x64x1xf32> to vector<1x64x1xf32>
    %30 = vector.shape_cast %29 : vector<1x64x1xf32> to vector<64x1xf32>
    %31 = vector.extract_strided_slice %0 {offsets = [0, 0, 3], sizes = [2, 1, 242], strides = [1, 1, 1]} : vector<2x1x256xf32> to vector<2x1x242xf32>
    %32 = vector.shape_cast %30 : vector<64x1xf32> to vector<1x64x1xf32>
    %33 = vector.broadcast %32 : vector<1x64x1xf32> to vector<2x64x242xf32>
    %34 = vector.broadcast %31 : vector<2x1x242xf32> to vector<2x64x242xf32>
    %35 = arith.mulf %33, %34 : vector<2x64x242xf32>
    %36 = arith.addf %28, %35 : vector<2x64x242xf32>
    %37 = vector.extract_strided_slice %1 {offsets = [4, 0, 0], sizes = [1, 64, 1], strides = [1, 1, 1]} : vector<15x64x1xf32> to vector<1x64x1xf32>
    %38 = vector.shape_cast %37 : vector<1x64x1xf32> to vector<64x1xf32>
    %39 = vector.extract_strided_slice %0 {offsets = [0, 0, 4], sizes = [2, 1, 242], strides = [1, 1, 1]} : vector<2x1x256xf32> to vector<2x1x242xf32>
    %40 = vector.shape_cast %38 : vector<64x1xf32> to vector<1x64x1xf32>
    %41 = vector.broadcast %40 : vector<1x64x1xf32> to vector<2x64x242xf32>
    %42 = vector.broadcast %39 : vector<2x1x242xf32> to vector<2x64x242xf32>
    %43 = arith.mulf %41, %42 : vector<2x64x242xf32>
    %44 = arith.addf %36, %43 : vector<2x64x242xf32>
    %45 = vector.extract_strided_slice %1 {offsets = [5, 0, 0], sizes = [1, 64, 1], strides = [1, 1, 1]} : vector<15x64x1xf32> to vector<1x64x1xf32>
    %46 = vector.shape_cast %45 : vector<1x64x1xf32> to vector<64x1xf32>
    %47 = vector.extract_strided_slice %0 {offsets = [0, 0, 5], sizes = [2, 1, 242], strides = [1, 1, 1]} : vector<2x1x256xf32> to vector<2x1x242xf32>
    %48 = vector.shape_cast %46 : vector<64x1xf32> to vector<1x64x1xf32>
    %49 = vector.broadcast %48 : vector<1x64x1xf32> to vector<2x64x242xf32>
    %50 = vector.broadcast %47 : vector<2x1x242xf32> to vector<2x64x242xf32>
    %51 = arith.mulf %49, %50 : vector<2x64x242xf32>
    %52 = arith.addf %44, %51 : vector<2x64x242xf32>
    %53 = vector.extract_strided_slice %1 {offsets = [6, 0, 0], sizes = [1, 64, 1], strides = [1, 1, 1]} : vector<15x64x1xf32> to vector<1x64x1xf32>
    %54 = vector.shape_cast %53 : vector<1x64x1xf32> to vector<64x1xf32>
    %55 = vector.extract_strided_slice %0 {offsets = [0, 0, 6], sizes = [2, 1, 242], strides = [1, 1, 1]} : vector<2x1x256xf32> to vector<2x1x242xf32>
    %56 = vector.shape_cast %54 : vector<64x1xf32> to vector<1x64x1xf32>
    %57 = vector.broadcast %56 : vector<1x64x1xf32> to vector<2x64x242xf32>
    %58 = vector.broadcast %55 : vector<2x1x242xf32> to vector<2x64x242xf32>
    %59 = arith.mulf %57, %58 : vector<2x64x242xf32>
    %60 = arith.addf %52, %59 : vector<2x64x242xf32>
    %61 = vector.extract_strided_slice %1 {offsets = [7, 0, 0], sizes = [1, 64, 1], strides = [1, 1, 1]} : vector<15x64x1xf32> to vector<1x64x1xf32>
    %62 = vector.shape_cast %61 : vector<1x64x1xf32> to vector<64x1xf32>
    %63 = vector.extract_strided_slice %0 {offsets = [0, 0, 7], sizes = [2, 1, 242], strides = [1, 1, 1]} : vector<2x1x256xf32> to vector<2x1x242xf32>
    %64 = vector.shape_cast %62 : vector<64x1xf32> to vector<1x64x1xf32>
    %65 = vector.broadcast %64 : vector<1x64x1xf32> to vector<2x64x242xf32>
    %66 = vector.broadcast %63 : vector<2x1x242xf32> to vector<2x64x242xf32>
    %67 = arith.mulf %65, %66 : vector<2x64x242xf32>
    %68 = arith.addf %60, %67 : vector<2x64x242xf32>
    %69 = vector.extract_strided_slice %1 {offsets = [8, 0, 0], sizes = [1, 64, 1], strides = [1, 1, 1]} : vector<15x64x1xf32> to vector<1x64x1xf32>
    %70 = vector.shape_cast %69 : vector<1x64x1xf32> to vector<64x1xf32>
    %71 = vector.extract_strided_slice %0 {offsets = [0, 0, 8], sizes = [2, 1, 242], strides = [1, 1, 1]} : vector<2x1x256xf32> to vector<2x1x242xf32>
    %72 = vector.shape_cast %70 : vector<64x1xf32> to vector<1x64x1xf32>
    %73 = vector.broadcast %72 : vector<1x64x1xf32> to vector<2x64x242xf32>
    %74 = vector.broadcast %71 : vector<2x1x242xf32> to vector<2x64x242xf32>
    %75 = arith.mulf %73, %74 : vector<2x64x242xf32>
    %76 = arith.addf %68, %75 : vector<2x64x242xf32>
    %77 = vector.extract_strided_slice %1 {offsets = [9, 0, 0], sizes = [1, 64, 1], strides = [1, 1, 1]} : vector<15x64x1xf32> to vector<1x64x1xf32>
    %78 = vector.shape_cast %77 : vector<1x64x1xf32> to vector<64x1xf32>
    %79 = vector.extract_strided_slice %0 {offsets = [0, 0, 9], sizes = [2, 1, 242], strides = [1, 1, 1]} : vector<2x1x256xf32> to vector<2x1x242xf32>
    %80 = vector.shape_cast %78 : vector<64x1xf32> to vector<1x64x1xf32>
    %81 = vector.broadcast %80 : vector<1x64x1xf32> to vector<2x64x242xf32>
    %82 = vector.broadcast %79 : vector<2x1x242xf32> to vector<2x64x242xf32>
    %83 = arith.mulf %81, %82 : vector<2x64x242xf32>
    %84 = arith.addf %76, %83 : vector<2x64x242xf32>
    %85 = vector.extract_strided_slice %1 {offsets = [10, 0, 0], sizes = [1, 64, 1], strides = [1, 1, 1]} : vector<15x64x1xf32> to vector<1x64x1xf32>
    %86 = vector.shape_cast %85 : vector<1x64x1xf32> to vector<64x1xf32>
    %87 = vector.extract_strided_slice %0 {offsets = [0, 0, 10], sizes = [2, 1, 242], strides = [1, 1, 1]} : vector<2x1x256xf32> to vector<2x1x242xf32>
    %88 = vector.shape_cast %86 : vector<64x1xf32> to vector<1x64x1xf32>
    %89 = vector.broadcast %88 : vector<1x64x1xf32> to vector<2x64x242xf32>
    %90 = vector.broadcast %87 : vector<2x1x242xf32> to vector<2x64x242xf32>
    %91 = arith.mulf %89, %90 : vector<2x64x242xf32>
    %92 = arith.addf %84, %91 : vector<2x64x242xf32>
    %93 = vector.extract_strided_slice %1 {offsets = [11, 0, 0], sizes = [1, 64, 1], strides = [1, 1, 1]} : vector<15x64x1xf32> to vector<1x64x1xf32>
    %94 = vector.shape_cast %93 : vector<1x64x1xf32> to vector<64x1xf32>
    %95 = vector.extract_strided_slice %0 {offsets = [0, 0, 11], sizes = [2, 1, 242], strides = [1, 1, 1]} : vector<2x1x256xf32> to vector<2x1x242xf32>
    %96 = vector.shape_cast %94 : vector<64x1xf32> to vector<1x64x1xf32>
    %97 = vector.broadcast %96 : vector<1x64x1xf32> to vector<2x64x242xf32>
    %98 = vector.broadcast %95 : vector<2x1x242xf32> to vector<2x64x242xf32>
    %99 = arith.mulf %97, %98 : vector<2x64x242xf32>
    %100 = arith.addf %92, %99 : vector<2x64x242xf32>
    %101 = vector.extract_strided_slice %1 {offsets = [12, 0, 0], sizes = [1, 64, 1], strides = [1, 1, 1]} : vector<15x64x1xf32> to vector<1x64x1xf32>
    %102 = vector.shape_cast %101 : vector<1x64x1xf32> to vector<64x1xf32>
    %103 = vector.extract_strided_slice %0 {offsets = [0, 0, 12], sizes = [2, 1, 242], strides = [1, 1, 1]} : vector<2x1x256xf32> to vector<2x1x242xf32>
    %104 = vector.shape_cast %102 : vector<64x1xf32> to vector<1x64x1xf32>
    %105 = vector.broadcast %104 : vector<1x64x1xf32> to vector<2x64x242xf32>
    %106 = vector.broadcast %103 : vector<2x1x242xf32> to vector<2x64x242xf32>
    %107 = arith.mulf %105, %106 : vector<2x64x242xf32>
    %108 = arith.addf %100, %107 : vector<2x64x242xf32>
    %109 = vector.extract_strided_slice %1 {offsets = [13, 0, 0], sizes = [1, 64, 1], strides = [1, 1, 1]} : vector<15x64x1xf32> to vector<1x64x1xf32>
    %110 = vector.shape_cast %109 : vector<1x64x1xf32> to vector<64x1xf32>
    %111 = vector.extract_strided_slice %0 {offsets = [0, 0, 13], sizes = [2, 1, 242], strides = [1, 1, 1]} : vector<2x1x256xf32> to vector<2x1x242xf32>
    %112 = vector.shape_cast %110 : vector<64x1xf32> to vector<1x64x1xf32>
    %113 = vector.broadcast %112 : vector<1x64x1xf32> to vector<2x64x242xf32>
    %114 = vector.broadcast %111 : vector<2x1x242xf32> to vector<2x64x242xf32>
    %115 = arith.mulf %113, %114 : vector<2x64x242xf32>
    %116 = arith.addf %108, %115 : vector<2x64x242xf32>
    %117 = vector.extract_strided_slice %1 {offsets = [14, 0, 0], sizes = [1, 64, 1], strides = [1, 1, 1]} : vector<15x64x1xf32> to vector<1x64x1xf32>
    %118 = vector.shape_cast %117 : vector<1x64x1xf32> to vector<64x1xf32>
    %119 = vector.extract_strided_slice %0 {offsets = [0, 0, 14], sizes = [2, 1, 242], strides = [1, 1, 1]} : vector<2x1x256xf32> to vector<2x1x242xf32>
    %120 = vector.shape_cast %118 : vector<64x1xf32> to vector<1x64x1xf32>
    %121 = vector.broadcast %120 : vector<1x64x1xf32> to vector<2x64x242xf32>
    %122 = vector.broadcast %119 : vector<2x1x242xf32> to vector<2x64x242xf32>
    %123 = arith.mulf %121, %122 : vector<2x64x242xf32>
    %124 = arith.addf %116, %123 : vector<2x64x242xf32>
    %cst = arith.constant 0.000000e+00 : f32
    %125 = vector.broadcast %cst : f32 to vector<2x64x242xf32>
    %126 = arith.maximumf %124, %125 : vector<2x64x242xf32>
    %c0_7 = arith.constant 0 : index
    %c0_8 = arith.constant 0 : index
    %127 = vector.load %arg6[%c0_7, %c0_8] : memref<80x242xf32, #tpu.memory_space<vmem>>, vector<80x242xf32>
    %128 = vector.extract_strided_slice %126 {offsets = [0, 0, 0], sizes = [1, 64, 242], strides = [1, 1, 1]} : vector<2x64x242xf32> to vector<1x64x242xf32>
    %129 = vector.shape_cast %128 : vector<1x64x242xf32> to vector<64x242xf32>
    %cst_9 = arith.constant dense<0.000000e+00> : vector<80x64xf32>
    %130 = tpu.matmul %127, %129, %cst_9 {dimension_numbers = #tpu.dot_dimension_numbers<[1], [1], [0], [0], [0, 0, 1, 0], [], []>} : vector<80x242xf32>, vector<64x242xf32>, vector<80x64xf32> -> vector<80x64xf32>
    %131 = vector.extract_strided_slice %126 {offsets = [1, 0, 0], sizes = [1, 64, 242], strides = [1, 1, 1]} : vector<2x64x242xf32> to vector<1x64x242xf32>
    %132 = vector.shape_cast %131 : vector<1x64x242xf32> to vector<64x242xf32>
    %cst_10 = arith.constant dense<0.000000e+00> : vector<80x64xf32>
    %133 = tpu.matmul %127, %132, %cst_10 {dimension_numbers = #tpu.dot_dimension_numbers<[1], [1], [0], [0], [0, 0, 1, 0], [], []>} : vector<80x242xf32>, vector<64x242xf32>, vector<80x64xf32> -> vector<80x64xf32>
    %134 = tpu.concatenate %130, %133 in 0 : vector<80x64xf32>, vector<80x64xf32> -> vector<160x64xf32>
    %c0_11 = arith.constant 0 : index
    %c0_12 = arith.constant 0 : index
    %135 = vector.load %arg4[%c0_11, %c0_12] : memref<1x64xf32, #tpu.memory_space<vmem>>, vector<1x64xf32>
    %136 = vector.broadcast %135 : vector<1x64xf32> to vector<160x64xf32>
    %137 = arith.mulf %134, %136 : vector<160x64xf32>
    %c0_13 = arith.constant 0 : index
    %c0_14 = arith.constant 0 : index
    %138 = vector.load %arg5[%c0_13, %c0_14] : memref<1x64xf32, #tpu.memory_space<vmem>>, vector<1x64xf32>
    %139 = vector.broadcast %138 : vector<1x64xf32> to vector<160x64xf32>
    %140 = arith.addf %137, %139 : vector<160x64xf32>
    %cst_15 = arith.constant 0.000000e+00 : f32
    %141 = vector.broadcast %cst_15 : f32 to vector<160x64xf32>
    %142 = arith.maximumf %140, %141 : vector<160x64xf32>
    %143 = vector.extract_strided_slice %142 {offsets = [0, 0], sizes = [153, 64], strides = [1, 1]} : vector<160x64xf32> to vector<153x64xf32>
    %144 = vector.extract_strided_slice %142 {offsets = [1, 0], sizes = [153, 64], strides = [1, 1]} : vector<160x64xf32> to vector<153x64xf32>
    %145 = vector.extract_strided_slice %142 {offsets = [2, 0], sizes = [153, 64], strides = [1, 1]} : vector<160x64xf32> to vector<153x64xf32>
    %146 = vector.extract_strided_slice %142 {offsets = [3, 0], sizes = [153, 64], strides = [1, 1]} : vector<160x64xf32> to vector<153x64xf32>
    %147 = vector.extract_strided_slice %142 {offsets = [4, 0], sizes = [153, 64], strides = [1, 1]} : vector<160x64xf32> to vector<153x64xf32>
    %148 = vector.extract_strided_slice %142 {offsets = [5, 0], sizes = [153, 64], strides = [1, 1]} : vector<160x64xf32> to vector<153x64xf32>
    %149 = vector.extract_strided_slice %142 {offsets = [6, 0], sizes = [153, 64], strides = [1, 1]} : vector<160x64xf32> to vector<153x64xf32>
    %150 = vector.extract_strided_slice %142 {offsets = [7, 0], sizes = [153, 64], strides = [1, 1]} : vector<160x64xf32> to vector<153x64xf32>
    %151 = tpu.concatenate %143, %144, %145, %146, %147, %148, %149, %150 in 1 : vector<153x64xf32>, vector<153x64xf32>, vector<153x64xf32>, vector<153x64xf32>, vector<153x64xf32>, vector<153x64xf32>, vector<153x64xf32>, vector<153x64xf32> -> vector<153x512xf32>
    %c0_16 = arith.constant 0 : index
    %c0_17 = arith.constant 0 : index
    %152 = vector.load %arg7[%c0_16, %c0_17] : memref<512x128xf32, #tpu.memory_space<vmem>>, vector<512x128xf32>
    %cst_18 = arith.constant dense<0.000000e+00> : vector<153x128xf32>
    %153 = tpu.matmul %151, %152, %cst_18 {dimension_numbers = #tpu.dot_dimension_numbers<[1], [0], [0], [1], [0, 0, 1, 1], [], []>} : vector<153x512xf32>, vector<512x128xf32>, vector<153x128xf32> -> vector<153x128xf32>
    %c0_19 = arith.constant 0 : index
    %c0_20 = arith.constant 0 : index
    %154 = vector.load %arg8[%c0_19, %c0_20] : memref<1x128xf32, #tpu.memory_space<vmem>>, vector<1x128xf32>
    %155 = vector.broadcast %154 : vector<1x128xf32> to vector<153x128xf32>
    %156 = arith.addf %153, %155 : vector<153x128xf32>
    %cst_21 = arith.constant 0.000000e+00 : f32
    %157 = vector.broadcast %cst_21 : f32 to vector<153x128xf32>
    %158 = arith.maximumf %156, %157 : vector<153x128xf32>
    %c0_22 = arith.constant 0 : index
    %c0_23 = arith.constant 0 : index
    %159 = vector.load %arg11[%c0_22, %c0_23] : memref<48x153xf32, #tpu.memory_space<vmem>>, vector<48x153xf32>
    %cst_24 = arith.constant dense<0.000000e+00> : vector<48x128xf32>
    %160 = tpu.matmul %159, %158, %cst_24 {dimension_numbers = #tpu.dot_dimension_numbers<[1], [0], [0], [1], [0, 0, 1, 1], [], []>} : vector<48x153xf32>, vector<153x128xf32>, vector<48x128xf32> -> vector<48x128xf32>
    %c0_25 = arith.constant 0 : index
    %c0_26 = arith.constant 0 : index
    %161 = vector.load %arg9[%c0_25, %c0_26] : memref<1x128xf32, #tpu.memory_space<vmem>>, vector<1x128xf32>
    %162 = vector.broadcast %161 : vector<1x128xf32> to vector<48x128xf32>
    %163 = arith.mulf %160, %162 : vector<48x128xf32>
    %c0_27 = arith.constant 0 : index
    %c0_28 = arith.constant 0 : index
    %164 = vector.load %arg10[%c0_27, %c0_28] : memref<1x128xf32, #tpu.memory_space<vmem>>, vector<1x128xf32>
    %165 = vector.broadcast %164 : vector<1x128xf32> to vector<48x128xf32>
    %166 = arith.addf %163, %165 : vector<48x128xf32>
    %cst_29 = arith.constant 0.000000e+00 : f32
    %167 = vector.broadcast %cst_29 : f32 to vector<48x128xf32>
    %168 = arith.maximumf %166, %167 : vector<48x128xf32>
    %169 = vector.extract_strided_slice %168 {offsets = [0, 0], sizes = [43, 128], strides = [1, 1]} : vector<48x128xf32> to vector<43x128xf32>
    %170 = vector.extract_strided_slice %168 {offsets = [1, 0], sizes = [43, 128], strides = [1, 1]} : vector<48x128xf32> to vector<43x128xf32>
    %171 = vector.extract_strided_slice %168 {offsets = [2, 0], sizes = [43, 128], strides = [1, 1]} : vector<48x128xf32> to vector<43x128xf32>
    %172 = vector.extract_strided_slice %168 {offsets = [3, 0], sizes = [43, 128], strides = [1, 1]} : vector<48x128xf32> to vector<43x128xf32>
    %173 = vector.extract_strided_slice %168 {offsets = [4, 0], sizes = [43, 128], strides = [1, 1]} : vector<48x128xf32> to vector<43x128xf32>
    %174 = vector.extract_strided_slice %168 {offsets = [5, 0], sizes = [43, 128], strides = [1, 1]} : vector<48x128xf32> to vector<43x128xf32>
    %175 = tpu.concatenate %169, %170, %171, %172, %173, %174 in 1 : vector<43x128xf32>, vector<43x128xf32>, vector<43x128xf32>, vector<43x128xf32>, vector<43x128xf32>, vector<43x128xf32> -> vector<43x768xf32>
    %c0_30 = arith.constant 0 : index
    %c0_31 = arith.constant 0 : index
    %176 = vector.load %arg12[%c0_30, %c0_31] : memref<768x256xf32, #tpu.memory_space<vmem>>, vector<768x256xf32>
    %cst_32 = arith.constant dense<0.000000e+00> : vector<43x256xf32>
    %177 = tpu.matmul %175, %176, %cst_32 {dimension_numbers = #tpu.dot_dimension_numbers<[1], [0], [0], [1], [0, 0, 1, 1], [], []>} : vector<43x768xf32>, vector<768x256xf32>, vector<43x256xf32> -> vector<43x256xf32>
    %c0_33 = arith.constant 0 : index
    %c0_34 = arith.constant 0 : index
    %178 = vector.load %arg13[%c0_33, %c0_34] : memref<1x256xf32, #tpu.memory_space<vmem>>, vector<1x256xf32>
    %179 = vector.broadcast %178 : vector<1x256xf32> to vector<43x256xf32>
    %180 = arith.addf %177, %179 : vector<43x256xf32>
    %cst_35 = arith.constant 0.000000e+00 : f32
    %181 = vector.broadcast %cst_35 : f32 to vector<43x256xf32>
    %182 = arith.maximumf %180, %181 : vector<43x256xf32>
    %c0_36 = arith.constant 0 : index
    %c0_37 = arith.constant 0 : index
    %183 = vector.load %arg16[%c0_36, %c0_37] : memref<18x43xf32, #tpu.memory_space<vmem>>, vector<18x43xf32>
    %cst_38 = arith.constant dense<0.000000e+00> : vector<18x256xf32>
    %184 = tpu.matmul %183, %182, %cst_38 {dimension_numbers = #tpu.dot_dimension_numbers<[1], [0], [0], [1], [0, 0, 1, 1], [], []>} : vector<18x43xf32>, vector<43x256xf32>, vector<18x256xf32> -> vector<18x256xf32>
    %c0_39 = arith.constant 0 : index
    %c0_40 = arith.constant 0 : index
    %185 = vector.load %arg14[%c0_39, %c0_40] : memref<1x256xf32, #tpu.memory_space<vmem>>, vector<1x256xf32>
    %186 = vector.broadcast %185 : vector<1x256xf32> to vector<18x256xf32>
    %187 = arith.mulf %184, %186 : vector<18x256xf32>
    %c0_41 = arith.constant 0 : index
    %c0_42 = arith.constant 0 : index
    %188 = vector.load %arg15[%c0_41, %c0_42] : memref<1x256xf32, #tpu.memory_space<vmem>>, vector<1x256xf32>
    %189 = vector.broadcast %188 : vector<1x256xf32> to vector<18x256xf32>
    %190 = arith.addf %187, %189 : vector<18x256xf32>
    %cst_43 = arith.constant 0.000000e+00 : f32
    %191 = vector.broadcast %cst_43 : f32 to vector<18x256xf32>
    %192 = arith.maximumf %190, %191 : vector<18x256xf32>
    %193 = vector.extract_strided_slice %192 {offsets = [0, 0], sizes = [15, 256], strides = [1, 1]} : vector<18x256xf32> to vector<15x256xf32>
    %194 = vector.extract_strided_slice %192 {offsets = [1, 0], sizes = [15, 256], strides = [1, 1]} : vector<18x256xf32> to vector<15x256xf32>
    %195 = vector.extract_strided_slice %192 {offsets = [2, 0], sizes = [15, 256], strides = [1, 1]} : vector<18x256xf32> to vector<15x256xf32>
    %196 = vector.extract_strided_slice %192 {offsets = [3, 0], sizes = [15, 256], strides = [1, 1]} : vector<18x256xf32> to vector<15x256xf32>
    %197 = tpu.concatenate %193, %194, %195, %196 in 1 : vector<15x256xf32>, vector<15x256xf32>, vector<15x256xf32>, vector<15x256xf32> -> vector<15x1024xf32>
    %c0_44 = arith.constant 0 : index
    %c0_45 = arith.constant 0 : index
    %198 = vector.load %arg17[%c0_44, %c0_45] : memref<1024x512xf32, #tpu.memory_space<vmem>>, vector<1024x512xf32>
    %cst_46 = arith.constant dense<0.000000e+00> : vector<15x512xf32>
    %199 = tpu.matmul %197, %198, %cst_46 {dimension_numbers = #tpu.dot_dimension_numbers<[1], [0], [0], [1], [0, 0, 1, 1], [], []>} : vector<15x1024xf32>, vector<1024x512xf32>, vector<15x512xf32> -> vector<15x512xf32>
    %c0_47 = arith.constant 0 : index
    %c0_48 = arith.constant 0 : index
    %200 = vector.load %arg18[%c0_47, %c0_48] : memref<1x512xf32, #tpu.memory_space<vmem>>, vector<1x512xf32>
    %201 = vector.broadcast %200 : vector<1x512xf32> to vector<15x512xf32>
    %202 = arith.addf %199, %201 : vector<15x512xf32>
    %cst_49 = arith.constant 0.000000e+00 : f32
    %203 = vector.broadcast %cst_49 : f32 to vector<15x512xf32>
    %204 = arith.cmpf ogt, %202, %203 : vector<15x512xf32>
    %cst_50 = arith.constant 0.00999999977 : f32
    %205 = vector.broadcast %cst_50 : f32 to vector<15x512xf32>
    %206 = arith.mulf %205, %202 : vector<15x512xf32>
    %207 = arith.select %204, %202, %206 : vector<15x512xi1>, vector<15x512xf32>
    %c0_51 = arith.constant 0 : index
    %c0_52 = arith.constant 0 : index
    %208 = vector.load %arg21[%c0_51, %c0_52] : memref<6x15xf32, #tpu.memory_space<vmem>>, vector<6x15xf32>
    %cst_53 = arith.constant dense<0.000000e+00> : vector<6x512xf32>
    %209 = tpu.matmul %208, %207, %cst_53 {dimension_numbers = #tpu.dot_dimension_numbers<[1], [0], [0], [1], [0, 0, 1, 1], [], []>} : vector<6x15xf32>, vector<15x512xf32>, vector<6x512xf32> -> vector<6x512xf32>
    %cst_54 = arith.constant 0.000000e+00 : f32
    %210 = vector.broadcast %cst_54 : f32 to vector<6x512xf32>
    %211 = arith.cmpf ogt, %209, %210 : vector<6x512xf32>
    %cst_55 = arith.constant 0.00999999977 : f32
    %212 = vector.broadcast %cst_55 : f32 to vector<6x512xf32>
    %213 = arith.mulf %212, %209 : vector<6x512xf32>
    %214 = arith.select %211, %209, %213 : vector<6x512xi1>, vector<6x512xf32>
    %c0_56 = arith.constant 0 : index
    %c0_57 = arith.constant 0 : index
    %215 = vector.load %arg19[%c0_56, %c0_57] : memref<1x512xf32, #tpu.memory_space<vmem>>, vector<1x512xf32>
    %216 = vector.broadcast %215 : vector<1x512xf32> to vector<6x512xf32>
    %217 = arith.mulf %214, %216 : vector<6x512xf32>
    %c0_58 = arith.constant 0 : index
    %c0_59 = arith.constant 0 : index
    %218 = vector.load %arg20[%c0_58, %c0_59] : memref<1x512xf32, #tpu.memory_space<vmem>>, vector<1x512xf32>
    %219 = vector.broadcast %218 : vector<1x512xf32> to vector<6x512xf32>
    %220 = arith.addf %217, %219 : vector<6x512xf32>
    %cst_60 = arith.constant 0.000000e+00 : f32
    %221 = vector.broadcast %cst_60 : f32 to vector<6x512xf32>
    %222 = arith.maximumf %220, %221 : vector<6x512xf32>
    %c0_61 = arith.constant 0 : index
    %c0_62 = arith.constant 0 : index
    %c0_63 = arith.constant 0 : index
    %223 = vector.load %arg22[%c0_61, %c0_62, %c0_63] : memref<1x6x512xf32, #tpu.memory_space<vmem>>, vector<1x6x512xf32>
    %224 = vector.shape_cast %223 : vector<1x6x512xf32> to vector<6x512xf32>
    %225 = vector.shape_cast %222 : vector<6x512xf32> to vector<1x6x512xf32>
    tpu.vector_store %arg22[%c0_61, %c0_62, %c0_63], %225 {strides = array<i32>} : memref<1x6x512xf32, #tpu.memory_space<vmem>>, vector<1x6x512xf32>,
    return
  }
  func.func @transform_0(%arg0: i32) -> (i32, i32, i32) {
    %c0_i32 = arith.constant 0 : i32
    %c0_i32_0 = arith.constant 0 : i32
    %c0_i32_1 = arith.constant 0 : i32
    return %arg0, %c0_i32, %c0_i32_0 : i32, i32, i32
  }
  func.func @transform_1(%arg0: i32) -> (i32, i32, i32) {
    %c0_i32 = arith.constant 0 : i32
    %c0_i32_0 = arith.constant 0 : i32
    %c0_i32_1 = arith.constant 0 : i32
    %c0_i32_2 = arith.constant 0 : i32
    return %c0_i32, %c0_i32_0, %c0_i32_1 : i32, i32, i32
  }
  func.func @transform_2(%arg0: i32) -> (i32, i32) {
    %c0_i32 = arith.constant 0 : i32
    %c0_i32_0 = arith.constant 0 : i32
    %c0_i32_1 = arith.constant 0 : i32
    return %c0_i32, %c0_i32_0 : i32, i32
  }
  func.func @transform_3(%arg0: i32) -> (i32, i32) {
    %c0_i32 = arith.constant 0 : i32
    %c0_i32_0 = arith.constant 0 : i32
    %c0_i32_1 = arith.constant 0 : i32
    return %c0_i32, %c0_i32_0 : i32, i32
  }
  func.func @transform_4(%arg0: i32) -> (i32, i32) {
    %c0_i32 = arith.constant 0 : i32
    %c0_i32_0 = arith.constant 0 : i32
    %c0_i32_1 = arith.constant 0 : i32
    return %c0_i32, %c0_i32_0 : i32, i32
  }
  func.func @transform_5(%arg0: i32) -> (i32, i32) {
    %c0_i32 = arith.constant 0 : i32
    %c0_i32_0 = arith.constant 0 : i32
    %c0_i32_1 = arith.constant 0 : i32
    return %c0_i32, %c0_i32_0 : i32, i32
  }
  func.func @transform_6(%arg0: i32) -> (i32, i32) {
    %c0_i32 = arith.constant 0 : i32
    %c0_i32_0 = arith.constant 0 : i32
    %c0_i32_1 = arith.constant 0 : i32
    return %c0_i32, %c0_i32_0 : i32, i32
  }
  func.func @transform_7(%arg0: i32) -> (i32, i32) {
    %c0_i32 = arith.constant 0 : i32
    %c0_i32_0 = arith.constant 0 : i32
    %c0_i32_1 = arith.constant 0 : i32
    return %c0_i32, %c0_i32_0 : i32, i32
  }
  func.func @transform_8(%arg0: i32) -> (i32, i32) {
    %c0_i32 = arith.constant 0 : i32
    %c0_i32_0 = arith.constant 0 : i32
    %c0_i32_1 = arith.constant 0 : i32
    return %c0_i32, %c0_i32_0 : i32, i32
  }
  func.func @transform_9(%arg0: i32) -> (i32, i32) {
    %c0_i32 = arith.constant 0 : i32
    %c0_i32_0 = arith.constant 0 : i32
    %c0_i32_1 = arith.constant 0 : i32
    return %c0_i32, %c0_i32_0 : i32, i32
  }
  func.func @transform_10(%arg0: i32) -> (i32, i32) {
    %c0_i32 = arith.constant 0 : i32
    %c0_i32_0 = arith.constant 0 : i32
    %c0_i32_1 = arith.constant 0 : i32
    return %c0_i32, %c0_i32_0 : i32, i32
  }
  func.func @transform_11(%arg0: i32) -> (i32, i32) {
    %c0_i32 = arith.constant 0 : i32
    %c0_i32_0 = arith.constant 0 : i32
    %c0_i32_1 = arith.constant 0 : i32
    return %c0_i32, %c0_i32_0 : i32, i32
  }
  func.func @transform_12(%arg0: i32) -> (i32, i32) {
    %c0_i32 = arith.constant 0 : i32
    %c0_i32_0 = arith.constant 0 : i32
    %c0_i32_1 = arith.constant 0 : i32
    return %c0_i32, %c0_i32_0 : i32, i32
  }
  func.func @transform_13(%arg0: i32) -> (i32, i32) {
    %c0_i32 = arith.constant 0 : i32
    %c0_i32_0 = arith.constant 0 : i32
    %c0_i32_1 = arith.constant 0 : i32
    return %c0_i32, %c0_i32_0 : i32, i32
  }
  func.func @transform_14(%arg0: i32) -> (i32, i32) {
    %c0_i32 = arith.constant 0 : i32
    %c0_i32_0 = arith.constant 0 : i32
    %c0_i32_1 = arith.constant 0 : i32
    return %c0_i32, %c0_i32_0 : i32, i32
  }
  func.func @transform_15(%arg0: i32) -> (i32, i32) {
    %c0_i32 = arith.constant 0 : i32
    %c0_i32_0 = arith.constant 0 : i32
    %c0_i32_1 = arith.constant 0 : i32
    return %c0_i32, %c0_i32_0 : i32, i32
  }
  func.func @transform_16(%arg0: i32) -> (i32, i32) {
    %c0_i32 = arith.constant 0 : i32
    %c0_i32_0 = arith.constant 0 : i32
    %c0_i32_1 = arith.constant 0 : i32
    return %c0_i32, %c0_i32_0 : i32, i32
  }
  func.func @transform_17(%arg0: i32) -> (i32, i32) {
    %c0_i32 = arith.constant 0 : i32
    %c0_i32_0 = arith.constant 0 : i32
    %c0_i32_1 = arith.constant 0 : i32
    return %c0_i32, %c0_i32_0 : i32, i32
  }
  func.func @transform_18(%arg0: i32) -> (i32, i32) {
    %c0_i32 = arith.constant 0 : i32
    %c0_i32_0 = arith.constant 0 : i32
    %c0_i32_1 = arith.constant 0 : i32
    return %c0_i32, %c0_i32_0 : i32, i32
  }
  func.func @transform_19(%arg0: i32) -> (i32, i32) {
    %c0_i32 = arith.constant 0 : i32
    %c0_i32_0 = arith.constant 0 : i32
    %c0_i32_1 = arith.constant 0 : i32
    return %c0_i32, %c0_i32_0 : i32, i32
  }
  func.func @transform_20(%arg0: i32) -> (i32, i32) {
    %c0_i32 = arith.constant 0 : i32
    %c0_i32_0 = arith.constant 0 : i32
    %c0_i32_1 = arith.constant 0 : i32
    return %c0_i32, %c0_i32_0 : i32, i32
  }
  func.func @transform_21(%arg0: i32) -> (i32, i32, i32) {
    %c0_i32 = arith.constant 0 : i32
    %c0_i32_0 = arith.constant 0 : i32
    %c0_i32_1 = arith.constant 0 : i32
    return %arg0, %c0_i32, %c0_i32_0 : i32, i32, i32
  }
}

</mosaic_0001>

<bundles_post_ra>
// kernel: cnn_block_pallas.1
= control target key start
LH: loop header
LB: loop body
LE: loop exit
PB: predicated region body
PF: predicated region fallthrough
CT: control target
= control target key end

     0   :  { %v8033_v0 = vmov 0   ;;  %s8034_s23 = smov 127   ;;  %s8036_s29 = smov 125   ;;  %vm520_vm0 = vcmask 1039360   ;;  %vm769_vm1 = vcmask 1031168   ;;  %vm1018_vm2 = vcmask 1022976   ;;  %s15531_s1 = inlined_call_operand.vmem [shape: f32[15,64,1], index: 1, kind: input, shape index: {}]   ;;  %s15532_s2 = inlined_call_operand.vmem [shape: f32[64,1], index: 2, kind: input, shape index: {}]   ;;  %s15533_s0 = inlined_call_operand.vmem [shape: f32[2,1,256], index: 0, kind: input, shape index: {}]   ;;  %s15534_s5 = inlined_call_operand.vmem [shape: f32[80,242], index: 5, kind: input, shape index: {}]   ;;  %s15535_s3 = inlined_call_operand.vmem [shape: f32[1,64], index: 3, kind: input, shape index: {}]   ;;  %s15536_s4 = inlined_call_operand.vmem [shape: f32[1,64], index: 4, kind: input, shape index: {}]   ;;  %s15537_s6 = inlined_call_operand.vmem [shape: f32[512,128], index: 6, kind: input, shape index: {}]   ;;  %s15538_s7 = inlined_call_operand.vmem [shape: f32[1,128], index: 7, kind: input, shape index: {}]   ;;  %s15539_s10 = inlined_call_operand.vmem [shape: f32[48,153], index: 10, kind: input, shape index: {}]   ;;  %s15540_s8 = inlined_call_operand.vmem [shape: f32[1,128], index: 8, kind: input, shape index: {}]   ;;  %s15541_s9 = inlined_call_operand.vmem [shape: f32[1,128], index: 9, kind: input, shape index: {}]   ;;  %s15542_s11 = inlined_call_operand.vmem [shape: f32[768,256], index: 11, kind: input, shape index: {}]   ;;  %s15543_s12 = inlined_call_operand.vmem [shape: f32[1,256], index: 12, kind: input, shape index: {}]   ;;  %s15544_s15 = inlined_call_operand.vmem [shape: f32[18,43], index: 15, kind: input, shape index: {}]   ;;  %s15545_s16 = inlined_call_operand.vmem [shape: f32[1024,512], index: 16, kind: input, shape index: {}]   ;;  %s15546_s13 = inlined_call_operand.vmem [shape: f32[1,256], index: 13, kind: input, shape index: {}]   ;;  %s15547_s14 = inlined_call_operand.vmem [shape: f32[1,256], index: 14, kind: input, shape index: {}]   ;;  %s15548_s17 = inlined_call_operand.vmem [shape: f32[1,512], index: 17, kind: input, shape index: {}]   ;;  %s15549_s20 = inlined_call_operand.vmem [shape: f32[6,15], index: 20, kind: input, shape index: {}]   ;;  %s15550_s18 = inlined_call_operand.vmem [shape: f32[1,512], index: 18, kind: input, shape index: {}]   ;;  %s15551_s19 = inlined_call_operand.vmem [shape: f32[1,512], index: 19, kind: input, shape index: {}]   ;;  %s15552_s21 = inlined_call_operand.vmem [shape: f32[1,6,512], index: 21, kind: output, shape index: {}]  }
   0x1   :  { %15833 = sst [smem:[#allocation249_spill]] %s15531_s1  ;;  %7805 = vset.pattern.permute.xlu2 %v8033_v0  ;;  %7804 = vset.pattern.permute.xlu1 %v8033_v0  ;;  %s8037_s30 = smov 124   ;;  %vm1267_vm3 = vcmask 1014784   ;;  %vm1516_vm4 = vcmask 1006592   ;;  %vm1765_vm5 = vcmask 998400   ;;  %vm2014_vm6 = vcmask 990208  }
   0x2   :  { %15834 = sst [smem:[#allocation250_spill]] %s15532_s2  ;;  %7803 = vset.pattern.permute.xlu0 %v8033_v0  ;;  %s8040_s25 = smov 121   ;;  %vm2263_vm7 = vcmask 982016   ;;  %vm2512_vm8 = vcmask 973824   ;;  %vm2761_vm9 = vcmask 965632   ;;  %vm3010_vm10 = vcmask 957440  }
   0x3   :  { %15835 = sst [smem:[#allocation251_spill]] %s15533_s0  ;;  %s8042_s27 = smov 119   ;;  %vm3259_vm11 = vcmask 949248   ;;  %vm3508_vm12 = vcmask 941056   ;;  %vm3757_vm13 = vcmask 932864   ;;  %vm4244_vm14 = vcmask 1046528  }
   0x4   :  { %15836 = sst [smem:[#allocation252_spill]] %s15534_s5  ;;  %s8035_s5 = smov 126   ;;  %vm4564_vm15 = vcmask 1042432  }
   0x5   :  { %15837 = sst [smem:[#allocation253_spill]] %s15535_s3  ;;  %s8045_s28 = smov 116  }
   0x6   :  { %15838 = sst [smem:[#allocation254_spill]] %s15536_s4  ;;  %s8047_s1 = smov 114  }
   0x7   :  { %s15839_s26 = sld [smem:[#allocation249_spill]] }
   0x8   :  { %s15840_s0 = sld [smem:[#allocation250_spill]] }
   0x9   :  { %s15850_s22 = sld [smem:[#allocation251_spill]] }
   0xa   :  { %s16396_s4 = sld [smem:[#allocation254_spill]] }
   0xd   :  { %v74_v1 = vld [vmem:[%s15839_s26 + $0x20] sm:$0xff]  ;;  %v72_v2 = vld [vmem:[%s15839_s26 + $0x10] sm:$0xff]  ;;  %v75_v4 = vld [vmem:[%s15839_s26 + $0x28] sm:$0xff] }
   0xe   :  { %v70_v3 = vld [vmem:[%s15839_s26] sm:$0xff]  ;;  %212 = vperm.xlu2 %7805, %v74_v1   ;;  %202 = vperm.xlu1 %7804, %v72_v2   ;;  %v73_v5 = vld [vmem:[%s15839_s26 + $0x18] sm:$0xff]  ;;  %v71_v6 = vld [vmem:[%s15839_s26 + $0x8] sm:$0xff] }
   0xf   :  { %192 = vperm.xlu0 %7803, %v70_v3   ;;  %v272_v7 = vld [vmem:[%s15840_s0] sm:$0xff]  ;;  %v77_v8 = vld [vmem:[%s15839_s26 + $0x38] sm:$0xff]  ;;  %v76_v9 = vld [vmem:[%s15839_s26 + $0x30] sm:$0xff] }
  0x10   :  { %v275_v10 = vld [vmem:[%s15840_s0 + $0x18] sm:$0xff]  ;;  %v274_v11 = vld [vmem:[%s15840_s0 + $0x10] sm:$0xff]  ;;  %v273_v12 = vld [vmem:[%s15840_s0 + $0x8] sm:$0xff] }
  0x11   :  { %v278_v13 = vld [vmem:[%s15840_s0 + $0x30] sm:$0xff]  ;;  %v277_v14 = vld [vmem:[%s15840_s0 + $0x28] sm:$0xff]  ;;  %v276_v15 = vld [vmem:[%s15840_s0 + $0x20] sm:$0xff] }
  0x12   :  { %v79_v16 = vld [vmem:[%s15839_s26 + $0x48] sm:$0xff]  ;;  %v78_v17 = vld [vmem:[%s15839_s26 + $0x40] sm:$0xff]  ;;  %v279_v18 = vld [vmem:[%s15840_s0 + $0x38] sm:$0xff]  ;;  %s8044_s0 = smov 117  }
  0x13   :  { %v82_v19 = vld [vmem:[%s15839_s26 + $0x60] sm:$0xff]  ;;  %v81_v20 = vld [vmem:[%s15839_s26 + $0x58] sm:$0xff]  ;;  %v80_v21 = vld [vmem:[%s15839_s26 + $0x50] sm:$0xff] }
  0x14   :  { %v85_v22 = vld [vmem:[%s15839_s26 + $0x78] sm:$0xff]  ;;  %v84_v23 = vld [vmem:[%s15839_s26 + $0x70] sm:$0xff]  ;;  %v83_v24 = vld [vmem:[%s15839_s26 + $0x68] sm:$0xff] }
  0x15   :  { %v68_v34 = vld [vmem:[%s15850_s22] sm:$0x3]  ;;  %v69_v3 = vld [vmem:[%s15850_s22 + $0x2] sm:$0x3]  ;;  %s8039_s22 = smov 122  }
  0x16   :  { %217 = vperm.xlu2 %7805, %v75_v4   ;;  %207 = vperm.xlu1 %7804, %v73_v5   ;;  %v8252_v35 = vperm.slane %v68_v34, 0  ;;  %v8268_v44 = vperm.slane %v68_v34, 1  ;;  %v8303_v4 = vperm.slane %v69_v3, 0  ;;  %v8305_v5 = vperm.slane %v69_v3, 1  ;;  %v89_v34 = vld [vmem:[%s15839_s26 + $0x98] sm:$0xff] }
  0x17   :  { %197 = vperm.xlu0 %7803, %v71_v6  }
  0x18   :  { %15858 = vst [vmem:[#allocation18_spill] sm:$0xff] %v8303_v4 }
  0x19   :  { %15859 = vst [vmem:[#allocation19_spill] sm:$0xff] %v8305_v5 }
  0x1e   :  { %282 = vperm.xlu2 %7805, %v272_v7   ;;  %227 = vperm.xlu1 %7804, %v77_v8  }
  0x1f   :  { %222 = vperm.xlu0 %7803, %v76_v9  }
  0x26   :  { %297 = vperm.xlu2 %7805, %v275_v10   ;;  %292 = vperm.xlu1 %7804, %v274_v11  }
  0x27   :  { %287 = vperm.xlu0 %7803, %v273_v12  }
  0x2e   :  { %312 = vperm.xlu2 %7805, %v278_v13   ;;  %307 = vperm.xlu1 %7804, %v277_v14  }
  0x2f   :  { %302 = vperm.xlu0 %7803, %v276_v15  }
  0x36   :  { %359 = vperm.xlu2 %7805, %v79_v16   ;;  %354 = vperm.xlu1 %7804, %v78_v17  }
  0x37   :  { %317 = vperm.xlu0 %7803, %v279_v18  }
  0x3e   :  { %374 = vperm.xlu2 %7805, %v82_v19   ;;  %369 = vperm.xlu1 %7804, %v81_v20  }
  0x3f   :  { %364 = vperm.xlu0 %7803, %v80_v21   ;;  %v86_v21 = vld [vmem:[%s15839_s26 + $0x80] sm:$0xff] }
  0x46   :  { %389 = vperm.xlu2 %7805, %v85_v22   ;;  %384 = vperm.xlu1 %7804, %v84_v23  }
  0x47   :  { %379 = vperm.xlu0 %7803, %v83_v24   ;;  %v88_v24 = vld [vmem:[%s15839_s26 + $0x90] sm:$0xff] }
  0x68   :  { %v8231_v25 = vpop.permute.xlu2 %212 }
  0x69   :  { %15841 = vst [vmem:[#allocation2_spill] sm:$0xff] %v8231_v25 }
  0x70   :  { %v8233_v26 = vpop.permute.xlu2 %217 }
  0x71   :  { %15842 = vst [vmem:[#allocation3_spill] sm:$0xff] %v8233_v26  ;;  %v182_v26 = vld [vmem:[%s15839_s26 + $0x380] sm:$0xff] }
  0x78   :  { %v8235_v27 = vpop.permute.xlu2 %282 }
  0x79   :  { %15843 = vst [vmem:[#allocation4_spill] sm:$0xff] %v8235_v27 }
  0x80   :  { %v8237_v28 = vpop.permute.xlu2 %297  ;;  %v8239_v29 = vpop.permute.xlu1 %202 }
  0x81   :  { %15844 = vst [vmem:[#allocation5_spill] sm:$0xff] %v8237_v28  ;;  %v8241_v30 = vpop.permute.xlu0 %192  ;;  %v178_v28 = vld [vmem:[%s15839_s26 + $0x360] sm:$0xff] }
  0x82   :  { %15845 = vst [vmem:[#allocation6_spill] sm:$0xff] %v8239_v29 }
  0x83   :  { %15846 = vst [vmem:[#allocation7_spill] sm:$0xff] %v8241_v30 }
  0x88   :  { %v8243_v31 = vpop.permute.xlu2 %312  ;;  %v8245_v32 = vpop.permute.xlu1 %207 }
  0x89   :  { %15847 = vst [vmem:[#allocation8_spill] sm:$0xff] %v8243_v31  ;;  %v8247_v33 = vpop.permute.xlu0 %197 }
  0x8a   :  { %15848 = vst [vmem:[#allocation9_spill] sm:$0xff] %v8245_v32  ;;  %v169_v32 = vld [vmem:[%s15839_s26 + $0x318] sm:$0xff] }
  0x8b   :  { %15849 = vst [vmem:[#allocation10_spill] sm:$0xff] %v8247_v33 }
  0x90   :  { %v360_v36 = vpop.permute.xlu2 %359  ;;  %v8254_v37 = vpop.permute.xlu1 %227 }
  0x91   :  { %15851 = vst [vmem:[#allocation11_spill] sm:$0xff] %v8254_v37  ;;  %v8256_v38 = vpop.permute.xlu0 %222  ;;  %v394_v39 = vmul.f32 %v360_v36, %v8252_v35  ;;  %v395_v52 = vmul.f32 %v360_v36, %v8268_v44  ;;  %v411_v9 = vmul.f32 %v360_v36, %v8305_v5  ;;  %v410_v11 = vmul.f32 %v360_v36, %v8303_v4  ;;  %v87_v36 = vld [vmem:[%s15839_s26 + $0x88] sm:$0xff] }
  0x92   :  { %15852 = vst [vmem:[#allocation12_spill] sm:$0xff] %v8256_v38 }
  0x93   :  { %460 = vrot.lane.b32.xlu2 %v394_v39, %s8034_s23 }
  0x98   :  { %v8260_v40 = vpop.permute.xlu1 %292  ;;  %v375_v53 = vpop.permute.xlu2 %374 }
  0x99   :  { %15853 = vst [vmem:[#allocation13_spill] sm:$0xff] %v8260_v40  ;;  %v8262_v41 = vpop.permute.xlu0 %287  ;;  %v400_v56 = vmul.f32 %v375_v53, %v8252_v35  ;;  %v401_v61 = vmul.f32 %v375_v53, %v8268_v44  ;;  %v417_v15 = vmul.f32 %v375_v53, %v8305_v5  ;;  %v416_v17 = vmul.f32 %v375_v53, %v8303_v4 }
  0x9a   :  { %15854 = vst [vmem:[#allocation14_spill] sm:$0xff] %v8262_v41 }
  0xa0   :  { %v8264_v42 = vpop.permute.xlu1 %307  ;;  %v390_v62 = vpop.permute.xlu2 %389 }
  0xa1   :  { %15855 = vst [vmem:[#allocation15_spill] sm:$0xff] %v8264_v42  ;;  %v8266_v43 = vpop.permute.xlu0 %302  ;;  %v406_v1 = vmul.f32 %v390_v62, %v8252_v35  ;;  %v407_v8 = vmul.f32 %v390_v62, %v8268_v44  ;;  %v423_v22 = vmul.f32 %v390_v62, %v8305_v5  ;;  %v422_v23 = vmul.f32 %v390_v62, %v8303_v4 }
  0xa2   :  { %15856 = vst [vmem:[#allocation16_spill] sm:$0xff] %v8266_v43  ;;  %v159_v43 = vld [vmem:[%s15839_s26 + $0x2c8] sm:$0xff] }
  0xa8   :  { %v355_v45 = vpop.permute.xlu1 %354 }
  0xa9   :  { %v8270_v46 = vpop.permute.xlu0 %317  ;;  %v393_v47 = vmul.f32 %v355_v45, %v8268_v44  ;;  %v392_v48 = vmul.f32 %v355_v45, %v8252_v35  ;;  %v408_v6 = vmul.f32 %v355_v45, %v8303_v4  ;;  %v409_v7 = vmul.f32 %v355_v45, %v8305_v5  ;;  %v91_v45 = vld [vmem:[%s15839_s26 + $0xa8] sm:$0xff] }
  0xaa   :  { %15857 = vst [vmem:[#allocation17_spill] sm:$0xff] %v8270_v46 }
  0xab   :  { %458 = vrot.lane.b32.xlu1 %v393_v47, %s8034_s23  ;;  %456 = vrot.lane.b32.xlu0 %v392_v48, %s8034_s23  ;;  %v92_v47 = vld [vmem:[%s15839_s26 + $0xb0] sm:$0xff]  ;;  %v90_v48 = vld [vmem:[%s15839_s26 + $0xa0] sm:$0xff] }
  0xb0   :  { %v370_v54 = vpop.permute.xlu1 %369 }
  0xb1   :  { %v365_v49 = vpop.permute.xlu0 %364  ;;  %v399_v55 = vmul.f32 %v370_v54, %v8268_v44  ;;  %v398_v57 = vmul.f32 %v370_v54, %v8252_v35  ;;  %v414_v12 = vmul.f32 %v370_v54, %v8303_v4  ;;  %v415_v13 = vmul.f32 %v370_v54, %v8305_v5 }
  0xb2   :  { %v396_v50 = vmul.f32 %v365_v49, %v8252_v35  ;;  %v397_v51 = vmul.f32 %v365_v49, %v8268_v44  ;;  %v412_v10 = vmul.f32 %v365_v49, %v8303_v4  ;;  %v413_v14 = vmul.f32 %v365_v49, %v8305_v5 }
  0xb3   :  { %462 = vrot.lane.b32.xlu0 %v395_v52, %s8034_s23 }
  0xb4   :  { %464 = vrot.lane.b32.xlu1 %v396_v50, %s8034_s23  ;;  %466 = vrot.lane.b32.xlu2 %v397_v51, %s8034_s23  ;;  %v93_v50 = vld [vmem:[%s15839_s26 + $0xb8] sm:$0xff] }
  0xb8   :  { %v385_v63 = vpop.permute.xlu1 %384 }
  0xb9   :  { %v380_v58 = vpop.permute.xlu0 %379  ;;  %v405_v0 = vmul.f32 %v385_v63, %v8268_v44  ;;  %v404_v2 = vmul.f32 %v385_v63, %v8252_v35  ;;  %v420_v18 = vmul.f32 %v385_v63, %v8303_v4  ;;  %v421_v19 = vmul.f32 %v385_v63, %v8305_v5 }
  0xba   :  { %v402_v59 = vmul.f32 %v380_v58, %v8252_v35  ;;  %v403_v60 = vmul.f32 %v380_v58, %v8268_v44  ;;  %v418_v16 = vmul.f32 %v380_v58, %v8303_v4  ;;  %v419_v20 = vmul.f32 %v380_v58, %v8305_v5 }
  0xbb   :  { %468 = vrot.lane.b32.xlu0 %v398_v57, %s8034_s23 }
  0xbc   :  { %470 = vrot.lane.b32.xlu1 %v399_v55, %s8034_s23  ;;  %472 = vrot.lane.b32.xlu2 %v400_v56, %s8034_s23 }
  0xc3   :  { %474 = vrot.lane.b32.xlu0 %v401_v61, %s8034_s23 }
  0xc4   :  { %476 = vrot.lane.b32.xlu1 %v402_v59, %s8034_s23  ;;  %478 = vrot.lane.b32.xlu2 %v403_v60, %s8034_s23 }
  0xcb   :  { %480 = vrot.lane.b32.xlu0 %v404_v2, %s8034_s23 }
  0xcc   :  { %482 = vrot.lane.b32.xlu1 %v405_v0, %s8034_s23  ;;  %484 = vrot.lane.b32.xlu2 %v406_v1, %s8034_s23 }
  0xd3   :  { %486 = vrot.lane.b32.xlu0 %v407_v8, %s8034_s23 }
  0xd4   :  { %488 = vrot.lane.b32.xlu1 %v408_v6, %s8034_s23  ;;  %490 = vrot.lane.b32.xlu2 %v409_v7, %s8034_s23 }
  0xdb   :  { %492 = vrot.lane.b32.xlu0 %v410_v11, %s8034_s23 }
  0xdc   :  { %494 = vrot.lane.b32.xlu1 %v411_v9, %s8034_s23  ;;  %496 = vrot.lane.b32.xlu2 %v412_v10, %s8034_s23 }
  0xe3   :  { %498 = vrot.lane.b32.xlu0 %v413_v14, %s8034_s23 }
  0xe4   :  { %500 = vrot.lane.b32.xlu1 %v414_v12, %s8034_s23  ;;  %502 = vrot.lane.b32.xlu2 %v415_v13, %s8034_s23 }
  0xeb   :  { %504 = vrot.lane.b32.xlu0 %v416_v17, %s8034_s23 }
  0xec   :  { %506 = vrot.lane.b32.xlu1 %v417_v15, %s8034_s23  ;;  %508 = vrot.lane.b32.xlu2 %v418_v16, %s8034_s23 }
  0xed   :  { %v8353_v39 = vpop.permute.xlu2 %460 }
  0xee   :  { %15860 = vst [vmem:[#allocation20_spill] sm:$0xff] %v8353_v39 }
  0xf3   :  { %510 = vrot.lane.b32.xlu0 %v419_v20, %s8034_s23 }
  0xf4   :  { %512 = vrot.lane.b32.xlu1 %v420_v18, %s8034_s23  ;;  %514 = vrot.lane.b32.xlu2 %v421_v19, %s8034_s23 }
  0xfb   :  { %516 = vrot.lane.b32.xlu0 %v422_v23, %s8034_s23 }
  0xfc   :  { %518 = vrot.lane.b32.xlu1 %v423_v22, %s8034_s23  ;;  %603 = vperm.xlu2 %7805, %v86_v21   ;;  %s8038_s23 = smov 123  }
 0x103   :  { %608 = vperm.xlu0 %7803, %v87_v36  }
 0x104   :  { %613 = vperm.xlu1 %7804, %v88_v24   ;;  %618 = vperm.xlu2 %7805, %v89_v34  }
 0x10b   :  { %623 = vperm.xlu0 %7803, %v90_v48  }
 0x10c   :  { %628 = vperm.xlu1 %7804, %v91_v45   ;;  %633 = vperm.xlu2 %7805, %v92_v47  }
 0x10e   :  { %v8364_v49 = vpop.permute.xlu2 %466 }
 0x10f   :  { %15861 = vst [vmem:[#allocation21_spill] sm:$0xff] %v8364_v49 }
 0x113   :  { %638 = vperm.xlu0 %7803, %v93_v50  }
 0x116   :  { %v8369_v51 = vpop.permute.xlu2 %472 }
 0x117   :  { %15862 = vst [vmem:[#allocation22_spill] sm:$0xff] %v8369_v51  ;;  %v168_v51 = vld [vmem:[%s15839_s26 + $0x310] sm:$0xff] }
 0x11d   :  { %v8371_v52 = vpop.permute.xlu1 %458  ;;  %v8375_v54 = vpop.permute.xlu0 %456 }
 0x11e   :  { %15863 = vst [vmem:[#allocation23_spill] sm:$0xff] %v8371_v52  ;;  %v8373_v53 = vpop.permute.xlu2 %478 }
 0x11f   :  { %15864 = vst [vmem:[#allocation24_spill] sm:$0xff] %v8373_v53  ;;  %v174_v53 = vld [vmem:[%s15839_s26 + $0x340] sm:$0xff] }
 0x120   :  { %15865 = vst [vmem:[#allocation25_spill] sm:$0xff] %v8375_v54 }
 0x125   :  { %v8381_v57 = vpop.permute.xlu0 %462 }
 0x126   :  { %v8377_v55 = vpop.permute.xlu1 %464  ;;  %v8379_v56 = vpop.permute.xlu2 %484  ;;  %15867 = vst [vmem:[#allocation27_spill] sm:$0xff] %v8381_v57 }
 0x127   :  { %15866 = vst [vmem:[#allocation26_spill] sm:$0xff] %v8377_v55 }
 0x12d   :  { %v8387_v60 = vpop.permute.xlu0 %468 }
 0x12e   :  { %v8383_v58 = vpop.permute.xlu1 %470  ;;  %v8385_v59 = vpop.permute.xlu2 %490  ;;  %15870 = vst [vmem:[#allocation30_spill] sm:$0xff] %v8387_v60  ;;  %v144_v60 = vld [vmem:[%s15839_s26 + $0x250] sm:$0xff] }
 0x12f   :  { %15868 = vst [vmem:[#allocation28_spill] sm:$0xff] %v8383_v58  ;;  %v118_v58 = vld [vmem:[%s15839_s26 + $0x180] sm:$0xff] }
 0x130   :  { %15869 = vst [vmem:[#allocation29_spill] sm:$0xff] %v8385_v59 }
 0x135   :  { %v8393_v63 = vpop.permute.xlu0 %474 }
 0x136   :  { %v8389_v61 = vpop.permute.xlu1 %476  ;;  %v8391_v62 = vpop.permute.xlu2 %496  ;;  %15873 = vst [vmem:[#allocation33_spill] sm:$0xff] %v8393_v63  ;;  %v176_v63 = vld [vmem:[%s15839_s26 + $0x350] sm:$0xff] }
 0x137   :  { %15871 = vst [vmem:[#allocation31_spill] sm:$0xff] %v8389_v61  ;;  %v183_v61 = vld [vmem:[%s15839_s26 + $0x388] sm:$0xff] }
 0x138   :  { %15872 = vst [vmem:[#allocation32_spill] sm:$0xff] %v8391_v62 }
 0x13d   :  { %v8399_v2 = vpop.permute.xlu0 %480 }
 0x13e   :  { %v8395_v0 = vpop.permute.xlu1 %482  ;;  %v8397_v1 = vpop.permute.xlu2 %502  ;;  %15875 = vst [vmem:[#allocation35_spill] sm:$0xff] %v8399_v2 }
 0x13f   :  { %15874 = vst [vmem:[#allocation34_spill] sm:$0xff] %v8397_v1 }
 0x145   :  { %v8405_v7 = vpop.permute.xlu0 %486 }
 0x146   :  { %v8401_v3 = vpop.permute.xlu1 %488  ;;  %v8403_v6 = vpop.permute.xlu2 %508 }
 0x147   :  { %15876 = vst [vmem:[#allocation36_spill] sm:$0xff] %v8401_v3 }
 0x148   :  { %15877 = vst [vmem:[#allocation37_spill] sm:$0xff] %v8403_v6 }
 0x14d   :  { %v8411_v10 = vpop.permute.xlu0 %492 }
 0x14e   :  { %v8407_v8 = vpop.permute.xlu1 %494  ;;  %v8409_v9 = vpop.permute.xlu2 %514  ;;  %15880 = vst [vmem:[#allocation40_spill] sm:$0xff] %v8411_v10 }
 0x14f   :  { %15878 = vst [vmem:[#allocation38_spill] sm:$0xff] %v8407_v8 }
 0x150   :  { %15879 = vst [vmem:[#allocation39_spill] sm:$0xff] %v8409_v9 }
 0x155   :  { %v8415_v13 = vpop.permute.xlu0 %498 }
 0x156   :  { %v8413_v11 = vpop.permute.xlu1 %500  ;;  %v604_v12 = vpop.permute.xlu2 %603  ;;  %15882 = vst [vmem:[#allocation42_spill] sm:$0xff] %v8415_v13 }
 0x157   :  { %15881 = vst [vmem:[#allocation41_spill] sm:$0xff] %v8413_v11  ;;  %v642_v14 = vmul.f32 %v604_v12, %v8268_v44  ;;  %v641_v15 = vmul.f32 %v604_v12, %v8252_v35 }
 0x159   :  { %707 = vrot.lane.b32.xlu2 %v642_v14, %s8035_s5  ;;  %705 = vrot.lane.b32.xlu1 %v641_v15, %s8035_s5 }
 0x15d   :  { %v8423_v17 = vpop.permute.xlu0 %504 }
 0x15e   :  { %v8421_v16 = vpop.permute.xlu1 %506  ;;  %15884 = vst [vmem:[#allocation44_spill] sm:$0xff] %v8423_v17  ;;  %v619_v45 = vpop.permute.xlu2 %618 }
 0x15f   :  { %15883 = vst [vmem:[#allocation43_spill] sm:$0xff] %v8421_v16  ;;  %v648_v47 = vmul.f32 %v619_v45, %v8268_v44  ;;  %v647_v48 = vmul.f32 %v619_v45, %v8252_v35 }
 0x165   :  { %v8427_v19 = vpop.permute.xlu0 %510 }
 0x166   :  { %v8425_v18 = vpop.permute.xlu1 %512  ;;  %15886 = vst [vmem:[#allocation46_spill] sm:$0xff] %v8427_v19  ;;  %v634_v3 = vpop.permute.xlu2 %633 }
 0x167   :  { %15885 = vst [vmem:[#allocation45_spill] sm:$0xff] %v8425_v18 }
 0x16d   :  { %v8431_v21 = vpop.permute.xlu0 %516 }
 0x16e   :  { %v8429_v20 = vpop.permute.xlu1 %518  ;;  %15888 = vst [vmem:[#allocation48_spill] sm:$0xff] %v8431_v21 }
 0x16f   :  { %15887 = vst [vmem:[#allocation47_spill] sm:$0xff] %v8429_v20 }
 0x175   :  { %v609_v23 = vpop.permute.xlu0 %608 }
 0x176   :  { %v614_v22 = vpop.permute.xlu1 %613  ;;  %v644_v34 = vmul.f32 %v609_v23, %v8268_v44  ;;  %v643_v36 = vmul.f32 %v609_v23, %v8252_v35  ;;  %v660_v10 = vmul.f32 %v609_v23, %v8305_v5 }
 0x177   :  { %v645_v24 = vmul.f32 %v614_v22, %v8252_v35  ;;  %v646_v50 = vmul.f32 %v614_v22, %v8268_v44 }
 0x178   :  { %711 = vrot.lane.b32.xlu1 %v644_v34, %s8035_s5  ;;  %709 = vrot.lane.b32.xlu0 %v643_v36, %s8035_s5 }
 0x179   :  { %713 = vrot.lane.b32.xlu2 %v645_v24, %s8035_s5 }
 0x17d   :  { %v624_v15 = vpop.permute.xlu0 %623 }
 0x17e   :  { %v629_v14 = vpop.permute.xlu1 %628  ;;  %v650_v34 = vmul.f32 %v624_v15, %v8268_v44  ;;  %v649_v36 = vmul.f32 %v624_v15, %v8252_v35 }
 0x17f   :  { %v651_v24 = vmul.f32 %v629_v14, %v8252_v35 }
 0x180   :  { %717 = vrot.lane.b32.xlu1 %v647_v48, %s8035_s5  ;;  %715 = vrot.lane.b32.xlu0 %v646_v50, %s8035_s5  ;;  %v653_v48 = vmul.f32 %v634_v3, %v8252_v35  ;;  %v652_v50 = vmul.f32 %v629_v14, %v8268_v44 }
 0x181   :  { %719 = vrot.lane.b32.xlu2 %v648_v47, %s8035_s5  ;;  %v654_v47 = vmul.f32 %v634_v3, %v8268_v44 }
 0x185   :  { %v639_v59 = vpop.permute.xlu0 %638 }
 0x188   :  { %723 = vrot.lane.b32.xlu1 %v650_v34, %s8035_s5  ;;  %721 = vrot.lane.b32.xlu0 %v649_v36, %s8035_s5  ;;  %v656_v34 = vmul.f32 %v639_v59, %v8268_v44  ;;  %v655_v36 = vmul.f32 %v639_v59, %v8252_v35 }
 0x189   :  { %725 = vrot.lane.b32.xlu2 %v651_v24, %s8035_s5  ;;  %v657_v24 = vmul.f32 %v604_v12, %v8303_v4 }
 0x190   :  { %729 = vrot.lane.b32.xlu1 %v653_v48, %s8035_s5  ;;  %727 = vrot.lane.b32.xlu0 %v652_v50, %s8035_s5  ;;  %v658_v48 = vmul.f32 %v604_v12, %v8305_v5  ;;  %v663_v50 = vmul.f32 %v619_v45, %v8303_v4  ;;  %v666_v12 = vmul.f32 %v624_v15, %v8305_v5 }
 0x191   :  { %731 = vrot.lane.b32.xlu2 %v654_v47, %s8035_s5  ;;  %v659_v47 = vmul.f32 %v609_v23, %v8303_v4  ;;  %v664_v23 = vmul.f32 %v619_v45, %v8305_v5  ;;  %v672_v45 = vmul.f32 %v639_v59, %v8305_v5 }
 0x198   :  { %735 = vrot.lane.b32.xlu1 %v656_v34, %s8035_s5  ;;  %733 = vrot.lane.b32.xlu0 %v655_v36, %s8035_s5  ;;  %v661_v34 = vmul.f32 %v614_v22, %v8303_v4  ;;  %v668_v36 = vmul.f32 %v629_v14, %v8305_v5 }
 0x199   :  { %737 = vrot.lane.b32.xlu2 %v657_v24, %s8035_s5  ;;  %v662_v24 = vmul.f32 %v614_v22, %v8305_v5  ;;  %v669_v22 = vmul.f32 %v634_v3, %v8303_v4 }
 0x1a0   :  { %741 = vrot.lane.b32.xlu1 %v659_v47, %s8035_s5  ;;  %739 = vrot.lane.b32.xlu0 %v658_v48, %s8035_s5  ;;  %v667_v47 = vmul.f32 %v629_v14, %v8303_v4  ;;  %v670_v48 = vmul.f32 %v634_v3, %v8305_v5  ;;  %v96_v14 = vld [vmem:[%s15839_s26 + $0xd0] sm:$0xff]  ;;  %v99_v3 = vld [vmem:[%s15839_s26 + $0xe8] sm:$0xff] }
 0x1a1   :  { %743 = vrot.lane.b32.xlu2 %v660_v10, %s8035_s5  ;;  %v665_v10 = vmul.f32 %v624_v15, %v8303_v4  ;;  %v671_v15 = vmul.f32 %v639_v59, %v8303_v4  ;;  %v94_v59 = vld [vmem:[%s15839_s26 + $0xc0] sm:$0xff] }
 0x1a8   :  { %747 = vrot.lane.b32.xlu1 %v662_v24, %s8035_s5  ;;  %745 = vrot.lane.b32.xlu0 %v661_v34, %s8035_s5  ;;  %v98_v24 = vld [vmem:[%s15839_s26 + $0xe0] sm:$0xff]  ;;  %v97_v34 = vld [vmem:[%s15839_s26 + $0xd8] sm:$0xff] }
 0x1a9   :  { %749 = vrot.lane.b32.xlu2 %v663_v50, %s8035_s5  ;;  %v95_v50 = vld [vmem:[%s15839_s26 + $0xc8] sm:$0xff] }
 0x1b0   :  { %753 = vrot.lane.b32.xlu1 %v665_v10, %s8035_s5  ;;  %751 = vrot.lane.b32.xlu0 %v664_v23, %s8035_s5  ;;  %v101_v10 = vld [vmem:[%s15839_s26 + $0xf8] sm:$0xff]  ;;  %v100_v23 = vld [vmem:[%s15839_s26 + $0xf0] sm:$0xff] }
 0x1b1   :  { %755 = vrot.lane.b32.xlu2 %v666_v12, %s8035_s5 }
 0x1b3   :  { %v8511_v12 = vpop.permute.xlu2 %707 }
 0x1b4   :  { %15889 = vst [vmem:[#allocation49_spill] sm:$0xff] %v8511_v12 }
 0x1b8   :  { %759 = vrot.lane.b32.xlu1 %v668_v36, %s8035_s5  ;;  %757 = vrot.lane.b32.xlu0 %v667_v47, %s8035_s5 }
 0x1b9   :  { %761 = vrot.lane.b32.xlu2 %v669_v22, %s8035_s5 }
 0x1c0   :  { %765 = vrot.lane.b32.xlu1 %v671_v15, %s8035_s5  ;;  %763 = vrot.lane.b32.xlu0 %v670_v48, %s8035_s5 }
 0x1c1   :  { %767 = vrot.lane.b32.xlu2 %v672_v45, %s8035_s5  ;;  %s8043_s5 = smov 118  }
 0x1c8   :  { %857 = vperm.xlu1 %7804, %v95_v50   ;;  %852 = vperm.xlu0 %7803, %v94_v59  }
 0x1c9   :  { %862 = vperm.xlu2 %7805, %v96_v14  }
 0x1cb   :  { %v8521_v36 = vpop.permute.xlu1 %705 }
 0x1cc   :  { %15891 = vst [vmem:[#allocation51_spill] sm:$0xff] %v8521_v36 }
 0x1d0   :  { %872 = vperm.xlu1 %7804, %v98_v24   ;;  %867 = vperm.xlu0 %7803, %v97_v34  }
 0x1d1   :  { %877 = vperm.xlu2 %7805, %v99_v3  }
 0x1d3   :  { %v8519_v22 = vpop.permute.xlu2 %713 }
 0x1d4   :  { %15890 = vst [vmem:[#allocation50_spill] sm:$0xff] %v8519_v22 }
 0x1d8   :  { %887 = vperm.xlu1 %7804, %v101_v10   ;;  %882 = vperm.xlu0 %7803, %v100_v23  }
 0x1db   :  { %v8523_v47 = vpop.permute.xlu2 %719 }
 0x1dc   :  { %15892 = vst [vmem:[#allocation52_spill] sm:$0xff] %v8523_v47 }
 0x1e3   :  { %v8529_v48 = vpop.permute.xlu2 %725 }
 0x1e4   :  { %15895 = vst [vmem:[#allocation55_spill] sm:$0xff] %v8529_v48 }
 0x1ea   :  { %v8525_v45 = vpop.permute.xlu1 %711  ;;  %v8527_v15 = vpop.permute.xlu0 %709 }
 0x1eb   :  { %15893 = vst [vmem:[#allocation53_spill] sm:$0xff] %v8525_v45  ;;  %v8535_v59 = vpop.permute.xlu2 %731 }
 0x1ec   :  { %15894 = vst [vmem:[#allocation54_spill] sm:$0xff] %v8527_v15 }
 0x1f2   :  { %v8531_v14 = vpop.permute.xlu1 %717  ;;  %v8533_v50 = vpop.permute.xlu0 %715 }
 0x1f3   :  { %15896 = vst [vmem:[#allocation56_spill] sm:$0xff] %v8531_v14  ;;  %v8545_v23 = vpop.permute.xlu2 %737  ;;  %v153_v14 = vld [vmem:[%s15839_s26 + $0x298] sm:$0xff] }
 0x1f4   :  { %15897 = vst [vmem:[#allocation57_spill] sm:$0xff] %v8533_v50 }
 0x1f5   :  { %15902 = vst [vmem:[#allocation62_spill] sm:$0xff] %v8545_v23 }
 0x1fa   :  { %v8537_v3 = vpop.permute.xlu1 %723  ;;  %v8539_v24 = vpop.permute.xlu0 %721 }
 0x1fb   :  { %15898 = vst [vmem:[#allocation58_spill] sm:$0xff] %v8537_v3  ;;  %v8551_v9 = vpop.permute.xlu2 %743 }
 0x1fc   :  { %15899 = vst [vmem:[#allocation59_spill] sm:$0xff] %v8539_v24 }
 0x1fd   :  { %15903 = vst [vmem:[#allocation63_spill] sm:$0xff] %v8551_v9 }
 0x202   :  { %v8541_v34 = vpop.permute.xlu1 %729  ;;  %v8543_v10 = vpop.permute.xlu0 %727 }
 0x203   :  { %15900 = vst [vmem:[#allocation60_spill] sm:$0xff] %v8541_v34  ;;  %v8557_v62 = vpop.permute.xlu2 %749 }
 0x204   :  { %15901 = vst [vmem:[#allocation61_spill] sm:$0xff] %v8543_v10 }
 0x205   :  { %15906 = vst [vmem:[#allocation66_spill] sm:$0xff] %v8557_v62 }
 0x20a   :  { %v8547_v8 = vpop.permute.xlu1 %735  ;;  %v8549_v18 = vpop.permute.xlu0 %733 }
 0x20b   :  { %v8563_v19 = vpop.permute.xlu2 %755 }
 0x20c   :  { %15909 = vst [vmem:[#allocation69_spill] sm:$0xff] %v8563_v19 }
 0x212   :  { %v8553_v11 = vpop.permute.xlu1 %741  ;;  %v8555_v1 = vpop.permute.xlu0 %739 }
 0x213   :  { %15904 = vst [vmem:[#allocation64_spill] sm:$0xff] %v8553_v11  ;;  %v8573_v9 = vpop.permute.xlu2 %761 }
 0x214   :  { %15905 = vst [vmem:[#allocation65_spill] sm:$0xff] %v8555_v1 }
 0x215   :  { %15914 = vst [vmem:[#allocation74_spill] sm:$0xff] %v8573_v9 }
 0x21a   :  { %v8559_v13 = vpop.permute.xlu1 %747  ;;  %v8561_v6 = vpop.permute.xlu0 %745 }
 0x21b   :  { %15907 = vst [vmem:[#allocation67_spill] sm:$0xff] %v8559_v13  ;;  %v8579_v62 = vpop.permute.xlu2 %767 }
 0x21c   :  { %15908 = vst [vmem:[#allocation68_spill] sm:$0xff] %v8561_v6 }
 0x21d   :  { %15917 = vst [vmem:[#allocation77_spill] sm:$0xff] %v8579_v62 }
 0x222   :  { %v8565_v17 = vpop.permute.xlu1 %753  ;;  %v8567_v23 = vpop.permute.xlu0 %751 }
 0x223   :  { %15910 = vst [vmem:[#allocation70_spill] sm:$0xff] %v8565_v17  ;;  %v863_v9 = vpop.permute.xlu2 %862 }
 0x224   :  { %15911 = vst [vmem:[#allocation71_spill] sm:$0xff] %v8567_v23  ;;  %v910_v54 = vmul.f32 %v863_v9, %v8303_v4 }
 0x22a   :  { %v8569_v16 = vpop.permute.xlu1 %759  ;;  %v8571_v21 = vpop.permute.xlu0 %757 }
 0x22b   :  { %15912 = vst [vmem:[#allocation72_spill] sm:$0xff] %v8569_v16  ;;  %v878_v20 = vpop.permute.xlu2 %877 }
 0x22c   :  { %15913 = vst [vmem:[#allocation73_spill] sm:$0xff] %v8571_v21  ;;  %v894_v21 = vmul.f32 %v863_v9, %v8252_v35 }
 0x232   :  { %v8575_v11 = vpop.permute.xlu1 %765  ;;  %v8577_v1 = vpop.permute.xlu0 %763 }
 0x233   :  { %15915 = vst [vmem:[#allocation75_spill] sm:$0xff] %v8575_v11 }
 0x234   :  { %15916 = vst [vmem:[#allocation76_spill] sm:$0xff] %v8577_v1  ;;  %v895_v1 = vmul.f32 %v863_v9, %v8268_v44 }
 0x23a   :  { %v858_v13 = vpop.permute.xlu1 %857  ;;  %v853_v6 = vpop.permute.xlu0 %852 }
 0x23b   :  { %v892_v19 = vmul.f32 %v858_v13, %v8252_v35  ;;  %v891_v17 = vmul.f32 %v853_v6, %v8268_v44  ;;  %v890_v23 = vmul.f32 %v853_v6, %v8252_v35  ;;  %v893_v16 = vmul.f32 %v858_v13, %v8268_v44 }
 0x23d   :  { %958 = vrot.lane.b32.xlu1 %v892_v19, %s8036_s29  ;;  %956 = vrot.lane.b32.xlu0 %v891_v17, %s8036_s29 }
 0x23e   :  { %954 = vrot.lane.b32.xlu2 %v890_v23, %s8036_s29 }
 0x242   :  { %v873_v11 = vpop.permute.xlu1 %872  ;;  %v868_v62 = vpop.permute.xlu0 %867 }
 0x243   :  { %v898_v19 = vmul.f32 %v873_v11, %v8252_v35  ;;  %v897_v17 = vmul.f32 %v868_v62, %v8268_v44  ;;  %v896_v23 = vmul.f32 %v868_v62, %v8252_v35 }
 0x245   :  { %964 = vrot.lane.b32.xlu1 %v895_v1, %s8036_s29  ;;  %962 = vrot.lane.b32.xlu0 %v894_v21, %s8036_s29  ;;  %v901_v1 = vmul.f32 %v878_v20, %v8268_v44  ;;  %v900_v21 = vmul.f32 %v878_v20, %v8252_v35 }
 0x246   :  { %960 = vrot.lane.b32.xlu2 %v893_v16, %s8036_s29  ;;  %v899_v16 = vmul.f32 %v873_v11, %v8268_v44 }
 0x24a   :  { %v888_v36 = vpop.permute.xlu1 %887  ;;  %v883_v12 = vpop.permute.xlu0 %882 }
 0x24d   :  { %970 = vrot.lane.b32.xlu1 %v898_v19, %s8036_s29  ;;  %968 = vrot.lane.b32.xlu0 %v897_v17, %s8036_s29  ;;  %v904_v19 = vmul.f32 %v888_v36, %v8252_v35  ;;  %v903_v17 = vmul.f32 %v883_v12, %v8268_v44 }
 0x24e   :  { %966 = vrot.lane.b32.xlu2 %v896_v23, %s8036_s29  ;;  %v902_v23 = vmul.f32 %v883_v12, %v8252_v35 }
 0x255   :  { %976 = vrot.lane.b32.xlu1 %v901_v1, %s8036_s29  ;;  %974 = vrot.lane.b32.xlu0 %v900_v21, %s8036_s29  ;;  %v907_v1 = vmul.f32 %v853_v6, %v8305_v5  ;;  %v906_v21 = vmul.f32 %v853_v6, %v8303_v4  ;;  %v913_v6 = vmul.f32 %v868_v62, %v8305_v5 }
 0x256   :  { %972 = vrot.lane.b32.xlu2 %v899_v16, %s8036_s29  ;;  %v905_v16 = vmul.f32 %v888_v36, %v8268_v44 }
 0x25d   :  { %982 = vrot.lane.b32.xlu1 %v904_v19, %s8036_s29  ;;  %980 = vrot.lane.b32.xlu0 %v903_v17, %s8036_s29  ;;  %v909_v19 = vmul.f32 %v858_v13, %v8305_v5  ;;  %v908_v17 = vmul.f32 %v858_v13, %v8303_v4  ;;  %v916_v13 = vmul.f32 %v878_v20, %v8303_v4 }
 0x25e   :  { %978 = vrot.lane.b32.xlu2 %v902_v23, %s8036_s29  ;;  %v912_v23 = vmul.f32 %v868_v62, %v8303_v4  ;;  %v919_v62 = vmul.f32 %v883_v12, %v8305_v5 }
 0x265   :  { %988 = vrot.lane.b32.xlu1 %v907_v1, %s8036_s29  ;;  %986 = vrot.lane.b32.xlu0 %v906_v21, %s8036_s29  ;;  %v911_v1 = vmul.f32 %v863_v9, %v8305_v5  ;;  %v914_v21 = vmul.f32 %v873_v11, %v8303_v4  ;;  %v918_v9 = vmul.f32 %v883_v12, %v8303_v4  ;;  %v104_v12 = vld [vmem:[%s15839_s26 + $0x110] sm:$0xff] }
 0x266   :  { %984 = vrot.lane.b32.xlu2 %v905_v16, %s8036_s29  ;;  %v917_v16 = vmul.f32 %v878_v20, %v8305_v5  ;;  %v105_v20 = vld [vmem:[%s15839_s26 + $0x118] sm:$0xff] }
 0x26d   :  { %994 = vrot.lane.b32.xlu1 %v910_v54, %s8036_s29  ;;  %992 = vrot.lane.b32.xlu0 %v909_v19, %s8036_s29  ;;  %v915_v54 = vmul.f32 %v873_v11, %v8305_v5  ;;  %v102_v11 = vld [vmem:[%s15839_s26 + $0x100] sm:$0xff]  ;;  %v921_v19 = vmul.f32 %v888_v36, %v8305_v5 }
 0x26e   :  { %990 = vrot.lane.b32.xlu2 %v908_v17, %s8036_s29  ;;  %v920_v17 = vmul.f32 %v888_v36, %v8303_v4 }
 0x275   :  { %1000 = vrot.lane.b32.xlu1 %v913_v6, %s8036_s29  ;;  %998 = vrot.lane.b32.xlu0 %v912_v23, %s8036_s29  ;;  %v103_v6 = vld [vmem:[%s15839_s26 + $0x108] sm:$0xff]  ;;  %v108_v23 = vld [vmem:[%s15839_s26 + $0x130] sm:$0xff] }
 0x276   :  { %996 = vrot.lane.b32.xlu2 %v911_v1, %s8036_s29  ;;  %v107_v1 = vld [vmem:[%s15839_s26 + $0x128] sm:$0xff] }
 0x27d   :  { %1006 = vrot.lane.b32.xlu1 %v916_v13, %s8036_s29  ;;  %1004 = vrot.lane.b32.xlu0 %v915_v54, %s8036_s29  ;;  %v106_v13 = vld [vmem:[%s15839_s26 + $0x120] sm:$0xff] }
 0x27e   :  { %1002 = vrot.lane.b32.xlu2 %v914_v21, %s8036_s29  ;;  %v109_v21 = vld [vmem:[%s15839_s26 + $0x138] sm:$0xff] }
 0x285   :  { %1012 = vrot.lane.b32.xlu1 %v919_v62, %s8036_s29  ;;  %1010 = vrot.lane.b32.xlu0 %v918_v9, %s8036_s29 }
 0x286   :  { %1008 = vrot.lane.b32.xlu2 %v917_v16, %s8036_s29 }
 0x28d   :  { %1101 = vperm.xlu1 %7804, %v102_v11   ;;  %1016 = vrot.lane.b32.xlu0 %v921_v19, %s8036_s29 }
 0x28e   :  { %1014 = vrot.lane.b32.xlu2 %v920_v17, %s8036_s29  ;;  %s8046_s29 = smov 115  }
 0x295   :  { %1116 = vperm.xlu1 %7804, %v105_v20   ;;  %1111 = vperm.xlu0 %7803, %v104_v12  }
 0x296   :  { %1106 = vperm.xlu2 %7805, %v103_v6  }
 0x298   :  { %v8657_v36 = vpop.permute.xlu2 %954 }
 0x299   :  { %15918 = vst [vmem:[#allocation78_spill] sm:$0xff] %v8657_v36 }
 0x29d   :  { %1131 = vperm.xlu1 %7804, %v108_v23   ;;  %1126 = vperm.xlu0 %7803, %v107_v1  }
 0x29e   :  { %1121 = vperm.xlu2 %7805, %v106_v13  }
 0x2a0   :  { %v8668_v54 = vpop.permute.xlu2 %960 }
 0x2a1   :  { %15919 = vst [vmem:[#allocation79_spill] sm:$0xff] %v8668_v54 }
 0x2a6   :  { %1136 = vperm.xlu2 %7805, %v109_v21  }
 0x2a8   :  { %v8673_v62 = vpop.permute.xlu2 %966 }
 0x2a9   :  { %15920 = vst [vmem:[#allocation80_spill] sm:$0xff] %v8673_v62  ;;  %v128_v62 = vld [vmem:[%s15839_s26 + $0x1d0] sm:$0xff] }
 0x2af   :  { %v8675_v9 = vpop.permute.xlu1 %958  ;;  %v8677_v16 = vpop.permute.xlu0 %956 }
 0x2b0   :  { %15921 = vst [vmem:[#allocation81_spill] sm:$0xff] %v8675_v9  ;;  %v8679_v11 = vpop.permute.xlu2 %972 }
 0x2b1   :  { %15922 = vst [vmem:[#allocation82_spill] sm:$0xff] %v8677_v16 }
 0x2b2   :  { %15923 = vst [vmem:[#allocation83_spill] sm:$0xff] %v8679_v11  ;;  %v185_v11 = vld [vmem:[%s15839_s26 + $0x398] sm:$0xff] }
 0x2b7   :  { %v8681_v19 = vpop.permute.xlu1 %964  ;;  %v8683_v17 = vpop.permute.xlu0 %962 }
 0x2b8   :  { %15924 = vst [vmem:[#allocation84_spill] sm:$0xff] %v8681_v19  ;;  %v8685_v20 = vpop.permute.xlu2 %978 }
 0x2b9   :  { %15925 = vst [vmem:[#allocation85_spill] sm:$0xff] %v8683_v17 }
 0x2ba   :  { %15926 = vst [vmem:[#allocation86_spill] sm:$0xff] %v8685_v20 }
 0x2bf   :  { %v8687_v12 = vpop.permute.xlu1 %970  ;;  %v8689_v6 = vpop.permute.xlu0 %968 }
 0x2c0   :  { %15927 = vst [vmem:[#allocation87_spill] sm:$0xff] %v8687_v12  ;;  %v8691_v23 = vpop.permute.xlu2 %984  ;;  %v134_v12 = vld [vmem:[%s15839_s26 + $0x200] sm:$0xff] }
 0x2c1   :  { %15928 = vst [vmem:[#allocation88_spill] sm:$0xff] %v8689_v6  ;;  %v127_v6 = vld [vmem:[%s15839_s26 + $0x1c8] sm:$0xff] }
 0x2c7   :  { %v8693_v1 = vpop.permute.xlu1 %976  ;;  %v8695_v13 = vpop.permute.xlu0 %974 }
 0x2c8   :  { %15929 = vst [vmem:[#allocation89_spill] sm:$0xff] %v8693_v1  ;;  %v8697_v21 = vpop.permute.xlu2 %990  ;;  %v166_v1 = vld [vmem:[%s15839_s26 + $0x300] sm:$0xff] }
 0x2c9   :  { %15930 = vst [vmem:[#allocation90_spill] sm:$0xff] %v8695_v13  ;;  %v175_v13 = vld [vmem:[%s15839_s26 + $0x348] sm:$0xff] }
 0x2ca   :  { %15931 = vst [vmem:[#allocation91_spill] sm:$0xff] %v8697_v21 }
 0x2cf   :  { %v8699_v36 = vpop.permute.xlu1 %982  ;;  %v8701_v16 = vpop.permute.xlu0 %980 }
 0x2d0   :  { %15932 = vst [vmem:[#allocation92_spill] sm:$0xff] %v8701_v16  ;;  %v8703_v9 = vpop.permute.xlu2 %996 }
 0x2d1   :  { %15933 = vst [vmem:[#allocation93_spill] sm:$0xff] %v8703_v9 }
 0x2d7   :  { %v8705_v52 = vpop.permute.xlu1 %988  ;;  %v8707_v54 = vpop.permute.xlu0 %986 }
 0x2d8   :  { %15934 = vst [vmem:[#allocation94_spill] sm:$0xff] %v8705_v52  ;;  %v8709_v15 = vpop.permute.xlu2 %1002 }
 0x2d9   :  { %15935 = vst [vmem:[#allocation95_spill] sm:$0xff] %v8707_v54 }
 0x2da   :  { %15936 = vst [vmem:[#allocation96_spill] sm:$0xff] %v8709_v15 }
 0x2df   :  { %v8711_v27 = vpop.permute.xlu1 %994  ;;  %v8713_v45 = vpop.permute.xlu0 %992 }
 0x2e0   :  { %15937 = vst [vmem:[#allocation97_spill] sm:$0xff] %v8711_v27  ;;  %v8715_v39 = vpop.permute.xlu2 %1008 }
 0x2e1   :  { %15938 = vst [vmem:[#allocation98_spill] sm:$0xff] %v8713_v45 }
 0x2e2   :  { %15939 = vst [vmem:[#allocation99_spill] sm:$0xff] %v8715_v39 }
 0x2e7   :  { %v8717_v57 = vpop.permute.xlu1 %1000  ;;  %v8719_v21 = vpop.permute.xlu0 %998 }
 0x2e8   :  { %15940 = vst [vmem:[#allocation100_spill] sm:$0xff] %v8717_v57  ;;  %v8721_v30 = vpop.permute.xlu2 %1014 }
 0x2e9   :  { %15941 = vst [vmem:[#allocation101_spill] sm:$0xff] %v8719_v21 }
 0x2ea   :  { %15942 = vst [vmem:[#allocation102_spill] sm:$0xff] %v8721_v30 }
 0x2ef   :  { %v8723_v41 = vpop.permute.xlu1 %1006  ;;  %v8725_v9 = vpop.permute.xlu0 %1004 }
 0x2f0   :  { %15943 = vst [vmem:[#allocation103_spill] sm:$0xff] %v8723_v41  ;;  %v1107_v52 = vpop.permute.xlu2 %1106 }
 0x2f1   :  { %15944 = vst [vmem:[#allocation104_spill] sm:$0xff] %v8725_v9  ;;  %v1141_v54 = vmul.f32 %v1107_v52, %v8252_v35  ;;  %v1142_v9 = vmul.f32 %v1107_v52, %v8268_v44  ;;  %v1157_v55 = vmul.f32 %v1107_v52, %v8303_v4 }
 0x2f3   :  { %1207 = vrot.lane.b32.xlu2 %v1141_v54, %s8037_s30 }
 0x2f7   :  { %v8729_v27 = vpop.permute.xlu1 %1012  ;;  %v8731_v45 = vpop.permute.xlu0 %1010 }
 0x2f8   :  { %15945 = vst [vmem:[#allocation105_spill] sm:$0xff] %v8729_v27 }
 0x2f9   :  { %15946 = vst [vmem:[#allocation106_spill] sm:$0xff] %v8731_v45  ;;  %v1122_v45 = vpop.permute.xlu2 %1121 }
 0x2ff   :  { %v1102_v39 = vpop.permute.xlu1 %1101  ;;  %v8733_v57 = vpop.permute.xlu0 %1016 }
 0x300   :  { %15947 = vst [vmem:[#allocation107_spill] sm:$0xff] %v8733_v57  ;;  %v1140_v21 = vmul.f32 %v1102_v39, %v8268_v44  ;;  %v1139_v15 = vmul.f32 %v1102_v39, %v8252_v35 }
 0x301   :  { %v1137_v17 = vpop.permute.xlu2 %1136 }
 0x302   :  { %1205 = vrot.lane.b32.xlu1 %v1140_v21, %s8037_s30  ;;  %1203 = vrot.lane.b32.xlu0 %v1139_v15, %s8037_s30  ;;  %v1147_v21 = vmul.f32 %v1122_v45, %v8252_v35 }
 0x307   :  { %v1112_v41 = vpop.permute.xlu0 %1111  ;;  %v1117_v30 = vpop.permute.xlu1 %1116 }
 0x308   :  { %v1144_v54 = vmul.f32 %v1112_v41, %v8268_v44  ;;  %v1143_v27 = vmul.f32 %v1112_v41, %v8252_v35  ;;  %v1145_v57 = vmul.f32 %v1117_v30, %v8252_v35  ;;  %v1146_v15 = vmul.f32 %v1117_v30, %v8268_v44 }
 0x30a   :  { %1209 = vrot.lane.b32.xlu0 %v1142_v9, %s8037_s30  ;;  %1213 = vrot.lane.b32.xlu2 %v1144_v54, %s8037_s30  ;;  %v1148_v9 = vmul.f32 %v1122_v45, %v8268_v44 }
 0x30b   :  { %1211 = vrot.lane.b32.xlu1 %v1143_v27, %s8037_s30 }
 0x30f   :  { %v1127_v33 = vpop.permute.xlu0 %1126  ;;  %v1132_v22 = vpop.permute.xlu1 %1131 }
 0x310   :  { %v1150_v54 = vmul.f32 %v1127_v33, %v8268_v44  ;;  %v1149_v27 = vmul.f32 %v1127_v33, %v8252_v35 }
 0x312   :  { %1215 = vrot.lane.b32.xlu0 %v1145_v57, %s8037_s30  ;;  %1219 = vrot.lane.b32.xlu2 %v1147_v21, %s8037_s30  ;;  %v1151_v57 = vmul.f32 %v1132_v22, %v8252_v35  ;;  %v1153_v21 = vmul.f32 %v1137_v17, %v8252_v35 }
 0x313   :  { %1217 = vrot.lane.b32.xlu1 %v1146_v15, %s8037_s30  ;;  %v1152_v15 = vmul.f32 %v1132_v22, %v8268_v44 }
 0x31a   :  { %1221 = vrot.lane.b32.xlu0 %v1148_v9, %s8037_s30  ;;  %1225 = vrot.lane.b32.xlu2 %v1150_v54, %s8037_s30  ;;  %v1154_v9 = vmul.f32 %v1137_v17, %v8268_v44  ;;  %v1156_v54 = vmul.f32 %v1102_v39, %v8305_v5 }
 0x31b   :  { %1223 = vrot.lane.b32.xlu1 %v1149_v27, %s8037_s30  ;;  %v1155_v27 = vmul.f32 %v1102_v39, %v8303_v4  ;;  %v1160_v39 = vmul.f32 %v1112_v41, %v8305_v5 }
 0x322   :  { %1227 = vrot.lane.b32.xlu0 %v1151_v57, %s8037_s30  ;;  %1231 = vrot.lane.b32.xlu2 %v1153_v21, %s8037_s30  ;;  %v1159_v57 = vmul.f32 %v1112_v41, %v8303_v4  ;;  %v1158_v21 = vmul.f32 %v1107_v52, %v8305_v5  ;;  %v1163_v52 = vmul.f32 %v1122_v45, %v8303_v4 }
 0x323   :  { %1229 = vrot.lane.b32.xlu1 %v1152_v15, %s8037_s30  ;;  %v1162_v15 = vmul.f32 %v1117_v30, %v8305_v5  ;;  %v1168_v41 = vmul.f32 %v1132_v22, %v8305_v5 }
 0x32a   :  { %1233 = vrot.lane.b32.xlu0 %v1154_v9, %s8037_s30  ;;  %1237 = vrot.lane.b32.xlu2 %v1156_v54, %s8037_s30  ;;  %v1161_v9 = vmul.f32 %v1117_v30, %v8303_v4  ;;  %v1164_v54 = vmul.f32 %v1122_v45, %v8305_v5  ;;  %v1166_v30 = vmul.f32 %v1127_v33, %v8305_v5  ;;  %v110_v45 = vld [vmem:[%s15839_s26 + $0x140] sm:$0xff] }
 0x32b   :  { %1235 = vrot.lane.b32.xlu1 %v1155_v27, %s8037_s30  ;;  %v1167_v27 = vmul.f32 %v1132_v22, %v8303_v4  ;;  %v113_v22 = vld [vmem:[%s15839_s26 + $0x158] sm:$0xff] }
 0x332   :  { %1239 = vrot.lane.b32.xlu0 %v1157_v55, %s8037_s30  ;;  %1243 = vrot.lane.b32.xlu2 %v1159_v57, %s8037_s30  ;;  %v1165_v55 = vmul.f32 %v1127_v33, %v8303_v4  ;;  %v1169_v57 = vmul.f32 %v1137_v17, %v8303_v4  ;;  %v111_v33 = vld [vmem:[%s15839_s26 + $0x148] sm:$0xff] }
 0x333   :  { %1241 = vrot.lane.b32.xlu1 %v1158_v21, %s8037_s30  ;;  %v1170_v21 = vmul.f32 %v1137_v17, %v8305_v5  ;;  %v152_v5 = vld [vmem:[%s15839_s26 + $0x290] sm:$0xff] }
 0x33a   :  { %1245 = vrot.lane.b32.xlu0 %v1160_v39, %s8037_s30  ;;  %1249 = vrot.lane.b32.xlu2 %v1162_v15, %s8037_s30  ;;  %v112_v39 = vld [vmem:[%s15839_s26 + $0x150] sm:$0xff]  ;;  %v114_v15 = vld [vmem:[%s15839_s26 + $0x160] sm:$0xff] }
 0x33b   :  { %1247 = vrot.lane.b32.xlu1 %v1161_v9, %s8037_s30  ;;  %v116_v9 = vld [vmem:[%s15839_s26 + $0x170] sm:$0xff] }
 0x342   :  { %1251 = vrot.lane.b32.xlu0 %v1163_v52, %s8037_s30  ;;  %1255 = vrot.lane.b32.xlu2 %v1165_v55, %s8037_s30  ;;  %v115_v52 = vld [vmem:[%s15839_s26 + $0x168] sm:$0xff] }
 0x343   :  { %1253 = vrot.lane.b32.xlu1 %v1164_v54, %s8037_s30  ;;  %v117_v54 = vld [vmem:[%s15839_s26 + $0x178] sm:$0xff] }
 0x34a   :  { %1257 = vrot.lane.b32.xlu0 %v1166_v30, %s8037_s30  ;;  %1261 = vrot.lane.b32.xlu2 %v1168_v41, %s8037_s30 }
 0x34b   :  { %1259 = vrot.lane.b32.xlu1 %v1167_v27, %s8037_s30 }
 0x34d   :  { %v8809_v17 = vpop.permute.xlu2 %1207 }
 0x34e   :  { %15948 = vst [vmem:[#allocation108_spill] sm:$0xff] %v8809_v17 }
 0x352   :  { %1263 = vrot.lane.b32.xlu0 %v1169_v57, %s8037_s30  ;;  %1350 = vperm.xlu2 %7805, %v110_v45  }
 0x353   :  { %1265 = vrot.lane.b32.xlu1 %v1170_v21, %s8037_s30  ;;  %s16341_s30 = sld [smem:[#allocation252_spill]] }
 0x35a   :  { %1355 = vperm.xlu0 %7803, %v111_v33   ;;  %1365 = vperm.xlu2 %7805, %v113_v22  }
 0x35b   :  { %1360 = vperm.xlu1 %7804, %v112_v39  }
 0x362   :  { %1370 = vperm.xlu0 %7803, %v114_v15   ;;  %1380 = vperm.xlu2 %7805, %v116_v9  }
 0x363   :  { %1375 = vperm.xlu1 %7804, %v115_v52  }
 0x364   :  { %v8820_v55 = vpop.permute.xlu2 %1213 }
 0x365   :  { %15949 = vst [vmem:[#allocation109_spill] sm:$0xff] %v8820_v55 }
 0x36a   :  { %1385 = vperm.xlu0 %7803, %v117_v54  }
 0x36c   :  { %v8825_v30 = vpop.permute.xlu2 %1219 }
 0x36d   :  { %15950 = vst [vmem:[#allocation110_spill] sm:$0xff] %v8825_v30  ;;  %v126_v30 = vld [vmem:[%s15839_s26 + $0x1c0] sm:$0xff] }
 0x374   :  { %v8827_v41 = vpop.permute.xlu1 %1205  ;;  %v8829_v27 = vpop.permute.xlu2 %1225 }
 0x375   :  { %15951 = vst [vmem:[#allocation111_spill] sm:$0xff] %v8827_v41  ;;  %v8831_v45 = vpop.permute.xlu0 %1203 }
 0x376   :  { %15952 = vst [vmem:[#allocation112_spill] sm:$0xff] %v8829_v27  ;;  %v158_v27 = vld [vmem:[%s15839_s26 + $0x2c0] sm:$0xff] }
 0x377   :  { %15953 = vst [vmem:[#allocation113_spill] sm:$0xff] %v8831_v45 }
 0x37c   :  { %v8833_v57 = vpop.permute.xlu2 %1231 }
 0x37d   :  { %v8835_v21 = vpop.permute.xlu1 %1211  ;;  %v8837_v33 = vpop.permute.xlu0 %1209 }
 0x37e   :  { %15954 = vst [vmem:[#allocation114_spill] sm:$0xff] %v8835_v21 }
 0x37f   :  { %15955 = vst [vmem:[#allocation115_spill] sm:$0xff] %v8837_v33 }
 0x384   :  { %v8839_v22 = vpop.permute.xlu2 %1237 }
 0x385   :  { %15956 = vst [vmem:[#allocation116_spill] sm:$0xff] %v8839_v22  ;;  %v8841_v39 = vpop.permute.xlu1 %1217  ;;  %v8843_v15 = vpop.permute.xlu0 %1215 }
 0x386   :  { %15957 = vst [vmem:[#allocation117_spill] sm:$0xff] %v8841_v39 }
 0x387   :  { %15958 = vst [vmem:[#allocation118_spill] sm:$0xff] %v8843_v15  ;;  %v145_v15 = vld [vmem:[%s15839_s26 + $0x258] sm:$0xff] }
 0x38c   :  { %v8845_v9 = vpop.permute.xlu2 %1243 }
 0x38d   :  { %15959 = vst [vmem:[#allocation119_spill] sm:$0xff] %v8845_v9  ;;  %v8847_v52 = vpop.permute.xlu1 %1223  ;;  %v8849_v54 = vpop.permute.xlu0 %1221 }
 0x38e   :  { %15960 = vst [vmem:[#allocation120_spill] sm:$0xff] %v8847_v52  ;;  %v167_v52 = vld [vmem:[%s15839_s26 + $0x308] sm:$0xff] }
 0x38f   :  { %15961 = vst [vmem:[#allocation121_spill] sm:$0xff] %v8849_v54  ;;  %v177_v54 = vld [vmem:[%s15839_s26 + $0x358] sm:$0xff] }
 0x394   :  { %v8851_v41 = vpop.permute.xlu2 %1249 }
 0x395   :  { %15962 = vst [vmem:[#allocation122_spill] sm:$0xff] %v8851_v41  ;;  %v8853_v45 = vpop.permute.xlu1 %1229  ;;  %v8855_v17 = vpop.permute.xlu0 %1227 }
 0x396   :  { %15963 = vst [vmem:[#allocation123_spill] sm:$0xff] %v8853_v45 }
 0x397   :  { %15964 = vst [vmem:[#allocation124_spill] sm:$0xff] %v8855_v17 }
 0x39c   :  { %v8857_v21 = vpop.permute.xlu2 %1255 }
 0x39d   :  { %15965 = vst [vmem:[#allocation125_spill] sm:$0xff] %v8857_v21  ;;  %v8859_v33 = vpop.permute.xlu1 %1235  ;;  %v8861_v22 = vpop.permute.xlu0 %1233 }
 0x39e   :  { %15966 = vst [vmem:[#allocation126_spill] sm:$0xff] %v8859_v33 }
 0x3a4   :  { %v8863_v55 = vpop.permute.xlu2 %1261 }
 0x3a5   :  { %15967 = vst [vmem:[#allocation127_spill] sm:$0xff] %v8863_v55  ;;  %v8865_v19 = vpop.permute.xlu1 %1241  ;;  %v8867_v9 = vpop.permute.xlu0 %1239 }
 0x3a6   :  { %15968 = vst [vmem:[#allocation128_spill] sm:$0xff] %v8865_v19 }
 0x3a7   :  { %15969 = vst [vmem:[#allocation129_spill] sm:$0xff] %v8867_v9 }
 0x3ac   :  { %v8869_v50 = vpop.permute.xlu2 %1350 }
 0x3ad   :  { %15970 = vst [vmem:[#allocation130_spill] sm:$0xff] %v8869_v50  ;;  %v8871_v49 = vpop.permute.xlu1 %1247  ;;  %v8873_v41 = vpop.permute.xlu0 %1245  ;;  %v1389_v40 = vmul.f32 %v8869_v50, %v8268_v44  ;;  %v1388_v33 = vmul.f32 %v8869_v50, %v8252_v35 }
 0x3ae   :  { %15971 = vst [vmem:[#allocation131_spill] sm:$0xff] %v8871_v49 }
 0x3af   :  { %15972 = vst [vmem:[#allocation132_spill] sm:$0xff] %v8873_v41  ;;  %1454 = vrot.lane.b32.xlu2 %v1389_v40, %s8038_s23  ;;  %1452 = vrot.lane.b32.xlu1 %v1388_v33, %s8038_s23 }
 0x3b5   :  { %v8881_v19 = vpop.permute.xlu1 %1253  ;;  %v8883_v9 = vpop.permute.xlu0 %1251 }
 0x3b6   :  { %15973 = vst [vmem:[#allocation133_spill] sm:$0xff] %v8881_v19 }
 0x3b7   :  { %15974 = vst [vmem:[#allocation134_spill] sm:$0xff] %v8883_v9 }
 0x3bd   :  { %v8885_v55 = vpop.permute.xlu1 %1259  ;;  %v8887_v49 = vpop.permute.xlu0 %1257 }
 0x3be   :  { %15975 = vst [vmem:[#allocation135_spill] sm:$0xff] %v8885_v55  ;;  %v8906_v55 = vpop.permute.xlu2 %1365 }
 0x3bf   :  { %15976 = vst [vmem:[#allocation136_spill] sm:$0xff] %v8887_v49  ;;  %v1395_v49 = vmul.f32 %v8906_v55, %v8268_v44  ;;  %v1394_v19 = vmul.f32 %v8906_v55, %v8252_v35 }
 0x3c0   :  { %15981 = vst [vmem:[#allocation141_spill] sm:$0xff] %v8906_v55 }
 0x3c5   :  { %v8889_v41 = vpop.permute.xlu1 %1265  ;;  %v8891_v21 = vpop.permute.xlu0 %1263 }
 0x3c6   :  { %15977 = vst [vmem:[#allocation137_spill] sm:$0xff] %v8889_v41 }
 0x3c7   :  { %15978 = vst [vmem:[#allocation138_spill] sm:$0xff] %v8891_v21 }
 0x3cd   :  { %v8893_v29 = vpop.permute.xlu1 %1360  ;;  %v8895_v50 = vpop.permute.xlu0 %1355 }
 0x3ce   :  { %15979 = vst [vmem:[#allocation139_spill] sm:$0xff] %v8893_v29  ;;  %v1392_v40 = vmul.f32 %v8893_v29, %v8252_v35  ;;  %v1391_v33 = vmul.f32 %v8895_v50, %v8268_v44  ;;  %v1390_v9 = vmul.f32 %v8895_v50, %v8252_v35  ;;  %v1393_v21 = vmul.f32 %v8893_v29, %v8268_v44 }
 0x3cf   :  { %15980 = vst [vmem:[#allocation140_spill] sm:$0xff] %v8895_v50 }
 0x3d0   :  { %1460 = vrot.lane.b32.xlu2 %v1392_v40, %s8038_s23  ;;  %1458 = vrot.lane.b32.xlu1 %v1391_v33, %s8038_s23 }
 0x3d1   :  { %1456 = vrot.lane.b32.xlu0 %v1390_v9, %s8038_s23 }
 0x3d5   :  { %v8917_v40 = vpop.permute.xlu1 %1375  ;;  %v8919_v9 = vpop.permute.xlu0 %1370 }
 0x3d6   :  { %15982 = vst [vmem:[#allocation142_spill] sm:$0xff] %v8917_v40  ;;  %v1398_v33 = vmul.f32 %v8917_v40, %v8252_v35  ;;  %v1397_v41 = vmul.f32 %v8919_v9, %v8268_v44  ;;  %v1396_v50 = vmul.f32 %v8919_v9, %v8252_v35  ;;  %v1399_v29 = vmul.f32 %v8917_v40, %v8268_v44  ;;  %v154_v40 = vld [vmem:[%s15839_s26 + $0x2a0] sm:$0xff] }
 0x3d7   :  { %15983 = vst [vmem:[#allocation143_spill] sm:$0xff] %v8919_v9  ;;  %v171_v9 = vld [vmem:[%s15839_s26 + $0x328] sm:$0xff] }
 0x3d8   :  { %1466 = vrot.lane.b32.xlu2 %v1395_v49, %s8038_s23  ;;  %1464 = vrot.lane.b32.xlu1 %v1394_v19, %s8038_s23  ;;  %v8930_v49 = vpop.permute.xlu2 %1380 }
 0x3d9   :  { %1462 = vrot.lane.b32.xlu0 %v1393_v21, %s8038_s23  ;;  %15984 = vst [vmem:[#allocation144_spill] sm:$0xff] %v8930_v49  ;;  %v1401_v19 = vmul.f32 %v8930_v49, %v8268_v44  ;;  %v1400_v21 = vmul.f32 %v8930_v49, %v8252_v35 }
 0x3e0   :  { %1472 = vrot.lane.b32.xlu2 %v1398_v33, %s8038_s23  ;;  %1470 = vrot.lane.b32.xlu1 %v1397_v41, %s8038_s23  ;;  %v133_v41 = vld [vmem:[%s15839_s26 + $0x1f8] sm:$0xff] }
 0x3e1   :  { %1468 = vrot.lane.b32.xlu0 %v1396_v50, %s8038_s23  ;;  %v124_v50 = vld [vmem:[%s15839_s26 + $0x1b0] sm:$0xff]  ;;  %v125_v33 = vld [vmem:[%s15839_s26 + $0x1b8] sm:$0xff] }
 0x3e8   :  { %1478 = vrot.lane.b32.xlu2 %v1401_v19, %s8038_s23  ;;  %1476 = vrot.lane.b32.xlu1 %v1400_v21, %s8038_s23  ;;  %v149_v19 = vld [vmem:[%s15839_s26 + $0x278] sm:$0xff] }
 0x3e9   :  { %1474 = vrot.lane.b32.xlu0 %v1399_v29, %s8038_s23  ;;  %v132_v29 = vld [vmem:[%s15839_s26 + $0x1f0] sm:$0xff]  ;;  %v141_v21 = vld [vmem:[%s15839_s26 + $0x238] sm:$0xff] }
 0x3f0   :  { %1629 = vperm.xlu2 %7805, %v124_v50   ;;  %1883 = vperm.xlu1 %7804, %v133_v41   ;;  %v157_v50 = vld [vmem:[%s15839_s26 + $0x2b8] sm:$0xff]  ;;  %v140_v41 = vld [vmem:[%s15839_s26 + $0x230] sm:$0xff] }
 0x3f1   :  { %1634 = vperm.xlu0 %7803, %v125_v33   ;;  %v123_v33 = vld [vmem:[%s15839_s26 + $0x1a8] sm:$0xff] }
 0x3f8   :  { %2381 = vperm.xlu2 %7805, %v149_v19   ;;  %1878 = vperm.xlu1 %7804, %v132_v29   ;;  %v165_v19 = vld [vmem:[%s15839_s26 + $0x2f8] sm:$0xff]  ;;  %v148_v29 = vld [vmem:[%s15839_s26 + $0x270] sm:$0xff] }
 0x3f9   :  { %2132 = vperm.xlu0 %7803, %v141_v21   ;;  %v131_v21 = vld [vmem:[%s15839_s26 + $0x1e8] sm:$0xff] }
 0x400   :  { %2630 = vperm.xlu2 %7805, %v157_v50   ;;  %2127 = vperm.xlu1 %7804, %v140_v41   ;;  %v156_v50 = vld [vmem:[%s15839_s26 + $0x2b0] sm:$0xff]  ;;  %v139_v41 = vld [vmem:[%s15839_s26 + $0x228] sm:$0xff] }
 0x401   :  { %1624 = vperm.xlu0 %7803, %v123_v33   ;;  %v122_v33 = vld [vmem:[%s15839_s26 + $0x1a0] sm:$0xff] }
 0x408   :  { %2879 = vperm.xlu2 %7805, %v165_v19   ;;  %2376 = vperm.xlu1 %7804, %v148_v29   ;;  %v147_v19 = vld [vmem:[%s15839_s26 + $0x268] sm:$0xff]  ;;  %v130_v29 = vld [vmem:[%s15839_s26 + $0x1e0] sm:$0xff] }
 0x409   :  { %1873 = vperm.xlu0 %7803, %v131_v21   ;;  %v173_v21 = vld [vmem:[%s15839_s26 + $0x338] sm:$0xff]  ;;  %v9004_v55 = vpop.permute.xlu2 %1454 }
 0x40a   :  { %15985 = vst [vmem:[#allocation145_spill] sm:$0xff] %v9004_v55  ;;  %v189_v55 = vld [vmem:[%s15839_s26 + $0x3b8] sm:$0xff] }
 0x410   :  { %2625 = vperm.xlu2 %7805, %v156_v50   ;;  %2122 = vperm.xlu1 %7804, %v139_v41   ;;  %v121_v50 = vld [vmem:[%s15839_s26 + $0x198] sm:$0xff] }
 0x411   :  { %1619 = vperm.xlu0 %7803, %v122_v33   ;;  %v181_v41 = vld [vmem:[%s15839_s26 + $0x378] sm:$0xff]  ;;  %v164_v33 = vld [vmem:[%s15839_s26 + $0x2f0] sm:$0xff] }
 0x418   :  { %2371 = vperm.xlu2 %7805, %v147_v19   ;;  %1868 = vperm.xlu1 %7804, %v130_v29   ;;  %v172_v19 = vld [vmem:[%s15839_s26 + $0x330] sm:$0xff]  ;;  %v155_v29 = vld [vmem:[%s15839_s26 + $0x2a8] sm:$0xff] }
 0x419   :  { %3128 = vperm.xlu0 %7803, %v173_v21   ;;  %v138_v21 = vld [vmem:[%s15839_s26 + $0x220] sm:$0xff] }
 0x420   :  { %1614 = vperm.xlu2 %7805, %v121_v50   ;;  %3377 = vperm.xlu1 %7804, %v181_v41   ;;  %v146_v41 = vld [vmem:[%s15839_s26 + $0x260] sm:$0xff] }
 0x421   :  { %2874 = vperm.xlu0 %7803, %v164_v33   ;;  %v129_v33 = vld [vmem:[%s15839_s26 + $0x1d8] sm:$0xff] }
 0x428   :  { %3123 = vperm.xlu2 %7805, %v172_v19   ;;  %2620 = vperm.xlu1 %7804, %v155_v29   ;;  %v120_v29 = vld [vmem:[%s15839_s26 + $0x190] sm:$0xff] }
 0x429   :  { %2117 = vperm.xlu0 %7803, %v138_v21   ;;  %v180_v21 = vld [vmem:[%s15839_s26 + $0x370] sm:$0xff] }
 0x42a   :  { %v9015_v50 = vpop.permute.xlu2 %1460 }
 0x42b   :  { %15986 = vst [vmem:[#allocation146_spill] sm:$0xff] %v9015_v50  ;;  %v163_v50 = vld [vmem:[%s15839_s26 + $0x2e8] sm:$0xff] }
 0x430   :  { %2366 = vperm.xlu2 %7805, %v146_v41   ;;  %1863 = vperm.xlu1 %7804, %v129_v33   ;;  %v9037_v41 = vpop.permute.xlu1 %1452  ;;  %v9041_v33 = vpop.permute.xlu0 %1385 }
 0x431   :  { %3626 = vperm.xlu0 %7803, %v189_v55   ;;  %15988 = vst [vmem:[#allocation148_spill] sm:$0xff] %v9037_v41  ;;  %v1402_v48 = vmul.f32 %v9041_v33, %v8252_v35 }
 0x432   :  { %v9026_v19 = vpop.permute.xlu2 %1466  ;;  %15990 = vst [vmem:[#allocation150_spill] sm:$0xff] %v9041_v33 }
 0x433   :  { %15987 = vst [vmem:[#allocation147_spill] sm:$0xff] %v9026_v19  ;;  %v179_v19 = vld [vmem:[%s15839_s26 + $0x368] sm:$0xff] }
 0x438   :  { %1609 = vperm.xlu2 %7805, %v120_v29   ;;  %3372 = vperm.xlu1 %7804, %v180_v21   ;;  %v137_v29 = vld [vmem:[%s15839_s26 + $0x218] sm:$0xff] }
 0x439   :  { %2869 = vperm.xlu0 %7803, %v163_v50  }
 0x43a   :  { %v9039_v55 = vpop.permute.xlu2 %1472 }
 0x43b   :  { %15989 = vst [vmem:[#allocation149_spill] sm:$0xff] %v9039_v55  ;;  %v184_v55 = vld [vmem:[%s15839_s26 + $0x390] sm:$0xff] }
 0x440   :  { %3118 = vperm.xlu2 %7805, %v171_v9   ;;  %2615 = vperm.xlu1 %7804, %v154_v40   ;;  %v188_v9 = vld [vmem:[%s15839_s26 + $0x3b0] sm:$0xff] }
 0x441   :  { %2112 = vperm.xlu0 %7803, %v137_v29  }
 0x442   :  { %v9052_v50 = vpop.permute.xlu2 %1478  ;;  %v9054_v21 = vpop.permute.xlu1 %1458 }
 0x443   :  { %15991 = vst [vmem:[#allocation151_spill] sm:$0xff] %v9052_v50  ;;  %v9056_v41 = vpop.permute.xlu0 %1456 }
 0x444   :  { %15992 = vst [vmem:[#allocation152_spill] sm:$0xff] %v9054_v21  ;;  %v119_v21 = vld [vmem:[%s15839_s26 + $0x188] sm:$0xff] }
 0x445   :  { %15993 = vst [vmem:[#allocation153_spill] sm:$0xff] %v9056_v41 }
 0x448   :  { %2361 = vperm.xlu2 %7805, %v145_v15   ;;  %1858 = vperm.xlu1 %7804, %v128_v62   ;;  %v162_v15 = vld [vmem:[%s15839_s26 + $0x2e0] sm:$0xff] }
 0x449   :  { %3621 = vperm.xlu0 %7803, %v188_v9  }
 0x44a   :  { %v9067_v40 = vpop.permute.xlu2 %1629  ;;  %v9069_v29 = vpop.permute.xlu1 %1464 }
 0x44b   :  { %15994 = vst [vmem:[#allocation154_spill] sm:$0xff] %v9067_v40  ;;  %v9071_v41 = vpop.permute.xlu0 %1462  ;;  %v1650_v17 = vmul.f32 %v9067_v40, %v8268_v44 }
 0x44c   :  { %15995 = vst [vmem:[#allocation155_spill] sm:$0xff] %v9069_v29  ;;  %v170_v29 = vld [vmem:[%s15839_s26 + $0x320] sm:$0xff] }
 0x44d   :  { %15996 = vst [vmem:[#allocation156_spill] sm:$0xff] %v9071_v41 }
 0x450   :  { %1604 = vperm.xlu2 %7805, %v119_v21   ;;  %3367 = vperm.xlu1 %7804, %v179_v19   ;;  %v136_v21 = vld [vmem:[%s15839_s26 + $0x210] sm:$0xff] }
 0x451   :  { %2864 = vperm.xlu0 %7803, %v162_v15  }
 0x452   :  { %v9082_v62 = vpop.permute.xlu2 %2381  ;;  %v9084_v9 = vpop.permute.xlu1 %1470 }
 0x453   :  { %15997 = vst [vmem:[#allocation157_spill] sm:$0xff] %v9082_v62  ;;  %v9086_v41 = vpop.permute.xlu0 %1468  ;;  %v2399_v34 = vmul.f32 %v9082_v62, %v8268_v44 }
 0x454   :  { %15998 = vst [vmem:[#allocation158_spill] sm:$0xff] %v9084_v9 }
 0x455   :  { %15999 = vst [vmem:[#allocation159_spill] sm:$0xff] %v9086_v41  ;;  %v143_v41 = vld [vmem:[%s15839_s26 + $0x248] sm:$0xff] }
 0x458   :  { %3113 = vperm.xlu2 %7805, %v170_v29   ;;  %2610 = vperm.xlu1 %7804, %v153_v14   ;;  %v187_v29 = vld [vmem:[%s15839_s26 + $0x3a8] sm:$0xff] }
 0x459   :  { %2107 = vperm.xlu0 %7803, %v136_v21  }
 0x45a   :  { %v9097_v19 = vpop.permute.xlu2 %2630  ;;  %v9099_v15 = vpop.permute.xlu1 %1476 }
 0x45b   :  { %16000 = vst [vmem:[#allocation160_spill] sm:$0xff] %v9097_v19  ;;  %v9101_v39 = vpop.permute.xlu0 %1474 }
 0x45c   :  { %16001 = vst [vmem:[#allocation161_spill] sm:$0xff] %v9099_v15 }
 0x45d   :  { %16002 = vst [vmem:[#allocation162_spill] sm:$0xff] %v9101_v39 }
 0x460   :  { %2356 = vperm.xlu2 %7805, %v144_v60   ;;  %1853 = vperm.xlu1 %7804, %v127_v6   ;;  %v161_v60 = vld [vmem:[%s15839_s26 + $0x2d8] sm:$0xff] }
 0x461   :  { %3616 = vperm.xlu0 %7803, %v187_v29  }
 0x462   :  { %v9112_v14 = vpop.permute.xlu2 %2879  ;;  %v9114_v21 = vpop.permute.xlu1 %1883 }
 0x463   :  { %16003 = vst [vmem:[#allocation163_spill] sm:$0xff] %v9112_v14  ;;  %v9116_v47 = vpop.permute.xlu0 %1634  ;;  %v1901_v15 = vmul.f32 %v9114_v21, %v8268_v44 }
 0x464   :  { %16004 = vst [vmem:[#allocation164_spill] sm:$0xff] %v9114_v21  ;;  %v1652_v42 = vmul.f32 %v9116_v47, %v8268_v44 }
 0x465   :  { %16005 = vst [vmem:[#allocation165_spill] sm:$0xff] %v9116_v47 }
 0x468   :  { %1599 = vperm.xlu2 %7805, %v118_v58   ;;  %3362 = vperm.xlu1 %7804, %v178_v28   ;;  %v135_v58 = vld [vmem:[%s15839_s26 + $0x208] sm:$0xff] }
 0x469   :  { %2859 = vperm.xlu0 %7803, %v161_v60  }
 0x46a   :  { %v9127_v6 = vpop.permute.xlu2 %2625  ;;  %v9129_v29 = vpop.permute.xlu1 %1878 }
 0x46b   :  { %16006 = vst [vmem:[#allocation166_spill] sm:$0xff] %v9127_v6  ;;  %v9131_v49 = vpop.permute.xlu0 %2132  ;;  %v1898_v20 = vmul.f32 %v9129_v29, %v8252_v35  ;;  %v1899_v45 = vmul.f32 %v9129_v29, %v8268_v44 }
 0x46c   :  { %16007 = vst [vmem:[#allocation167_spill] sm:$0xff] %v9129_v29  ;;  %v2149_v50 = vmul.f32 %v9131_v49, %v8252_v35 }
 0x46d   :  { %16008 = vst [vmem:[#allocation168_spill] sm:$0xff] %v9131_v49 }
 0x470   :  { %3108 = vperm.xlu2 %7805, %v169_v32   ;;  %2605 = vperm.xlu1 %7804, %v152_v5   ;;  %v186_v32 = vld [vmem:[%s15839_s26 + $0x3a0] sm:$0xff] }
 0x471   :  { %2102 = vperm.xlu0 %7803, %v135_v58  }
 0x472   :  { %v9142_v28 = vpop.permute.xlu2 %2371  ;;  %v9144_v60 = vpop.permute.xlu1 %2127 }
 0x473   :  { %16009 = vst [vmem:[#allocation169_spill] sm:$0xff] %v9142_v28  ;;  %v9146_v4 = vpop.permute.xlu0 %1624  ;;  %v2147_v16 = vmul.f32 %v9144_v60, %v8252_v35  ;;  %v2148_v2 = vmul.f32 %v9144_v60, %v8268_v44 }
 0x474   :  { %16010 = vst [vmem:[#allocation170_spill] sm:$0xff] %v9144_v60  ;;  %v1647_v29 = vmul.f32 %v9146_v4, %v8252_v35 }
 0x475   :  { %16011 = vst [vmem:[#allocation171_spill] sm:$0xff] %v9146_v4 }
 0x478   :  { %2351 = vperm.xlu2 %7805, %v143_v41   ;;  %1848 = vperm.xlu1 %7804, %v126_v30   ;;  %v160_v41 = vld [vmem:[%s15839_s26 + $0x2d0] sm:$0xff] }
 0x479   :  { %3611 = vperm.xlu0 %7803, %v186_v32  }
 0x47a   :  { %v9157_v5 = vpop.permute.xlu2 %1614  ;;  %v9159_v58 = vpop.permute.xlu1 %2376 }
 0x47b   :  { %16012 = vst [vmem:[#allocation172_spill] sm:$0xff] %v9157_v5  ;;  %v9161_v9 = vpop.permute.xlu0 %1873 }
 0x47c   :  { %16013 = vst [vmem:[#allocation173_spill] sm:$0xff] %v9159_v58  ;;  %v1896_v60 = vmul.f32 %v9161_v9, %v8252_v35 }
 0x47d   :  { %16014 = vst [vmem:[#allocation174_spill] sm:$0xff] %v9161_v9 }
 0x480   :  { %2097 = vperm.xlu2 %7805, %v134_v12   ;;  %3357 = vperm.xlu1 %7804, %v177_v54   ;;  %v151_v12 = vld [vmem:[%s15839_s26 + $0x288] sm:$0xff] }
 0x481   :  { %2854 = vperm.xlu0 %7803, %v160_v41  }
 0x482   :  { %v9172_v30 = vpop.permute.xlu2 %3123  ;;  %v9174_v32 = vpop.permute.xlu1 %2122 }
 0x483   :  { %16015 = vst [vmem:[#allocation175_spill] sm:$0xff] %v9172_v30  ;;  %v9176_v24 = vpop.permute.xlu0 %1619 }
 0x484   :  { %16016 = vst [vmem:[#allocation176_spill] sm:$0xff] %v9174_v32 }
 0x485   :  { %16017 = vst [vmem:[#allocation177_spill] sm:$0xff] %v9176_v24 }
 0x488   :  { %3606 = vperm.xlu2 %7805, %v185_v11   ;;  %3103 = vperm.xlu1 %7804, %v168_v51   ;;  %v142_v11 = vld [vmem:[%s15839_s26 + $0x240] sm:$0xff] }
 0x489   :  { %2600 = vperm.xlu0 %7803, %v151_v12  }
 0x48a   :  { %v9187_v54 = vpop.permute.xlu2 %2366  ;;  %v9189_v41 = vpop.permute.xlu1 %1868 }
 0x48b   :  { %16018 = vst [vmem:[#allocation178_spill] sm:$0xff] %v9187_v54  ;;  %v9191_v3 = vpop.permute.xlu0 %3128 }
 0x48c   :  { %16019 = vst [vmem:[#allocation179_spill] sm:$0xff] %v9189_v41 }
 0x48d   :  { %16020 = vst [vmem:[#allocation180_spill] sm:$0xff] %v9191_v3 }
 0x490   :  { %3352 = vperm.xlu2 %7805, %v176_v63   ;;  %2849 = vperm.xlu1 %7804, %v159_v43   ;;  %v150_v63 = vld [vmem:[%s15839_s26 + $0x280] sm:$0xff]  ;;  %s8041_s26 = smov 120  }
 0x491   :  { %2346 = vperm.xlu0 %7803, %v142_v11  }
 0x492   :  { %v9202_v51 = vpop.permute.xlu2 %1609  ;;  %v9204_v12 = vpop.permute.xlu1 %3377 }
 0x493   :  { %16021 = vst [vmem:[#allocation181_spill] sm:$0xff] %v9202_v51  ;;  %v9206_v25 = vpop.permute.xlu0 %2874 }
 0x494   :  { %16022 = vst [vmem:[#allocation182_spill] sm:$0xff] %v9204_v12 }
 0x495   :  { %16023 = vst [vmem:[#allocation183_spill] sm:$0xff] %v9206_v25 }
 0x498   :  { %3601 = vperm.xlu2 %7805, %v184_v55   ;;  %3098 = vperm.xlu1 %7804, %v167_v52  }
 0x499   :  { %2595 = vperm.xlu0 %7803, %v150_v63  }
 0x49a   :  { %v9217_v43 = vpop.permute.xlu2 %3118  ;;  %v9219_v11 = vpop.permute.xlu1 %2620 }
 0x49b   :  { %16024 = vst [vmem:[#allocation184_spill] sm:$0xff] %v9217_v43  ;;  %v9221_v39 = vpop.permute.xlu0 %2117 }
 0x49c   :  { %16025 = vst [vmem:[#allocation185_spill] sm:$0xff] %v9219_v11 }
 0x49d   :  { %16026 = vst [vmem:[#allocation186_spill] sm:$0xff] %v9221_v39 }
 0x4a0   :  { %3347 = vperm.xlu1 %7804, %v175_v13   ;;  %1480 = vrot.lane.b32.xlu2 %v1402_v48, %s8038_s23  ;;  %v1403_v13 = vmul.f32 %v9041_v33, %v8268_v44  ;;  %v1651_v33 = vmul.f32 %v9116_v47, %v8252_v35 }
 0x4a1   :  { %2844 = vperm.xlu0 %7803, %v158_v27  }
 0x4a2   :  { %v9232_v52 = vpop.permute.xlu2 %2361  ;;  %v9234_v55 = vpop.permute.xlu1 %1863 }
 0x4a3   :  { %16027 = vst [vmem:[#allocation187_spill] sm:$0xff] %v9232_v52  ;;  %v9236_v63 = vpop.permute.xlu0 %3626 }
 0x4a4   :  { %16028 = vst [vmem:[#allocation188_spill] sm:$0xff] %v9234_v55 }
 0x4a5   :  { %16029 = vst [vmem:[#allocation189_spill] sm:$0xff] %v9236_v63 }
 0x4a8   :  { %3093 = vperm.xlu1 %7804, %v166_v1   ;;  %3596 = vperm.xlu2 %7805, %v183_v61  }
 0x4a9   :  { %1482 = vrot.lane.b32.xlu0 %v1403_v13, %s8038_s23 }
 0x4aa   :  { %v9247_v48 = vpop.permute.xlu2 %1604  ;;  %v9249_v27 = vpop.permute.xlu1 %3372 }
 0x4ab   :  { %16030 = vst [vmem:[#allocation190_spill] sm:$0xff] %v9247_v48  ;;  %v9251_v10 = vpop.permute.xlu0 %2869 }
 0x4ac   :  { %16031 = vst [vmem:[#allocation191_spill] sm:$0xff] %v9249_v27 }
 0x4ad   :  { %16032 = vst [vmem:[#allocation192_spill] sm:$0xff] %v9251_v10 }
 0x4b0   :  { %3342 = vperm.xlu2 %7805, %v174_v53   ;;  %1731 = vrot.lane.b32.xlu1 %v1652_v42, %s8039_s22  ;;  %v1900_v53 = vmul.f32 %v9114_v21, %v8252_v35 }
 0x4b1   :  { %1729 = vrot.lane.b32.xlu0 %v1651_v33, %s8039_s22 }
 0x4b2   :  { %v9262_v61 = vpop.permute.xlu2 %3113  ;;  %v9264_v1 = vpop.permute.xlu1 %2615 }
 0x4b3   :  { %16033 = vst [vmem:[#allocation193_spill] sm:$0xff] %v9262_v61  ;;  %v9266_v13 = vpop.permute.xlu0 %2112 }
 0x4b4   :  { %16034 = vst [vmem:[#allocation194_spill] sm:$0xff] %v9264_v1 }
 0x4b5   :  { %16035 = vst [vmem:[#allocation195_spill] sm:$0xff] %v9266_v13 }
 0x4b8   :  { %3591 = vperm.xlu2 %7805, %v182_v26   ;;  %1980 = vrot.lane.b32.xlu1 %v1901_v15, %s8040_s25  ;;  %v1649_v26 = vmul.f32 %v9067_v40, %v8252_v35 }
 0x4b9   :  { %1978 = vrot.lane.b32.xlu0 %v1900_v53, %s8040_s25 }
 0x4ba   :  { %v9277_v42 = vpop.permute.xlu2 %2356  ;;  %v9279_v33 = vpop.permute.xlu1 %1858 }
 0x4bb   :  { %16036 = vst [vmem:[#allocation196_spill] sm:$0xff] %v9277_v42  ;;  %v9281_v47 = vpop.permute.xlu0 %3621 }
 0x4bc   :  { %16037 = vst [vmem:[#allocation197_spill] sm:$0xff] %v9279_v33 }
 0x4bd   :  { %16038 = vst [vmem:[#allocation198_spill] sm:$0xff] %v9281_v47 }
 0x4c0   :  { %1727 = vrot.lane.b32.xlu1 %v1650_v17, %s8039_s22  ;;  %2227 = vrot.lane.b32.xlu2 %v2149_v50, %s8041_s26  ;;  %v2150_v17 = vmul.f32 %v9131_v49, %v8268_v44  ;;  %v2398_v49 = vmul.f32 %v9082_v62, %v8252_v35  ;;  %v1648_v62 = vmul.f32 %v9146_v4, %v8268_v44 }
 0x4c1   :  { %1725 = vrot.lane.b32.xlu0 %v1649_v26, %s8039_s22  ;;  %v2647_v4 = vmul.f32 %v9097_v19, %v8252_v35 }
 0x4c2   :  { %v9292_v15 = vpop.permute.xlu2 %1599  ;;  %v9294_v53 = vpop.permute.xlu1 %3367 }
 0x4c3   :  { %16039 = vst [vmem:[#allocation199_spill] sm:$0xff] %v9292_v15  ;;  %v9296_v21 = vpop.permute.xlu0 %2864 }
 0x4c4   :  { %16040 = vst [vmem:[#allocation200_spill] sm:$0xff] %v9294_v53 }
 0x4c5   :  { %16041 = vst [vmem:[#allocation201_spill] sm:$0xff] %v9296_v21 }
 0x4c8   :  { %1974 = vrot.lane.b32.xlu1 %v1898_v20, %s8040_s25  ;;  %1976 = vrot.lane.b32.xlu2 %v1899_v45, %s8040_s25 }
 0x4c9   :  { %2229 = vrot.lane.b32.xlu0 %v2150_v17, %s8041_s26 }
 0x4ca   :  { %v9307_v50 = vpop.permute.xlu2 %3108  ;;  %v9309_v26 = vpop.permute.xlu1 %2610 }
 0x4cb   :  { %16042 = vst [vmem:[#allocation202_spill] sm:$0xff] %v9307_v50  ;;  %v9311_v40 = vpop.permute.xlu0 %2107  ;;  %v2397_v50 = vmul.f32 %v9159_v58, %v8268_v44 }
 0x4cc   :  { %16043 = vst [vmem:[#allocation203_spill] sm:$0xff] %v9309_v26 }
 0x4cd   :  { %16044 = vst [vmem:[#allocation204_spill] sm:$0xff] %v9311_v40 }
 0x4d0   :  { %2478 = vrot.lane.b32.xlu1 %v2399_v34, %s8042_s27  ;;  %1721 = vrot.lane.b32.xlu2 %v1647_v29, %s8039_s22 }
 0x4d1   :  { %2476 = vrot.lane.b32.xlu0 %v2398_v49, %s8042_s27 }
 0x4d2   :  { %v9322_v20 = vpop.permute.xlu2 %2351  ;;  %v9324_v45 = vpop.permute.xlu1 %1853 }
 0x4d3   :  { %16045 = vst [vmem:[#allocation205_spill] sm:$0xff] %v9322_v20  ;;  %v9326_v17 = vpop.permute.xlu0 %3616  ;;  %v2648_v20 = vmul.f32 %v9097_v19, %v8268_v44  ;;  %v1897_v19 = vmul.f32 %v9161_v9, %v8268_v44  ;;  %v2896_v9 = vmul.f32 %v9112_v14, %v8252_v35 }
 0x4d4   :  { %16046 = vst [vmem:[#allocation206_spill] sm:$0xff] %v9324_v45 }
 0x4d5   :  { %16047 = vst [vmem:[#allocation207_spill] sm:$0xff] %v9326_v17 }
 0x4d8   :  { %2223 = vrot.lane.b32.xlu1 %v2147_v16, %s8041_s26  ;;  %2225 = vrot.lane.b32.xlu2 %v2148_v2, %s8041_s26 }
 0x4d9   :  { %1723 = vrot.lane.b32.xlu0 %v1648_v62, %s8039_s22 }
 0x4da   :  { %v9337_v34 = vpop.permute.xlu2 %2097  ;;  %v9339_v49 = vpop.permute.xlu1 %3362 }
 0x4db   :  { %16048 = vst [vmem:[#allocation208_spill] sm:$0xff] %v9337_v34  ;;  %v9341_v29 = vpop.permute.xlu0 %2859  ;;  %v2396_v34 = vmul.f32 %v9159_v58, %v8252_v35  ;;  %v1645_v58 = vmul.f32 %v9176_v24, %v8252_v35 }
 0x4dc   :  { %16049 = vst [vmem:[#allocation209_spill] sm:$0xff] %v9339_v49 }
 0x4dd   :  { %16050 = vst [vmem:[#allocation210_spill] sm:$0xff] %v9341_v29 }
 0x4e0   :  { %2727 = vrot.lane.b32.xlu1 %v2648_v20, %s8043_s5  ;;  %1970 = vrot.lane.b32.xlu2 %v1896_v60, %s8040_s25 }
 0x4e1   :  { %2725 = vrot.lane.b32.xlu0 %v2647_v4, %s8043_s5 }
 0x4e2   :  { %v9352_v2 = vpop.permute.xlu2 %3606  ;;  %v9354_v16 = vpop.permute.xlu1 %2605 }
 0x4e3   :  { %16051 = vst [vmem:[#allocation211_spill] sm:$0xff] %v9352_v2  ;;  %v9356_v62 = vpop.permute.xlu0 %2102  ;;  %v2897_v2 = vmul.f32 %v9112_v14, %v8268_v44  ;;  %v1646_v14 = vmul.f32 %v9176_v24, %v8268_v44  ;;  %v2645_v24 = vmul.f32 %v9127_v6, %v8252_v35 }
 0x4e4   :  { %16052 = vst [vmem:[#allocation212_spill] sm:$0xff] %v9354_v16 }
 0x4e5   :  { %16053 = vst [vmem:[#allocation213_spill] sm:$0xff] %v9356_v62 }
 0x4e8   :  { %2472 = vrot.lane.b32.xlu1 %v2396_v34, %s8042_s27  ;;  %2474 = vrot.lane.b32.xlu2 %v2397_v50, %s8042_s27 }
 0x4e9   :  { %1972 = vrot.lane.b32.xlu0 %v1897_v19, %s8040_s25 }
 0x4ea   :  { %v9367_v4 = vpop.permute.xlu2 %3352  ;;  %v9369_v60 = vpop.permute.xlu1 %1848 }
 0x4eb   :  { %16054 = vst [vmem:[#allocation214_spill] sm:$0xff] %v9367_v4  ;;  %v9371_v20 = vpop.permute.xlu0 %3611  ;;  %v2145_v4 = vmul.f32 %v9174_v32, %v8252_v35 }
 0x4ec   :  { %16055 = vst [vmem:[#allocation215_spill] sm:$0xff] %v9369_v60  ;;  %v2146_v60 = vmul.f32 %v9174_v32, %v8268_v44  ;;  %v3145_v32 = vmul.f32 %v9191_v3, %v8252_v35 }
 0x4ed   :  { %16056 = vst [vmem:[#allocation216_spill] sm:$0xff] %v9371_v20 }
 0x4f0   :  { %2976 = vrot.lane.b32.xlu1 %v2897_v2, %s8044_s0  ;;  %1717 = vrot.lane.b32.xlu2 %v1645_v58, %s8039_s22 }
 0x4f1   :  { %2974 = vrot.lane.b32.xlu0 %v2896_v9, %s8044_s0 }
 0x4f2   :  { %v9382_v19 = vpop.permute.xlu2 %3601  ;;  %v9384_v50 = vpop.permute.xlu1 %3357 }
 0x4f3   :  { %16057 = vst [vmem:[#allocation217_spill] sm:$0xff] %v9382_v19  ;;  %v9386_v34 = vpop.permute.xlu0 %2854  ;;  %v2646_v19 = vmul.f32 %v9127_v6, %v8268_v44 }
 0x4f4   :  { %16058 = vst [vmem:[#allocation218_spill] sm:$0xff] %v9384_v50  ;;  %v1642_v50 = vmul.f32 %v9202_v51, %v8268_v44 }
 0x4f5   :  { %16059 = vst [vmem:[#allocation219_spill] sm:$0xff] %v9386_v34 }
 0x4f8   :  { %2219 = vrot.lane.b32.xlu1 %v2145_v4, %s8041_s26  ;;  %2221 = vrot.lane.b32.xlu2 %v2146_v60, %s8041_s26 }
 0x4f9   :  { %1719 = vrot.lane.b32.xlu0 %v1646_v14, %s8039_s22 }
 0x4fa   :  { %v9397_v9 = vpop.permute.xlu1 %3103  ;;  %v9399_v58 = vpop.permute.xlu2 %1480 }
 0x4fb   :  { %16060 = vst [vmem:[#allocation220_spill] sm:$0xff] %v9397_v9  ;;  %v9401_v2 = vpop.permute.xlu0 %2600  ;;  %v1894_v9 = vmul.f32 %v9189_v41, %v8252_v35 }
 0x4fc   :  { %16061 = vst [vmem:[#allocation221_spill] sm:$0xff] %v9401_v2  ;;  %v1895_v2 = vmul.f32 %v9189_v41, %v8268_v44  ;;  %v2894_v41 = vmul.f32 %v9206_v25, %v8252_v35 }
 0x500   :  { %2723 = vrot.lane.b32.xlu1 %v2646_v19, %s8043_s5  ;;  %3223 = vrot.lane.b32.xlu2 %v3145_v32, %s8045_s28  ;;  %v3146_v19 = vmul.f32 %v9191_v3, %v8268_v44  ;;  %v2394_v3 = vmul.f32 %v9142_v28, %v8252_v35 }
 0x501   :  { %2721 = vrot.lane.b32.xlu0 %v2645_v24, %s8043_s5 }
 0x502   :  { %v9412_v14 = vpop.permute.xlu1 %2849  ;;  %v9414_v4 = vpop.permute.xlu2 %3596 }
 0x503   :  { %16062 = vst [vmem:[#allocation222_spill] sm:$0xff] %v9412_v14  ;;  %v9416_v60 = vpop.permute.xlu0 %2346  ;;  %v2393_v14 = vmul.f32 %v9187_v54, %v8268_v44 }
 0x504   :  { %16063 = vst [vmem:[#allocation223_spill] sm:$0xff] %v9414_v4  ;;  %v2395_v4 = vmul.f32 %v9142_v28, %v8268_v44  ;;  %v2895_v28 = vmul.f32 %v9206_v25, %v8268_v44  ;;  %v1643_v25 = vmul.f32 %v9157_v5, %v8252_v35 }
 0x505   :  { %16064 = vst [vmem:[#allocation224_spill] sm:$0xff] %v9416_v60  ;;  %v3393_v60 = vmul.f32 %v9249_v27, %v8268_v44 }
 0x508   :  { %1966 = vrot.lane.b32.xlu1 %v1894_v9, %s8040_s25  ;;  %1968 = vrot.lane.b32.xlu2 %v1895_v2, %s8040_s25 }
 0x509   :  { %3225 = vrot.lane.b32.xlu0 %v3146_v19, %s8045_s28 }
 0x50a   :  { %v9427_v24 = vpop.permute.xlu1 %3098  ;;  %v9429_v32 = vpop.permute.xlu2 %3342 }
 0x50b   :  { %16065 = vst [vmem:[#allocation225_spill] sm:$0xff] %v9427_v24  ;;  %v9431_v6 = vpop.permute.xlu0 %2595  ;;  %v3395_v24 = vmul.f32 %v9204_v12, %v8268_v44 }
 0x50c   :  { %16066 = vst [vmem:[#allocation226_spill] sm:$0xff] %v9429_v32  ;;  %v3394_v32 = vmul.f32 %v9204_v12, %v8252_v35  ;;  %v2143_v12 = vmul.f32 %v9221_v39, %v8252_v35 }
 0x50d   :  { %16067 = vst [vmem:[#allocation227_spill] sm:$0xff] %v9431_v6  ;;  %v1892_v6 = vmul.f32 %v9234_v55, %v8252_v35 }
 0x510   :  { %2470 = vrot.lane.b32.xlu1 %v2395_v4, %s8042_s27  ;;  %2970 = vrot.lane.b32.xlu2 %v2894_v41, %s8044_s0 }
 0x511   :  { %2468 = vrot.lane.b32.xlu0 %v2394_v3, %s8042_s27 }
 0x512   :  { %v9442_v9 = vpop.permute.xlu1 %3347  ;;  %v9444_v2 = vpop.permute.xlu2 %3591 }
 0x513   :  { %16068 = vst [vmem:[#allocation228_spill] sm:$0xff] %v9442_v9  ;;  %v9446_v19 = vpop.permute.xlu0 %2844  ;;  %v2644_v9 = vmul.f32 %v9219_v11, %v8268_v44 }
 0x514   :  { %16069 = vst [vmem:[#allocation229_spill] sm:$0xff] %v9444_v2  ;;  %v1644_v2 = vmul.f32 %v9157_v5, %v8268_v44  ;;  %v2144_v5 = vmul.f32 %v9221_v39, %v8268_v44  ;;  %v3143_v39 = vmul.f32 %v9172_v30, %v8252_v35 }
 0x515   :  { %16070 = vst [vmem:[#allocation230_spill] sm:$0xff] %v9446_v19  ;;  %v3144_v19 = vmul.f32 %v9172_v30, %v8268_v44 }
 0x518   :  { %3472 = vrot.lane.b32.xlu1 %v3394_v32, %s8046_s29  ;;  %3474 = vrot.lane.b32.xlu2 %v3395_v24, %s8046_s29 }
 0x519   :  { %2972 = vrot.lane.b32.xlu0 %v2895_v28, %s8044_s0 }
 0x51a   :  { %v9457_v3 = vpop.permute.xlu1 %3093  ;;  %v9459_v41 = vpop.permute.xlu2 %2227 }
 0x51b   :  { %16071 = vst [vmem:[#allocation231_spill] sm:$0xff] %v9457_v3  ;;  %v9461_v4 = vpop.permute.xlu0 %1482  ;;  %v2643_v3 = vmul.f32 %v9219_v11, %v8252_v35  ;;  %v3643_v11 = vmul.f32 %v9236_v63, %v8252_v35 }
 0x520   :  { %1715 = vrot.lane.b32.xlu1 %v1644_v2, %s8039_s22  ;;  %2215 = vrot.lane.b32.xlu2 %v2143_v12, %s8041_s26 }
 0x521   :  { %1713 = vrot.lane.b32.xlu0 %v1643_v25, %s8039_s22 }
 0x522   :  { %v9472_v28 = vpop.permute.xlu1 %1731  ;;  %v9474_v24 = vpop.permute.xlu2 %1976 }
 0x523   :  { %v9476_v32 = vpop.permute.xlu0 %1729 }
 0x528   :  { %2717 = vrot.lane.b32.xlu1 %v2643_v3, %s8043_s5  ;;  %2719 = vrot.lane.b32.xlu2 %v2644_v9, %s8043_s5 }
 0x529   :  { %2217 = vrot.lane.b32.xlu0 %v2144_v5, %s8041_s26 }
 0x52a   :  { %v9487_v25 = vpop.permute.xlu1 %1980  ;;  %v9489_v12 = vpop.permute.xlu2 %1721 }
 0x52b   :  { %16072 = vst [vmem:[#allocation232_spill] sm:$0xff] %v9489_v12  ;;  %v9491_v2 = vpop.permute.xlu0 %1978  ;;  %v1893_v12 = vmul.f32 %v9234_v55, %v8268_v44  ;;  %v2892_v55 = vmul.f32 %v9251_v10, %v8252_v35 }
 0x530   :  { %3221 = vrot.lane.b32.xlu1 %v3144_v19, %s8045_s28  ;;  %3721 = vrot.lane.b32.xlu2 %v3643_v11, %s8047_s1  ;;  %v3644_v19 = vmul.f32 %v9236_v63, %v8268_v44  ;;  %v2392_v63 = vmul.f32 %v9187_v54, %v8252_v35  ;;  %v2893_v54 = vmul.f32 %v9251_v10, %v8268_v44 }
 0x531   :  { %3219 = vrot.lane.b32.xlu0 %v3143_v39, %s8045_s28  ;;  %v1641_v10 = vmul.f32 %v9202_v51, %v8252_v35  ;;  %v2142_v51 = vmul.f32 %v9266_v13, %v8268_v44 }
 0x532   :  { %v9502_v5 = vpop.permute.xlu1 %1727  ;;  %v9504_v9 = vpop.permute.xlu2 %2225 }
 0x533   :  { %v9506_v3 = vpop.permute.xlu0 %1725 }
 0x538   :  { %1962 = vrot.lane.b32.xlu1 %v1892_v6, %s8040_s25  ;;  %1964 = vrot.lane.b32.xlu2 %v1893_v12, %s8040_s25 }
 0x539   :  { %3723 = vrot.lane.b32.xlu0 %v3644_v19, %s8047_s1 }
 0x53a   :  { %v9517_v39 = vpop.permute.xlu1 %1974  ;;  %v9519_v11 = vpop.permute.xlu2 %1970 }
 0x53b   :  { %16073 = vst [vmem:[#allocation233_spill] sm:$0xff] %v9519_v11  ;;  %v9521_v30 = vpop.permute.xlu0 %2229  ;;  %v3392_v11 = vmul.f32 %v9249_v27, %v8252_v35  ;;  %v2141_v27 = vmul.f32 %v9266_v13, %v8252_v35  ;;  %v3141_v13 = vmul.f32 %v9217_v43, %v8252_v35 }
 0x540   :  { %2466 = vrot.lane.b32.xlu1 %v2393_v14, %s8042_s27  ;;  %2966 = vrot.lane.b32.xlu2 %v2892_v55, %s8044_s0 }
 0x541   :  { %2464 = vrot.lane.b32.xlu0 %v2392_v63, %s8042_s27 }
 0x542   :  { %v9532_v6 = vpop.permute.xlu1 %2478  ;;  %v9534_v12 = vpop.permute.xlu2 %2474 }
 0x543   :  { %v9536_v19 = vpop.permute.xlu0 %2476 }
 0x548   :  { %3468 = vrot.lane.b32.xlu1 %v3392_v11, %s8046_s29  ;;  %3470 = vrot.lane.b32.xlu2 %v3393_v60, %s8046_s29 }
 0x549   :  { %2968 = vrot.lane.b32.xlu0 %v2893_v54, %s8044_s0 }
 0x54a   :  { %v9547_v55 = vpop.permute.xlu1 %2223  ;;  %v9549_v63 = vpop.permute.xlu2 %1717 }
 0x54b   :  { %16074 = vst [vmem:[#allocation234_spill] sm:$0xff] %v9549_v63  ;;  %v9551_v14 = vpop.permute.xlu0 %1723  ;;  %v2641_v63 = vmul.f32 %v9264_v1, %v8252_v35 }
 0x54c   :  { %16075 = vst [vmem:[#allocation235_spill] sm:$0xff] %v9551_v14  ;;  %v2642_v14 = vmul.f32 %v9264_v1, %v8268_v44  ;;  %v3641_v1 = vmul.f32 %v9281_v47, %v8252_v35 }
 0x550   :  { %1711 = vrot.lane.b32.xlu1 %v1642_v50, %s8039_s22  ;;  %2211 = vrot.lane.b32.xlu2 %v2141_v27, %s8041_s26 }
 0x551   :  { %1709 = vrot.lane.b32.xlu0 %v1641_v10, %s8039_s22 }
 0x552   :  { %v9562_v54 = vpop.permute.xlu1 %2727  ;;  %v9564_v60 = vpop.permute.xlu2 %2221 }
 0x553   :  { %16076 = vst [vmem:[#allocation236_spill] sm:$0xff] %v9564_v60  ;;  %v9566_v11 = vpop.permute.xlu0 %2725  ;;  %v3142_v60 = vmul.f32 %v9217_v43, %v8268_v44  ;;  %v3642_v43 = vmul.f32 %v9281_v47, %v8268_v44  ;;  %v2390_v47 = vmul.f32 %v9232_v52, %v8252_v35 }
 0x558   :  { %2713 = vrot.lane.b32.xlu1 %v2641_v63, %s8043_s5  ;;  %2715 = vrot.lane.b32.xlu2 %v2642_v14, %s8043_s5 }
 0x559   :  { %2213 = vrot.lane.b32.xlu0 %v2142_v51, %s8041_s26 }
 0x55a   :  { %v9577_v10 = vpop.permute.xlu1 %2472  ;;  %v9579_v27 = vpop.permute.xlu2 %3223 }
 0x55b   :  { %16077 = vst [vmem:[#allocation237_spill] sm:$0xff] %v9577_v10  ;;  %v9581_v50 = vpop.permute.xlu0 %1972  ;;  %v1891_v10 = vmul.f32 %v9279_v33, %v8268_v44 }
 0x55c   :  { %16078 = vst [vmem:[#allocation238_spill] sm:$0xff] %v9581_v50  ;;  %v1890_v50 = vmul.f32 %v9279_v33, %v8252_v35  ;;  %v2890_v33 = vmul.f32 %v9296_v21, %v8252_v35 }
 0x560   :  { %3217 = vrot.lane.b32.xlu1 %v3142_v60, %s8045_s28  ;;  %3717 = vrot.lane.b32.xlu2 %v3641_v1, %s8047_s1 }
 0x561   :  { %3215 = vrot.lane.b32.xlu0 %v3141_v13, %s8045_s28 }
 0x562   :  { %v9592_v51 = vpop.permute.xlu1 %2976  ;;  %v9594_v63 = vpop.permute.xlu2 %1968 }
 0x563   :  { %16079 = vst [vmem:[#allocation239_spill] sm:$0xff] %v9594_v63  ;;  %v9596_v14 = vpop.permute.xlu0 %2974  ;;  %v2391_v63 = vmul.f32 %v9232_v52, %v8268_v44  ;;  %v2891_v52 = vmul.f32 %v9296_v21, %v8268_v44  ;;  %v1639_v21 = vmul.f32 %v9247_v48, %v8252_v35 }
 0x568   :  { %1958 = vrot.lane.b32.xlu1 %v1890_v50, %s8040_s25  ;;  %1960 = vrot.lane.b32.xlu2 %v1891_v10, %s8040_s25 }
 0x569   :  { %3719 = vrot.lane.b32.xlu0 %v3642_v43, %s8047_s1 }
 0x56a   :  { %v9607_v1 = vpop.permute.xlu1 %2219  ;;  %v9609_v13 = vpop.permute.xlu2 %2970 }
 0x56b   :  { %16080 = vst [vmem:[#allocation240_spill] sm:$0xff] %v9607_v1  ;;  %v9611_v60 = vpop.permute.xlu0 %1719  ;;  %v3391_v1 = vmul.f32 %v9294_v53, %v8268_v44 }
 0x56c   :  { %16081 = vst [vmem:[#allocation241_spill] sm:$0xff] %v9609_v13  ;;  %v1640_v13 = vmul.f32 %v9247_v48, %v8268_v44  ;;  %v2140_v48 = vmul.f32 %v9311_v40, %v8268_v44 }
 0x56d   :  { %16082 = vst [vmem:[#allocation242_spill] sm:$0xff] %v9611_v60  ;;  %v3390_v60 = vmul.f32 %v9294_v53, %v8252_v35  ;;  %v2139_v53 = vmul.f32 %v9311_v40, %v8252_v35  ;;  %v3140_v40 = vmul.f32 %v9262_v61, %v8268_v44 }
 0x570   :  { %2462 = vrot.lane.b32.xlu1 %v2391_v63, %s8042_s27  ;;  %2962 = vrot.lane.b32.xlu2 %v2890_v33, %s8044_s0 }
 0x571   :  { %2460 = vrot.lane.b32.xlu0 %v2390_v47, %s8042_s27 }
 0x572   :  { %v9622_v43 = vpop.permute.xlu1 %2723  ;;  %v9624_v10 = vpop.permute.xlu2 %3474 }
 0x573   :  { %v9626_v50 = vpop.permute.xlu0 %2721 }
 0x578   :  { %3464 = vrot.lane.b32.xlu1 %v3390_v60, %s8046_s29  ;;  %3466 = vrot.lane.b32.xlu2 %v3391_v1, %s8046_s29 }
 0x579   :  { %2964 = vrot.lane.b32.xlu0 %v2891_v52, %s8044_s0 }
 0x57a   :  { %v9637_v47 = vpop.permute.xlu1 %1966  ;;  %v9639_v33 = vpop.permute.xlu2 %2215 }
 0x57b   :  { %16083 = vst [vmem:[#allocation243_spill] sm:$0xff] %v9637_v47  ;;  %v9641_v63 = vpop.permute.xlu0 %3225  ;;  %v2640_v47 = vmul.f32 %v9309_v26, %v8268_v44 }
 0x57c   :  { %16084 = vst [vmem:[#allocation244_spill] sm:$0xff] %v9639_v33  ;;  %v2639_v33 = vmul.f32 %v9309_v26, %v8252_v35 }
 0x580   :  { %1707 = vrot.lane.b32.xlu1 %v1640_v13, %s8039_s22  ;;  %2207 = vrot.lane.b32.xlu2 %v2139_v53, %s8041_s26 }
 0x581   :  { %1705 = vrot.lane.b32.xlu0 %v1639_v21, %s8039_s22 }
 0x582   :  { %v9652_v52 = vpop.permute.xlu1 %2470  ;;  %v9654_v1 = vpop.permute.xlu2 %2719 }
 0x583   :  { %16085 = vst [vmem:[#allocation245_spill] sm:$0xff] %v9652_v52  ;;  %v9656_v60 = vpop.permute.xlu0 %2468 }
 0x584   :  { %16086 = vst [vmem:[#allocation246_spill] sm:$0xff] %v9654_v1  ;;  %v255_v1 = vmul.f32 %v8268_v44, %v8254_v37 }
 0x585   :  { %16087 = vst [vmem:[#allocation247_spill] sm:$0xff] %v9656_v60  ;;  %v528_v60 = vsel %vm520_vm0, %v8379_v56, %v8405_v7 }
 0x586   :  { %v335_v26 = vadd.f32 %v8270_v46, %v255_v1 }
 0x588   :  { %2709 = vrot.lane.b32.xlu1 %v2639_v33, %s8043_s5  ;;  %2711 = vrot.lane.b32.xlu2 %v2640_v47, %s8043_s5  ;;  %v3639_v33 = vmul.f32 %v9326_v17, %v8252_v35  ;;  %v3139_v47 = vmul.f32 %v9262_v61, %v8252_v35  ;;  %v584_v52 = vadd.f32 %v8405_v7, %v335_v26 }
 0x589   :  { %2209 = vrot.lane.b32.xlu0 %v2140_v48, %s8041_s26  ;;  %v254_v48 = vmul.f32 %v8252_v35, %v8254_v37  ;;  %v777_v61 = vsel %vm769_vm1, %v8549_v18, %v8547_v8 }
 0x58a   :  { %v9667_v21 = vpop.permute.xlu1 %3472  ;;  %v9669_v53 = vpop.permute.xlu2 %3721  ;;  %v833_v37 = vadd.f32 %v8547_v8, %v584_v52  ;;  %v1275_v8 = vsel %vm1267_vm3, %v8833_v57, %v8861_v22  ;;  %v1888_v52 = vmul.f32 %v9324_v45, %v8252_v35 }
 0x58b   :  { %v9671_v13 = vpop.permute.xlu0 %2972  ;;  %v334_v1 = vadd.f32 %v8270_v46, %v254_v48 }
 0x58c   :  { %16088 = vst [vmem:[#allocation248_spill] sm:$0xff] %v9671_v13  ;;  %v1082_v26 = vadd.f32 %v8691_v23, %v833_v37  ;;  %v3640_v37 = vmul.f32 %v9326_v17, %v8268_v44 }
 0x58d   :  { %v583_v7 = vadd.f32 %v528_v60, %v334_v1  ;;  %v1889_v60 = vmul.f32 %v9324_v45, %v8268_v44  ;;  %v16149_v45 = vld [vmem:[#allocation110_spill] sm:$0xff] }
 0x58e   :  { %v1331_v18 = vadd.f32 %v8861_v22, %v1082_v26 }
 0x58f   :  { %v832_v48 = vadd.f32 %v777_v61, %v583_v7  ;;  %v1773_v61 = vsel %vm1765_vm5, %v9476_v32, %v9472_v28 }
 0x590   :  { %3213 = vrot.lane.b32.xlu1 %v3140_v40, %s8045_s28  ;;  %3713 = vrot.lane.b32.xlu2 %v3639_v33, %s8047_s1  ;;  %v1026_v33 = vsel %vm1018_vm2, %v8699_v36, %v8691_v23  ;;  %v1524_v36 = vsel %vm1516_vm4, %v9399_v58, %v9461_v4  ;;  %v1580_v23 = vadd.f32 %v9461_v4, %v1331_v18 }
 0x591   :  { %3211 = vrot.lane.b32.xlu0 %v3139_v47, %s8045_s28  ;;  %v1081_v47 = vadd.f32 %v1026_v33, %v832_v48  ;;  %v2022_v33 = vsel %vm2014_vm6, %v9491_v2, %v9487_v25  ;;  %v2888_v18 = vmul.f32 %v9341_v29, %v8252_v35  ;;  %v2520_v2 = vsel %vm2512_vm8, %v9536_v19, %v9532_v6 }
 0x592   :  { %v9696_v13 = vpop.permute.xlu1 %1715  ;;  %v9698_v56 = vpop.permute.xlu2 %1964  ;;  %v1829_v22 = vadd.f32 %v9472_v28, %v1580_v23  ;;  %v2271_v28 = vsel %vm2263_vm7, %v9459_v41, %v9521_v30 }
 0x593   :  { %v9700_v40 = vpop.permute.xlu0 %1713  ;;  %v1330_v57 = vadd.f32 %v1275_v8, %v1081_v47  ;;  %v2389_v8 = vmul.f32 %v9277_v42, %v8268_v44  ;;  %v2769_v47 = vsel %vm2761_vm9, %v9566_v11, %v9562_v54 }
 0x594   :  { %v2078_v26 = vadd.f32 %v9487_v25, %v1829_v22 }
 0x595   :  { %v1579_v58 = vadd.f32 %v1524_v36, %v1330_v57  ;;  %v3018_v57 = vsel %vm3010_vm10, %v9596_v14, %v9592_v51 }
 0x596   :  { %v2327_v32 = vadd.f32 %v9521_v30, %v2078_v26 }
 0x597   :  { %v1828_v48 = vadd.f32 %v1773_v61, %v1579_v58  ;;  %v3388_v61 = vmul.f32 %v9339_v49, %v8252_v35  ;;  %v3389_v58 = vmul.f32 %v9339_v49, %v8268_v44  ;;  %v16145_v49 = vld [vmem:[#allocation59_spill] sm:$0xff] }
 0x598   :  { %1954 = vrot.lane.b32.xlu1 %v1888_v52, %s8040_s25  ;;  %1956 = vrot.lane.b32.xlu2 %v1889_v60, %s8040_s25  ;;  %v2388_v60 = vmul.f32 %v9277_v42, %v8252_v35  ;;  %v2576_v25 = vadd.f32 %v9532_v6, %v2327_v32 }
 0x599   :  { %3715 = vrot.lane.b32.xlu0 %v3640_v37, %s8047_s1  ;;  %v2077_v52 = vadd.f32 %v2022_v33, %v1828_v48  ;;  %v2889_v33 = vmul.f32 %v9341_v29, %v8268_v44  ;;  %v16146_v29 = vld [vmem:[#allocation121_spill] sm:$0xff] }
 0x59a   :  { %v9727_v1 = vpop.permute.xlu1 %2717  ;;  %v9729_v7 = vpop.permute.xlu2 %2966  ;;  %v2825_v41 = vadd.f32 %v9562_v54, %v2576_v25  ;;  %v3267_v54 = vsel %vm3259_vm11, %v9579_v27, %v9641_v63  ;;  %v1637_v25 = vmul.f32 %v9292_v15, %v8252_v35 }
 0x59b   :  { %v9731_v4 = vpop.permute.xlu0 %2217  ;;  %v2326_v30 = vadd.f32 %v2271_v28, %v2077_v52 }
 0x59c   :  { %v3074_v19 = vadd.f32 %v9592_v51, %v2825_v41  ;;  %v3516_v51 = vsel %vm3508_vm12, %v9667_v21, %v9624_v10 }
 0x59d   :  { %v2575_v23 = vadd.f32 %v2520_v2, %v2326_v30  ;;  %v2137_v2 = vmul.f32 %v9356_v62, %v8252_v35 }
 0x59e   :  { %v3323_v11 = vadd.f32 %v9641_v63, %v3074_v19  ;;  %v2138_v19 = vmul.f32 %v9356_v62, %v8268_v44 }
 0x59f   :  { %v2824_v22 = vadd.f32 %v2769_v47, %v2575_v23  ;;  %v253_v47 = vmul.f32 %v8268_v44, %v8256_v38  ;;  %v2637_v23 = vmul.f32 %v9354_v16, %v8252_v35 }
 0x5a0   :  { %2458 = vrot.lane.b32.xlu1 %v2389_v8, %s8042_s27  ;;  %2958 = vrot.lane.b32.xlu2 %v2888_v18, %s8044_s0  ;;  %v3572_v48 = vadd.f32 %v9624_v10, %v3323_v11 }
 0x5a1   :  { %2456 = vrot.lane.b32.xlu0 %v2388_v60, %s8042_s27  ;;  %v3073_v26 = vadd.f32 %v3018_v57, %v2824_v22  ;;  %v1638_v60 = vmul.f32 %v9292_v15, %v8268_v44  ;;  %v2638_v57 = vmul.f32 %v9354_v16, %v8268_v44  ;;  %v333_v22 = vadd.f32 %v8243_v31, %v253_v47  ;;  %v16121_v16 = vld [vmem:[#allocation222_spill] sm:$0xff] }
 0x5a2   :  { %v9758_v37 = vpop.permute.xlu1 %3221  ;;  %v9760_v36 = vpop.permute.xlu2 %3470  ;;  %v2884_v62 = vmul.f32 %v16121_v16, %v8252_v35 }
 0x5a3   :  { %v9762_v6 = vpop.permute.xlu0 %3219  ;;  %v3322_v27 = vadd.f32 %v3267_v54, %v3073_v26  ;;  %v252_v26 = vmul.f32 %v8252_v35, %v8256_v38 }
 0x5a5   :  { %v3571_v32 = vadd.f32 %v3516_v51, %v3322_v27  ;;  %v16089_v51 = vld [vmem:[#allocation202_spill] sm:$0xff] }
 0x5a6   :  { %v3138_v27 = vmul.f32 %v16089_v51, %v8268_v44 }
 0x5a8   :  { %3460 = vrot.lane.b32.xlu1 %v3388_v61, %s8046_s29  ;;  %3462 = vrot.lane.b32.xlu2 %v3389_v58, %s8046_s29  ;;  %v582_v58 = vadd.f32 %v8395_v0, %v333_v22 }
 0x5a9   :  { %2960 = vrot.lane.b32.xlu0 %v2889_v33, %s8044_s0 }
 0x5aa   :  { %v9784_v14 = vpop.permute.xlu1 %1962  ;;  %v9786_v63 = vpop.permute.xlu2 %2211  ;;  %v831_v33 = vadd.f32 %v8535_v59, %v582_v58  ;;  %v16095_v58 = vld [vmem:[#allocation151_spill] sm:$0xff] }
 0x5ab   :  { %v3724_v28 = vpop.permute.xlu0 %3723 }
 0x5ac   :  { %v3821_v8 = vadd.f32 %v3724_v28, %v3572_v48  ;;  %v3765_v21 = vsel %vm3757_vm13, %v9669_v53, %v3724_v28  ;;  %v3137_v48 = vmul.f32 %v16089_v51, %v8252_v35  ;;  %v3637_v28 = vmul.f32 %v9371_v20, %v8252_v35  ;;  %v16119_v51 = vld [vmem:[#allocation120_spill] sm:$0xff] }
 0x5ad   :  { %v3820_v18 = vadd.f32 %v3765_v21, %v3571_v32  ;;  %v16090_v32 = vld [vmem:[#allocation35_spill] sm:$0xff]  ;;  %v16091_v21 = vld [vmem:[#allocation92_spill] sm:$0xff] }
 0x5ae   :  { %v3853_v52 = vmax.f32 %v3821_v8, 0.0  ;;  %v527_v8 = vsel %vm520_vm0, %v16090_v32, %v8395_v0 }
 0x5af   :  { %v3852_v30 = vmax.f32 %v3820_v18, 0.0  ;;  %v1080_v18 = vadd.f32 %v16091_v21, %v831_v33 }
 0x5b0   :  { %7728 = vmatpush.xpose.msk.msra.mxu1 %vm3757_vm13, %v3853_v52  ;;  %1703 = vrot.lane.b32.xlu1 %v1638_v60, %s8039_s22  ;;  %v332_v52 = vadd.f32 %v8243_v31, %v252_v26  ;;  %v16092_v60 = vld [vmem:[#allocation60_spill] sm:$0xff] }
 0x5b1   :  { %1701 = vrot.lane.b32.xlu0 %v1637_v25, %s8039_s22  ;;  %2203 = vrot.lane.b32.xlu2 %v2137_v2, %s8041_s26  ;;  %v776_v25 = vsel %vm769_vm1, %v16092_v60, %v8535_v59  ;;  %v16093_v2 = vld [vmem:[#allocation123_spill] sm:$0xff] }
 0x5b2   :  { %3952 = vmatpush.xpose.msra.mxu0 %v3852_v30  ;;  %v9801_v10 = vpop.permute.xlu1 %2466  ;;  %v9803_v53 = vpop.permute.xlu2 %2715  ;;  %v1329_v30 = vadd.f32 %v16093_v2, %v1080_v18  ;;  %v581_v0 = vadd.f32 %v527_v8, %v332_v52  ;;  %v3638_v8 = vmul.f32 %v9371_v20, %v8268_v44 }
 0x5b3   :  { %v9805_v41 = vpop.permute.xlu0 %2464 }
 0x5b4   :  { %v1578_v26 = vadd.f32 %v16095_v58, %v1329_v30  ;;  %v830_v33 = vadd.f32 %v776_v25, %v581_v0  ;;  %v1772_v30 = vsel %vm1765_vm5, %v9506_v3, %v9502_v5 }
 0x5b8   :  { %2705 = vrot.lane.b32.xlu1 %v2637_v23, %s8043_s5 }
 0x5b9   :  { %2205 = vrot.lane.b32.xlu0 %v2138_v19, %s8041_s26  ;;  %2707 = vrot.lane.b32.xlu2 %v2638_v57, %s8043_s5  ;;  %v16094_v57 = vld [vmem:[#allocation86_spill] sm:$0xff] }
 0x5ba   :  { %v9819_v54 = vpop.permute.xlu1 %3468  ;;  %v9821_v11 = vpop.permute.xlu2 %3717  ;;  %v1025_v22 = vsel %vm1018_vm2, %v16094_v57, %v16091_v21  ;;  %v16098_v21 = vld [vmem:[#allocation161_spill] sm:$0xff] }
 0x5bb   :  { %v9823_v61 = vpop.permute.xlu0 %2968  ;;  %v1079_v18 = vadd.f32 %v1025_v22, %v830_v33  ;;  %v1523_v60 = vsel %vm1516_vm4, %v16098_v21, %v16095_v58  ;;  %v2021_v58 = vsel %vm2014_vm6, %v9517_v39, %v9474_v24 }
 0x5c0   :  { %3209 = vrot.lane.b32.xlu1 %v3138_v27, %s8045_s28  ;;  %v16096_v27 = vld [vmem:[#allocation124_spill] sm:$0xff] }
 0x5c1   :  { %3207 = vrot.lane.b32.xlu0 %v3137_v48, %s8045_s28  ;;  %3709 = vrot.lane.b32.xlu2 %v3637_v28, %s8047_s1  ;;  %v1274_v59 = vsel %vm1267_vm3, %v16096_v27, %v16093_v2  ;;  %v1827_v48 = vadd.f32 %v9502_v5, %v1578_v26  ;;  %v16097_v28 = vld [vmem:[#allocation215_spill] sm:$0xff]  ;;  %v16099_v5 = vld [vmem:[#allocation205_spill] sm:$0xff] }
 0x5c2   :  { %v9847_v47 = vpop.permute.xlu1 %1711  ;;  %v9849_v23 = vpop.permute.xlu2 %1960  ;;  %v1886_v32 = vmul.f32 %v16097_v28, %v8252_v35  ;;  %v1887_v52 = vmul.f32 %v16097_v28, %v8268_v44  ;;  %v1328_v25 = vadd.f32 %v1274_v59, %v1079_v18  ;;  %v2270_v59 = vsel %vm2263_vm7, %v9547_v55, %v9504_v9 }
 0x5c3   :  { %v9851_v19 = vpop.permute.xlu0 %1709  ;;  %v2076_v2 = vadd.f32 %v9474_v24, %v1827_v48  ;;  %v2387_v3 = vmul.f32 %v16099_v5, %v8268_v44  ;;  %v2886_v18 = vmul.f32 %v9386_v34, %v8252_v35  ;;  %v16100_v24 = vld [vmem:[#allocation237_spill] sm:$0xff]  ;;  %v2768_v55 = vsel %vm2761_vm9, %v9626_v50, %v9622_v43  ;;  %v16103_v50 = vld [vmem:[#allocation218_spill] sm:$0xff] }
 0x5c4   :  { %v1577_v22 = vadd.f32 %v1523_v60, %v1328_v25  ;;  %v2519_v39 = vsel %vm2512_vm8, %v16100_v24, %v9534_v12 }
 0x5c5   :  { %v2325_v27 = vadd.f32 %v9504_v9, %v2076_v2 }
 0x5c6   :  { %v1826_v33 = vadd.f32 %v1772_v30, %v1577_v22  ;;  %v16102_v30 = vld [vmem:[#allocation241_spill] sm:$0xff] }
 0x5c8   :  { %1950 = vrot.lane.b32.xlu1 %v1886_v32, %s8040_s25  ;;  %v2075_v48 = vadd.f32 %v2021_v58, %v1826_v33  ;;  %v2386_v32 = vmul.f32 %v16099_v5, %v8252_v35 }
 0x5c9   :  { %3711 = vrot.lane.b32.xlu0 %v3638_v8, %s8047_s1  ;;  %1952 = vrot.lane.b32.xlu2 %v1887_v52, %s8040_s25  ;;  %v2574_v8 = vadd.f32 %v9534_v12, %v2325_v27  ;;  %v16101_v12 = vld [vmem:[#allocation248_spill] sm:$0xff] }
 0x5ca   :  { %v9877_v0 = vpop.permute.xlu1 %2713  ;;  %v9879_v57 = vpop.permute.xlu2 %2962  ;;  %v2324_v52 = vadd.f32 %v2270_v59, %v2075_v48  ;;  %v3017_v22 = vsel %vm3010_vm10, %v16102_v30, %v16101_v12  ;;  %v3386_v59 = vmul.f32 %v16103_v50, %v8252_v35  ;;  %v2887_v48 = vmul.f32 %v9386_v34, %v8268_v44  ;;  %v16116_v34 = vld [vmem:[#allocation112_spill] sm:$0xff] }
 0x5cb   :  { %v9881_v26 = vpop.permute.xlu0 %2213  ;;  %v2823_v9 = vadd.f32 %v9622_v43, %v2574_v8  ;;  %v3266_v43 = vsel %vm3259_vm11, %v9762_v6, %v9758_v37 }
 0x5cc   :  { %v2573_v25 = vadd.f32 %v2519_v39, %v2324_v52 }
 0x5cd   :  { %v3072_v58 = vadd.f32 %v16101_v12, %v2823_v9  ;;  %v16104_v12 = vld [vmem:[#allocation208_spill] sm:$0xff] }
 0x5ce   :  { %v2822_v33 = vadd.f32 %v2768_v55, %v2573_v25  ;;  %v2136_v30 = vmul.f32 %v16104_v12, %v8268_v44 }
 0x5cf   :  { %v3321_v27 = vadd.f32 %v9758_v37, %v3072_v58 }
 0x5d0   :  { %2454 = vrot.lane.b32.xlu1 %v2387_v3, %s8042_s27  ;;  %v3071_v3 = vadd.f32 %v3017_v22, %v2822_v33  ;;  %v2135_v22 = vmul.f32 %v16104_v12, %v8252_v35  ;;  %v16114_v12 = vld [vmem:[#allocation89_spill] sm:$0xff] }
 0x5d1   :  { %2452 = vrot.lane.b32.xlu0 %v2386_v32, %s8042_s27  ;;  %2954 = vrot.lane.b32.xlu2 %v2886_v18, %s8044_s0  ;;  %v3387_v32 = vmul.f32 %v16103_v50, %v8268_v44  ;;  %v3515_v18 = vsel %vm3508_vm12, %v9819_v54, %v9760_v36  ;;  %v3570_v37 = vadd.f32 %v9760_v36, %v3321_v27  ;;  %v16105_v36 = vld [vmem:[#allocation221_spill] sm:$0xff]  ;;  %v16115_v50 = vld [vmem:[#allocation55_spill] sm:$0xff] }
 0x5d2   :  { %v9907_v21 = vpop.permute.xlu1 %3217  ;;  %v9909_v60 = vpop.permute.xlu2 %3466  ;;  %v3320_v8 = vadd.f32 %v3266_v43, %v3071_v3  ;;  %v2635_v58 = vmul.f32 %v16105_v36, %v8252_v35 }
 0x5d3   :  { %v9911_v2 = vpop.permute.xlu0 %3215 }
 0x5d4   :  { %v3569_v39 = vadd.f32 %v3515_v18, %v3320_v8  ;;  %v16107_v18 = vld [vmem:[#allocation3_spill] sm:$0xff] }
 0x5d5   :  { %v251_v8 = vmul.f32 %v8268_v44, %v16107_v18 }
 0x5d8   :  { %3456 = vrot.lane.b32.xlu1 %v3386_v59, %s8046_s29  ;;  %v16106_v59 = vld [vmem:[#allocation220_spill] sm:$0xff] }
 0x5d9   :  { %2956 = vrot.lane.b32.xlu0 %v2887_v48, %s8044_s0  ;;  %3458 = vrot.lane.b32.xlu2 %v3387_v32, %s8046_s29  ;;  %v3135_v3 = vmul.f32 %v16106_v59, %v8252_v35  ;;  %v2636_v48 = vmul.f32 %v16105_v36, %v8268_v44  ;;  %v3136_v32 = vmul.f32 %v16106_v59, %v8268_v44  ;;  %v16113_v59 = vld [vmem:[#allocation31_spill] sm:$0xff] }
 0x5da   :  { %v9934_v6 = vpop.permute.xlu1 %1958  ;;  %v9936_v24 = vpop.permute.xlu2 %2207 }
 0x5db   :  { %v3720_v52 = vpop.permute.xlu0 %3719 }
 0x5dc   :  { %v3819_v9 = vadd.f32 %v3720_v52, %v3570_v37  ;;  %v3764_v55 = vsel %vm3757_vm13, %v9821_v11, %v3720_v52  ;;  %v16108_v37 = vld [vmem:[#allocation15_spill] sm:$0xff] }
 0x5dd   :  { %v3818_v54 = vadd.f32 %v3764_v55, %v3569_v39  ;;  %v331_v39 = vadd.f32 %v16108_v37, %v251_v8 }
 0x5de   :  { %v3851_v25 = vmax.f32 %v3819_v9, 0.0 }
 0x5df   :  { %v3850_v33 = vmax.f32 %v3818_v54, 0.0  ;;  %v16109_v54 = vld [vmem:[#allocation24_spill] sm:$0xff] }
 0x5e0   :  { %7729 = vmatpush.xpose.msk.msra.mxu1 %vm3757_vm13, %v3851_v25  ;;  %2201 = vrot.lane.b32.xlu1 %v2136_v30, %s8041_s26  ;;  %v580_v25 = vadd.f32 %v16109_v54, %v331_v39  ;;  %v16110_v30 = vld [vmem:[#allocation61_spill] sm:$0xff]  ;;  %v526_v36 = vsel %vm520_vm0, %v16113_v59, %v16109_v54 }
 0x5e1   :  { %2199 = vrot.lane.b32.xlu0 %v2135_v22, %s8041_s26  ;;  %2701 = vrot.lane.b32.xlu2 %v2635_v58, %s8043_s5  ;;  %v16111_v58 = vld [vmem:[#allocation211_spill] sm:$0xff] }
 0x5e2   :  { %3953 = vmatpush.xpose.msra.mxu0 %v3850_v33  ;;  %v9950_v11 = vpop.permute.xlu1 %2462  ;;  %v9952_v27 = vpop.permute.xlu2 %2711  ;;  %v829_v22 = vadd.f32 %v16110_v30, %v580_v25  ;;  %v3636_v33 = vmul.f32 %v16111_v58, %v8268_v44 }
 0x5e3   :  { %v9954_v43 = vpop.permute.xlu0 %2460 }
 0x5e4   :  { %v1078_v39 = vadd.f32 %v16114_v12, %v829_v22  ;;  %v16117_v22 = vld [vmem:[#allocation90_spill] sm:$0xff] }
 0x5e6   :  { %v1327_v5 = vadd.f32 %v16116_v34, %v1078_v39 }
 0x5e8   :  { %3203 = vrot.lane.b32.xlu1 %v3135_v3, %s8045_s28  ;;  %v250_v3 = vmul.f32 %v8252_v35, %v16107_v18 }
 0x5e9   :  { %2703 = vrot.lane.b32.xlu0 %v2636_v48, %s8043_s5  ;;  %3205 = vrot.lane.b32.xlu2 %v3136_v32, %s8045_s28  ;;  %v3635_v48 = vmul.f32 %v16111_v58, %v8252_v35  ;;  %v16112_v32 = vld [vmem:[#allocation224_spill] sm:$0xff]  ;;  %v775_v58 = vsel %vm769_vm1, %v16115_v50, %v16110_v30  ;;  %v1273_v50 = vsel %vm1267_vm3, %v16119_v51, %v16116_v34  ;;  %v16120_v30 = vld [vmem:[#allocation235_spill] sm:$0xff] }
 0x5ea   :  { %v9968_v52 = vpop.permute.xlu1 %3464  ;;  %v9970_v9 = vpop.permute.xlu2 %3713  ;;  %v2384_v8 = vmul.f32 %v16112_v32, %v8252_v35  ;;  %v330_v25 = vadd.f32 %v16108_v37, %v250_v3  ;;  %v16118_v3 = vld [vmem:[#allocation162_spill] sm:$0xff]  ;;  %v16124_v51 = vld [vmem:[#allocation232_spill] sm:$0xff] }
 0x5eb   :  { %v9972_v55 = vpop.permute.xlu0 %2964 }
 0x5ec   :  { %v579_v59 = vadd.f32 %v526_v36, %v330_v25  ;;  %v2385_v36 = vmul.f32 %v16112_v32, %v8268_v44  ;;  %v2885_v25 = vmul.f32 %v16121_v16, %v8268_v44 }
 0x5f0   :  { %3707 = vrot.lane.b32.xlu1 %v3636_v33, %s8047_s1  ;;  %v1024_v33 = vsel %vm1018_vm2, %v16117_v22, %v16114_v12  ;;  %v16122_v12 = vld [vmem:[#allocation149_spill] sm:$0xff]  ;;  %v1771_v22 = vsel %vm1765_vm5, %v16124_v51, %v16120_v30  ;;  %v16129_v51 = vld [vmem:[#allocation214_spill] sm:$0xff] }
 0x5f1   :  { %3705 = vrot.lane.b32.xlu0 %v3635_v48, %s8047_s1  ;;  %2448 = vrot.lane.b32.xlu2 %v2384_v8, %s8042_s27  ;;  %v1576_v48 = vadd.f32 %v16118_v3, %v1327_v5  ;;  %v828_v8 = vadd.f32 %v775_v58, %v579_v59  ;;  %v1522_v5 = vsel %vm1516_vm4, %v16122_v12, %v16118_v3  ;;  %v16123_v58 = vld [vmem:[#allocation238_spill] sm:$0xff]  ;;  %v16125_v3 = vld [vmem:[#allocation233_spill] sm:$0xff] }
 0x5f2   :  { %v9996_v28 = vpop.permute.xlu1 %1707  ;;  %v9998_v20 = vpop.permute.xlu2 %1956  ;;  %v16128_v12 = vld [vmem:[#allocation245_spill] sm:$0xff]  ;;  %v3385_v32 = vmul.f32 %v16129_v51, %v8268_v44 }
 0x5f3   :  { %v10000_v54 = vpop.permute.xlu0 %1705  ;;  %v1825_v39 = vadd.f32 %v16120_v30, %v1576_v48  ;;  %v1077_v31 = vadd.f32 %v1024_v33, %v828_v8 }
 0x5f5   :  { %v2074_v59 = vadd.f32 %v16123_v58, %v1825_v39  ;;  %v1326_v34 = vadd.f32 %v1273_v50, %v1077_v31  ;;  %v16126_v31 = vld [vmem:[#allocation236_spill] sm:$0xff] }
 0x5f7   :  { %v1575_v8 = vadd.f32 %v1522_v5, %v1326_v34  ;;  %v2323_v50 = vadd.f32 %v16126_v31, %v2074_v59  ;;  %v3384_v5 = vmul.f32 %v16129_v51, %v8252_v35  ;;  %v16130_v34 = vld [vmem:[#allocation227_spill] sm:$0xff] }
 0x5f8   :  { %2950 = vrot.lane.b32.xlu1 %v2884_v62, %s8044_s0  ;;  %v2020_v62 = vsel %vm2014_vm6, %v16125_v3, %v16123_v58  ;;  %v2633_v38 = vmul.f32 %v16130_v34, %v8252_v35  ;;  %v16131_v58 = vld [vmem:[#allocation247_spill] sm:$0xff] }
 0x5f9   :  { %2450 = vrot.lane.b32.xlu0 %v2385_v36, %s8042_s27  ;;  %2952 = vrot.lane.b32.xlu2 %v2885_v25, %s8044_s0  ;;  %v1824_v39 = vadd.f32 %v1771_v22, %v1575_v8  ;;  %v16127_v36 = vld [vmem:[#allocation240_spill] sm:$0xff]  ;;  %v2572_v30 = vadd.f32 %v16128_v12, %v2323_v50  ;;  %v2518_v59 = vsel %vm2512_vm8, %v16131_v58, %v16128_v12  ;;  %v16132_v8 = vld [vmem:[#allocation246_spill] sm:$0xff]  ;;  %v16133_v12 = vld [vmem:[#allocation225_spill] sm:$0xff] }
 0x5fa   :  { %v10026_v33 = vpop.permute.xlu1 %2709  ;;  %v10028_v48 = vpop.permute.xlu2 %2958  ;;  %v2269_v25 = vsel %vm2263_vm7, %v16127_v36, %v16126_v31  ;;  %v2634_v58 = vmul.f32 %v16130_v34, %v8268_v44  ;;  %v16144_v51 = vld [vmem:[#allocation83_spill] sm:$0xff] }
 0x5fb   :  { %v10030_v16 = vpop.permute.xlu0 %2209  ;;  %v2073_v15 = vadd.f32 %v2020_v62, %v1824_v39  ;;  %v2821_v3 = vadd.f32 %v16132_v8, %v2572_v30  ;;  %v2767_v62 = vsel %vm2761_vm9, %v9727_v1, %v16132_v8  ;;  %v3265_v1 = vsel %vm3259_vm11, %v9911_v2, %v9907_v21 }
 0x5fc   :  { %v3133_v30 = vmul.f32 %v16133_v12, %v8252_v35 }
 0x5fd   :  { %v2322_v22 = vadd.f32 %v2269_v25, %v2073_v15  ;;  %v3016_v15 = vsel %vm3010_vm10, %v9729_v7, %v9823_v61  ;;  %v3514_v7 = vsel %vm3508_vm12, %v9968_v52, %v9909_v60 }
 0x5ff   :  { %v2571_v39 = vadd.f32 %v2518_v59, %v2322_v22  ;;  %v3134_v59 = vmul.f32 %v16133_v12, %v8268_v44  ;;  %v16143_v12 = vld [vmem:[#allocation22_spill] sm:$0xff] }
 0x600   :  { %3454 = vrot.lane.b32.xlu1 %v3385_v32, %s8046_s29  ;;  %v3070_v32 = vadd.f32 %v9823_v61, %v2821_v3 }
 0x601   :  { %3452 = vrot.lane.b32.xlu0 %v3384_v5, %s8046_s29  ;;  %2697 = vrot.lane.b32.xlu2 %v2633_v38, %s8043_s5  ;;  %v2820_v38 = vadd.f32 %v2767_v62, %v2571_v39 }
 0x602   :  { %v10056_v31 = vpop.permute.xlu1 %3213  ;;  %v10058_v50 = vpop.permute.xlu2 %3462  ;;  %v3319_v25 = vadd.f32 %v9907_v21, %v3070_v32  ;;  %v16134_v32 = vld [vmem:[#allocation217_spill] sm:$0xff] }
 0x603   :  { %v10060_v36 = vpop.permute.xlu0 %3211  ;;  %v3069_v5 = vadd.f32 %v3016_v15, %v2820_v38  ;;  %v3634_v38 = vmul.f32 %v16134_v32, %v8268_v44 }
 0x604   :  { %v3568_v21 = vadd.f32 %v9909_v60, %v3319_v25  ;;  %v16135_v60 = vld [vmem:[#allocation230_spill] sm:$0xff] }
 0x605   :  { %v3318_v61 = vadd.f32 %v3265_v1, %v3069_v5  ;;  %v3633_v1 = vmul.f32 %v16134_v32, %v8252_v35  ;;  %v2882_v25 = vmul.f32 %v16135_v60, %v8252_v35 }
 0x607   :  { %v3567_v22 = vadd.f32 %v3514_v7, %v3318_v61  ;;  %v2883_v61 = vmul.f32 %v16135_v60, %v8268_v44  ;;  %v16141_v60 = vld [vmem:[#allocation231_spill] sm:$0xff] }
 0x608   :  { %3199 = vrot.lane.b32.xlu1 %v3133_v30, %s8045_s28  ;;  %v3132_v32 = vmul.f32 %v16141_v60, %v8268_v44 }
 0x609   :  { %2699 = vrot.lane.b32.xlu0 %v2634_v58, %s8043_s5  ;;  %3201 = vrot.lane.b32.xlu2 %v3134_v59, %s8045_s28  ;;  %v16136_v59 = vld [vmem:[#allocation228_spill] sm:$0xff] }
 0x60a   :  { %v10083_v2 = vpop.permute.xlu1 %1954  ;;  %v3382_v7 = vmul.f32 %v16136_v59, %v8252_v35 }
 0x60b   :  { %v10085_v8 = vpop.permute.xlu2 %2203  ;;  %v3716_v3 = vpop.permute.xlu0 %3715 }
 0x60c   :  { %v3817_v62 = vadd.f32 %v3716_v3, %v3568_v21  ;;  %v3763_v39 = vsel %vm3757_vm13, %v9970_v9, %v3716_v3  ;;  %v3383_v21 = vmul.f32 %v16136_v59, %v8268_v44 }
 0x60d   :  { %v3816_v52 = vadd.f32 %v3763_v39, %v3567_v22  ;;  %v16137_v22 = vld [vmem:[#allocation2_spill] sm:$0xff] }
 0x60e   :  { %v3849_v15 = vmax.f32 %v3817_v62, 0.0  ;;  %v249_v3 = vmul.f32 %v8268_v44, %v16137_v22  ;;  %v16138_v62 = vld [vmem:[#allocation16_spill] sm:$0xff] }
 0x60f   :  { %v3848_v30 = vmax.f32 %v3816_v52, 0.0 }
 0x610   :  { %7730 = vmatpush.xpose.msk.msra.mxu1 %vm3757_vm13, %v3849_v15  ;;  %3703 = vrot.lane.b32.xlu1 %v3634_v38, %s8047_s1  ;;  %v329_v39 = vadd.f32 %v16138_v62, %v249_v3 }
 0x611   :  { %3701 = vrot.lane.b32.xlu0 %v3633_v1, %s8047_s1  ;;  %2946 = vrot.lane.b32.xlu2 %v2882_v25, %s8044_s0  ;;  %v16139_v1 = vld [vmem:[#allocation33_spill] sm:$0xff] }
 0x612   :  { %3954 = vmatpush.xpose.msra.mxu0 %v3848_v30  ;;  %v10099_v9 = vpop.permute.xlu1 %2458  ;;  %v578_v25 = vadd.f32 %v16139_v1, %v329_v39  ;;  %v16140_v30 = vld [vmem:[#allocation58_spill] sm:$0xff]  ;;  %v525_v34 = vsel %vm520_vm0, %v16143_v12, %v16139_v1 }
 0x613   :  { %v10101_v5 = vpop.permute.xlu2 %2707  ;;  %v10103_v58 = vpop.permute.xlu0 %2456 }
 0x614   :  { %v827_v59 = vadd.f32 %v16140_v30, %v578_v25 }
 0x616   :  { %v1076_v39 = vadd.f32 %v16144_v51, %v827_v59 }
 0x618   :  { %3448 = vrot.lane.b32.xlu1 %v3382_v7, %s8046_s29  ;;  %v248_v7 = vmul.f32 %v8252_v35, %v16137_v22  ;;  %v1325_v42 = vadd.f32 %v16146_v29, %v1076_v39 }
 0x619   :  { %2948 = vrot.lane.b32.xlu0 %v2883_v61, %s8044_s0  ;;  %3450 = vrot.lane.b32.xlu2 %v3383_v21, %s8046_s29  ;;  %v3131_v61 = vmul.f32 %v16141_v60, %v8252_v35  ;;  %v16142_v21 = vld [vmem:[#allocation223_spill] sm:$0xff]  ;;  %v774_v60 = vsel %vm769_vm1, %v16145_v49, %v16140_v30  ;;  %v1272_v49 = vsel %vm1267_vm3, %v16149_v45, %v16146_v29  ;;  %v16150_v30 = vld [vmem:[#allocation242_spill] sm:$0xff] }
 0x61a   :  { %v10117_v52 = vpop.permute.xlu1 %3460  ;;  %v3631_v3 = vmul.f32 %v16142_v21, %v8252_v35  ;;  %v328_v25 = vadd.f32 %v16138_v62, %v248_v7  ;;  %v16148_v7 = vld [vmem:[#allocation158_spill] sm:$0xff]  ;;  %v3632_v22 = vmul.f32 %v16142_v21, %v8268_v44 }
 0x61b   :  { %v10119_v15 = vpop.permute.xlu2 %3709  ;;  %v10121_v38 = vpop.permute.xlu0 %2960  ;;  %v16151_v62 = vld [vmem:[#allocation226_spill] sm:$0xff] }
 0x61c   :  { %v577_v18 = vadd.f32 %v525_v34, %v328_v25  ;;  %v3380_v34 = vmul.f32 %v16151_v62, %v8252_v35  ;;  %v3381_v17 = vmul.f32 %v16151_v62, %v8268_v44  ;;  %v16153_v45 = vld [vmem:[#allocation234_spill] sm:$0xff] }
 0x61d   :  { %v1770_v29 = vsel %vm1765_vm5, %v16153_v45, %v16150_v30  ;;  %v16159_v45 = vld [vmem:[#allocation150_spill] sm:$0xff] }
 0x620   :  { %3197 = vrot.lane.b32.xlu1 %v3132_v32, %s8045_s28  ;;  %v16147_v32 = vld [vmem:[#allocation87_spill] sm:$0xff] }
 0x621   :  { %3195 = vrot.lane.b32.xlu0 %v3131_v61, %s8045_s28  ;;  %3697 = vrot.lane.b32.xlu2 %v3631_v3, %s8047_s1  ;;  %v1023_v1 = vsel %vm1018_vm2, %v16147_v32, %v16144_v51  ;;  %v1574_v61 = vadd.f32 %v16148_v7, %v1325_v42  ;;  %v826_v3 = vadd.f32 %v774_v60, %v577_v18  ;;  %v16152_v51 = vld [vmem:[#allocation159_spill] sm:$0xff] }
 0x622   :  { %v10145_v37 = vpop.permute.xlu1 %1703  ;;  %v1521_v42 = vsel %vm1516_vm4, %v16152_v51, %v16148_v7  ;;  %v16154_v60 = vld [vmem:[#allocation239_spill] sm:$0xff] }
 0x623   :  { %v10147_v12 = vpop.permute.xlu2 %1952  ;;  %v10149_v59 = vpop.permute.xlu0 %1701  ;;  %v1823_v39 = vadd.f32 %v16150_v30, %v1574_v61  ;;  %v1075_v25 = vadd.f32 %v1023_v1, %v826_v3  ;;  %v16155_v7 = vld [vmem:[#allocation243_spill] sm:$0xff] }
 0x625   :  { %v1324_v18 = vadd.f32 %v1272_v49, %v1075_v25  ;;  %v2072_v32 = vadd.f32 %v16154_v60, %v1823_v39  ;;  %v2019_v49 = vsel %vm2014_vm6, %v16155_v7, %v16154_v60  ;;  %v16157_v25 = vld [vmem:[#allocation229_spill] sm:$0xff] }
 0x626   :  { %v3630_v51 = vmul.f32 %v16157_v25, %v8268_v44  ;;  %v3629_v46 = vmul.f32 %v16157_v25, %v8252_v35  ;;  %v16174_v25 = vld [vmem:[#allocation147_spill] sm:$0xff] }
 0x627   :  { %v1573_v61 = vadd.f32 %v1521_v42, %v1324_v18  ;;  %v16158_v18 = vld [vmem:[#allocation18_spill] sm:$0xff] }
 0x628   :  { %3444 = vrot.lane.b32.xlu1 %v3380_v34, %s8046_s29  ;;  %v16156_v34 = vld [vmem:[#allocation244_spill] sm:$0xff]  ;;  %v1418_v21 = vmul.f32 %v16159_v45, %v16158_v18 }
 0x629   :  { %3699 = vrot.lane.b32.xlu0 %v3632_v22, %s8047_s1  ;;  %3446 = vrot.lane.b32.xlu2 %v3381_v17, %s8046_s29  ;;  %v2321_v22 = vadd.f32 %v9731_v4, %v2072_v32  ;;  %v1822_v17 = vadd.f32 %v1770_v29, %v1573_v61  ;;  %v2268_v30 = vsel %vm2263_vm7, %v16156_v34, %v9731_v4 }
 0x62a   :  { %v10175_v1 = vpop.permute.xlu1 %2705  ;;  %v2517_v29 = vsel %vm2512_vm8, %v9805_v41, %v9801_v10  ;;  %v2766_v32 = vsel %vm2761_vm9, %v9877_v0, %v9803_v53  ;;  %v16160_v0 = vld [vmem:[#allocation165_spill] sm:$0xff] }
 0x62b   :  { %v10177_v3 = vpop.permute.xlu2 %2954  ;;  %v10179_v62 = vpop.permute.xlu0 %2205  ;;  %v2570_v39 = vadd.f32 %v9801_v10, %v2321_v22  ;;  %v2071_v42 = vadd.f32 %v2019_v49, %v1822_v17  ;;  %v3015_v10 = vsel %vm3010_vm10, %v9879_v57, %v9972_v55  ;;  %v1667_v17 = vmul.f32 %v16160_v0, %v16158_v18 }
 0x62c   :  { %v3513_v57 = vsel %vm3508_vm12, %v10117_v52, %v10058_v50  ;;  %v16163_v52 = vld [vmem:[#allocation9_spill] sm:$0xff] }
 0x62d   :  { %v2320_v60 = vadd.f32 %v2268_v30, %v2071_v42  ;;  %v2819_v4 = vadd.f32 %v9803_v53, %v2570_v39  ;;  %v3264_v53 = vsel %vm3259_vm11, %v10060_v36, %v10056_v31  ;;  %v16161_v30 = vld [vmem:[#allocation19_spill] sm:$0xff] }
 0x62e   :  { %v1668_v39 = vmul.f32 %v16160_v0, %v16161_v30 }
 0x62f   :  { %v2569_v7 = vadd.f32 %v2517_v29, %v2320_v60  ;;  %v3068_v41 = vadd.f32 %v9972_v55, %v2819_v4 }
 0x630   :  { %3695 = vrot.lane.b32.xlu1 %v3630_v51, %s8047_s1  ;;  %v1419_v51 = vmul.f32 %v16159_v45, %v16161_v30 }
 0x631   :  { %1512 = vrot.lane.b32.xlu2 %v1418_v21, %s8038_s23  ;;  %3693 = vrot.lane.b32.xlu0 %v3629_v46, %s8047_s1  ;;  %v2818_v46 = vadd.f32 %v2766_v32, %v2569_v7  ;;  %v3317_v21 = vadd.f32 %v10056_v31, %v3068_v41  ;;  %v247_v32 = vmul.f32 %v8268_v44, %v16163_v52  ;;  %v16164_v41 = vld [vmem:[#allocation144_spill] sm:$0xff] }
 0x632   :  { %v10205_v61 = vpop.permute.xlu1 %3209 }
 0x633   :  { %v10207_v49 = vpop.permute.xlu2 %3458  ;;  %v10209_v22 = vpop.permute.xlu0 %3207  ;;  %v3067_v34 = vadd.f32 %v3015_v10, %v2818_v46  ;;  %v3566_v31 = vadd.f32 %v10058_v50, %v3317_v21  ;;  %v1417_v46 = vmul.f32 %v16164_v41, %v16161_v30  ;;  %v16165_v50 = vld [vmem:[#allocation164_spill] sm:$0xff] }
 0x634   :  { %v1916_v21 = vmul.f32 %v16165_v50, %v16158_v18 }
 0x635   :  { %v3316_v55 = vadd.f32 %v3264_v53, %v3067_v34  ;;  %v1416_v53 = vmul.f32 %v16164_v41, %v16158_v18  ;;  %v1917_v41 = vmul.f32 %v16165_v50, %v16161_v30 }
 0x637   :  { %v3565_v42 = vadd.f32 %v3513_v57, %v3316_v55 }
 0x638   :  { %1761 = vrot.lane.b32.xlu1 %v1667_v17, %s8039_s22 }
 0x639   :  { %1763 = vrot.lane.b32.xlu2 %v1668_v39, %s8039_s22  ;;  %1514 = vrot.lane.b32.xlu0 %v1419_v51, %s8038_s23  ;;  %v16167_v39 = vld [vmem:[#allocation28_spill] sm:$0xff] }
 0x63a   :  { %v10232_v36 = vpop.permute.xlu1 %1950 }
 0x63b   :  { %16162 = vst [vmem:[#allocation35_spill] sm:$0xff] %v10232_v36  ;;  %v10234_v29 = vpop.permute.xlu2 %2701  ;;  %v3712_v60 = vpop.permute.xlu0 %3711 }
 0x63c   :  { %v3815_v45 = vadd.f32 %v3712_v60, %v3566_v31  ;;  %v3762_v4 = vsel %vm3757_vm13, %v10119_v15, %v3712_v60  ;;  %v16166_v15 = vld [vmem:[#allocation5_spill] sm:$0xff]  ;;  %v246_v31 = vmul.f32 %v8252_v35, %v16163_v52 }
 0x63d   :  { %v3814_v7 = vadd.f32 %v3762_v4, %v3565_v42  ;;  %v327_v17 = vadd.f32 %v16166_v15, %v247_v32  ;;  %v16168_v42 = vld [vmem:[#allocation52_spill] sm:$0xff] }
 0x63e   :  { %v3847_v10 = vmax.f32 %v3815_v45, 0.0  ;;  %v16169_v45 = vld [vmem:[#allocation154_spill] sm:$0xff]  ;;  %v16170_v32 = vld [vmem:[#allocation88_spill] sm:$0xff] }
 0x63f   :  { %v3846_v0 = vmax.f32 %v3814_v7, 0.0  ;;  %v576_v51 = vadd.f32 %v16167_v39, %v327_v17  ;;  %v1665_v4 = vmul.f32 %v16169_v45, %v16158_v18 }
 0x640   :  { %7731 = vmatpush.xpose.msk.msra.mxu1 %vm3757_vm13, %v3847_v10  ;;  %1510 = vrot.lane.b32.xlu1 %v1417_v46, %s8038_s23  ;;  %v1666_v10 = vmul.f32 %v16169_v45, %v16161_v30  ;;  %v16171_v46 = vld [vmem:[#allocation30_spill] sm:$0xff] }
 0x641   :  { %2010 = vrot.lane.b32.xlu2 %v1916_v21, %s8040_s25  ;;  %1508 = vrot.lane.b32.xlu0 %v1416_v53, %s8038_s23  ;;  %v825_v60 = vadd.f32 %v16168_v42, %v576_v51  ;;  %v524_v21 = vsel %vm520_vm0, %v16171_v46, %v16167_v39  ;;  %v326_v53 = vadd.f32 %v16166_v15, %v246_v31  ;;  %v16173_v51 = vld [vmem:[#allocation56_spill] sm:$0xff] }
 0x642   :  { %3955 = vmatpush.xpose.msra.mxu0 %v3846_v0  ;;  %v10251_v34 = vpop.permute.xlu1 %2454  ;;  %v16172_v0 = vld [vmem:[#allocation117_spill] sm:$0xff]  ;;  %v16176_v31 = vld [vmem:[#allocation80_spill] sm:$0xff] }
 0x643   :  { %v10254_v57 = vpop.permute.xlu2 %3205  ;;  %v10256_v55 = vpop.permute.xlu0 %2452  ;;  %v1074_v7 = vadd.f32 %v16170_v32, %v825_v60  ;;  %v773_v60 = vsel %vm769_vm1, %v16173_v51, %v16168_v42  ;;  %v575_v50 = vadd.f32 %v524_v21, %v326_v53  ;;  %v16178_v42 = vld [vmem:[#allocation168_spill] sm:$0xff] }
 0x644   :  { %v2166_v21 = vmul.f32 %v16178_v42, %v16161_v30  ;;  %v2165_v15 = vmul.f32 %v16178_v42, %v16158_v18 }
 0x645   :  { %v1323_v17 = vadd.f32 %v16172_v0, %v1074_v7  ;;  %v824_v7 = vadd.f32 %v773_v60, %v575_v50 }
 0x647   :  { %v1572_v52 = vadd.f32 %v16174_v25, %v1323_v17  ;;  %v16179_v17 = vld [vmem:[#allocation142_spill] sm:$0xff] }
 0x648   :  { %1757 = vrot.lane.b32.xlu1 %v1665_v4, %s8039_s22  ;;  %v1022_v4 = vsel %vm1018_vm2, %v16176_v31, %v16170_v32  ;;  %v1414_v51 = vmul.f32 %v16179_v17, %v16158_v18 }
 0x649   :  { %1759 = vrot.lane.b32.xlu2 %v1666_v10, %s8039_s22  ;;  %2012 = vrot.lane.b32.xlu0 %v1917_v41, %s8040_s25  ;;  %v1821_v10 = vadd.f32 %v9696_v13, %v1572_v52  ;;  %v16177_v41 = vld [vmem:[#allocation118_spill] sm:$0xff]  ;;  %v1073_v53 = vadd.f32 %v1022_v4, %v824_v7 }
 0x64a   :  { %v3457_v45 = vpop.permute.xlu1 %3456  ;;  %v1271_v46 = vsel %vm1267_vm3, %v16177_v41, %v16172_v0  ;;  %v1769_v0 = vsel %vm1765_vm5, %v9700_v40, %v9696_v13  ;;  %v2267_v13 = vsel %vm2263_vm7, %v9786_v63, %v9881_v26  ;;  %v16181_v40 = vld [vmem:[#allocation167_spill] sm:$0xff]  ;;  %v2765_v63 = vsel %vm2761_vm9, %v10026_v33, %v9952_v27  ;;  %v16182_v33 = vld [vmem:[#allocation157_spill] sm:$0xff] }
 0x64b   :  { %v10280_v36 = vpop.permute.xlu2 %2448  ;;  %v10282_v39 = vpop.permute.xlu0 %2956  ;;  %v1322_v52 = vadd.f32 %v1271_v46, %v1073_v53  ;;  %v2070_v60 = vadd.f32 %v9698_v56, %v1821_v10  ;;  %v1914_v41 = vmul.f32 %v16181_v40, %v16158_v18  ;;  %v1915_v42 = vmul.f32 %v16181_v40, %v16161_v30 }
 0x64c   :  { %16175 = vst [vmem:[#allocation92_spill] sm:$0xff] %v10280_v36  ;;  %v16180_v36 = vld [vmem:[#allocation155_spill] sm:$0xff] }
 0x64d   :  { %v1520_v32 = vsel %vm1516_vm4, %v16180_v36, %v16174_v25  ;;  %v2319_v4 = vadd.f32 %v9881_v26, %v2070_v60  ;;  %v2018_v36 = vsel %vm2014_vm6, %v9784_v14, %v9698_v56  ;;  %v2516_v56 = vsel %vm2512_vm8, %v9954_v43, %v9950_v11 }
 0x64e   :  { %v1571_v31 = vadd.f32 %v1520_v32, %v1322_v52  ;;  %v3014_v43 = vsel %vm3010_vm10, %v10028_v48, %v10121_v38  ;;  %v2414_v48 = vmul.f32 %v16182_v33, %v16158_v18 }
 0x650   :  { %2261 = vrot.lane.b32.xlu1 %v2166_v21, %s8041_s26  ;;  %v1820_v10 = vadd.f32 %v1769_v0, %v1571_v31  ;;  %v1415_v21 = vmul.f32 %v16179_v17, %v16161_v30  ;;  %v2415_v0 = vmul.f32 %v16182_v33, %v16161_v30  ;;  %v16183_v31 = vld [vmem:[#allocation6_spill] sm:$0xff] }
 0x651   :  { %1504 = vrot.lane.b32.xlu2 %v1414_v51, %s8038_s23  ;;  %2259 = vrot.lane.b32.xlu0 %v2165_v15, %s8041_s26  ;;  %v2568_v15 = vadd.f32 %v9950_v11, %v2319_v4  ;;  %v245_v4 = vmul.f32 %v8268_v44, %v16183_v31 }
 0x652   :  { %v10307_v50 = vpop.permute.xlu1 %2201  ;;  %v2069_v46 = vadd.f32 %v2018_v36, %v1820_v10  ;;  %v16184_v10 = vld [vmem:[#allocation171_spill] sm:$0xff] }
 0x653   :  { %v10310_v7 = vpop.permute.xlu2 %2952  ;;  %v10312_v25 = vpop.permute.xlu0 %2199  ;;  %v2817_v53 = vadd.f32 %v9952_v27, %v2568_v15  ;;  %v3263_v27 = vsel %vm3259_vm11, %v10209_v22, %v10205_v61  ;;  %v1663_v15 = vmul.f32 %v16184_v10, %v16158_v18 }
 0x654   :  { %v2318_v14 = vadd.f32 %v2267_v13, %v2069_v46  ;;  %v16185_v13 = vld [vmem:[#allocation13_spill] sm:$0xff] }
 0x655   :  { %v3066_v51 = vadd.f32 %v10121_v38, %v2817_v53  ;;  %v3512_v38 = vsel %vm3508_vm12, %v3457_v45, %v10207_v49  ;;  %v16186_v46 = vld [vmem:[#allocation21_spill] sm:$0xff] }
 0x656   :  { %v2567_v17 = vadd.f32 %v2516_v56, %v2318_v14 }
 0x657   :  { %v3315_v60 = vadd.f32 %v10205_v61, %v3066_v51  ;;  %v325_v61 = vadd.f32 %v16185_v13, %v245_v4  ;;  %v1664_v4 = vmul.f32 %v16184_v10, %v16161_v30 }
 0x658   :  { %2006 = vrot.lane.b32.xlu1 %v1914_v41, %s8040_s25  ;;  %v2816_v52 = vadd.f32 %v2765_v63, %v2567_v17  ;;  %v16187_v63 = vld [vmem:[#allocation57_spill] sm:$0xff] }
 0x659   :  { %2008 = vrot.lane.b32.xlu2 %v1915_v42, %s8040_s25  ;;  %1506 = vrot.lane.b32.xlu0 %v1415_v21, %s8038_s23  ;;  %v3564_v22 = vadd.f32 %v10207_v49, %v3315_v60  ;;  %v574_v42 = vadd.f32 %v16186_v46, %v325_v61  ;;  %v244_v49 = vmul.f32 %v8252_v35, %v16183_v31  ;;  %v16191_v61 = vld [vmem:[#allocation109_spill] sm:$0xff] }
 0x65a   :  { %v10337_v26 = vpop.permute.xlu1 %3203  ;;  %v3065_v36 = vadd.f32 %v3014_v43, %v2816_v52  ;;  %v16188_v52 = vld [vmem:[#allocation170_spill] sm:$0xff] }
 0x65b   :  { %v10340_v32 = vpop.permute.xlu2 %2697  ;;  %v10342_v11 = vpop.permute.xlu0 %2703  ;;  %v823_v17 = vadd.f32 %v16187_v63, %v574_v42  ;;  %v2163_v60 = vmul.f32 %v16188_v52, %v16158_v18 }
 0x65c   :  { %v3314_v40 = vadd.f32 %v3263_v27, %v3065_v36  ;;  %v16189_v27 = vld [vmem:[#allocation84_spill] sm:$0xff] }
 0x65d   :  { %v1072_v33 = vadd.f32 %v16189_v27, %v823_v17 }
 0x65e   :  { %v3563_v21 = vadd.f32 %v3512_v38, %v3314_v40  ;;  %v324_v38 = vadd.f32 %v16185_v13, %v244_v49  ;;  %v16192_v40 = vld [vmem:[#allocation50_spill] sm:$0xff] }
 0x65f   :  { %v16195_v49 = vld [vmem:[#allocation114_spill] sm:$0xff] }
 0x660   :  { %2510 = vrot.lane.b32.xlu1 %v2415_v0, %s8042_s27  ;;  %v2164_v0 = vmul.f32 %v16188_v52, %v16161_v30  ;;  %v16196_v52 = vld [vmem:[#allocation160_spill] sm:$0xff] }
 0x661   :  { %1753 = vrot.lane.b32.xlu2 %v1663_v15, %s8039_s22  ;;  %2508 = vrot.lane.b32.xlu0 %v2414_v48, %s8042_s27  ;;  %v16190_v15 = vld [vmem:[#allocation26_spill] sm:$0xff] }
 0x662   :  { %v3708_v41 = vpop.permute.xlu1 %3707  ;;  %v523_v48 = vsel %vm520_vm0, %v16190_v15, %v16186_v46  ;;  %v16198_v15 = vld [vmem:[#allocation146_spill] sm:$0xff] }
 0x663   :  { %v3813_v56 = vadd.f32 %v3708_v41, %v3564_v22  ;;  %v10367_v14 = vpop.permute.xlu2 %3201  ;;  %v3706_v53 = vpop.permute.xlu0 %3705  ;;  %v1321_v22 = vadd.f32 %v16191_v61, %v1072_v33  ;;  %v573_v42 = vadd.f32 %v523_v48, %v324_v38 }
 0x664   :  { %v3761_v45 = vsel %vm3757_vm13, %v3706_v53, %v3708_v41  ;;  %v772_v41 = vsel %vm769_vm1, %v16192_v40, %v16187_v63  ;;  %v1270_v63 = vsel %vm1267_vm3, %v16195_v49, %v16191_v61  ;;  %v1768_v61 = vsel %vm1765_vm5, %v9851_v19, %v9847_v47 }
 0x665   :  { %v3845_v51 = vmax.f32 %v3813_v56, 0.0  ;;  %v3812_v43 = vadd.f32 %v3761_v45, %v3563_v21  ;;  %v16193_v21 = vld [vmem:[#allocation156_spill] sm:$0xff]  ;;  %v16194_v45 = vld [vmem:[#allocation85_spill] sm:$0xff] }
 0x666   :  { %v1570_v46 = vadd.f32 %v16193_v21, %v1321_v22  ;;  %v1021_v17 = vsel %vm1018_vm2, %v16194_v45, %v16189_v27  ;;  %v1519_v27 = vsel %vm1516_vm4, %v16198_v15, %v16193_v21 }
 0x667   :  { %7732 = vmatpush.xpose.msk.msra.mxu1 %vm3757_vm13, %v3845_v51  ;;  %v3844_v36 = vmax.f32 %v3812_v43, 0.0  ;;  %v822_v51 = vadd.f32 %v772_v41, %v573_v42 }
 0x668   :  { %2255 = vrot.lane.b32.xlu1 %v2163_v60, %s8041_s26  ;;  %v1819_v43 = vadd.f32 %v9847_v47, %v1570_v46  ;;  %v2664_v60 = vmul.f32 %v16196_v52, %v16161_v30  ;;  %v2017_v46 = vsel %vm2014_vm6, %v9934_v6, %v9849_v23  ;;  %v16199_v47 = vld [vmem:[#allocation174_spill] sm:$0xff] }
 0x669   :  { %2257 = vrot.lane.b32.xlu2 %v2164_v0, %s8041_s26  ;;  %1755 = vrot.lane.b32.xlu0 %v1664_v4, %s8039_s22  ;;  %v1071_v33 = vadd.f32 %v1021_v17, %v822_v51  ;;  %v16197_v0 = vld [vmem:[#allocation143_spill] sm:$0xff]  ;;  %v2266_v51 = vsel %vm2263_vm7, %v9936_v24, %v10030_v16  ;;  %v1912_v19 = vmul.f32 %v16199_v47, %v16158_v18 }
 0x66a   :  { %3956 = vmatpush.xpose.msra.mxu0 %v3844_v36  ;;  %v10392_v10 = vpop.permute.xlu1 %2950  ;;  %v1412_v4 = vmul.f32 %v16197_v0, %v16158_v18  ;;  %v2663_v36 = vmul.f32 %v16196_v52, %v16158_v18  ;;  %v2068_v38 = vadd.f32 %v9849_v23, %v1819_v43  ;;  %v1913_v49 = vmul.f32 %v16199_v47, %v16161_v30 }
 0x66b   :  { %v10395_v56 = vpop.permute.xlu2 %2946  ;;  %v10397_v53 = vpop.permute.xlu0 %2450  ;;  %v1320_v48 = vadd.f32 %v1270_v63, %v1071_v33  ;;  %v1413_v63 = vmul.f32 %v16197_v0, %v16161_v30  ;;  %v2515_v23 = vsel %vm2512_vm8, %v10103_v58, %v10099_v9 }
 0x66c   :  { %v2317_v41 = vadd.f32 %v10030_v16, %v2068_v38  ;;  %v16200_v16 = vld [vmem:[#allocation10_spill] sm:$0xff] }
 0x66d   :  { %v1569_v40 = vadd.f32 %v1519_v27, %v1320_v48  ;;  %v243_v24 = vmul.f32 %v8268_v44, %v16200_v16  ;;  %v3013_v27 = vsel %vm3010_vm10, %v10177_v3, %v10282_v39  ;;  %v16202_v48 = vld [vmem:[#allocation7_spill] sm:$0xff] }
 0x66e   :  { %v2566_v17 = vadd.f32 %v10099_v9, %v2317_v41  ;;  %v241_v38 = vmul.f32 %v8268_v44, %v16202_v48  ;;  %v16205_v44 = vld [vmem:[#allocation163_spill] sm:$0xff] }
 0x66f   :  { %v1818_v45 = vadd.f32 %v1768_v61, %v1569_v40  ;;  %v242_v61 = vmul.f32 %v8252_v35, %v16200_v16  ;;  %v16203_v40 = vld [vmem:[#allocation27_spill] sm:$0xff] }
 0x670   :  { %2759 = vrot.lane.b32.xlu1 %v2664_v60, %s8043_s5  ;;  %v2815_v52 = vadd.f32 %v10101_v5, %v2566_v17  ;;  %v2764_v60 = vsel %vm2761_vm9, %v10175_v1, %v10101_v5  ;;  %v240_v5 = vmul.f32 %v8252_v35, %v16202_v48  ;;  %v16206_v35 = vld [vmem:[#allocation20_spill] sm:$0xff]  ;;  %v16268_v48 = vld [vmem:[#allocation17_spill] sm:$0xff] }
 0x671   :  { %1500 = vrot.lane.b32.xlu2 %v1412_v4, %s8038_s23  ;;  %2757 = vrot.lane.b32.xlu0 %v2663_v36, %s8043_s5  ;;  %v2067_v43 = vadd.f32 %v2017_v46, %v1818_v45  ;;  %v16201_v36 = vld [vmem:[#allocation14_spill] sm:$0xff]  ;;  %v3262_v46 = vsel %vm3259_vm11, %v10337_v26, %v10254_v57  ;;  %v16204_v45 = vld [vmem:[#allocation173_spill] sm:$0xff] }
 0x672   :  { %v3455_v22 = vpop.permute.xlu1 %3454  ;;  %v3064_v9 = vadd.f32 %v10282_v39, %v2815_v52  ;;  %v323_v15 = vadd.f32 %v16201_v36, %v243_v24  ;;  %v2413_v17 = vmul.f32 %v16204_v45, %v16161_v30  ;;  %v2412_v47 = vmul.f32 %v16204_v45, %v16158_v18  ;;  %v16209_v24 = vld [vmem:[#allocation54_spill] sm:$0xff]  ;;  %v16212_v45 = vld [vmem:[#allocation81_spill] sm:$0xff] }
 0x673   :  { %v10423_v42 = vpop.permute.xlu2 %3450  ;;  %v3453_v21 = vpop.permute.xlu0 %3452  ;;  %v2316_v6 = vadd.f32 %v2266_v51, %v2067_v43  ;;  %v2912_v51 = vmul.f32 %v16205_v44, %v16158_v18  ;;  %v16207_v43 = vld [vmem:[#allocation53_spill] sm:$0xff] }
 0x674   :  { %v572_v41 = vadd.f32 %v16203_v40, %v323_v15  ;;  %v3313_v39 = vadd.f32 %v10254_v57, %v3064_v9  ;;  %v3511_v26 = vsel %vm3508_vm12, %v3453_v21, %v3455_v22 }
 0x675   :  { %v2565_v0 = vadd.f32 %v2515_v23, %v2316_v6  ;;  %v16208_v6 = vld [vmem:[#allocation4_spill] sm:$0xff] }
 0x676   :  { %v3562_v57 = vadd.f32 %v3455_v22, %v3313_v39  ;;  %v321_v52 = vadd.f32 %v16208_v6, %v241_v38  ;;  %v320_v21 = vadd.f32 %v16208_v6, %v240_v5 }
 0x677   :  { %v2814_v1 = vadd.f32 %v2764_v60, %v2565_v0  ;;  %v771_v60 = vsel %vm769_vm1, %v16209_v24, %v16207_v43  ;;  %v16210_v0 = vld [vmem:[#allocation79_spill] sm:$0xff] }
 0x678   :  { %2002 = vrot.lane.b32.xlu1 %v1912_v19, %s8040_s25  ;;  %v522_v19 = vsel %vm520_vm0, %v16206_v35, %v16203_v40  ;;  %v1020_v38 = vsel %vm1018_vm2, %v16212_v45, %v16210_v0  ;;  %v16221_v45 = vld [vmem:[#allocation82_spill] sm:$0xff] }
 0x679   :  { %2004 = vrot.lane.b32.xlu2 %v1913_v49, %s8040_s25  ;;  %1502 = vrot.lane.b32.xlu0 %v1413_v63, %s8038_s23  ;;  %v3063_v3 = vadd.f32 %v3013_v27, %v2814_v1  ;;  %v821_v49 = vadd.f32 %v16207_v43, %v572_v41  ;;  %v322_v63 = vadd.f32 %v16201_v36, %v242_v61  ;;  %v16211_v41 = vld [vmem:[#allocation23_spill] sm:$0xff]  ;;  %v16215_v43 = vld [vmem:[#allocation49_spill] sm:$0xff] }
 0x67a   :  { %v10450_v33 = vpop.permute.xlu1 %3199 }
 0x67b   :  { %v10453_v58 = vpop.permute.xlu2 %3697  ;;  %v10455_v4 = vpop.permute.xlu0 %2699  ;;  %v3312_v23 = vadd.f32 %v3262_v46, %v3063_v3  ;;  %v1070_v9 = vadd.f32 %v16210_v0, %v821_v49  ;;  %v571_v27 = vadd.f32 %v522_v19, %v322_v63  ;;  %v570_v46 = vadd.f32 %v16211_v41, %v321_v52  ;;  %v16218_v52 = vld [vmem:[#allocation177_spill] sm:$0xff] }
 0x67c   :  { %v1661_v24 = vmul.f32 %v16218_v52, %v16158_v18 }
 0x67d   :  { %v3561_v1 = vadd.f32 %v3511_v26, %v3312_v23  ;;  %v819_v49 = vadd.f32 %v16215_v43, %v570_v46  ;;  %v16216_v26 = vld [vmem:[#allocation108_spill] sm:$0xff] }
 0x67e   :  { %v16217_v23 = vld [vmem:[#allocation152_spill] sm:$0xff] }
 0x680   :  { %2506 = vrot.lane.b32.xlu1 %v2413_v17, %s8042_s27  ;;  %v16213_v17 = vld [vmem:[#allocation115_spill] sm:$0xff] }
 0x681   :  { %3006 = vrot.lane.b32.xlu2 %v2912_v51, %s8044_s0  ;;  %2504 = vrot.lane.b32.xlu0 %v2412_v47, %s8042_s27  ;;  %v1319_v3 = vadd.f32 %v16213_v17, %v1070_v9  ;;  %v16214_v51 = vld [vmem:[#allocation25_spill] sm:$0xff]  ;;  %v820_v47 = vadd.f32 %v771_v60, %v571_v27  ;;  %v1269_v63 = vsel %vm1267_vm3, %v16216_v26, %v16213_v17  ;;  %v16219_v27 = vld [vmem:[#allocation51_spill] sm:$0xff] }
 0x682   :  { %v3704_v15 = vpop.permute.xlu1 %3703  ;;  %v521_v5 = vsel %vm520_vm0, %v16214_v51, %v16211_v41  ;;  %v1662_v9 = vmul.f32 %v16218_v52, %v16161_v30  ;;  %v2913_v60 = vmul.f32 %v16205_v44, %v16161_v30  ;;  %v16222_v44 = vld [vmem:[#allocation78_spill] sm:$0xff]  ;;  %v2016_v26 = vsel %vm2014_vm6, %v10083_v2, %v9998_v20 }
 0x683   :  { %v3811_v61 = vadd.f32 %v3704_v15, %v3562_v57  ;;  %v10493_v40 = vpop.permute.xlu2 %3446  ;;  %v3702_v22 = vpop.permute.xlu0 %3701  ;;  %v1568_v57 = vadd.f32 %v16217_v23, %v1319_v3  ;;  %v1069_v0 = vadd.f32 %v1020_v38, %v820_v47  ;;  %v569_v46 = vadd.f32 %v521_v5, %v320_v21  ;;  %v16227_v2 = vld [vmem:[#allocation166_spill] sm:$0xff] }
 0x684   :  { %v3760_v39 = vsel %vm3757_vm13, %v3702_v22, %v3704_v15  ;;  %v1068_v38 = vadd.f32 %v16221_v45, %v819_v49  ;;  %v1019_v3 = vsel %vm1018_vm2, %v16222_v44, %v16221_v45  ;;  %v1766_v45 = vsel %vm1765_vm5, %v10149_v59, %v10145_v37 }
 0x685   :  { %v3843_v35 = vmax.f32 %v3811_v61, 0.0  ;;  %v3810_v19 = vadd.f32 %v3760_v39, %v3561_v1  ;;  %v770_v1 = vsel %vm769_vm1, %v16219_v27, %v16215_v43  ;;  %v16220_v61 = vld [vmem:[#allocation153_spill] sm:$0xff]  ;;  %v1817_v41 = vadd.f32 %v9996_v28, %v1568_v57 }
 0x686   :  { %v1518_v22 = vsel %vm1516_vm4, %v16220_v61, %v16217_v23  ;;  %v1318_v17 = vadd.f32 %v1269_v63, %v1069_v0  ;;  %v1767_v39 = vsel %vm1765_vm5, %v10000_v54, %v9996_v28  ;;  %v818_v47 = vadd.f32 %v770_v1, %v569_v46  ;;  %v16224_v23 = vld [vmem:[#allocation145_spill] sm:$0xff]  ;;  %v16228_v61 = vld [vmem:[#allocation148_spill] sm:$0xff] }
 0x687   :  { %7733 = vmatpush.xpose.msk.msra.mxu1 %vm3757_vm13, %v3843_v35  ;;  %v3842_v15 = vmax.f32 %v3810_v19, 0.0  ;;  %v16223_v35 = vld [vmem:[#allocation111_spill] sm:$0xff]  ;;  %v2066_v49 = vadd.f32 %v9998_v20, %v1817_v41  ;;  %v16225_v54 = vld [vmem:[#allocation113_spill] sm:$0xff]  ;;  %v2661_v27 = vmul.f32 %v16227_v2, %v16158_v18 }
 0x688   :  { %1749 = vrot.lane.b32.xlu1 %v1661_v24, %s8039_s22  ;;  %v1317_v21 = vadd.f32 %v16223_v35, %v1068_v38  ;;  %v1567_v5 = vadd.f32 %v1518_v22, %v1318_v17  ;;  %v1067_v63 = vadd.f32 %v1019_v3, %v818_v47  ;;  %v1268_v52 = vsel %vm1267_vm3, %v16225_v54, %v16223_v35  ;;  %v16229_v35 = vld [vmem:[#allocation35_spill] sm:$0xff] }
 0x689   :  { %1751 = vrot.lane.b32.xlu2 %v1662_v9, %s8039_s22  ;;  %3008 = vrot.lane.b32.xlu0 %v2913_v60, %s8044_s0  ;;  %v2265_v24 = vsel %vm2263_vm7, %v10085_v8, %v10179_v62  ;;  %v2315_v0 = vadd.f32 %v10179_v62, %v2066_v49  ;;  %v16226_v9 = vld [vmem:[#allocation176_spill] sm:$0xff]  ;;  %v1517_v22 = vsel %vm1516_vm4, %v16228_v61, %v16224_v23 }
 0x68a   :  { %3957 = vmatpush.xpose.msra.mxu0 %v3842_v15  ;;  %v3449_v51 = vpop.permute.xlu1 %3448  ;;  %v1566_v57 = vadd.f32 %v16224_v23, %v1317_v21  ;;  %v1816_v28 = vadd.f32 %v1767_v39, %v1567_v5  ;;  %v2162_v60 = vmul.f32 %v16226_v9, %v16161_v30  ;;  %v2161_v1 = vmul.f32 %v16226_v9, %v16158_v18 }
 0x68b   :  { %v10534_v19 = vpop.permute.xlu2 %1512  ;;  %v10536_v43 = vpop.permute.xlu0 %2948  ;;  %v2564_v8 = vadd.f32 %v10251_v34, %v2315_v0  ;;  %v2514_v62 = vsel %vm2512_vm8, %v10256_v55, %v10251_v34  ;;  %v1316_v41 = vadd.f32 %v1268_v52, %v1067_v63  ;;  %v2763_v38 = vsel %vm2761_vm9, %v10234_v29, %v10342_v11  ;;  %v16230_v63 = vld [vmem:[#allocation180_spill] sm:$0xff] }
 0x68c   :  { %v2065_v15 = vadd.f32 %v2016_v26, %v1816_v28  ;;  %v1815_v20 = vadd.f32 %v10145_v37, %v1566_v57  ;;  %v2015_v21 = vsel %vm2014_vm6, %v16229_v35, %v10147_v12  ;;  %v3012_v37 = vsel %vm3010_vm10, %v10392_v10, %v10310_v7 }
 0x68d   :  { %v2813_v17 = vadd.f32 %v10342_v11, %v2564_v8  ;;  %v1565_v34 = vadd.f32 %v1517_v22, %v1316_v41  ;;  %v2662_v5 = vmul.f32 %v16227_v2, %v16161_v30  ;;  %v2264_v49 = vsel %vm2263_vm7, %v10312_v25, %v10307_v50 }
 0x68e   :  { %v2314_v46 = vadd.f32 %v2265_v24, %v2065_v15  ;;  %v2064_v55 = vadd.f32 %v10147_v12, %v1815_v20  ;;  %v3261_v12 = vsel %vm3259_vm11, %v10450_v33, %v10367_v14  ;;  %v3161_v10 = vmul.f32 %v16230_v63, %v16158_v18 }
 0x68f   :  { %v1814_v59 = vadd.f32 %v1766_v45, %v1565_v34  ;;  %v3062_v26 = vadd.f32 %v10310_v7, %v2813_v17  ;;  %v3162_v54 = vmul.f32 %v16230_v63, %v16161_v30  ;;  %v3510_v25 = vsel %vm3508_vm12, %v3449_v51, %v10423_v42  ;;  %v16233_v45 = vld [vmem:[#allocation179_spill] sm:$0xff] }
 0x690   :  { %2253 = vrot.lane.b32.xlu1 %v2162_v60, %s8041_s26  ;;  %v2563_v3 = vadd.f32 %v2514_v62, %v2314_v46  ;;  %v2313_v29 = vadd.f32 %v10307_v50, %v2064_v55  ;;  %v16231_v50 = vld [vmem:[#allocation92_spill] sm:$0xff]  ;;  %v16232_v62 = vld [vmem:[#allocation141_spill] sm:$0xff] }
 0x691   :  { %2753 = vrot.lane.b32.xlu2 %v2661_v27, %s8043_s5  ;;  %2251 = vrot.lane.b32.xlu0 %v2161_v1, %s8041_s26  ;;  %v2063_v23 = vadd.f32 %v2015_v21, %v1814_v59  ;;  %v3311_v52 = vadd.f32 %v10367_v14, %v3062_v26  ;;  %v2513_v7 = vsel %vm2512_vm8, %v16231_v50, %v10397_v53 }
 0x692   :  { %v3198_v44 = vpop.permute.xlu1 %3197  ;;  %v2812_v11 = vadd.f32 %v2763_v38, %v2563_v3  ;;  %v2562_v28 = vadd.f32 %v10397_v53, %v2313_v29  ;;  %v2762_v14 = vsel %vm2761_vm9, %v10340_v32, %v10455_v4  ;;  %v3011_v27 = vsel %vm3010_vm10, %v10395_v56, %v10536_v43  ;;  %v16234_v29 = vld [vmem:[#allocation169_spill] sm:$0xff] }
 0x693   :  { %v10575_v39 = vpop.permute.xlu2 %1763  ;;  %v3196_v47 = vpop.permute.xlu0 %3195  ;;  %v2312_v33 = vadd.f32 %v2264_v49, %v2063_v23  ;;  %v3560_v9 = vadd.f32 %v10423_v42, %v3311_v52  ;;  %v1411_v41 = vmul.f32 %v16232_v62, %v16161_v30  ;;  %v1910_v38 = vmul.f32 %v16233_v45, %v16158_v18 }
 0x694   :  { %v3061_v57 = vadd.f32 %v3012_v37, %v2812_v11  ;;  %v2811_v0 = vadd.f32 %v10455_v4, %v2562_v28  ;;  %v3260_v32 = vsel %vm3259_vm11, %v3196_v47, %v3198_v44  ;;  %v1410_v56 = vmul.f32 %v16232_v62, %v16158_v18 }
 0x695   :  { %v2561_v60 = vadd.f32 %v2513_v7, %v2312_v33  ;;  %v2410_v11 = vmul.f32 %v16234_v29, %v16158_v18 }
 0x696   :  { %v3310_v24 = vadd.f32 %v3261_v12, %v3061_v57  ;;  %v3060_v51 = vadd.f32 %v10536_v43, %v2811_v0  ;;  %v16236_v57 = vld [vmem:[#allocation182_spill] sm:$0xff] }
 0x697   :  { %v2810_v61 = vadd.f32 %v2762_v14, %v2561_v60  ;;  %v3410_v28 = vmul.f32 %v16236_v57, %v16158_v18  ;;  %v3411_v0 = vmul.f32 %v16236_v57, %v16161_v30  ;;  %v16239_v60 = vld [vmem:[#allocation186_spill] sm:$0xff] }
 0x698   :  { %3255 = vrot.lane.b32.xlu1 %v3161_v10, %s8045_s28  ;;  %v3559_v15 = vadd.f32 %v3510_v25, %v3310_v24  ;;  %v3309_v22 = vadd.f32 %v3198_v44, %v3060_v51  ;;  %v16235_v10 = vld [vmem:[#allocation183_spill] sm:$0xff]  ;;  %v16238_v25 = vld [vmem:[#allocation172_spill] sm:$0xff]  ;;  %v16240_v51 = vld [vmem:[#allocation185_spill] sm:$0xff] }
 0x699   :  { %3257 = vrot.lane.b32.xlu2 %v3162_v54, %s8045_s28  ;;  %2755 = vrot.lane.b32.xlu0 %v2662_v5, %s8043_s5  ;;  %v3059_v46 = vadd.f32 %v3011_v27, %v2810_v61  ;;  %v2411_v5 = vmul.f32 %v16234_v29, %v16161_v30  ;;  %v2911_v23 = vmul.f32 %v16235_v10, %v16161_v30 }
 0x69a   :  { %v3445_v53 = vpop.permute.xlu1 %3444  ;;  %v3558_v44 = vadd.f32 %v10493_v40, %v3309_v22  ;;  %v2910_v54 = vmul.f32 %v16235_v10, %v16158_v18  ;;  %v1659_v33 = vmul.f32 %v16238_v25, %v16158_v18  ;;  %v1660_v24 = vmul.f32 %v16238_v25, %v16161_v30  ;;  %v16242_v22 = vld [vmem:[#allocation175_spill] sm:$0xff] }
 0x69b   :  { %v10613_v20 = vpop.permute.xlu2 %2010  ;;  %v3700_v2 = vpop.permute.xlu0 %3699  ;;  %v3308_v17 = vadd.f32 %v3260_v32, %v3059_v46  ;;  %v2159_v27 = vmul.f32 %v16239_v60, %v16158_v18  ;;  %v3160_v32 = vmul.f32 %v16242_v22, %v16161_v30 }
 0x69c   :  { %v3809_v1 = vadd.f32 %v3700_v2, %v3560_v9  ;;  %v3759_v42 = vsel %vm3757_vm13, %v10453_v58, %v3700_v2  ;;  %v3509_v58 = vsel %vm3508_vm12, %v3445_v53, %v10493_v40  ;;  %v1911_v40 = vmul.f32 %v16233_v45, %v16161_v30  ;;  %v16244_v45 = vld [vmem:[#allocation189_spill] sm:$0xff] }
 0x69d   :  { %v3808_v8 = vadd.f32 %v3759_v42, %v3559_v15  ;;  %v3557_v55 = vadd.f32 %v3509_v58, %v3308_v17  ;;  %v2160_v15 = vmul.f32 %v16239_v60, %v16161_v30  ;;  %v2659_v2 = vmul.f32 %v16240_v51, %v16158_v18 }
 0x69e   :  { %v3841_v4 = vmax.f32 %v3809_v1, 0.0  ;;  %v3659_v58 = vmul.f32 %v16244_v45, %v16158_v18 }
 0x69f   :  { %v3840_v43 = vmax.f32 %v3808_v8, 0.0  ;;  %v3159_v8 = vmul.f32 %v16242_v22, %v16158_v18 }
 0x6a0   :  { %7734 = vmatpush.xpose.msk.msra.mxu1 %vm3757_vm13, %v3841_v4  ;;  %1498 = vrot.lane.b32.xlu1 %v1411_v41, %s8038_s23  ;;  %v2660_v4 = vmul.f32 %v16240_v51, %v16161_v30  ;;  %v16252_v51 = vld [vmem:[#allocation181_spill] sm:$0xff] }
 0x6a1   :  { %1998 = vrot.lane.b32.xlu2 %v1910_v38, %s8040_s25  ;;  %1496 = vrot.lane.b32.xlu0 %v1410_v56, %s8038_s23  ;;  %v3660_v38 = vmul.f32 %v16244_v45, %v16161_v30  ;;  %v16245_v56 = vld [vmem:[#allocation139_spill] sm:$0xff] }
 0x6a2   :  { %3958 = vmatpush.xpose.msra.mxu0 %v3840_v43  ;;  %v3696_v34 = vpop.permute.xlu1 %3695  ;;  %v1408_v43 = vmul.f32 %v16245_v56, %v16158_v18 }
 0x6a3   :  { %v3807_v3 = vadd.f32 %v3696_v34, %v3558_v44  ;;  %v10634_v47 = vpop.permute.xlu2 %1759  ;;  %v3694_v35 = vpop.permute.xlu0 %3693 }
 0x6a4   :  { %v3758_v21 = vsel %vm3757_vm13, %v3694_v35, %v3696_v34 }
 0x6a5   :  { %v3839_v37 = vmax.f32 %v3807_v3, 0.0  ;;  %v3806_v59 = vadd.f32 %v3758_v21, %v3557_v55  ;;  %v16246_v55 = vld [vmem:[#allocation188_spill] sm:$0xff]  ;;  %v1409_v21 = vmul.f32 %v16245_v56, %v16161_v30 }
 0x6a6   :  { %v1908_v3 = vmul.f32 %v16246_v55, %v16158_v18  ;;  %v1909_v35 = vmul.f32 %v16246_v55, %v16161_v30 }
 0x6a7   :  { %7735 = vmatpush.xpose.msk.msra.mxu1 %vm3757_vm13, %v3839_v37  ;;  %v3838_v49 = vmax.f32 %v3806_v59, 0.0 }
 0x6a8   :  { %2500 = vrot.lane.b32.xlu1 %v2410_v11, %s8042_s27  ;;  %v16248_v11 = vld [vmem:[#allocation178_spill] sm:$0xff] }
 0x6a9   :  { %2502 = vrot.lane.b32.xlu2 %v2411_v5, %s8042_s27  ;;  %2000 = vrot.lane.b32.xlu0 %v1911_v40, %s8040_s25  ;;  %v2409_v5 = vmul.f32 %v16248_v11, %v16161_v30  ;;  %v16249_v40 = vld [vmem:[#allocation192_spill] sm:$0xff]  ;;  %v2408_v10 = vmul.f32 %v16248_v11, %v16158_v18 }
 0x6aa   :  { %3959 = vmatpush.xpose.msra.mxu0 %v3838_v49  ;;  %v10647_v26 = vpop.permute.xlu1 %1761  ;;  %v2908_v49 = vmul.f32 %v16249_v40, %v16158_v18 }
 0x6ab   :  { %v10649_v12 = vpop.permute.xlu2 %1504  ;;  %v10651_v63 = vpop.permute.xlu0 %1514 }
 0x6b0   :  { %3004 = vrot.lane.b32.xlu1 %v2911_v23, %s8044_s0 }
 0x6b1   :  { %3504 = vrot.lane.b32.xlu2 %v3410_v28, %s8046_s29  ;;  %3002 = vrot.lane.b32.xlu0 %v2910_v54, %s8044_s0  ;;  %v16250_v54 = vld [vmem:[#allocation191_spill] sm:$0xff] }
 0x6b2   :  { %v10662_v52 = vpop.permute.xlu1 %1510  ;;  %v3408_v25 = vmul.f32 %v16250_v54, %v16158_v18 }
 0x6b3   :  { %v10664_v50 = vpop.permute.xlu2 %2008  ;;  %v10666_v7 = vpop.permute.xlu0 %1508 }
 0x6b4   :  { %16237 = vst [vmem:[#allocation60_spill] sm:$0xff] %v10664_v50 }
 0x6b8   :  { %1745 = vrot.lane.b32.xlu1 %v1659_v33, %s8039_s22  ;;  %v3409_v33 = vmul.f32 %v16250_v54, %v16161_v30 }
 0x6b9   :  { %1747 = vrot.lane.b32.xlu2 %v1660_v24, %s8039_s22  ;;  %3506 = vrot.lane.b32.xlu0 %v3411_v0, %s8046_s29  ;;  %v2909_v24 = vmul.f32 %v16249_v40, %v16161_v30 }
 0x6ba   :  { %v10677_v9 = vpop.permute.xlu1 %1757 }
 0x6bb   :  { %v10679_v14 = vpop.permute.xlu2 %1753  ;;  %v10681_v53 = vpop.permute.xlu0 %2012 }
 0x6c0   :  { %2249 = vrot.lane.b32.xlu1 %v2160_v15, %s8041_s26 }
 0x6c1   :  { %2749 = vrot.lane.b32.xlu2 %v2659_v2, %s8043_s5  ;;  %2247 = vrot.lane.b32.xlu0 %v2159_v27, %s8041_s26  ;;  %v1658_v2 = vmul.f32 %v16252_v51, %v16161_v30  ;;  %v16253_v27 = vld [vmem:[#allocation195_spill] sm:$0xff] }
 0x6c2   :  { %v10692_v1 = vpop.permute.xlu1 %2261  ;;  %v2157_v22 = vmul.f32 %v16253_v27, %v16158_v18 }
 0x6c3   :  { %v10694_v42 = vpop.permute.xlu2 %2257  ;;  %v10696_v61 = vpop.permute.xlu0 %2259 }
 0x6c4   :  { %16241 = vst [vmem:[#allocation123_spill] sm:$0xff] %v10694_v42 }
 0x6c8   :  { %3251 = vrot.lane.b32.xlu1 %v3159_v8, %s8045_s28  ;;  %v1657_v8 = vmul.f32 %v16252_v51, %v16158_v18 }
 0x6c9   :  { %3253 = vrot.lane.b32.xlu2 %v3160_v32, %s8045_s28  ;;  %2751 = vrot.lane.b32.xlu0 %v2660_v4, %s8043_s5 }
 0x6ca   :  { %v10707_v62 = vpop.permute.xlu1 %2006 }
 0x6cb   :  { %16243 = vst [vmem:[#allocation86_spill] sm:$0xff] %v10707_v62  ;;  %v10709_v41 = vpop.permute.xlu2 %1500  ;;  %v10711_v46 = vpop.permute.xlu0 %1506 }
 0x6d0   :  { %3755 = vrot.lane.b32.xlu1 %v3660_v38, %s8047_s1  ;;  %v16256_v38 = vld [vmem:[#allocation194_spill] sm:$0xff] }
 0x6d1   :  { %1492 = vrot.lane.b32.xlu2 %v1408_v43, %s8038_s23  ;;  %3753 = vrot.lane.b32.xlu0 %v3659_v58, %s8047_s1  ;;  %v2657_v56 = vmul.f32 %v16256_v38, %v16158_v18  ;;  %v2658_v43 = vmul.f32 %v16256_v38, %v16161_v30  ;;  %v2158_v58 = vmul.f32 %v16253_v27, %v16161_v30  ;;  %v16261_v38 = vld [vmem:[#allocation197_spill] sm:$0xff] }
 0x6d2   :  { %v10722_v17 = vpop.permute.xlu1 %2510 }
 0x6d3   :  { %v10724_v44 = vpop.permute.xlu2 %2004  ;;  %v10726_v34 = vpop.permute.xlu0 %2508 }
 0x6d8   :  { %1994 = vrot.lane.b32.xlu1 %v1908_v3, %s8040_s25 }
 0x6d9   :  { %1996 = vrot.lane.b32.xlu2 %v1909_v35, %s8040_s25  ;;  %1494 = vrot.lane.b32.xlu0 %v1409_v21, %s8038_s23  ;;  %v16257_v21 = vld [vmem:[#allocation184_spill] sm:$0xff] }
 0x6da   :  { %v10737_v37 = vpop.permute.xlu1 %2255  ;;  %v3158_v11 = vmul.f32 %v16257_v21, %v16161_v30 }
 0x6db   :  { %16247 = vst [vmem:[#allocation151_spill] sm:$0xff] %v10737_v37  ;;  %v10739_v59 = vpop.permute.xlu2 %3006  ;;  %v10741_v29 = vpop.permute.xlu0 %1755  ;;  %v16274_v37 = vld [vmem:[#allocation77_spill] sm:$0xff] }
 0x6e0   :  { %2498 = vrot.lane.b32.xlu1 %v2409_v5, %s8042_s27  ;;  %v16258_v5 = vld [vmem:[#allocation198_spill] sm:$0xff] }
 0x6e1   :  { %2998 = vrot.lane.b32.xlu2 %v2908_v49, %s8044_s0  ;;  %2496 = vrot.lane.b32.xlu0 %v2408_v10, %s8042_s27  ;;  %v3657_v40 = vmul.f32 %v16258_v5, %v16158_v18  ;;  %v3157_v49 = vmul.f32 %v16257_v21, %v16158_v18  ;;  %v1906_v21 = vmul.f32 %v16261_v38, %v16158_v18 }
 0x6e2   :  { %v10752_v23 = vpop.permute.xlu1 %2759 }
 0x6e3   :  { %v10754_v57 = vpop.permute.xlu2 %1751  ;;  %v10756_v28 = vpop.permute.xlu0 %2757 }
 0x6e8   :  { %3500 = vrot.lane.b32.xlu1 %v3408_v25, %s8046_s29 }
 0x6e9   :  { %3502 = vrot.lane.b32.xlu2 %v3409_v33, %s8046_s29  ;;  %3000 = vrot.lane.b32.xlu0 %v2909_v24, %s8044_s0  ;;  %v16259_v33 = vld [vmem:[#allocation140_spill] sm:$0xff] }
 0x6ea   :  { %v10767_v0 = vpop.permute.xlu1 %2002  ;;  %v1406_v24 = vmul.f32 %v16259_v33, %v16158_v18  ;;  %v1407_v51 = vmul.f32 %v16259_v33, %v16161_v30 }
 0x6eb   :  { %v10769_v60 = vpop.permute.xlu2 %2753  ;;  %v10771_v15 = vpop.permute.xlu0 %1502 }
 0x6ec   :  { %16251 = vst [vmem:[#allocation124_spill] sm:$0xff] %v10769_v60 }
 0x6f0   :  { %1743 = vrot.lane.b32.xlu1 %v1658_v2, %s8039_s22  ;;  %v3658_v2 = vmul.f32 %v16258_v5, %v16161_v30 }
 0x6f1   :  { %2243 = vrot.lane.b32.xlu2 %v2157_v22, %s8041_s26  ;;  %1741 = vrot.lane.b32.xlu0 %v1657_v8, %s8039_s22 }
 0x6f2   :  { %v10782_v32 = vpop.permute.xlu1 %2506 }
 0x6f3   :  { %16254 = vst [vmem:[#allocation161_spill] sm:$0xff] %v10782_v32  ;;  %v10784_v4 = vpop.permute.xlu2 %3257  ;;  %v10786_v45 = vpop.permute.xlu0 %2504 }
 0x6f4   :  { %16255 = vst [vmem:[#allocation237_spill] sm:$0xff] %v10786_v45 }
 0x6f8   :  { %2745 = vrot.lane.b32.xlu1 %v2657_v56, %s8043_s5  ;;  %v1907_v56 = vmul.f32 %v16261_v38, %v16161_v30 }
 0x6f9   :  { %2747 = vrot.lane.b32.xlu2 %v2658_v43, %s8043_s5  ;;  %2245 = vrot.lane.b32.xlu0 %v2158_v58, %s8041_s26  ;;  %v16262_v43 = vld [vmem:[#allocation187_spill] sm:$0xff] }
 0x6fa   :  { %v10797_v55 = vpop.permute.xlu1 %1749  ;;  %v2406_v58 = vmul.f32 %v16262_v43, %v16158_v18 }
 0x6fb   :  { %v10799_v3 = vpop.permute.xlu2 %1998  ;;  %v10801_v35 = vpop.permute.xlu0 %3008 }
 0x700   :  { %3249 = vrot.lane.b32.xlu1 %v3158_v11, %s8045_s28 }
 0x701   :  { %3749 = vrot.lane.b32.xlu2 %v3657_v40, %s8047_s1  ;;  %3247 = vrot.lane.b32.xlu0 %v3157_v49, %s8045_s28  ;;  %v16263_v49 = vld [vmem:[#allocation201_spill] sm:$0xff] }
 0x702   :  { %v10812_v10 = vpop.permute.xlu1 %2253  ;;  %v2906_v33 = vmul.f32 %v16263_v49, %v16158_v18 }
 0x703   :  { %v10814_v54 = vpop.permute.xlu2 %2502  ;;  %v10816_v25 = vpop.permute.xlu0 %2251 }
 0x708   :  { %1488 = vrot.lane.b32.xlu1 %v1406_v24, %s8038_s23  ;;  %v2907_v24 = vmul.f32 %v16263_v49, %v16161_v30  ;;  %v16265_v49 = vld [vmem:[#allocation190_spill] sm:$0xff] }
 0x709   :  { %1490 = vrot.lane.b32.xlu2 %v1407_v51, %s8038_s23  ;;  %3751 = vrot.lane.b32.xlu0 %v3658_v2, %s8047_s1  ;;  %v2407_v51 = vmul.f32 %v16262_v43, %v16161_v30  ;;  %v1655_v6 = vmul.f32 %v16265_v49, %v16158_v18 }
 0x70a   :  { %v10827_v27 = vpop.permute.xlu1 %3255 }
 0x70b   :  { %v10829_v22 = vpop.permute.xlu2 %3504  ;;  %v10831_v8 = vpop.permute.xlu0 %2755 }
 0x70c   :  { %16260 = vst [vmem:[#allocation248_spill] sm:$0xff] %v10831_v8  ;;  %v16271_v8 = vld [vmem:[#allocation47_spill] sm:$0xff] }
 0x710   :  { %1992 = vrot.lane.b32.xlu1 %v1907_v56, %s8040_s25 }
 0x711   :  { %2492 = vrot.lane.b32.xlu2 %v2406_v58, %s8042_s27  ;;  %1990 = vrot.lane.b32.xlu0 %v1906_v21, %s8040_s25  ;;  %v16264_v58 = vld [vmem:[#allocation200_spill] sm:$0xff] }
 0x712   :  { %v10842_v11 = vpop.permute.xlu1 %1498  ;;  %v3407_v21 = vmul.f32 %v16264_v58, %v16161_v30  ;;  %v3406_v43 = vmul.f32 %v16264_v58, %v16158_v18 }
 0x713   :  { %v10844_v5 = vpop.permute.xlu2 %1747  ;;  %v10846_v40 = vpop.permute.xlu0 %1496 }
 0x718   :  { %2994 = vrot.lane.b32.xlu1 %v2906_v33, %s8044_s0  ;;  %v16266_v33 = vld [vmem:[#allocation11_spill] sm:$0xff] }
 0x719   :  { %2996 = vrot.lane.b32.xlu2 %v2907_v24, %s8044_s0  ;;  %2494 = vrot.lane.b32.xlu0 %v2407_v51, %s8042_s27  ;;  %v271_v24 = vmul.f32 %v16161_v30, %v16266_v33  ;;  %v270_v58 = vmul.f32 %v16158_v18, %v16266_v33 }
 0x71a   :  { %v10857_v2 = vpop.permute.xlu1 %2500 }
 0x71b   :  { %v10859_v38 = vpop.permute.xlu2 %2749  ;;  %v10861_v56 = vpop.permute.xlu0 %2000  ;;  %v351_v36 = vadd.f32 %v16268_v48, %v271_v24 }
 0x71d   :  { %v600_v45 = vadd.f32 %v16271_v8, %v351_v36  ;;  %v1656_v36 = vmul.f32 %v16265_v49, %v16161_v30 }
 0x71f   :  { %v849_v24 = vadd.f32 %v16274_v37, %v600_v45 }
 0x720   :  { %3498 = vrot.lane.b32.xlu1 %v3407_v21, %s8046_s29  ;;  %v16272_v21 = vld [vmem:[#allocation48_spill] sm:$0xff] }
 0x721   :  { %1737 = vrot.lane.b32.xlu2 %v1655_v6, %s8039_s22  ;;  %3496 = vrot.lane.b32.xlu0 %v3406_v43, %s8046_s29  ;;  %v536_v32 = vsel %vm520_vm0, %v16272_v21, %v16271_v8  ;;  %v16273_v6 = vld [vmem:[#allocation204_spill] sm:$0xff]  ;;  %v16276_v21 = vld [vmem:[#allocation107_spill] sm:$0xff] }
 0x722   :  { %v10874_v51 = vpop.permute.xlu1 %3004  ;;  %v2155_v43 = vmul.f32 %v16273_v6, %v16158_v18  ;;  %v1098_v42 = vadd.f32 %v16276_v21, %v849_v24  ;;  %v16280_v24 = vld [vmem:[#allocation203_spill] sm:$0xff] }
 0x723   :  { %16267 = vst [vmem:[#allocation241_spill] sm:$0xff] %v10874_v51  ;;  %v10877_v16 = vpop.permute.xlu2 %3253  ;;  %v10879_v60 = vpop.permute.xlu0 %3002  ;;  %v350_v51 = vadd.f32 %v16268_v48, %v270_v58  ;;  %v16277_v48 = vld [vmem:[#allocation102_spill] sm:$0xff] }
 0x724   :  { %16269 = vst [vmem:[#allocation24_spill] sm:$0xff] %v10877_v16  ;;  %v2156_v16 = vmul.f32 %v16273_v6, %v16161_v30  ;;  %v1034_v45 = vsel %vm1018_vm2, %v16277_v48, %v16276_v21  ;;  %v16278_v6 = vld [vmem:[#allocation137_spill] sm:$0xff]  ;;  %v2655_v21 = vmul.f32 %v16280_v24, %v16158_v18 }
 0x725   :  { %16270 = vst [vmem:[#allocation61_spill] sm:$0xff] %v10879_v60  ;;  %v16275_v60 = vld [vmem:[#allocation75_spill] sm:$0xff]  ;;  %v599_v8 = vadd.f32 %v536_v32, %v350_v51  ;;  %v1347_v62 = vadd.f32 %v16278_v6, %v1098_v42  ;;  %v16281_v42 = vld [vmem:[#allocation193_spill] sm:$0xff] }
 0x726   :  { %v785_v33 = vsel %vm769_vm1, %v16275_v60, %v16274_v37  ;;  %v16279_v60 = vld [vmem:[#allocation138_spill] sm:$0xff] }
 0x727   :  { %v848_v49 = vadd.f32 %v785_v33, %v599_v8  ;;  %v1283_v32 = vsel %vm1267_vm3, %v16279_v60, %v16278_v6  ;;  %v3155_v8 = vmul.f32 %v16281_v42, %v16158_v18  ;;  %v1781_v6 = vsel %vm1765_vm5, %v10647_v26, %v10575_v39 }
 0x728   :  { %2239 = vrot.lane.b32.xlu1 %v2155_v43, %s8041_s26  ;;  %v1532_v43 = vsel %vm1516_vm4, %v10534_v19, %v10651_v63  ;;  %v2030_v60 = vsel %vm2014_vm6, %v10613_v20, %v10681_v53  ;;  %v3156_v26 = vmul.f32 %v16281_v42, %v16161_v30  ;;  %v2528_v20 = vsel %vm2512_vm8, %v10726_v34, %v10722_v17  ;;  %v16284_v34 = vld [vmem:[#allocation2_spill] sm:$0xff] }
 0x729   :  { %2241 = vrot.lane.b32.xlu2 %v2156_v16, %s8041_s26  ;;  %1739 = vrot.lane.b32.xlu0 %v1656_v36, %s8039_s22  ;;  %v1097_v51 = vadd.f32 %v1034_v45, %v848_v49  ;;  %v1596_v16 = vadd.f32 %v10651_v63, %v1347_v62  ;;  %v2656_v36 = vmul.f32 %v16280_v24, %v16161_v30 }
 0x72a   :  { %v10905_v58 = vpop.permute.xlu1 %1745 }
 0x72b   :  { %v10908_v50 = vpop.permute.xlu2 %1492  ;;  %v3507_v37 = vpop.permute.xlu0 %3506  ;;  %v1346_v33 = vadd.f32 %v1283_v32, %v1097_v51  ;;  %v1845_v45 = vadd.f32 %v10575_v39, %v1596_v16  ;;  %v2279_v16 = vsel %vm2263_vm7, %v10696_v61, %v10692_v1  ;;  %v2777_v61 = vsel %vm2761_vm9, %v10756_v28, %v10752_v23 }
 0x72d   :  { %v1595_v48 = vadd.f32 %v1532_v43, %v1346_v33  ;;  %v2094_v63 = vadd.f32 %v10681_v53, %v1845_v45  ;;  %v16282_v43 = vld [vmem:[#allocation207_spill] sm:$0xff]  ;;  %v265_v45 = vmul.f32 %v16161_v30, %v16284_v34 }
 0x72e   :  { %v3655_v24 = vmul.f32 %v16282_v43, %v16158_v18  ;;  %v3656_v39 = vmul.f32 %v16282_v43, %v16161_v30 }
 0x72f   :  { %v1844_v32 = vadd.f32 %v1781_v6, %v1595_v48  ;;  %v2343_v51 = vadd.f32 %v10692_v1, %v2094_v63  ;;  %v3026_v63 = vsel %vm3010_vm10, %v10739_v59, %v10801_v35  ;;  %v16285_v6 = vld [vmem:[#allocation16_spill] sm:$0xff]  ;;  %v16287_v59 = vld [vmem:[#allocation206_spill] sm:$0xff] }
 0x730   :  { %2743 = vrot.lane.b32.xlu1 %v2656_v36, %s8043_s5 }
 0x731   :  { %3243 = vrot.lane.b32.xlu2 %v3155_v8, %s8045_s28  ;;  %2741 = vrot.lane.b32.xlu0 %v2655_v21, %s8043_s5  ;;  %v2093_v36 = vadd.f32 %v2030_v60, %v1844_v32  ;;  %v2592_v33 = vadd.f32 %v10722_v17, %v2343_v51  ;;  %v345_v60 = vadd.f32 %v16285_v6, %v265_v45  ;;  %v16286_v51 = vld [vmem:[#allocation130_spill] sm:$0xff] }
 0x732   :  { %v10927_v19 = vpop.permute.xlu1 %2249  ;;  %v3275_v32 = vsel %vm3259_vm11, %v10827_v27, %v10784_v4  ;;  %v3524_v27 = vsel %vm3508_vm12, %v10829_v22, %v3507_v37  ;;  %v16292_v22 = vld [vmem:[#allocation70_spill] sm:$0xff] }
 0x733   :  { %v10930_v62 = vpop.permute.xlu2 %1996  ;;  %v10932_v49 = vpop.permute.xlu0 %2247  ;;  %v2342_v53 = vadd.f32 %v2279_v16, %v2093_v36  ;;  %v2841_v1 = vadd.f32 %v10752_v23, %v2592_v33  ;;  %v1405_v16 = vmul.f32 %v16286_v51, %v16161_v30  ;;  %v16288_v36 = vld [vmem:[#allocation43_spill] sm:$0xff] }
 0x734   :  { %v594_v33 = vadd.f32 %v16288_v36, %v345_v60 }
 0x735   :  { %v2591_v42 = vadd.f32 %v2528_v20, %v2342_v53  ;;  %v3090_v21 = vadd.f32 %v10801_v35, %v2841_v1  ;;  %v1904_v35 = vmul.f32 %v16287_v59, %v16158_v18 }
 0x737   :  { %v2840_v28 = vadd.f32 %v2777_v61, %v2591_v42  ;;  %v16290_v61 = vld [vmem:[#allocation3_spill] sm:$0xff] }
 0x738   :  { %3745 = vrot.lane.b32.xlu1 %v3655_v24, %s8047_s1  ;;  %v3339_v24 = vadd.f32 %v10784_v4, %v3090_v21  ;;  %v266_v42 = vmul.f32 %v16158_v18, %v16290_v61 }
 0x739   :  { %3747 = vrot.lane.b32.xlu2 %v3656_v39, %s8047_s1  ;;  %3245 = vrot.lane.b32.xlu0 %v3156_v26, %s8045_s28  ;;  %v3089_v43 = vadd.f32 %v3026_v63, %v2840_v28  ;;  %v264_v39 = vmul.f32 %v16158_v18, %v16284_v34  ;;  %v16289_v26 = vld [vmem:[#allocation44_spill] sm:$0xff]  ;;  %v16291_v34 = vld [vmem:[#allocation69_spill] sm:$0xff] }
 0x73a   :  { %v10961_v8 = vpop.permute.xlu1 %3251  ;;  %v533_v4 = vsel %vm520_vm0, %v16289_v26, %v16288_v36  ;;  %v3588_v53 = vadd.f32 %v3507_v37, %v3339_v24  ;;  %v843_v45 = vadd.f32 %v16291_v34, %v594_v33  ;;  %v782_v63 = vsel %vm769_vm1, %v16292_v22, %v16291_v34  ;;  %v16294_v24 = vld [vmem:[#allocation46_spill] sm:$0xff]  ;;  %v16296_v36 = vld [vmem:[#allocation104_spill] sm:$0xff] }
 0x73b   :  { %v10964_v48 = vpop.permute.xlu2 %2998  ;;  %v10966_v17 = vpop.permute.xlu0 %2751  ;;  %v3338_v20 = vadd.f32 %v3275_v32, %v3089_v43  ;;  %v344_v1 = vadd.f32 %v16285_v6, %v264_v39  ;;  %v16297_v34 = vld [vmem:[#allocation72_spill] sm:$0xff] }
 0x73c   :  { %16283 = vst [vmem:[#allocation31_spill] sm:$0xff] %v10966_v17  ;;  %v10976_v23 = vsel %vm2761_vm9, %v10859_v38, %v10966_v17  ;;  %v1404_v38 = vmul.f32 %v16286_v51, %v16158_v18  ;;  %v1092_v33 = vadd.f32 %v16296_v36, %v843_v45 }
 0x73d   :  { %v3587_v32 = vadd.f32 %v3524_v27, %v3338_v20  ;;  %v593_v51 = vadd.f32 %v533_v4, %v344_v1  ;;  %v16299_v27 = vld [vmem:[#allocation96_spill] sm:$0xff] }
 0x73e   :  { %v1031_v4 = vsel %vm1018_vm2, %v16299_v27, %v16296_v36  ;;  %v16300_v20 = vld [vmem:[#allocation196_spill] sm:$0xff]  ;;  %v16306_v27 = vld [vmem:[#allocation125_spill] sm:$0xff] }
 0x73f   :  { %v842_v17 = vadd.f32 %v782_v63, %v593_v51  ;;  %v2404_v1 = vmul.f32 %v16300_v20, %v16158_v18  ;;  %v2405_v45 = vmul.f32 %v16300_v20, %v16161_v30  ;;  %v1905_v63 = vmul.f32 %v16287_v59, %v16161_v30 }
 0x740   :  { %1486 = vrot.lane.b32.xlu1 %v1405_v16, %s8038_s23  ;;  %v16293_v16 = vld [vmem:[#allocation15_spill] sm:$0xff] }
 0x741   :  { %1986 = vrot.lane.b32.xlu2 %v1904_v35, %s8040_s25  ;;  %1484 = vrot.lane.b32.xlu0 %v1404_v38, %s8038_s23  ;;  %v346_v43 = vadd.f32 %v16293_v16, %v266_v42  ;;  %v16295_v35 = vld [vmem:[#allocation37_spill] sm:$0xff] }
 0x742   :  { %v3756_v21 = vpop.permute.xlu1 %3755  ;;  %v534_v38 = vsel %vm520_vm0, %v16295_v35, %v16294_v24  ;;  %v16301_v42 = vld [vmem:[#allocation133_spill] sm:$0xff]  ;;  %v16304_v35 = vld [vmem:[#allocation103_spill] sm:$0xff] }
 0x743   :  { %v3837_v28 = vadd.f32 %v3756_v21, %v3588_v53  ;;  %v11007_v60 = vpop.permute.xlu2 %3502  ;;  %v3754_v37 = vpop.permute.xlu0 %3753  ;;  %v16298_v53 = vld [vmem:[#allocation73_spill] sm:$0xff] }
 0x744   :  { %v3773_v6 = vsel %vm3757_vm13, %v3754_v37, %v3756_v21  ;;  %v783_v22 = vsel %vm769_vm1, %v16298_v53, %v16297_v34  ;;  %v1341_v21 = vadd.f32 %v16301_v42, %v1092_v33  ;;  %v595_v37 = vadd.f32 %v534_v38, %v346_v43  ;;  %v16305_v53 = vld [vmem:[#allocation136_spill] sm:$0xff] }
 0x745   :  { %v3869_v39 = vmax.f32 %v3837_v28, 0.0  ;;  %v3836_v26 = vadd.f32 %v3773_v6, %v3587_v32  ;;  %v16302_v32 = vld [vmem:[#allocation134_spill] sm:$0xff]  ;;  %v16303_v6 = vld [vmem:[#allocation99_spill] sm:$0xff]  ;;  %v1091_v33 = vadd.f32 %v1031_v4, %v842_v17  ;;  %v1529_v43 = vsel %vm1516_vm4, %v10709_v41, %v10771_v15 }
 0x746   :  { %v1280_v51 = vsel %vm1267_vm3, %v16302_v32, %v16301_v42  ;;  %v1032_v36 = vsel %vm1018_vm2, %v16304_v35, %v16303_v6  ;;  %v844_v59 = vadd.f32 %v783_v22, %v595_v37  ;;  %v1281_v20 = vsel %vm1267_vm3, %v16306_v27, %v16305_v53  ;;  %v16307_v37 = vld [vmem:[#allocation210_spill] sm:$0xff] }
 0x747   :  { %7746 = vmatpush.xpose.msk.msra.mxu3 %vm3757_vm13, %v3869_v39  ;;  %v3868_v28 = vmax.f32 %v3836_v26, 0.0  ;;  %v1590_v39 = vadd.f32 %v10771_v15, %v1341_v21  ;;  %v1340_v26 = vadd.f32 %v1280_v51, %v1091_v33  ;;  %v1778_v41 = vsel %vm1765_vm5, %v10797_v55, %v10754_v57 }
 0x748   :  { %2488 = vrot.lane.b32.xlu1 %v2404_v1, %s8042_s27  ;;  %v1093_v22 = vadd.f32 %v1032_v36, %v844_v59  ;;  %v2905_v55 = vmul.f32 %v16307_v37, %v16161_v30 }
 0x749   :  { %2490 = vrot.lane.b32.xlu2 %v2405_v45, %s8042_s27  ;;  %1988 = vrot.lane.b32.xlu0 %v1905_v63, %s8040_s25  ;;  %v1589_v42 = vadd.f32 %v1529_v43, %v1340_v26  ;;  %v1839_v21 = vadd.f32 %v10754_v57, %v1590_v39  ;;  %v1530_v63 = vsel %vm1516_vm4, %v10649_v12, %v10711_v46  ;;  %v16309_v39 = vld [vmem:[#allocation9_spill] sm:$0xff] }
 0x74a   :  { %4070 = vmatpush.xpose.msra.mxu2 %v3868_v28  ;;  %v1995_v38 = vpop.permute.xlu1 %1994  ;;  %v1342_v45 = vadd.f32 %v1281_v20, %v1093_v22  ;;  %v2027_v28 = vsel %vm2014_vm6, %v10799_v3, %v10861_v56  ;;  %v2904_v57 = vmul.f32 %v16307_v37, %v16158_v18  ;;  %v1779_v12 = vsel %vm1765_vm5, %v10679_v14, %v10741_v29  ;;  %v16310_v22 = vld [vmem:[#allocation12_spill] sm:$0xff] }
 0x74b   :  { %v11047_v17 = vsel %vm2014_vm6, %v1995_v38, %v10930_v62  ;;  %v11049_v4 = vpop.permute.xlu2 %2243  ;;  %v11051_v1 = vpop.permute.xlu0 %1494  ;;  %v1838_v32 = vadd.f32 %v1778_v41, %v1589_v42  ;;  %v2088_v51 = vadd.f32 %v10861_v56, %v1839_v21  ;;  %v2276_v3 = vsel %vm2263_vm7, %v10932_v49, %v10927_v19 }
 0x74c   :  { %v11059_v15 = vsel %vm1516_vm4, %v10908_v50, %v11051_v1  ;;  %v16308_v50 = vld [vmem:[#allocation209_spill] sm:$0xff]  ;;  %v1591_v36 = vadd.f32 %v1530_v63, %v1342_v45  ;;  %v263_v59 = vmul.f32 %v16161_v30, %v16309_v39  ;;  %v2028_v14 = vsel %vm2014_vm6, %v10767_v0, %v10724_v44 }
 0x74d   :  { %v3404_v35 = vmul.f32 %v16308_v50, %v16158_v18  ;;  %v2087_v33 = vadd.f32 %v2027_v28, %v1838_v32  ;;  %v2337_v56 = vadd.f32 %v10927_v19, %v2088_v51  ;;  %v261_v49 = vmul.f32 %v16161_v30, %v16183_v31 }
 0x74e   :  { %v1840_v38 = vadd.f32 %v1779_v12, %v1591_v36  ;;  %v269_v41 = vmul.f32 %v16161_v30, %v16310_v22  ;;  %v262_v42 = vmul.f32 %v16158_v18, %v16309_v39  ;;  %v2277_v0 = vsel %vm2263_vm7, %v10816_v25, %v10812_v10  ;;  %v16312_v25 = vld [vmem:[#allocation199_spill] sm:$0xff]  ;;  %v16313_v12 = vld [vmem:[#allocation42_spill] sm:$0xff]  ;;  %v16315_v39 = vld [vmem:[#allocation8_spill] sm:$0xff] }
 0x74f   :  { %v2336_v26 = vadd.f32 %v2276_v3, %v2087_v33  ;;  %v260_v45 = vmul.f32 %v16158_v18, %v16183_v31  ;;  %v341_v51 = vadd.f32 %v16185_v13, %v261_v49  ;;  %v16314_v3 = vld [vmem:[#allocation32_spill] sm:$0xff]  ;;  %v1654_v33 = vmul.f32 %v16312_v25, %v16161_v30 }
 0x750   :  { %2992 = vrot.lane.b32.xlu1 %v2905_v55, %s8044_s0  ;;  %v2089_v63 = vadd.f32 %v2028_v14, %v1840_v38  ;;  %v16311_v55 = vld [vmem:[#allocation5_spill] sm:$0xff]  ;;  %v531_v31 = vsel %vm520_vm0, %v16314_v3, %v16313_v12 }
 0x751   :  { %3492 = vrot.lane.b32.xlu2 %v3404_v35, %s8046_s29  ;;  %2990 = vrot.lane.b32.xlu0 %v2904_v57, %s8044_s0  ;;  %v343_v32 = vadd.f32 %v16311_v55, %v263_v59  ;;  %v2526_v35 = vsel %vm2512_vm8, %v10857_v2, %v10814_v54  ;;  %v1653_v57 = vmul.f32 %v16312_v25, %v16158_v18  ;;  %v16317_v2 = vld [vmem:[#allocation41_spill] sm:$0xff] }
 0x752   :  { %v2499_v43 = vpop.permute.xlu1 %2498  ;;  %v2338_v36 = vadd.f32 %v2277_v0, %v2089_v63  ;;  %v349_v59 = vadd.f32 %v16315_v39, %v269_v41  ;;  %v342_v14 = vadd.f32 %v16311_v55, %v262_v42  ;;  %v340_v38 = vadd.f32 %v16185_v13, %v260_v45  ;;  %v16320_v41 = vld [vmem:[#allocation39_spill] sm:$0xff]  ;;  %v16321_v25 = vld [vmem:[#allocation93_spill] sm:$0xff] }
 0x753   :  { %v2586_v27 = vadd.f32 %v2499_v43, %v2337_v56  ;;  %v11092_v20 = vpop.permute.xlu2 %2747  ;;  %v2497_v19 = vpop.permute.xlu0 %2496  ;;  %v3405_v56 = vmul.f32 %v16308_v50, %v16161_v30  ;;  %v268_v13 = vmul.f32 %v16158_v18, %v16310_v22 }
 0x754   :  { %v2525_v21 = vsel %vm2512_vm8, %v2497_v19, %v2499_v43  ;;  %v16316_v43 = vld [vmem:[#allocation34_spill] sm:$0xff]  ;;  %v16319_v19 = vld [vmem:[#allocation68_spill] sm:$0xff]  ;;  %v598_v42 = vadd.f32 %v16320_v41, %v349_v59  ;;  %v589_v63 = vadd.f32 %v531_v31, %v340_v38  ;;  %v16323_v31 = vld [vmem:[#allocation45_spill] sm:$0xff] }
 0x755   :  { %v11105_v28 = vadd.f32 %v11092_v20, %v2586_v27  ;;  %v11107_v37 = vadd.f32 %v2525_v21, %v2336_v26  ;;  %v532_v49 = vsel %vm520_vm0, %v16317_v2, %v16316_v43  ;;  %v590_v26 = vadd.f32 %v16313_v12, %v341_v51  ;;  %v16318_v27 = vld [vmem:[#allocation67_spill] sm:$0xff] }
 0x756   :  { %v780_v0 = vsel %vm769_vm1, %v16319_v19, %v16318_v27  ;;  %v2587_v21 = vadd.f32 %v2526_v35, %v2338_v36  ;;  %v592_v50 = vadd.f32 %v16316_v43, %v343_v32  ;;  %v591_v55 = vadd.f32 %v532_v49, %v342_v14  ;;  %v16328_v19 = vld [vmem:[#allocation101_spill] sm:$0xff] }
 0x757   :  { %v839_v51 = vadd.f32 %v16318_v27, %v590_v26  ;;  %v535_v36 = vsel %vm520_vm0, %v16323_v31, %v16320_v41  ;;  %v838_v22 = vadd.f32 %v780_v0, %v589_v63  ;;  %v16327_v27 = vld [vmem:[#allocation100_spill] sm:$0xff]  ;;  %v16330_v41 = vld [vmem:[#allocation119_spill] sm:$0xff]  ;;  %v16332_v31 = vld [vmem:[#allocation105_spill] sm:$0xff] }
 0x758   :  { %1733 = vrot.lane.b32.xlu1 %v1653_v57, %s8039_s22  ;;  %v16322_v57 = vld [vmem:[#allocation97_spill] sm:$0xff]  ;;  %v2836_v12 = vadd.f32 %v10976_v23, %v2587_v21  ;;  %v16326_v23 = vld [vmem:[#allocation76_spill] sm:$0xff]  ;;  %v1030_v0 = vsel %vm1018_vm2, %v16328_v19, %v16327_v27 }
 0x759   :  { %1735 = vrot.lane.b32.xlu2 %v1654_v33, %s8039_s22  ;;  %3494 = vrot.lane.b32.xlu0 %v3405_v56, %s8046_s29  ;;  %v1029_v35 = vsel %vm1018_vm2, %v16322_v57, %v16321_v25  ;;  %v16324_v33 = vld [vmem:[#allocation71_spill] sm:$0xff]  ;;  %v16325_v56 = vld [vmem:[#allocation66_spill] sm:$0xff]  ;;  %v847_v2 = vadd.f32 %v16326_v23, %v598_v42  ;;  %v1088_v49 = vadd.f32 %v16321_v25, %v839_v51  ;;  %v16329_v21 = vld [vmem:[#allocation132_spill] sm:$0xff] }
 0x75a   :  { %v11140_v45 = vpop.permute.xlu1 %3500  ;;  %v781_v59 = vsel %vm769_vm1, %v16325_v56, %v16324_v33  ;;  %v841_v43 = vadd.f32 %v16324_v33, %v592_v50  ;;  %v1087_v26 = vadd.f32 %v1029_v35, %v838_v22  ;;  %v1278_v63 = vsel %vm1267_vm3, %v16330_v41, %v16329_v21  ;;  %v16331_v57 = vld [vmem:[#allocation213_spill] sm:$0xff]  ;;  %v16333_v51 = vld [vmem:[#allocation212_spill] sm:$0xff]  ;;  %v16334_v33 = vld [vmem:[#allocation74_spill] sm:$0xff] }
 0x75b   :  { %v11147_v3 = vpop.permute.xlu2 %3749  ;;  %v11149_v32 = vpop.permute.xlu0 %3000  ;;  %v1096_v50 = vadd.f32 %v16332_v31, %v847_v2  ;;  %v1337_v42 = vadd.f32 %v16329_v21, %v1088_v49  ;;  %v2653_v25 = vmul.f32 %v16333_v51, %v16158_v18  ;;  %v2153_v35 = vmul.f32 %v16331_v57, %v16158_v18  ;;  %v16335_v2 = vld [vmem:[#allocation127_spill] sm:$0xff] }
 0x75c   :  { %v3024_v14 = vsel %vm3010_vm10, %v10964_v48, %v11149_v32  ;;  %v2154_v48 = vmul.f32 %v16331_v57, %v16161_v30  ;;  %v840_v22 = vadd.f32 %v781_v59, %v591_v55  ;;  %v784_v56 = vsel %vm769_vm1, %v16334_v33, %v16326_v23  ;;  %v16337_v59 = vld [vmem:[#allocation131_spill] sm:$0xff] }
 0x75d   :  { %v11163_v38 = vadd.f32 %v3024_v14, %v2836_v12  ;;  %v348_v12 = vadd.f32 %v16315_v39, %v268_v13  ;;  %v1090_v14 = vadd.f32 %v16327_v27, %v841_v43  ;;  %v1345_v19 = vadd.f32 %v16335_v2, %v1096_v50  ;;  %v16336_v13 = vld [vmem:[#allocation122_spill] sm:$0xff] }
 0x75e   :  { %v1336_v49 = vadd.f32 %v1278_v63, %v1087_v26  ;;  %v1586_v21 = vadd.f32 %v11051_v1, %v1337_v42  ;;  %v1089_v39 = vadd.f32 %v1030_v0, %v840_v22  ;;  %v1279_v23 = vsel %vm1267_vm3, %v16337_v59, %v16336_v13  ;;  %v16338_v27 = vld [vmem:[#allocation106_spill] sm:$0xff] }
 0x75f   :  { %v597_v41 = vadd.f32 %v535_v36, %v348_v12  ;;  %v1339_v55 = vadd.f32 %v16336_v13, %v1090_v14  ;;  %v1033_v57 = vsel %vm1018_vm2, %v16338_v27, %v16332_v31  ;;  %v1594_v26 = vadd.f32 %v10662_v52, %v1345_v19  ;;  %v16342_v13 = vld [vmem:[#allocation60_spill] sm:$0xff] }
 0x760   :  { %2237 = vrot.lane.b32.xlu1 %v2154_v48, %s8041_s26  ;;  %v1585_v1 = vadd.f32 %v11059_v15, %v1336_v49  ;;  %v1528_v42 = vsel %vm1516_vm4, %v10846_v40, %v10842_v11  ;;  %v16339_v15 = vld [vmem:[#allocation135_spill] sm:$0xff]  ;;  %v1777_v33 = vsel %vm1765_vm5, %v10905_v58, %v10844_v5  ;;  %v2654_v49 = vmul.f32 %v16333_v51, %v16161_v30 }
 0x761   :  { %2737 = vrot.lane.b32.xlu2 %v2653_v25, %s8043_s5  ;;  %2235 = vrot.lane.b32.xlu0 %v2153_v35, %s8041_s26  ;;  %v846_v0 = vadd.f32 %v784_v56, %v597_v41  ;;  %v1588_v50 = vadd.f32 %v10842_v11, %v1339_v55  ;;  %v1338_v35 = vadd.f32 %v1279_v23, %v1089_v39  ;;  %v16340_v56 = vld [vmem:[#allocation202_spill] sm:$0xff]  ;;  %v3871_v51 = vld [vmem:[%s16341_s30 + $0x8] sm:$0xff] }
 0x762   :  { %v1744_v43 = vpop.permute.xlu1 %1743  ;;  %v1282_v22 = vsel %vm1267_vm3, %v16339_v15, %v16335_v2  ;;  %v3153_v14 = vmul.f32 %v16340_v56, %v16158_v18  ;;  %v1843_v19 = vadd.f32 %v10634_v47, %v1594_v26  ;;  %v3154_v40 = vmul.f32 %v16340_v56, %v16161_v30  ;;  %v3870_v39 = vld [vmem:[%s16341_s30] sm:$0xff]  ;;  %7736 = vmatmul.msk.f32.vlgmr.msra.gmra.mxu1 %vm3757_vm13, %v3871_v51  ;;  %v16349_v56 = vld [vmem:[#allocation237_spill] sm:$0xff] }
 0x763   :  { %v11198_v63 = vadd.f32 %v1744_v43, %v1586_v21  ;;  %v11200_v48 = vpop.permute.xlu2 %1490  ;;  %v1742_v36 = vpop.permute.xlu0 %1741  ;;  %v1095_v12 = vadd.f32 %v1033_v57, %v846_v0  ;;  %v1587_v11 = vadd.f32 %v1528_v42, %v1338_v35  ;;  %v1531_v2 = vsel %vm1516_vm4, %v10666_v7, %v10662_v52  ;;  %3960 = vmatmul.f32.vlgmr.msra.gmra.mxu0 %v3870_v39  ;;  %v16343_v26 = vld [vmem:[#allocation86_spill] sm:$0xff]  ;;  %v16344_v0 = vld [vmem:[#allocation123_spill] sm:$0xff] }
 0x764   :  { %v1776_v25 = vsel %vm1765_vm5, %v1742_v36, %v1744_v43  ;;  %v1837_v21 = vadd.f32 %v10844_v5, %v1588_v50  ;;  %v1780_v52 = vsel %vm1765_vm5, %v10677_v9, %v10634_v47  ;;  %v2092_v55 = vadd.f32 %v16342_v13, %v1843_v19  ;;  %v16345_v50 = vld [vmem:[#allocation151_spill] sm:$0xff] }
 0x765   :  { %v11207_v31 = vadd.f32 %v1776_v25, %v1585_v1  ;;  %v1344_v58 = vadd.f32 %v1282_v22, %v1095_v12  ;;  %v1836_v41 = vadd.f32 %v1777_v33, %v1587_v11  ;;  %v2029_v47 = vsel %vm2014_vm6, %v16343_v26, %v16342_v13  ;;  %v16346_v25 = vld [vmem:[#allocation216_spill] sm:$0xff]  ;;  %v16348_v22 = vld [vmem:[#allocation161_spill] sm:$0xff] }
 0x766   :  { %v2086_v7 = vadd.f32 %v10930_v62, %v1837_v21  ;;  %v2278_v42 = vsel %vm2263_vm7, %v16345_v50, %v16344_v0  ;;  %v3654_v35 = vmul.f32 %v16346_v25, %v16161_v30  ;;  %v3872_v11 = vld [vmem:[%s16341_s30 + $0x10] sm:$0xff]  ;;  %v267_v39 = vmul.f32 %v16161_v30, %v16290_v61 }
 0x767   :  { %v1593_v59 = vadd.f32 %v1531_v2, %v1344_v58  ;;  %v2085_v23 = vadd.f32 %v11047_v17, %v1836_v41  ;;  %v16351_v2 = vld [vmem:[#allocation124_spill] sm:$0xff] }
 0x768   :  { %3239 = vrot.lane.b32.xlu1 %v3153_v14, %s8045_s28  ;;  %v2527_v14 = vsel %vm2512_vm8, %v16349_v56, %v16348_v22  ;;  %v16354_v26 = vld [vmem:[#allocation24_spill] sm:$0xff] }
 0x769   :  { %3241 = vrot.lane.b32.xlu2 %v3154_v40, %s8045_s28  ;;  %2739 = vrot.lane.b32.xlu0 %v2654_v49, %s8043_s5  ;;  %v1842_v36 = vadd.f32 %v1780_v52, %v1593_v59  ;;  %v3873_v40 = vld [vmem:[%s16341_s30 + $0x18] sm:$0xff]  ;;  %v16350_v49 = vld [vmem:[#allocation248_spill] sm:$0xff]  ;;  %v3274_v61 = vsel %vm3259_vm11, %v10961_v8, %v16354_v26 }
 0x76a   :  { %v2746_v5 = vpop.permute.xlu1 %2745  ;;  %v2776_v21 = vsel %vm2761_vm9, %v16351_v2, %v16350_v49  ;;  %7737 = vmatmul.msk.f32.gmra.mxu1 %vm3757_vm13, %v3873_v40  ;;  %v16357_v40 = vld [vmem:[#allocation218_spill] sm:$0xff] }
 0x76b   :  { %v2774_v43 = vsel %vm2761_vm9, %v2746_v5, %v11092_v20  ;;  %v11244_v27 = vpop.permute.xlu2 %2492  ;;  %v2246_v57 = vpop.permute.xlu0 %2245  ;;  %v2341_v20 = vadd.f32 %v16344_v0, %v2092_v55  ;;  %v2091_v12 = vadd.f32 %v2029_v47, %v1842_v36  ;;  %3963 = vmatmul.f32.gmra.mxu0 %v3872_v11  ;;  %v16352_v5 = vld [vmem:[#allocation241_spill] sm:$0xff] }
 0x76c   :  { %v11250_v9 = vadd.f32 %v2774_v43, %v11107_v37  ;;  %v2275_v62 = vsel %vm2263_vm7, %v11049_v4, %v2246_v57  ;;  %v11254_v1 = vadd.f32 %v2246_v57, %v2086_v7  ;;  %v16347_v37 = vld [vmem:[#allocation215_spill] sm:$0xff]  ;;  %v3653_v4 = vmul.f32 %v16346_v25, %v16158_v18  ;;  %v16353_v55 = vld [vmem:[#allocation61_spill] sm:$0xff] }
 0x76d   :  { %v11256_v17 = vadd.f32 %v2275_v62, %v2085_v23  ;;  %v1902_v15 = vmul.f32 %v16347_v37, %v16158_v18  ;;  %v2590_v33 = vadd.f32 %v16348_v22, %v2341_v20  ;;  %v2340_v19 = vadd.f32 %v2278_v42, %v2091_v12  ;;  %v16355_v47 = vld [vmem:[#allocation205_spill] sm:$0xff]  ;;  %v3875_v25 = vld [vmem:[%s16341_s30 + $0x28] sm:$0xff] }
 0x76e   :  { %v3025_v59 = vsel %vm3010_vm10, %v16353_v55, %v16352_v5  ;;  %v347_v43 = vadd.f32 %v16293_v16, %v267_v39  ;;  %v2402_v62 = vmul.f32 %v16355_v47, %v16158_v18  ;;  %v2403_v20 = vmul.f32 %v16355_v47, %v16161_v30 }
 0x76f   :  { %v2839_v58 = vadd.f32 %v16350_v49, %v2590_v33  ;;  %v2589_v51 = vadd.f32 %v2527_v14, %v2340_v19  ;;  %v3523_v16 = vsel %vm3508_vm12, %v11140_v45, %v11007_v60  ;;  %v16356_v19 = vld [vmem:[#allocation219_spill] sm:$0xff]  ;;  %v3402_v49 = vmul.f32 %v16357_v40, %v16158_v18 }
 0x770   :  { %3743 = vrot.lane.b32.xlu1 %v3654_v35, %s8047_s1  ;;  %v596_v36 = vadd.f32 %v16294_v24, %v347_v43  ;;  %v3874_v24 = vld [vmem:[%s16341_s30 + $0x20] sm:$0xff]  ;;  %v2903_v11 = vmul.f32 %v16356_v19, %v16161_v30  ;;  %v2902_v2 = vmul.f32 %v16356_v19, %v16158_v18  ;;  %v16358_v43 = vld [vmem:[#allocation208_spill] sm:$0xff]  ;;  %v16366_v19 = vld [vmem:[#allocation63_spill] sm:$0xff] }
 0x771   :  { %1982 = vrot.lane.b32.xlu2 %v1902_v15, %s8040_s25  ;;  %3741 = vrot.lane.b32.xlu0 %v3653_v4, %s8047_s1  ;;  %v3088_v13 = vadd.f32 %v16352_v5, %v2839_v58  ;;  %v2838_v57 = vadd.f32 %v2776_v21, %v2589_v51 }
 0x772   :  { %v11285_v41 = vpop.permute.xlu1 %3249  ;;  %v845_v8 = vadd.f32 %v16297_v34, %v596_v36  ;;  %7738 = vmatmul.msk.f32.gmra.mxu1 %vm3757_vm13, %v3875_v25 }
 0x773   :  { %v11290_v52 = vpop.permute.xlu2 %2996  ;;  %v11292_v7 = vpop.permute.xlu0 %3247  ;;  %v3087_v0 = vadd.f32 %v3025_v59, %v2838_v57  ;;  %v3337_v50 = vadd.f32 %v16354_v26, %v3088_v13  ;;  %3966 = vmatmul.f32.gmra.mxu0 %v3874_v24  ;;  %v2151_v57 = vmul.f32 %v16358_v43, %v16158_v18  ;;  %v2152_v26 = vmul.f32 %v16358_v43, %v16161_v30  ;;  %v16361_v24 = vld [vmem:[#allocation221_spill] sm:$0xff]  ;;  %v16370_v43 = vld [vmem:[#allocation128_spill] sm:$0xff] }
 0x774   :  { %v11300_v23 = vadd.f32 %v11290_v52, %v11105_v28  ;;  %v1903_v28 = vmul.f32 %v16347_v37, %v16161_v30  ;;  %v1094_v34 = vadd.f32 %v16303_v6, %v845_v8  ;;  %v2652_v25 = vmul.f32 %v16361_v24, %v16161_v30 }
 0x775   :  { %v3336_v42 = vadd.f32 %v3274_v61, %v3087_v0  ;;  %v3586_v35 = vadd.f32 %v11007_v60, %v3337_v50  ;;  %v3403_v61 = vmul.f32 %v16357_v40, %v16161_v30 }
 0x776   :  { %v1343_v60 = vadd.f32 %v16305_v53, %v1094_v34  ;;  %v16363_v34 = vld [vmem:[#allocation14_spill] sm:$0xff] }
 0x777   :  { %v3585_v12 = vadd.f32 %v3523_v16, %v3336_v42  ;;  %v16359_v16 = vld [vmem:[#allocation31_spill] sm:$0xff] }
 0x778   :  { %2484 = vrot.lane.b32.xlu1 %v2402_v62, %s8042_s27  ;;  %v1592_v6 = vadd.f32 %v10711_v46, %v1343_v60  ;;  %v3876_v46 = vld [vmem:[%s16341_s30 + $0x30] sm:$0xff] }
 0x779   :  { %2486 = vrot.lane.b32.xlu2 %v2403_v20, %s8042_s27  ;;  %1984 = vrot.lane.b32.xlu0 %v1903_v28, %s8040_s25 }
 0x77a   :  { %v1489_v45 = vpop.permute.xlu1 %1488  ;;  %v1841_v53 = vadd.f32 %v10741_v29, %v1592_v6 }
 0x77b   :  { %v11332_v37 = vsel %vm1516_vm4, %v1489_v45, %v11200_v48  ;;  %v11334_v15 = vpop.permute.xlu2 %1737  ;;  %v3752_v4 = vpop.permute.xlu0 %3751  ;;  %3969 = vmatmul.f32.gmra.mxu0 %v3876_v46  ;;  %v2651_v45 = vmul.f32 %v16361_v24, %v16158_v18 }
 0x77c   :  { %v3772_v22 = vsel %vm3757_vm13, %v11147_v3, %v3752_v4  ;;  %v3835_v33 = vadd.f32 %v3752_v4, %v3586_v35  ;;  %v3877_v3 = vld [vmem:[%s16341_s30 + $0x38] sm:$0xff]  ;;  %v2090_v13 = vadd.f32 %v10724_v44, %v1841_v53  ;;  %v3878_v44 = vld [vmem:[%s16341_s30 + $0x40] sm:$0xff]  ;;  %v16365_v4 = vld [vmem:[#allocation40_spill] sm:$0xff] }
 0x77d   :  { %v3834_v56 = vadd.f32 %v3772_v22, %v3585_v12  ;;  %7739 = vmatmul.msk.f32.gmra.mxu1 %vm3757_vm13, %v3877_v3  ;;  %v16364_v12 = vld [vmem:[#allocation38_spill] sm:$0xff] }
 0x77e   :  { %v3867_v14 = vmax.f32 %v3835_v33, 0.0  ;;  %v530_v22 = vsel %vm520_vm0, %v16365_v4, %v16364_v12  ;;  %v16368_v3 = vld [vmem:[#allocation98_spill] sm:$0xff] }
 0x77f   :  { %v3866_v21 = vmax.f32 %v3834_v56, 0.0  ;;  %v3881_v56 = vld [vmem:[%s16341_s30 + $0x58] sm:$0xff] }
 0x780   :  { %7747 = vmatpush.xpose.msk.msra.mxu3 %vm3757_vm13, %v3867_v14  ;;  %2988 = vrot.lane.b32.xlu1 %v2903_v11, %s8044_s0  ;;  %v16367_v11 = vld [vmem:[#allocation64_spill] sm:$0xff] }
 0x781   :  { %3488 = vrot.lane.b32.xlu2 %v3402_v49, %s8046_s29  ;;  %2986 = vrot.lane.b32.xlu0 %v2902_v2, %s8044_s0  ;;  %v779_v6 = vsel %vm769_vm1, %v16367_v11, %v16366_v19 }
 0x782   :  { %4071 = vmatpush.xpose.msra.mxu2 %v3866_v21  ;;  %v1993_v58 = vpop.permute.xlu1 %1992 }
 0x783   :  { %v2084_v39 = vadd.f32 %v1993_v58, %v11198_v63  ;;  %v11358_v51 = vpop.permute.xlu2 %2241  ;;  %v1991_v29 = vpop.permute.xlu0 %1990  ;;  %v2339_v63 = vadd.f32 %v10812_v10, %v2090_v13  ;;  %v3879_v10 = vld [vmem:[%s16341_s30 + $0x48] sm:$0xff]  ;;  %3972 = vmatmul.f32.gmra.mxu0 %v3878_v44 }
 0x784   :  { %v2025_v5 = vsel %vm2014_vm6, %v1991_v29, %v1993_v58  ;;  %v16369_v58 = vld [vmem:[#allocation91_spill] sm:$0xff] }
 0x785   :  { %v11364_v55 = vadd.f32 %v11358_v51, %v2084_v39  ;;  %v11367_v59 = vadd.f32 %v2025_v5, %v11207_v31  ;;  %v2588_v47 = vadd.f32 %v10814_v54, %v2339_v63  ;;  %7740 = vmatmul.msk.f32.gmra.mxu1 %vm3757_vm13, %v3879_v10  ;;  %v1028_v39 = vsel %vm1018_vm2, %v16369_v58, %v16368_v3 }
 0x787   :  { %v2837_v8 = vadd.f32 %v16359_v16, %v2588_v47  ;;  %v3883_v16 = vld [vmem:[%s16341_s30 + $0x68] sm:$0xff] }
 0x788   :  { %2231 = vrot.lane.b32.xlu1 %v2151_v57, %s8041_s26  ;;  %v16371_v57 = vld [vmem:[#allocation129_spill] sm:$0xff] }
 0x789   :  { %2233 = vrot.lane.b32.xlu2 %v2152_v26, %s8041_s26  ;;  %3490 = vrot.lane.b32.xlu0 %v3403_v61, %s8046_s29  ;;  %v3086_v35 = vadd.f32 %v11149_v32, %v2837_v8  ;;  %v3880_v32 = vld [vmem:[%s16341_s30 + $0x50] sm:$0xff]  ;;  %v1277_v63 = vsel %vm1267_vm3, %v16371_v57, %v16370_v43  ;;  %v16372_v26 = vld [vmem:[#allocation211_spill] sm:$0xff]  ;;  %v16379_v57 = vld [vmem:[#allocation65_spill] sm:$0xff] }
 0x78a   :  { %v2995_v31 = vpop.permute.xlu1 %2994  ;;  %v3651_v61 = vmul.f32 %v16372_v26, %v16158_v18 }
 0x78b   :  { %v3023_v62 = vsel %vm3010_vm10, %v2995_v31, %v11290_v52  ;;  %v11388_v36 = vpop.permute.xlu2 %3243  ;;  %v2495_v0 = vpop.permute.xlu0 %2494  ;;  %v16360_v52 = vld [vmem:[#allocation10_spill] sm:$0xff]  ;;  %v3335_v60 = vadd.f32 %v11285_v41, %v3086_v35  ;;  %3975 = vmatmul.f32.gmra.mxu0 %v3880_v32  ;;  %v3652_v31 = vmul.f32 %v16372_v26, %v16161_v30 }
 0x78c   :  { %v11392_v20 = vadd.f32 %v3023_v62, %v11250_v9  ;;  %v2524_v28 = vsel %vm2512_vm8, %v11244_v27, %v2495_v0  ;;  %v11397_v50 = vadd.f32 %v2495_v0, %v11254_v1  ;;  %v259_v42 = vmul.f32 %v16161_v30, %v16360_v52  ;;  %v16362_v27 = vld [vmem:[#allocation220_spill] sm:$0xff] }
 0x78d   :  { %v11401_v54 = vadd.f32 %v2524_v28, %v11256_v17  ;;  %v258_v9 = vmul.f32 %v16158_v18, %v16360_v52  ;;  %v3151_v1 = vmul.f32 %v16362_v27, %v16158_v18  ;;  %7741 = vmatmul.msk.f32.gmra.mxu1 %vm3757_vm13, %v3881_v56  ;;  %v3152_v47 = vmul.f32 %v16362_v27, %v16161_v30  ;;  %v3882_v28 = vld [vmem:[%s16341_s30 + $0x60] sm:$0xff]  ;;  %v16375_v56 = vld [vmem:[#allocation7_spill] sm:$0xff] }
 0x78e   :  { %v339_v17 = vadd.f32 %v16363_v34, %v259_v42 }
 0x78f   :  { %v338_v33 = vadd.f32 %v16363_v34, %v258_v9 }
 0x790   :  { %2735 = vrot.lane.b32.xlu1 %v2652_v25, %s8043_s5  ;;  %v588_v14 = vadd.f32 %v16364_v12, %v339_v17 }
 0x791   :  { %3235 = vrot.lane.b32.xlu2 %v3151_v1, %s8045_s28  ;;  %2733 = vrot.lane.b32.xlu0 %v2651_v45, %s8043_s5  ;;  %v587_v49 = vadd.f32 %v530_v22, %v338_v33 }
 0x792   :  { %v3499_v40 = vpop.permute.xlu1 %3498  ;;  %v837_v46 = vadd.f32 %v16366_v19, %v588_v14  ;;  %v257_v14 = vmul.f32 %v16161_v30, %v16375_v56  ;;  %v3273_v19 = vsel %vm3259_vm11, %v11292_v7, %v11285_v41  ;;  %v3886_v7 = vld [vmem:[%s16341_s30 + $0x80] sm:$0xff] }
 0x793   :  { %v3584_v2 = vadd.f32 %v3499_v40, %v3335_v60  ;;  %v11433_v21 = vpop.permute.xlu2 %3747  ;;  %v3497_v53 = vpop.permute.xlu0 %3496  ;;  %v836_v29 = vadd.f32 %v779_v6, %v587_v49  ;;  %3978 = vmatmul.f32.gmra.mxu0 %v3882_v28 }
 0x794   :  { %v1086_v13 = vadd.f32 %v16368_v3, %v837_v46  ;;  %v3522_v49 = vsel %vm3508_vm12, %v3497_v53, %v3499_v40  ;;  %v3334_v46 = vadd.f32 %v3273_v19, %v11163_v38  ;;  %v16377_v3 = vld [vmem:[#allocation4_spill] sm:$0xff]  ;;  %v16378_v38 = vld [vmem:[#allocation29_spill] sm:$0xff] }
 0x795   :  { %v3833_v5 = vadd.f32 %v11433_v21, %v3584_v2  ;;  %v1085_v44 = vadd.f32 %v1028_v39, %v836_v29  ;;  %7742 = vmatmul.msk.f32.gmra.mxu1 %vm3757_vm13, %v3883_v16  ;;  %v337_v41 = vadd.f32 %v16377_v3, %v257_v14  ;;  %v3889_v16 = vld [vmem:[%s16341_s30 + $0x98] sm:$0xff] }
 0x796   :  { %v1335_v62 = vadd.f32 %v16370_v43, %v1086_v13  ;;  %v3583_v40 = vadd.f32 %v3522_v49, %v3334_v46 }
 0x797   :  { %v3865_v10 = vmax.f32 %v3833_v5, 0.0  ;;  %v1334_v0 = vadd.f32 %v1277_v63, %v1085_v44  ;;  %v586_v58 = vadd.f32 %v16378_v38, %v337_v41 }
 0x798   :  { %3737 = vrot.lane.b32.xlu1 %v3651_v61, %s8047_s1  ;;  %v1584_v8 = vadd.f32 %v11200_v48, %v1335_v62  ;;  %v16380_v61 = vld [vmem:[#allocation227_spill] sm:$0xff] }
 0x799   :  { %3739 = vrot.lane.b32.xlu2 %v3652_v31, %s8047_s1  ;;  %3237 = vrot.lane.b32.xlu0 %v3152_v47, %s8045_s28  ;;  %v1583_v42 = vadd.f32 %v11332_v37, %v1334_v0  ;;  %v16373_v37 = vld [vmem:[#allocation224_spill] sm:$0xff]  ;;  %v835_v63 = vadd.f32 %v16379_v57, %v586_v58  ;;  %v2650_v44 = vmul.f32 %v16380_v61, %v16161_v30  ;;  %v16382_v47 = vld [vmem:[#allocation225_spill] sm:$0xff]  ;;  %v16390_v58 = vld [vmem:[#allocation126_spill] sm:$0xff] }
 0x79a   :  { %7748 = vmatpush.xpose.msk.msra.mxu3 %vm3757_vm13, %v3865_v10  ;;  %v2240_v52 = vpop.permute.xlu1 %2239  ;;  %v2401_v45 = vmul.f32 %v16373_v37, %v16161_v30  ;;  %v2400_v17 = vmul.f32 %v16373_v37, %v16158_v18  ;;  %v16381_v10 = vld [vmem:[#allocation94_spill] sm:$0xff]  ;;  %v3149_v62 = vmul.f32 %v16382_v47, %v16158_v18  ;;  %v2649_v0 = vmul.f32 %v16380_v61, %v16158_v18  ;;  %v16384_v37 = vld [vmem:[#allocation217_spill] sm:$0xff] }
 0x79b   :  { %v2274_v24 = vsel %vm2263_vm7, %v2240_v52, %v11358_v51  ;;  %v11466_v25 = vpop.permute.xlu2 %1986  ;;  %v1740_v9 = vpop.permute.xlu0 %1739  ;;  %v16374_v51 = vld [vmem:[#allocation222_spill] sm:$0xff]  ;;  %v1084_v31 = vadd.f32 %v16381_v10, %v835_v63 }
 0x79c   :  { %v11470_v35 = vadd.f32 %v2274_v24, %v11367_v59  ;;  %v1775_v48 = vsel %vm1765_vm5, %v11334_v15, %v1740_v9  ;;  %v11474_v27 = vadd.f32 %v1740_v9, %v1584_v8  ;;  %v2900_v34 = vmul.f32 %v16374_v51, %v16158_v18  ;;  %v3884_v15 = vld [vmem:[%s16341_s30 + $0x70] sm:$0xff]  ;;  %v3885_v59 = vld [vmem:[%s16341_s30 + $0x78] sm:$0xff] }
 0x79d   :  { %v11476_v1 = vadd.f32 %v1775_v48, %v1583_v42  ;;  %3981 = vmatmul.f32.gmra.mxu0 %v3884_v15  ;;  %7743 = vmatmul.msk.f32.gmra.mxu1 %vm3757_vm13, %v3885_v59  ;;  %v2901_v2 = vmul.f32 %v16374_v51, %v16161_v30  ;;  %v3650_v51 = vmul.f32 %v16384_v37, %v16161_v30 }
 0x7a0   :  { %2482 = vrot.lane.b32.xlu1 %v2401_v45, %s8042_s27  ;;  %v3649_v45 = vmul.f32 %v16384_v37, %v16158_v18 }
 0x7a1   :  { %2982 = vrot.lane.b32.xlu2 %v2900_v34, %s8044_s0  ;;  %2480 = vrot.lane.b32.xlu0 %v2400_v17, %s8042_s27  ;;  %v3150_v34 = vmul.f32 %v16382_v47, %v16161_v30  ;;  %s8048_s27 = smov 64  }
 0x7a2   :  { %v2744_v12 = vpop.permute.xlu1 %2743 }
 0x7a3   :  { %v11494_v4 = vadd.f32 %v2744_v12, %v11397_v50  ;;  %v2491_v22 = vpop.permute.xlu2 %2490  ;;  %v2742_v33 = vpop.permute.xlu0 %2741  ;;  %v16376_v50 = vld [vmem:[#allocation214_spill] sm:$0xff] }
 0x7a4   :  { %v11498_v60 = vadd.f32 %v2491_v22, %v11364_v55  ;;  %v2773_v32 = vsel %vm2761_vm9, %v2742_v33, %v2744_v12  ;;  %v3400_v6 = vmul.f32 %v16376_v50, %v16158_v18  ;;  %v3401_v55 = vmul.f32 %v16376_v50, %v16161_v30 }
 0x7a5   :  { %v11507_v11 = vadd.f32 %v2773_v32, %v11401_v54  ;;  %v3887_v54 = vld [vmem:[%s16341_s30 + $0x88] sm:$0xff]  ;;  %3984 = vmatmul.f32.gmra.mxu0 %v3886_v7  ;;  %v256_v33 = vmul.f32 %v16158_v18, %v16375_v56 }
 0x7a6   :  { %7744 = vmatmul.msk.f32.gmra.mxu1 %vm3757_vm13, %v3887_v54  ;;  %v16389_v7 = vld [vmem:[#allocation95_spill] sm:$0xff] }
 0x7a7   :  { %v336_v56 = vadd.f32 %v16377_v3, %v256_v33  ;;  %v1027_v54 = vsel %vm1018_vm2, %v16389_v7, %v16381_v10  ;;  %vm4824_vm2 = vcmask 523264  }
 0x7a8   :  { %3484 = vrot.lane.b32.xlu1 %v3400_v6, %s8046_s29  ;;  %v16385_v6 = vld [vmem:[#allocation230_spill] sm:$0xff] }
 0x7a9   :  { %3486 = vrot.lane.b32.xlu2 %v3401_v55, %s8046_s29  ;;  %2984 = vrot.lane.b32.xlu0 %v2901_v2, %s8044_s0  ;;  %v2899_v49 = vmul.f32 %v16385_v6, %v16161_v30  ;;  %v16387_v2 = vld [vmem:[#allocation228_spill] sm:$0xff] }
 0x7aa   :  { %v3746_v53 = vpop.permute.xlu1 %3745  ;;  %v3398_v46 = vmul.f32 %v16387_v2, %v16158_v18 }
 0x7ab   :  { %v3771_v39 = vsel %vm3757_vm13, %v3746_v53, %v11433_v21  ;;  %v11530_v29 = vpop.permute.xlu2 %3492  ;;  %v11532_v5 = vpop.permute.xlu0 %3245 }
 0x7ac   :  { %v3272_v13 = vsel %vm3259_vm11, %v11388_v36, %v11532_v5  ;;  %v3832_v43 = vadd.f32 %v3771_v39, %v3583_v40  ;;  %v16383_v36 = vld [vmem:[#allocation116_spill] sm:$0xff] }
 0x7ad   :  { %v11540_v26 = vadd.f32 %v3272_v13, %v11392_v20  ;;  %v1333_v28 = vadd.f32 %v16383_v36, %v1084_v31  ;;  %v3888_v20 = vld [vmem:[%s16341_s30 + $0x90] sm:$0xff]  ;;  %v1276_v39 = vsel %vm1267_vm3, %v16390_v58, %v16383_v36  ;;  %v16392_v36 = vld [vmem:[#allocation223_spill] sm:$0xff]  ;;  %vm4344_vm3 = vcmask 1045504  }
 0x7ae   :  { %v3864_v21 = vmax.f32 %v3832_v43, 0.0  ;;  %3987 = vmatmul.f32.gmra.mxu0 %v3888_v20  ;;  %7745 = vmatmul.msk.f32.gmra.mxu1 %vm3757_vm13, %v3889_v16  ;;  %v16393_v20 = vld [vmem:[#allocation226_spill] sm:$0xff] }
 0x7af   :  { %v3396_v16 = vmul.f32 %v16393_v20, %v16158_v18 }
 0x7b0   :  { %2731 = vrot.lane.b32.xlu1 %v2650_v44, %s8043_s5  ;;  %4072 = vmatpush.xpose.msra.mxu2 %v3864_v21  ;;  %v3399_v44 = vmul.f32 %v16387_v2, %v16161_v30 }
 0x7b1   :  { %3231 = vrot.lane.b32.xlu2 %v3149_v62, %s8045_s28  ;;  %2729 = vrot.lane.b32.xlu0 %v2649_v0, %s8043_s5 }
 0x7b2   :  { %v1487_v8 = vpop.permute.xlu1 %1486 }
 0x7b3   :  { %v1582_v52 = vadd.f32 %v1487_v8, %v1333_v28  ;;  %v1736_v42 = vpop.permute.xlu2 %1735  ;;  %v1485_v24 = vpop.permute.xlu0 %1484  ;;  %v3648_v28 = vmul.f32 %v16392_v36, %v16161_v30 }
 0x7b4   :  { %v1525_v9 = vsel %vm1516_vm4, %v1485_v24, %v1487_v8  ;;  %v3647_v8 = vmul.f32 %v16392_v36, %v16158_v18  ;;  %vm4664_vm4 = vcmask 1041408  }
 0x7b5   :  { %v11561_v48 = vadd.f32 %v1736_v42, %v1582_v52 }
 0x7b8   :  { %3733 = vrot.lane.b32.xlu1 %v3649_v45, %s8047_s1 }
 0x7b9   :  { %3735 = vrot.lane.b32.xlu2 %v3650_v51, %s8047_s1  ;;  %3233 = vrot.lane.b32.xlu0 %v3150_v34, %s8045_s28  ;;  %v16394_v34 = vld [vmem:[#allocation229_spill] sm:$0xff] }
 0x7ba   :  { %v2489_v17 = vpop.permute.xlu1 %2488 }
 0x7bb   :  { %v2523_v15 = vsel %vm2512_vm8, %v2489_v17, %v2491_v22  ;;  %v11573_v59 = vpop.permute.xlu2 %2737  ;;  %v1989_v12 = vpop.permute.xlu0 %1988  ;;  %v16386_v22 = vld [vmem:[#allocation36_spill] sm:$0xff]  ;;  %v3645_v17 = vmul.f32 %v16394_v34, %v16158_v18 }
 0x7bc   :  { %v2581_v32 = vadd.f32 %v2523_v15, %v11470_v35  ;;  %v2024_v14 = vsel %vm2014_vm6, %v11466_v25, %v1989_v12  ;;  %v2082_v19 = vadd.f32 %v1989_v12, %v11474_v27  ;;  %v529_v55 = vsel %vm520_vm0, %v16386_v22, %v16378_v38  ;;  %v16388_v25 = vld [vmem:[#allocation62_spill] sm:$0xff] }
 0x7bd   :  { %v2081_v50 = vadd.f32 %v2024_v14, %v11476_v1  ;;  %v2898_v35 = vmul.f32 %v16385_v6, %v16158_v18  ;;  %v778_v27 = vsel %vm769_vm1, %v16388_v25, %v16379_v57  ;;  %v585_v1 = vadd.f32 %v529_v55, %v336_v56  ;;  %v16391_v57 = vld [vmem:[#allocation231_spill] sm:$0xff] }
 0x7be   :  { %v3147_v63 = vmul.f32 %v16391_v57, %v16158_v18  ;;  %v3148_v61 = vmul.f32 %v16391_v57, %v16161_v30  ;;  %v3646_v15 = vmul.f32 %v16394_v34, %v16161_v30  ;;  %v3397_v12 = vmul.f32 %v16393_v20, %v16161_v30  ;;  %v11678_v57 = vld [vmem:[%s16396_s4] ss:$0 sm:$0xff] }
 0x7bf   :  { %v834_v53 = vadd.f32 %v778_v27, %v585_v1  ;;  %vm4404_vm0 = vcmask 1044480   ;;  %vm4724_vm1 = vcmask 1040384  }
 0x7c0   :  { %2980 = vrot.lane.b32.xlu1 %v2899_v49, %s8044_s0  ;;  %v3333_v49 = vadd.f32 %v11532_v5, %v11300_v23 }
 0x7c1   :  { %3480 = vrot.lane.b32.xlu2 %v3398_v46, %s8046_s29  ;;  %2978 = vrot.lane.b32.xlu0 %v2898_v35, %s8044_s0  ;;  %v1083_v43 = vadd.f32 %v1027_v54, %v834_v53 }
 0x7c2   :  { %v11598_v41 = vpop.permute.xlu1 %2992 }
 0x7c3   :  { %v11603_v40 = vpop.permute.xlu2 %3241  ;;  %v2991_v3 = vpop.permute.xlu0 %2990  ;;  %v1332_v21 = vadd.f32 %v1276_v39, %v1083_v43 }
 0x7c4   :  { %v3022_v38 = vsel %vm3010_vm10, %v2991_v3, %v11598_v41 }
 0x7c5   :  { %v3081_v13 = vadd.f32 %v3022_v38, %v11507_v11  ;;  %v1581_v10 = vadd.f32 %v1525_v9, %v1332_v21 }
 0x7c8   :  { %3227 = vrot.lane.b32.xlu1 %v3147_v63, %s8045_s28 }
 0x7c9   :  { %3229 = vrot.lane.b32.xlu2 %v3148_v61, %s8045_s28  ;;  %3482 = vrot.lane.b32.xlu0 %v3399_v44, %s8046_s29  ;;  %s16395_s28 = sld [smem:[#allocation253_spill]] }
 0x7ca   :  { %v1734_v31 = vpop.permute.xlu1 %1733 }
 0x7cb   :  { %v1774_v11 = vsel %vm1765_vm5, %v1734_v31, %v1736_v42  ;;  %v1983_v47 = vpop.permute.xlu2 %1982  ;;  %v3495_v62 = vpop.permute.xlu0 %3494  ;;  %vm4504_vm5 = vcmask 1043456  }
 0x7cc   :  { %v1830_v0 = vadd.f32 %v1774_v11, %v1581_v10  ;;  %v3521_v22 = vsel %vm3508_vm12, %v11530_v29, %v3495_v62  ;;  %v3582_v55 = vadd.f32 %v3495_v62, %v3333_v49 }
 0x7cd   :  { %v3581_v46 = vadd.f32 %v3521_v22, %v11540_v26 }
 0x7cf   :  { %v11665_v29 = vld [vmem:[%s16395_s28] ss:$0 sm:$0xff] }
 0x7d0   :  { %3731 = vrot.lane.b32.xlu1 %v3648_v28, %s8047_s1 }
 0x7d1   :  { %3476 = vrot.lane.b32.xlu2 %v3396_v16, %s8046_s29  ;;  %3729 = vrot.lane.b32.xlu0 %v3647_v8, %s8047_s1 }
 0x7d2   :  { %v2238_v52 = vpop.permute.xlu1 %2237 }
 0x7d3   :  { %v2331_v42 = vadd.f32 %v2238_v52, %v2082_v19  ;;  %v2487_v24 = vpop.permute.xlu2 %2486  ;;  %v2236_v9 = vpop.permute.xlu0 %2235 }
 0x7d4   :  { %v2273_v37 = vsel %vm2263_vm7, %v2236_v9, %v2238_v52 }
 0x7d5   :  { %v11631_v45 = vadd.f32 %v2487_v24, %v2331_v42  ;;  %v2330_v51 = vadd.f32 %v2273_v37, %v2081_v50 }
 0x7d8   :  { %3725 = vrot.lane.b32.xlu1 %v3645_v17, %s8047_s1 }
 0x7d9   :  { %3727 = vrot.lane.b32.xlu2 %v3646_v15, %s8047_s1  ;;  %3478 = vrot.lane.b32.xlu0 %v3397_v12, %s8046_s29 }
 0x7da   :  { %v3240_v33 = vpop.permute.xlu1 %3239 }
 0x7db   :  { %v3271_v14 = vsel %vm3259_vm11, %v3240_v33, %v11603_v40  ;;  %v11644_v19 = vpop.permute.xlu2 %3488  ;;  %v11646_v50 = vpop.permute.xlu0 %2739 }
 0x7dc   :  { %v11648_v18 = vadd.f32 %v3271_v14, %v3081_v13  ;;  %v2772_v30 = vsel %vm2761_vm9, %v11573_v59, %v11646_v50 }
 0x7dd   :  { %v11653_v6 = vadd.f32 %v2772_v30, %v2581_v32 }
 0x7df   :  { %v4008_v54 = vpop.f32.mrf.mxu1 }
 0x7e0   :  { %v3961_v32 = vpop.f32.mrf.mxu0 }
 0x7e1   :  { %v4009_v5 = vadd.f32 %v4008_v54, %v3961_v32 }
 0x7e2   :  { %v3744_v2 = vpop.permute.xlu1 %3743 }
 0x7e3   :  { %v3831_v35 = vadd.f32 %v3744_v2, %v3582_v55  ;;  %v2234_v56 = vpop.permute.xlu2 %2233  ;;  %v3742_v25 = vpop.permute.xlu0 %3741  ;;  %v4160_v43 = vmul.f32 %v11665_v29, %v4009_v5 }
 0x7e4   :  { %v3770_v27 = vsel %vm3757_vm13, %v3742_v25, %v3744_v2 }
 0x7e5   :  { %v3863_v1 = vmax.f32 %v3831_v35, 0.0  ;;  %v3830_v7 = vadd.f32 %v3770_v27, %v3581_v46  ;;  %v4184_v31 = vadd.f32 %v11678_v57, %v4160_v43 }
 0x7e7   :  { %7749 = vmatpush.xpose.msk.msra.mxu3 %vm3757_vm13, %v3863_v1  ;;  %v3862_v59 = vmax.f32 %v3830_v7, 0.0  ;;  %v4011_v44 = vpop.f32.mrf.mxu1  ;;  %v11693_v36 = vmax.f32 %v4184_v31, 0.0 }
 0x7e8   :  { %v3964_v61 = vpop.f32.mrf.mxu0 }
 0x7e9   :  { %4073 = vmatpush.xpose.msra.mxu2 %v3862_v59  ;;  %v4012_v21 = vadd.f32 %v4011_v44, %v3964_v61  ;;  %v4245_v9 = vrot.slane %v11693_v36, 1  ;;  %v4405_v22 = vrot.slane %v11693_v36, 3  ;;  %v4725_v2 = vrot.slane %v11693_v36, 7 }
 0x7ea   :  { %v2485_v23 = vpop.permute.xlu1 %2484 }
 0x7eb   :  { %v2522_v26 = vsel %vm2512_vm8, %v2485_v23, %v2487_v24  ;;  %v11668_v3 = vpop.permute.xlu2 %3235  ;;  %v1985_v53 = vpop.permute.xlu0 %1984  ;;  %v4161_v11 = vmul.f32 %v11665_v29, %v4012_v21 }
 0x7ec   :  { %v11670_v38 = vadd.f32 %v2522_v26, %v2330_v51  ;;  %v2023_v58 = vsel %vm2014_vm6, %v1983_v47, %v1985_v53  ;;  %v2080_v39 = vadd.f32 %v1985_v53, %v11561_v48  ;;  %v4565_v51 = vrot.slane %v11693_v36, 5 }
 0x7ed   :  { %v2079_v13 = vadd.f32 %v2023_v58, %v1830_v0  ;;  %v4185_v62 = vadd.f32 %v11678_v57, %v4161_v11  ;;  %v3082_v0 = vadd.f32 %v11598_v41, %v11494_v4  ;;  %vm5313_vm6 = vcmask 203776  }
 0x7ee   :  { %v11680_v63 = vadd.f32 %v2234_v56, %v2080_v39 }
 0x7ef   :  { %v11695_v28 = vmax.f32 %v4185_v62, 0.0  ;;  %v4014_v16 = vpop.f32.mrf.mxu1  ;;  %v3331_v52 = vadd.f32 %v11603_v40, %v3082_v0  ;;  %v2831_v62 = vadd.f32 %v11646_v50, %v11498_v60 }
 0x7f0   :  { %v3967_v20 = vpop.f32.mrf.mxu0 }
 0x7f1   :  { %v4015_v8 = vadd.f32 %v4014_v16, %v3967_v20  ;;  %v4246_v37 = vrot.slane %v11695_v28, 1  ;;  %v4566_v17 = vrot.slane %v11695_v28, 5  ;;  %v4406_v55 = vrot.slane %v11695_v28, 3 }
 0x7f2   :  { %v11682_v10 = vpop.permute.xlu1 %2988  ;;  %v4726_v46 = vrot.slane %v11695_v28, 7 }
 0x7f3   :  { %v11686_v48 = vpop.permute.xlu2 %3739  ;;  %v11688_v47 = vpop.permute.xlu0 %2986  ;;  %v4162_v24 = vmul.f32 %v11665_v29, %v4015_v8  ;;  %v4247_v33 = vsel %vm4244_vm14, %v4245_v9, %v4246_v37  ;;  %v4567_v14 = vsel %vm4564_vm15, %v4565_v51, %v4566_v17  ;;  %v4407_v1 = vsel %vm4404_vm0, %v4405_v22, %v4406_v55 }
 0x7f4   :  { %v7806_v49 = vpack.i.bf16 %v4247_v33, %v4567_v14  ;;  %v4727_v7 = vsel %vm4724_vm1, %v4725_v2, %v4726_v46 }
 0x7f5   :  { %v4186_v12 = vadd.f32 %v11678_v57, %v4162_v24  ;;  %v7811_v54 = vpack.i.bf16 %v4407_v1, %v4727_v7 }
 0x7f6   :  { %7807 = vrot.lane.b32.xlu0 %v7806_v49, %s8048_s27 }
 0x7f7   :  { %v11720_v25 = vmax.f32 %v4186_v12, 0.0  ;;  %7812 = vrot.lane.b32.xlu1 %v7811_v54, %s8048_s27 }
 0x7f8   :  { %v3970_v35 = vpop.f32.mrf.mxu0 }
 0x7f9   :  { %v4408_v53 = vrot.slane %v11720_v25, 3  ;;  %v4728_v58 = vrot.slane %v11720_v25, 7  ;;  %v4248_v16 = vrot.slane %v11720_v25, 1 }
 0x7fa   :  { %v2232_v42 = vpop.permute.xlu1 %2231  ;;  %v4017_v27 = vpop.f32.mrf.mxu1 }
 0x7fb   :  { %v2272_v4 = vsel %vm2263_vm7, %v2232_v42, %v2234_v56  ;;  %v11703_v41 = vpop.permute.xlu2 %2982  ;;  %v3491_v34 = vpop.permute.xlu0 %3490  ;;  %v4018_v59 = vadd.f32 %v4017_v27, %v3970_v35  ;;  %v4409_v43 = vsel %vm4404_vm0, %v4406_v55, %v4408_v53  ;;  %v4729_v61 = vsel %vm4724_vm1, %v4726_v46, %v4728_v58 }
 0x7fc   :  { %v11706_v15 = vadd.f32 %v2272_v4, %v2079_v13  ;;  %v3580_v40 = vadd.f32 %v3491_v34, %v3331_v52  ;;  %v3520_v13 = vsel %vm3508_vm12, %v11644_v19, %v3491_v34  ;;  %v7821_v21 = vpack.i.bf16 %v4409_v43, %v4729_v61 }
 0x7fd   :  { %v4163_v26 = vmul.f32 %v11665_v29, %v4018_v59  ;;  %v3579_v0 = vadd.f32 %v3520_v13, %v11648_v18  ;;  %v4568_v52 = vrot.slane %v11720_v25, 5  ;;  %v3080_v18 = vadd.f32 %v11682_v10, %v2831_v62 }
 0x7fe   :  { %v3829_v30 = vadd.f32 %v11686_v48, %v3580_v40  ;;  %7822 = vrot.lane.b32.xlu0 %v7821_v21, %s8048_s27  ;;  %vm6155_vm7 = vcmask 351232  }
 0x7ff   :  { %v4187_v39 = vadd.f32 %v11678_v57, %v4163_v26 }
 0x800   :  { %v3861_v56 = vmax.f32 %v3829_v30, 0.0  ;;  %v3973_v31 = vpop.f32.mrf.mxu0 }
 0x801   :  { %v11743_v44 = vmax.f32 %v4187_v39, 0.0 }
 0x802   :  { %7750 = vmatpush.xpose.msk.msra.mxu3 %vm3757_vm13, %v3861_v56  ;;  %v11726_v32 = vpop.permute.xlu1 %2735  ;;  %v4020_v11 = vpop.f32.mrf.mxu1 }
 0x803   :  { %v11728_v23 = vpop.permute.xlu2 %3486  ;;  %v2734_v5 = vpop.permute.xlu0 %2733  ;;  %v4021_v19 = vadd.f32 %v4020_v11, %v3973_v31  ;;  %v4250_v8 = vrot.slane %v11743_v44, 1  ;;  %v4570_v42 = vrot.slane %v11743_v44, 5  ;;  %v4410_v13 = vrot.slane %v11743_v44, 3 }
 0x804   :  { %v4730_v21 = vrot.slane %v11743_v44, 7  ;;  %v2771_v62 = vsel %vm2761_vm9, %v2734_v5, %v11726_v32 }
 0x805   :  { %v4164_v50 = vmul.f32 %v11665_v29, %v4021_v19  ;;  %v4251_v4 = vsel %vm4244_vm14, %v4248_v16, %v4250_v8  ;;  %v4571_v40 = vsel %vm4564_vm15, %v4568_v52, %v4570_v42 }
 0x806   :  { %v7826_v14 = vpack.i.bf16 %v4251_v4, %v4571_v40 }
 0x807   :  { %v4188_v34 = vadd.f32 %v11678_v57, %v4164_v50 }
 0x808   :  { %v3976_v30 = vpop.f32.mrf.mxu0  ;;  %7827 = vrot.lane.b32.xlu1 %v7826_v14, %s8048_s27 }
 0x80a   :  { %v3738_v20 = vpop.permute.xlu1 %3737  ;;  %v4023_v49 = vpop.f32.mrf.mxu1 }
 0x80b   :  { %v3769_v24 = vsel %vm3757_vm13, %v3738_v20, %v11686_v48  ;;  %v11755_v9 = vpop.permute.xlu2 %3231  ;;  %v11757_v60 = vpop.permute.xlu0 %3237  ;;  %v11765_v48 = vmax.f32 %v4188_v34, 0.0  ;;  %v4024_v22 = vadd.f32 %v4023_v49, %v3976_v30  ;;  %v4249_v34 = vsel %vm4244_vm14, %v4246_v37, %v4248_v16 }
 0x80c   :  { %v3828_v51 = vadd.f32 %v3769_v24, %v3579_v0  ;;  %v3329_v12 = vadd.f32 %v11757_v60, %v3080_v18  ;;  %v2828_v18 = vadd.f32 %v2771_v62, %v11670_v38  ;;  %v4569_v38 = vsel %vm4564_vm15, %v4566_v17, %v4568_v52 }
 0x80d   :  { %v4252_v46 = vrot.slane %v11765_v48, 1  ;;  %v4572_v35 = vrot.slane %v11765_v48, 5  ;;  %v4165_v1 = vmul.f32 %v11665_v29, %v4024_v22  ;;  %v4412_v61 = vrot.slane %v11765_v48, 3 }
 0x80e   :  { %v3860_v33 = vmax.f32 %v3828_v51, 0.0  ;;  %v3578_v2 = vadd.f32 %v11728_v23, %v3329_v12  ;;  %v4732_v31 = vrot.slane %v11765_v48, 7  ;;  %v7816_v14 = vpack.i.bf16 %v4249_v34, %v4569_v38 }
 0x80f   :  { %v4253_v59 = vsel %vm4244_vm14, %v4250_v8, %v4252_v46  ;;  %v4573_v54 = vsel %vm4564_vm15, %v4570_v42, %v4572_v35  ;;  %v4189_v26 = vadd.f32 %v11678_v57, %v4165_v1  ;;  %v4413_v19 = vsel %vm4404_vm0, %v4410_v13, %v4412_v61 }
 0x810   :  { %4074 = vmatpush.xpose.msra.mxu2 %v3860_v33  ;;  %v7836_v39 = vpack.i.bf16 %v4253_v59, %v4573_v54  ;;  %v3979_v11 = vpop.f32.mrf.mxu0  ;;  %v4733_v20 = vsel %vm4724_vm1, %v4730_v21, %v4732_v31  ;;  %7817 = vrot.lane.b32.xlu2 %v7816_v14, %s8048_s27 }
 0x811   :  { %v11796_v8 = vmax.f32 %v4189_v26, 0.0  ;;  %v7841_v42 = vpack.i.bf16 %v4413_v19, %v4733_v20  ;;  %v3021_v26 = vsel %vm3010_vm10, %v11688_v47, %v11682_v10  ;;  %v4411_v10 = vsel %vm4404_vm0, %v4408_v53, %v4410_v13 }
 0x812   :  { %v11768_v55 = vpop.permute.xlu1 %2482  ;;  %7837 = vrot.lane.b32.xlu0 %v7836_v39, %s8048_s27  ;;  %v4026_v0 = vpop.f32.mrf.mxu1  ;;  %v3079_v47 = vadd.f32 %v3021_v26, %v11653_v6  ;;  %v4731_v19 = vsel %vm4724_vm1, %v4728_v58, %v4730_v21 }
 0x813   :  { %v11773_v56 = vpop.permute.xlu2 %3735  ;;  %v11775_v27 = vpop.permute.xlu0 %2480  ;;  %v4027_v24 = vadd.f32 %v4026_v0, %v3979_v11  ;;  %7842 = vrot.lane.b32.xlu1 %v7841_v42, %s8048_s27  ;;  %v4414_v33 = vrot.slane %v11796_v8, 3  ;;  %v4734_v30 = vrot.slane %v11796_v8, 7  ;;  %v4254_v1 = vrot.slane %v11796_v8, 1 }
 0x814   :  { %v3827_v7 = vadd.f32 %v11773_v56, %v3578_v2  ;;  %v4574_v59 = vrot.slane %v11796_v8, 5  ;;  %v3270_v11 = vsel %vm3259_vm11, %v11668_v3, %v11757_v60  ;;  %v7831_v3 = vpack.i.bf16 %v4411_v10, %v4731_v19 }
 0x815   :  { %v4166_v5 = vmul.f32 %v11665_v29, %v4027_v24  ;;  %v4735_v22 = vsel %vm4724_vm1, %v4732_v31, %v4734_v30  ;;  %v3328_v24 = vadd.f32 %v3270_v11, %v3079_v47  ;;  %v4255_v10 = vsel %vm4244_vm14, %v4252_v46, %v4254_v1 }
 0x816   :  { %v3859_v43 = vmax.f32 %v3827_v7, 0.0  ;;  %v4575_v47 = vsel %vm4564_vm15, %v4572_v35, %v4574_v59 }
 0x817   :  { %v4190_v12 = vadd.f32 %v11678_v57, %v4166_v5 }
 0x818   :  { %7751 = vmatpush.xpose.msk.msra.mxu3 %vm3757_vm13, %v3859_v43  ;;  %7832 = vrot.lane.b32.xlu2 %v7831_v3, %s8048_s27  ;;  %v7846_v3 = vpack.i.bf16 %v4255_v10, %v4575_v47 }
 0x819   :  { %v11817_v49 = vmax.f32 %v4190_v12, 0.0 }
 0x81a   :  { %v3485_v50 = vpop.permute.xlu1 %3484  ;;  %v3982_v37 = vpop.f32.mrf.mxu0 }
 0x81b   :  { %v11799_v51 = vpop.permute.xlu0 %2984  ;;  %v4029_v16 = vpop.f32.mrf.mxu1  ;;  %v4256_v7 = vrot.slane %v11817_v49, 1  ;;  %v4576_v54 = vrot.slane %v11817_v49, 5  ;;  %v3519_v20 = vsel %vm3508_vm12, %v3485_v50, %v11728_v23  ;;  %v4416_v14 = vrot.slane %v11817_v49, 3 }
 0x81c   :  { %v3020_v4 = vsel %vm3010_vm10, %v11703_v41, %v11799_v51  ;;  %v4415_v41 = vsel %vm4404_vm0, %v4412_v61, %v4414_v33  ;;  %v4030_v52 = vadd.f32 %v4029_v16, %v3982_v37  ;;  %v3577_v13 = vadd.f32 %v3519_v20, %v3328_v24 }
 0x81d   :  { %v11809_v40 = vadd.f32 %v3020_v4, %v2828_v18  ;;  %v7851_v17 = vpack.i.bf16 %v4415_v41, %v4735_v22  ;;  %v4257_v61 = vsel %vm4244_vm14, %v4254_v1, %v4256_v7  ;;  %v4577_v31 = vsel %vm4564_vm15, %v4574_v59, %v4576_v54  ;;  %v3481_v22 = vpop.permute.xlu2 %3480 }
 0x81e   :  { %v4167_v43 = vmul.f32 %v11665_v29, %v4030_v52  ;;  %v7856_v0 = vpack.i.bf16 %v4257_v61, %v4577_v31  ;;  %v4736_v16 = vrot.slane %v11817_v49, 7 }
 0x81f   :  { %7852 = vrot.lane.b32.xlu0 %v7851_v17, %s8048_s27 }
 0x820   :  { %v4191_v62 = vadd.f32 %v11678_v57, %v4167_v43  ;;  %7857 = vrot.lane.b32.xlu1 %v7856_v0, %s8048_s27  ;;  %7847 = vrot.lane.b32.xlu2 %v7846_v3, %s8048_s27 }
 0x822   :  { %v11826_v2 = vpop.permute.xlu1 %2731  ;;  %v11854_v42 = vmax.f32 %v4191_v62, 0.0  ;;  %v3985_v60 = vpop.f32.mrf.mxu0 }
 0x823   :  { %v11835_v39 = vpop.permute.xlu0 %2729  ;;  %v4032_v18 = vpop.f32.mrf.mxu1 }
 0x824   :  { %v4033_v53 = vadd.f32 %v4032_v18, %v3985_v60  ;;  %v4258_v5 = vrot.slane %v11854_v42, 1  ;;  %v4578_v58 = vrot.slane %v11854_v42, 5  ;;  %v4738_v17 = vrot.slane %v11854_v42, 7 }
 0x825   :  { %v3230_v35 = vpop.permute.xlu2 %3229 }
 0x826   :  { %v4168_v50 = vmul.f32 %v11665_v29, %v4033_v53  ;;  %v4259_v34 = vsel %vm4244_vm14, %v4256_v7, %v4258_v5  ;;  %v4579_v38 = vsel %vm4564_vm15, %v4576_v54, %v4578_v58  ;;  %v4739_v43 = vsel %vm4724_vm1, %v4736_v16, %v4738_v17 }
 0x827   :  { %v7866_v37 = vpack.i.bf16 %v4259_v34, %v4579_v38 }
 0x828   :  { %v4192_v12 = vadd.f32 %v11678_v57, %v4168_v50 }
 0x829   :  { %7867 = vrot.lane.b32.xlu0 %v7866_v37, %s8048_s27 }
 0x82a   :  { %v3734_v6 = vpop.permute.xlu1 %3733  ;;  %v11874_v7 = vmax.f32 %v4192_v12, 0.0 }
 0x82b   :  { %v3768_v23 = vsel %vm3757_vm13, %v3734_v6, %v11773_v56  ;;  %v3234_v21 = vpop.permute.xlu0 %3233  ;;  %v4418_v56 = vrot.slane %v11854_v42, 3  ;;  %v3988_v52 = vpop.f32.mrf.mxu0  ;;  %v2829_v6 = vadd.f32 %v11726_v32, %v11631_v45  ;;  %v4417_v45 = vsel %vm4404_vm0, %v4414_v33, %v4416_v14 }
 0x82c   :  { %v3826_v4 = vadd.f32 %v3768_v23, %v3577_v13  ;;  %v4035_v26 = vpop.f32.mrf.mxu1  ;;  %v4420_v19 = vrot.slane %v11874_v7, 3  ;;  %v4580_v53 = vrot.slane %v11874_v7, 5  ;;  %v3269_v12 = vsel %vm3259_vm11, %v11755_v9, %v3234_v21 }
 0x82d   :  { %v4419_v54 = vsel %vm4404_vm0, %v4416_v14, %v4418_v56  ;;  %v4036_v61 = vadd.f32 %v4035_v26, %v3988_v52  ;;  %v4737_v32 = vsel %vm4724_vm1, %v4734_v30, %v4736_v16  ;;  %v2578_v9 = vadd.f32 %v11768_v55, %v11680_v63  ;;  %v3477_v30 = vpop.permute.xlu2 %3476 }
 0x82e   :  { %v3858_v41 = vmax.f32 %v3826_v4, 0.0  ;;  %v7871_v11 = vpack.i.bf16 %v4419_v54, %v4739_v43  ;;  %v4421_v60 = vsel %vm4404_vm0, %v4418_v56, %v4420_v19  ;;  %v3078_v4 = vadd.f32 %v11799_v51, %v2829_v6  ;;  %v4920_v6 = vld [vmem:[%s15537_s6 + $0x78] sm:$0xff] }
 0x82f   :  { %v4169_v0 = vmul.f32 %v11665_v29, %v4036_v61  ;;  %v4740_v29 = vrot.slane %v11874_v7, 7  ;;  %v7861_v37 = vpack.i.bf16 %v4417_v45, %v4737_v32  ;;  %v3326_v56 = vadd.f32 %v3269_v12, %v11809_v40  ;;  %4973 = vmatpush.msrb.mxu0 %v4920_v6  ;;  %v4936_v12 = vld [vmem:[%s15537_s6 + $0xf8] sm:$0xff]  ;;  %v4918_v32 = vld [vmem:[%s15537_s6 + $0x68] sm:$0xff] }
 0x830   :  { %4075 = vmatpush.xpose.msra.mxu2 %v3858_v41  ;;  %7872 = vrot.lane.b32.xlu1 %v7871_v11, %s8048_s27  ;;  %v3327_v41 = vadd.f32 %v3234_v21, %v3078_v4  ;;  %v2521_v33 = vsel %vm2512_vm8, %v11775_v27, %v11768_v55  ;;  %v2770_v40 = vsel %vm2761_vm9, %v11835_v39, %v11826_v2  ;;  %v8012_v4 = vld [vmem:[%s16341_s30] sm:$0xff]  ;;  %v4948_v6 = vld [vmem:[%s15537_s6 + $0x158] sm:$0xff] }
 0x831   :  { %v4193_v20 = vadd.f32 %v11678_v57, %v4169_v0  ;;  %v4741_v46 = vsel %vm4724_vm1, %v4738_v17, %v4740_v29  ;;  %v4260_v57 = vrot.slane %v11874_v7, 1  ;;  %7862 = vrot.lane.b32.xlu2 %v7861_v37, %s8048_s27  ;;  %v2577_v54 = vadd.f32 %v2521_v33, %v11706_v15  ;;  %5050 = vmatpush.msrb.mxu1 %v4936_v12  ;;  %v4935_v37 = vld [vmem:[%s15537_s6 + $0xf0] sm:$0xff] }
 0x832   :  { %v2981_v31 = vpop.permute.xlu1 %2980  ;;  %v7881_v1 = vpack.i.bf16 %v4421_v60, %v4741_v46  ;;  %v4915_v33 = vld [vmem:[%s15537_s6 + $0x50] sm:$0xff] }
 0x833   :  { %v2979_v62 = vpop.permute.xlu0 %2978  ;;  %v11893_v24 = vmax.f32 %v4193_v20, 0.0  ;;  %v2826_v27 = vadd.f32 %v2770_v40, %v2577_v54  ;;  %v4261_v60 = vsel %vm4244_vm14, %v4258_v5, %v4260_v57  ;;  %5051 = vmatpush.msrb.mxu1 %v4935_v37  ;;  %v4929_v40 = vld [vmem:[%s15537_s6 + $0xc0] sm:$0xff]  ;;  %v4346_v37 = vrot.slane %v11695_v28, 2 }
 0x834   :  { %7882 = vrot.lane.b32.xlu0 %v7881_v1, %s8048_s27  ;;  %v3019_v55 = vsel %vm3010_vm10, %v2979_v62, %v2981_v31  ;;  %v8016_v54 = vld [vmem:[%s16341_s30 + $0x20] sm:$0xff] }
 0x835   :  { %v4262_v18 = vrot.slane %v11893_v24, 1  ;;  %v4582_v13 = vrot.slane %v11893_v24, 5  ;;  %v3075_v10 = vadd.f32 %v3019_v55, %v2826_v27  ;;  %v3728_v62 = vpop.permute.xlu2 %3727  ;;  %v4952_v55 = vld [vmem:[%s15537_s6 + $0x178] sm:$0xff]  ;;  %v4910_v27 = vld [vmem:[%s15537_s6 + $0x28] sm:$0xff] }
 0x837   :  { %v4263_v50 = vsel %vm4244_vm14, %v4260_v57, %v4262_v18  ;;  %v4583_v34 = vsel %vm4564_vm15, %v4580_v53, %v4582_v13  ;;  %v4742_v57 = vrot.slane %v11893_v24, 7 }
 0x838   :  { %v7886_v38 = vpack.i.bf16 %v4263_v50, %v4583_v34  ;;  %v4919_v34 = vld [vmem:[%s15537_s6 + $0x70] sm:$0xff] }
 0x839   :  { %v4743_v45 = vsel %vm4724_vm1, %v4740_v29, %v4742_v57  ;;  %4974 = vmatpush.msrb.mxu0 %v4919_v34  ;;  %v4934_v29 = vld [vmem:[%s15537_s6 + $0xe8] sm:$0xff] }
 0x83a   :  { %v3228_v59 = vpop.permute.xlu1 %3227  ;;  %7887 = vrot.lane.b32.xlu1 %v7886_v38, %s8048_s27  ;;  %5052 = vmatpush.msrb.mxu1 %v4934_v29  ;;  %v4922_v34 = vld [vmem:[%s15537_s6 + $0x88] sm:$0xff] }
 0x83b   :  { %v3483_v23 = vpop.permute.xlu0 %3482  ;;  %v3268_v0 = vsel %vm3259_vm11, %v3228_v59, %v3230_v35  ;;  %4975 = vmatpush.msrb.mxu0 %v4918_v32  ;;  %v4962_v32 = vld [vmem:[%s15537_s6 + $0x1c8] sm:$0xff] }
 0x83c   :  { %v3518_v51 = vsel %vm3508_vm12, %v3481_v22, %v3483_v23  ;;  %v3576_v17 = vadd.f32 %v3483_v23, %v3327_v41  ;;  %v2827_v22 = vadd.f32 %v11826_v2, %v2578_v9  ;;  %v3324_v20 = vadd.f32 %v3268_v0, %v3075_v10  ;;  %v8014_v9 = vld [vmem:[%s16341_s30 + $0x10] sm:$0xff]  ;;  %v8019_v29 = vld [vmem:[%s16341_s30 + $0x48] sm:$0xff] }
 0x83d   :  { %v3575_v21 = vadd.f32 %v3518_v51, %v3326_v56  ;;  %v4916_v51 = vld [vmem:[%s15537_s6 + $0x58] sm:$0xff]  ;;  %v4933_v56 = vld [vmem:[%s15537_s6 + $0xe0] sm:$0xff]  ;;  %v4967_v0 = vld [vmem:[%s15537_s6 + $0x1f0] sm:$0xff] }
 0x83e   :  { %v3076_v61 = vadd.f32 %v2981_v31, %v2827_v22  ;;  %v4581_v31 = vsel %vm4564_vm15, %v4578_v58, %v4580_v53  ;;  %v4422_v58 = vrot.slane %v11893_v24, 3  ;;  %v8011_v53 = vld [vmem:[%s16341_s30 + $0x8] sm:$0xff]  ;;  %5053 = vmatpush.msrb.mxu1 %v4933_v56  ;;  %v4912_v22 = vld [vmem:[%s15537_s6 + $0x38] sm:$0xff]  ;;  %v4951_v10 = vld [vmem:[%s15537_s6 + $0x170] sm:$0xff] }
 0x83f   :  { %v7876_v1 = vpack.i.bf16 %v4261_v60, %v4581_v31  ;;  %v4965_v60 = vld [vmem:[%s15537_s6 + $0x1e0] sm:$0xff]  ;;  %v8017_v31 = vld [vmem:[%s16341_s30 + $0x38] sm:$0xff] }
 0x840   :  { %v3325_v47 = vadd.f32 %v3230_v35, %v3076_v61  ;;  %v4423_v38 = vsel %vm4404_vm0, %v4420_v19, %v4422_v58  ;;  %v4917_v19 = vld [vmem:[%s15537_s6 + $0x60] sm:$0xff]  ;;  %v4968_v61 = vld [vmem:[%s15537_s6 + $0x1f8] sm:$0xff] }
 0x841   :  { %7877 = vrot.lane.b32.xlu2 %v7876_v1, %s8048_s27  ;;  %v7891_v41 = vpack.i.bf16 %v4423_v38, %v4743_v45  ;;  %4976 = vmatpush.msrb.mxu0 %v4917_v19  ;;  %v4907_v1 = vld [vmem:[%s15537_s6 + $0x10] sm:$0xff]  ;;  %v4946_v38 = vld [vmem:[%s15537_s6 + $0x148] sm:$0xff]  ;;  %v4921_v19 = vld [vmem:[%s15537_s6 + $0x80] sm:$0xff] }
 0x842   :  { %v3732_v14 = vpop.permute.xlu1 %3731  ;;  %v4961_v56 = vld [vmem:[%s15537_s6 + $0x1c0] sm:$0xff] }
 0x843   :  { %v3825_v16 = vadd.f32 %v3732_v14, %v3576_v17  ;;  %v3730_v52 = vpop.permute.xlu0 %3729  ;;  %v8013_v17 = vld [vmem:[%s16341_s30 + $0x18] sm:$0xff]  ;;  %4977 = vmatpush.msrb.mxu0 %v4916_v51 }
 0x844   :  { %v3767_v26 = vsel %vm3757_vm13, %v3730_v52, %v3732_v14  ;;  %v4932_v14 = vld [vmem:[%s15537_s6 + $0xd8] sm:$0xff]  ;;  %v4930_v52 = vld [vmem:[%s15537_s6 + $0xc8] sm:$0xff] }
 0x845   :  { %v3857_v63 = vmax.f32 %v3825_v16, 0.0  ;;  %v3824_v43 = vadd.f32 %v3767_v26, %v3575_v21  ;;  %4978 = vmatpush.msrb.mxu0 %v4915_v33  ;;  %v4931_v21 = vld [vmem:[%s15537_s6 + $0xd0] sm:$0xff]  ;;  %5054 = vmatpush.msrb.mxu1 %v4932_v14  ;;  %v4913_v16 = vld [vmem:[%s15537_s6 + $0x40] sm:$0xff]  ;;  %v8015_v26 = vld [vmem:[%s16341_s30 + $0x28] sm:$0xff] }
 0x847   :  { %7752 = vmatpush.xpose.msk.msra.mxu3 %vm3757_vm13, %v3857_v63  ;;  %v3856_v11 = vmax.f32 %v3824_v43, 0.0  ;;  %5055 = vmatpush.msrb.mxu1 %v4931_v21  ;;  %v4911_v63 = vld [vmem:[%s15537_s6 + $0x30] sm:$0xff]  ;;  %v4928_v43 = vld [vmem:[%s15537_s6 + $0xb8] sm:$0xff] }
 0x848   :  { %v4960_v21 = vld [vmem:[%s15537_s6 + $0x1b8] sm:$0xff] }
 0x849   :  { %4076 = vmatpush.xpose.msra.mxu2 %v3856_v11  ;;  %7892 = vrot.lane.b32.xlu2 %v7891_v41, %s8048_s27  ;;  %v4927_v11 = vld [vmem:[%s15537_s6 + $0xb0] sm:$0xff]  ;;  %v4345_v41 = vrot.slane %v11693_v36, 2 }
 0x84a   :  { %v3726_v2 = vpop.permute.xlu1 %3725  ;;  %5056 = vmatpush.msrb.mxu1 %v4930_v52 }
 0x84b   :  { %v3479_v39 = vpop.permute.xlu0 %3478  ;;  %v3766_v59 = vsel %vm3757_vm13, %v3726_v2, %v3728_v62  ;;  %v4966_v2 = vld [vmem:[%s15537_s6 + $0x1e8] sm:$0xff]  ;;  %v4347_v14 = vsel %vm4344_vm3, %v4345_v41, %v4346_v37  ;;  %v4352_v41 = vrot.slane %v11765_v48, 2 }
 0x84c   :  { %v3517_v3 = vsel %vm3508_vm12, %v3477_v30, %v3479_v39  ;;  %v3574_v15 = vadd.f32 %v3479_v39, %v3325_v47  ;;  %v4914_v30 = vld [vmem:[%s15537_s6 + $0x48] sm:$0xff]  ;;  %5057 = vmatpush.msrb.mxu1 %v4929_v40  ;;  %v4909_v47 = vld [vmem:[%s15537_s6 + $0x20] sm:$0xff] }
 0x84d   :  { %v3573_v46 = vadd.f32 %v3517_v3, %v3324_v20  ;;  %4979 = vmatpush.msrb.mxu0 %v4914_v30  ;;  %v4926_v20 = vld [vmem:[%s15537_s6 + $0xa8] sm:$0xff]  ;;  %v4908_v3 = vld [vmem:[%s15537_s6 + $0x18] sm:$0xff] }
 0x84e   :  { %v3823_v35 = vadd.f32 %v3728_v62, %v3574_v15  ;;  %5058 = vmatpush.msrb.mxu1 %v4928_v43  ;;  %v4950_v39 = vld [vmem:[%s15537_s6 + $0x168] sm:$0xff]  ;;  %v4925_v15 = vld [vmem:[%s15537_s6 + $0xa0] sm:$0xff] }
 0x84f   :  { %v3822_v23 = vadd.f32 %v3766_v59, %v3573_v46  ;;  %4980 = vmatpush.msrb.mxu0 %v4913_v16  ;;  %v4949_v62 = vld [vmem:[%s15537_s6 + $0x160] sm:$0xff]  ;;  %v8018_v46 = vld [vmem:[%s16341_s30 + $0x30] sm:$0xff]  ;;  %v4924_v59 = vld [vmem:[%s15537_s6 + $0x98] sm:$0xff] }
 0x850   :  { %v3855_v50 = vmax.f32 %v3823_v35, 0.0  ;;  %5059 = vmatpush.msrb.mxu1 %v4927_v11  ;;  %v4964_v35 = vld [vmem:[%s15537_s6 + $0x1d8] sm:$0xff]  ;;  %v4958_v43 = vld [vmem:[%s15537_s6 + $0x1a8] sm:$0xff] }
 0x851   :  { %v3854_v5 = vmax.f32 %v3822_v23, 0.0  ;;  %4981 = vmatpush.msrb.mxu0 %v4912_v22  ;;  %v4906_v23 = vld [vmem:[%s15537_s6 + $0x8] sm:$0xff]  ;;  %v4944_v16 = vld [vmem:[%s15537_s6 + $0x138] sm:$0xff]  ;;  %v4959_v22 = vld [vmem:[%s15537_s6 + $0x1b0] sm:$0xff] }
 0x852   :  { %7753 = vmatpush.xpose.msk.msra.mxu3 %vm3757_vm13, %v3855_v50  ;;  %5060 = vmatpush.msrb.mxu1 %v4926_v20  ;;  %v4923_v50 = vld [vmem:[%s15537_s6 + $0x90] sm:$0xff]  ;;  %v8021_v11 = vld [vmem:[%s16341_s30 + $0x58] sm:$0xff] }
 0x853   :  { %4077 = vmatpush.xpose.msra.mxu2 %v3854_v5  ;;  %4982 = vmatpush.msrb.mxu0 %v4911_v63  ;;  %v4963_v5 = vld [vmem:[%s15537_s6 + $0x1d0] sm:$0xff] }
 0x854   :  { %5061 = vmatpush.msrb.mxu1 %v4925_v15  ;;  %v8022_v20 = vld [vmem:[%s16341_s30 + $0x50] sm:$0xff]  ;;  %v4940_v15 = vld [vmem:[%s15537_s6 + $0x118] sm:$0xff] }
 0x855   :  { %7754 = vmatmul.msk.f32.vlgmr.msra.gmra.mxu3 %vm3757_vm13, %v8011_v53  ;;  %4983 = vmatpush.msrb.mxu0 %v4910_v27  ;;  %v4947_v53 = vld [vmem:[%s15537_s6 + $0x150] sm:$0xff]  ;;  %v4942_v27 = vld [vmem:[%s15537_s6 + $0x128] sm:$0xff] }
 0x856   :  { %4078 = vmatmul.f32.vlgmr.msra.gmra.mxu2 %v8012_v4  ;;  %5204 = vmatpush.msrb.mxu3 %v4968_v61  ;;  %v4905_v4 = vld [vmem:[%s15537_s6] sm:$0xff]  ;;  %v4348_v61 = vrot.slane %v11720_v25, 2 }
 0x857   :  { %5127 = vmatpush.msrb.mxu2 %v4952_v55  ;;  %4984 = vmatpush.msrb.mxu0 %v4909_v47 }
 0x858   :  { %5205 = vmatpush.msrb.mxu3 %v4967_v0  ;;  %5062 = vmatpush.msrb.mxu1 %v4924_v59  ;;  %v4349_v47 = vsel %vm4344_vm3, %v4346_v37, %v4348_v61 }
 0x859   :  { %5128 = vmatpush.msrb.mxu2 %v4951_v10  ;;  %4985 = vmatpush.msrb.mxu0 %v4908_v3  ;;  %v4957_v10 = vld [vmem:[%s15537_s6 + $0x1a0] sm:$0xff]  ;;  %v4956_v3 = vld [vmem:[%s15537_s6 + $0x198] sm:$0xff] }
 0x85a   :  { %5206 = vmatpush.msrb.mxu3 %v4966_v2  ;;  %5063 = vmatpush.msrb.mxu1 %v4923_v50  ;;  %v4941_v2 = vld [vmem:[%s15537_s6 + $0x120] sm:$0xff] }
 0x85b   :  { %5129 = vmatpush.msrb.mxu2 %v4950_v39  ;;  %4986 = vmatpush.msrb.mxu0 %v4907_v1 }
 0x85c   :  { %5207 = vmatpush.msrb.mxu3 %v4965_v60  ;;  %5064 = vmatpush.msrb.mxu1 %v4922_v34  ;;  %v4350_v60 = vrot.slane %v11743_v44, 2  ;;  %v8024_v34 = vld [vmem:[%s16341_s30 + $0x60] sm:$0xff] }
 0x85d   :  { %7755 = vmatmul.msk.f32.gmra.mxu3 %vm3757_vm13, %v8013_v17  ;;  %5130 = vmatpush.msrb.mxu2 %v4949_v62  ;;  %v4945_v17 = vld [vmem:[%s15537_s6 + $0x140] sm:$0xff] }
 0x85e   :  { %4081 = vmatmul.f32.gmra.mxu2 %v8014_v9  ;;  %5208 = vmatpush.msrb.mxu3 %v4964_v35  ;;  %v8020_v9 = vld [vmem:[%s16341_s30 + $0x40] sm:$0xff]  ;;  %v4954_v35 = vld [vmem:[%s15537_s6 + $0x188] sm:$0xff]  ;;  %v4351_v50 = vsel %vm4344_vm3, %v4348_v61, %v4350_v60 }
 0x85f   :  { %5131 = vmatpush.msrb.mxu2 %v4948_v6  ;;  %4987 = vmatpush.msrb.mxu0 %v4906_v23  ;;  %v4938_v23 = vld [vmem:[%s15537_s6 + $0x108] sm:$0xff] }
 0x860   :  { %5209 = vmatpush.msrb.mxu3 %v4963_v5  ;;  %5065 = vmatpush.msrb.mxu1 %v4921_v19  ;;  %v8023_v5 = vld [vmem:[%s16341_s30 + $0x68] sm:$0xff] }
 0x861   :  { %5132 = vmatpush.msrb.mxu2 %v4947_v53  ;;  %4988 = vmatpush.msrb.mxu0 %v4905_v4  ;;  %v4953_v4 = vld [vmem:[%s15537_s6 + $0x180] sm:$0xff] }
 0x862   :  { %5210 = vmatpush.msrb.mxu3 %v4962_v32 }
 0x863   :  { %5133 = vmatpush.msrb.mxu2 %v4946_v38  ;;  %v4937_v38 = vld [vmem:[%s15537_s6 + $0x100] sm:$0xff] }
 0x864   :  { %5211 = vmatpush.msrb.mxu3 %v4961_v56  ;;  %v4353_v56 = vsel %vm4344_vm3, %v4350_v60, %v4352_v41  ;;  %v8030_v60 = vld [vmem:[%s16341_s30 + $0x90] sm:$0xff] }
 0x865   :  { %7756 = vmatmul.msk.f32.gmra.mxu3 %vm3757_vm13, %v8015_v26  ;;  %5134 = vmatpush.msrb.mxu2 %v4945_v17  ;;  %v4943_v26 = vld [vmem:[%s15537_s6 + $0x130] sm:$0xff] }
 0x866   :  { %4084 = vmatmul.f32.gmra.mxu2 %v8016_v54  ;;  %5212 = vmatpush.msrb.mxu3 %v4960_v21  ;;  %v8026_v17 = vld [vmem:[%s16341_s30 + $0x70] sm:$0xff]  ;;  %v4354_v21 = vrot.slane %v11796_v8, 2 }
 0x867   :  { %5135 = vmatpush.msrb.mxu2 %v4944_v16 }
 0x868   :  { %v12119_v12 = vpop.permute.xlu0 %7807  ;;  %5213 = vmatpush.msrb.mxu3 %v4959_v22  ;;  %v8027_v22 = vld [vmem:[%s16341_s30 + $0x88] sm:$0xff] }
 0x869   :  { %v7810_v45 = vunpack.i.h.bf16 %v12119_v12  ;;  %v12148_v33 = vpop.permute.xlu1 %7812  ;;  %5136 = vmatpush.msrb.mxu2 %v4943_v26 }
 0x86a   :  { %v7815_v30 = vunpack.i.h.bf16 %v12148_v33  ;;  %v12162_v40 = vpop.permute.xlu2 %7817  ;;  %5214 = vmatpush.msrb.mxu3 %v4958_v43  ;;  %v8028_v43 = vld [vmem:[%s16341_s30 + $0x80] sm:$0xff] }
 0x86b   :  { %v4825_v51 = vsel %vm4824_vm2, %v11693_v36, %v7810_v45  ;;  %v7820_v54 = vunpack.i.h.bf16 %v12162_v40  ;;  %5137 = vmatpush.msrb.mxu2 %v4942_v27  ;;  %v4356_v27 = vrot.slane %v11817_v49, 2 }
 0x86c   :  { %4989 = vmatmul.f32.vlgmr.msrb.gmra.mxu0 %v4825_v51  ;;  %v4845_v52 = vsel %vm4824_vm2, %v4347_v14, %v7815_v30  ;;  %5215 = vmatpush.msrb.mxu3 %v4957_v10 }
 0x86d   :  { %7757 = vmatmul.msk.f32.gmra.mxu3 %vm3757_vm13, %v8017_v31  ;;  %5066 = vmatmul.f32.vlgmr.msrb.gmra.mxu1 %v4845_v52  ;;  %v4826_v0 = vsel %vm4824_vm2, %v11695_v28, %v7820_v54  ;;  %v4955_v31 = vld [vmem:[%s15537_s6 + $0x190] sm:$0xff]  ;;  %v4355_v54 = vsel %vm4344_vm3, %v4352_v41, %v4354_v21 }
 0x86e   :  { %4087 = vmatmul.f32.gmra.mxu2 %v8018_v46  ;;  %5216 = vmatpush.msrb.mxu3 %v4956_v3  ;;  %v4939_v46 = vld [vmem:[%s15537_s6 + $0x110] sm:$0xff]  ;;  %v4665_v3 = vrot.slane %v11693_v36, 6 }
 0x86f   :  { %5138 = vmatpush.msrb.mxu2 %v4941_v2  ;;  %v4357_v2 = vsel %vm4344_vm3, %v4354_v21, %v4356_v27 }
 0x870   :  { %v12168_v63 = vpop.permute.xlu0 %7822  ;;  %5217 = vmatpush.msrb.mxu3 %v4955_v31  ;;  %v4505_v31 = vrot.slane %v11693_v36, 4 }
 0x871   :  { %v7825_v55 = vunpack.i.h.bf16 %v12168_v63  ;;  %5139 = vmatpush.msrb.mxu2 %v4940_v15  ;;  %v4666_v15 = vrot.slane %v11695_v28, 6 }
 0x872   :  { %v12211_v59 = vpop.permute.xlu2 %7832  ;;  %5218 = vmatpush.msrb.mxu3 %v4954_v35  ;;  %v7814_v35 = vunpack.i.l.bf16 %v12148_v33  ;;  %v4668_v33 = vrot.slane %v11720_v25, 6 }
 0x873   :  { %v4846_v39 = vsel %vm4824_vm2, %v4349_v47, %v7825_v55  ;;  %v7835_v6 = vunpack.i.h.bf16 %v12211_v59  ;;  %5140 = vmatpush.msrb.mxu2 %v4939_v46  ;;  %v4506_v46 = vrot.slane %v11695_v28, 4 }
 0x874   :  { %4992 = vmatmul.f32.gmra.mxu0 %v4826_v0  ;;  %5219 = vmatpush.msrb.mxu3 %v4953_v4 }
 0x875   :  { %7758 = vmatmul.msk.f32.gmra.mxu3 %vm3757_vm13, %v8019_v29  ;;  %5069 = vmatmul.f32.gmra.mxu1 %v4846_v39  ;;  %v4847_v45 = vsel %vm4824_vm2, %v4351_v50, %v7835_v6  ;;  %v8025_v29 = vld [vmem:[%s16341_s30 + $0x78] sm:$0xff]  ;;  %v7809_v6 = vunpack.i.l.bf16 %v12119_v12  ;;  %v4507_v50 = vsel %vm4504_vm5, %v4505_v31, %v4506_v46 }
 0x876   :  { %4090 = vmatmul.f32.gmra.mxu2 %v8020_v9  ;;  %v8029_v39 = vld [vmem:[%s16341_s30 + $0x98] sm:$0xff] }
 0x877   :  { %5141 = vmatpush.msrb.mxu2 %v4938_v23  ;;  %v4667_v23 = vsel %vm4664_vm4, %v4665_v3, %v4666_v15  ;;  %v4865_v4 = vsel %vm4824_vm2, %v4507_v50, %v7809_v6 }
 0x878   :  { %v4885_v28 = vsel %vm4824_vm2, %v4667_v23, %v7814_v35 }
 0x879   :  { %5142 = vmatpush.msrb.mxu2 %v4937_v38 }
 0x87a   :  { %v12205_v62 = vpop.permute.xlu1 %7827  ;;  %v12255_v30 = vpop.permute.xlu2 %7847 }
 0x87b   :  { %v7830_v1 = vunpack.i.h.bf16 %v12205_v62  ;;  %v7850_v16 = vunpack.i.h.bf16 %v12255_v30 }
 0x87d   :  { %7759 = vmatmul.msk.f32.gmra.mxu3 %vm3757_vm13, %v8021_v11  ;;  %v4827_v53 = vsel %vm4824_vm2, %v11720_v25, %v7830_v1  ;;  %5072 = vmatmul.f32.gmra.mxu1 %v4847_v45  ;;  %v4829_v52 = vsel %vm4824_vm2, %v11765_v48, %v7850_v16  ;;  %v4670_v16 = vrot.slane %v11743_v44, 6 }
 0x87e   :  { %4093 = vmatmul.f32.gmra.mxu2 %v8022_v20  ;;  %4995 = vmatmul.f32.gmra.mxu0 %v4827_v53  ;;  %v4358_v53 = vrot.slane %v11854_v42, 2 }
 0x880   :  { %v4359_v45 = vsel %vm4344_vm3, %v4356_v27, %v4358_v53  ;;  %v4362_v27 = vrot.slane %v11893_v24, 2 }
 0x884   :  { %v12237_v32 = vpop.permute.xlu0 %7837 }
 0x885   :  { %7760 = vmatmul.msk.f32.gmra.mxu3 %vm3757_vm13, %v8023_v5  ;;  %v7840_v37 = vunpack.i.h.bf16 %v12237_v32  ;;  %v12247_v51 = vpop.permute.xlu1 %7842  ;;  %v7839_v6 = vunpack.i.l.bf16 %v12237_v32 }
 0x886   :  { %4096 = vmatmul.f32.gmra.mxu2 %v8024_v34  ;;  %v7845_v9 = vunpack.i.h.bf16 %v12247_v51  ;;  %v4508_v34 = vrot.slane %v11720_v25, 4  ;;  %v7844_v35 = vunpack.i.l.bf16 %v12247_v51  ;;  %v7849_v51 = vunpack.i.l.bf16 %v12255_v30 }
 0x887   :  { %v4828_v19 = vsel %vm4824_vm2, %v11743_v44, %v7840_v37  ;;  %v7824_v37 = vunpack.i.l.bf16 %v12168_v63 }
 0x888   :  { %4998 = vmatmul.f32.gmra.mxu0 %v4828_v19  ;;  %v4848_v14 = vsel %vm4824_vm2, %v4353_v56, %v7845_v9  ;;  %v7819_v19 = vunpack.i.l.bf16 %v12162_v40  ;;  %v4360_v9 = vrot.slane %v11874_v7, 2  ;;  %v4509_v25 = vsel %vm4504_vm5, %v4506_v46, %v4508_v34 }
 0x889   :  { %5075 = vmatmul.f32.gmra.mxu1 %v4848_v14  ;;  %v4512_v46 = vrot.slane %v11765_v48, 4 }
 0x88a   :  { %v4866_v40 = vsel %vm4824_vm2, %v4509_v25, %v7819_v19 }
 0x88b   :  { %v12277_v10 = vpop.permute.xlu2 %7862 }
 0x88c   :  { %v7865_v47 = vunpack.i.h.bf16 %v12277_v10 }
 0x88d   :  { %7761 = vmatmul.msk.f32.gmra.mxu3 %vm3757_vm13, %v8025_v29  ;;  %v4669_v29 = vsel %vm4664_vm4, %v4666_v15, %v4668_v33  ;;  %v4363_v15 = vsel %vm4344_vm3, %v4360_v9, %v4362_v27 }
 0x88e   :  { %4099 = vmatmul.f32.gmra.mxu2 %v8026_v17  ;;  %v4850_v1 = vsel %vm4824_vm2, %v4357_v2, %v7865_v47  ;;  %v4886_v21 = vsel %vm4824_vm2, %v4669_v29, %v7824_v37  ;;  %v4671_v47 = vsel %vm4664_vm4, %v4668_v33, %v4670_v16 }
 0x890   :  { %5001 = vmatmul.f32.gmra.mxu0 %v4829_v52 }
 0x891   :  { %v12265_v26 = vpop.permute.xlu0 %7852 }
 0x892   :  { %v7855_v61 = vunpack.i.h.bf16 %v12265_v26  ;;  %v12274_v11 = vpop.permute.xlu1 %7857 }
 0x893   :  { %v7860_v0 = vunpack.i.h.bf16 %v12274_v11 }
 0x894   :  { %v4849_v55 = vsel %vm4824_vm2, %v4355_v54, %v7855_v61  ;;  %v4510_v54 = vrot.slane %v11743_v44, 4  ;;  %v7834_v61 = vunpack.i.l.bf16 %v12211_v59 }
 0x895   :  { %7762 = vmatmul.msk.f32.gmra.mxu3 %vm3757_vm13, %v8027_v22  ;;  %5078 = vmatmul.f32.gmra.mxu1 %v4849_v55  ;;  %v4830_v20 = vsel %vm4824_vm2, %v11796_v8, %v7860_v0  ;;  %v4361_v22 = vsel %vm4344_vm3, %v4358_v53, %v4360_v9  ;;  %v7829_v0 = vunpack.i.l.bf16 %v12205_v62  ;;  %v4518_v9 = vrot.slane %v11854_v42, 4 }
 0x896   :  { %4102 = vmatmul.f32.gmra.mxu2 %v8028_v43  ;;  %v4887_v3 = vsel %vm4824_vm2, %v4671_v47, %v7834_v61  ;;  %v4513_v50 = vsel %vm4504_vm5, %v4510_v54, %v4512_v46  ;;  %v12393_v61 = vld [vmem:[%s16395_s28] ss:$0 sm:$0xff] }
 0x897   :  { %v12403_v47 = vld [vmem:[%s16396_s4] ss:$0 sm:$0xff] }
 0x898   :  { %5004 = vmatmul.f32.gmra.mxu0 %v4830_v20  ;;  %v4511_v20 = vsel %vm4504_vm5, %v4508_v34, %v4510_v54 }
 0x899   :  { %v4867_v62 = vsel %vm4824_vm2, %v4511_v20, %v7829_v0  ;;  %v4522_v0 = vrot.slane %v11893_v24, 4 }
 0x89b   :  { %v12299_v5 = vpop.permute.xlu0 %7867  ;;  %v12317_v17 = vpop.permute.xlu2 %7877 }
 0x89c   :  { %v7870_v36 = vunpack.i.h.bf16 %v12299_v5  ;;  %v7880_v14 = vunpack.i.h.bf16 %v12317_v17 }
 0x89d   :  { %7763 = vmatmul.msk.f32.gmra.mxu3 %vm3757_vm13, %v8029_v39  ;;  %5081 = vmatmul.f32.gmra.mxu1 %v4850_v1 }
 0x89e   :  { %4105 = vmatmul.f32.gmra.mxu2 %v8030_v60  ;;  %v4831_v12 = vsel %vm4824_vm2, %v11817_v49, %v7870_v36  ;;  %v4832_v63 = vsel %vm4824_vm2, %v11854_v42, %v7880_v14  ;;  %v4672_v60 = vrot.slane %v11765_v48, 6  ;;  %v4868_v36 = vsel %vm4824_vm2, %v4513_v50, %v7839_v6 }
 0x89f   :  { %v4514_v48 = vrot.slane %v11796_v8, 4 }
 0x8a0   :  { %5007 = vmatmul.f32.gmra.mxu0 %v4831_v12  ;;  %v4673_v23 = vsel %vm4664_vm4, %v4670_v16, %v4672_v60 }
 0x8a1   :  { %v4888_v53 = vsel %vm4824_vm2, %v4673_v23, %v7844_v35  ;;  %v4515_v33 = vsel %vm4504_vm5, %v4512_v46, %v4514_v48 }
 0x8a2   :  { %v12309_v38 = vpop.permute.xlu1 %7872  ;;  %v4869_v34 = vsel %vm4824_vm2, %v4515_v33, %v7849_v51 }
 0x8a3   :  { %v7875_v41 = vunpack.i.h.bf16 %v12309_v38  ;;  %v12341_v39 = vpop.permute.xlu2 %7892 }
 0x8a4   :  { %v7895_v59 = vunpack.i.h.bf16 %v12341_v39 }
 0x8a5   :  { %5220 = vmatmul.f32.vlgmr.msrb.gmra.mxu3 %v4885_v28  ;;  %v4851_v56 = vsel %vm4824_vm2, %v4359_v45, %v7875_v41  ;;  %v4674_v28 = vrot.slane %v11796_v8, 6  ;;  %v4676_v45 = vrot.slane %v11817_v49, 6  ;;  %v4516_v41 = vrot.slane %v11817_v49, 4 }
 0x8a6   :  { %5143 = vmatmul.f32.vlgmr.msrb.gmra.mxu2 %v4865_v4  ;;  %5084 = vmatmul.f32.gmra.mxu1 %v4851_v56  ;;  %v12327_v52 = vpop.permute.xlu0 %7882  ;;  %v4853_v1 = vsel %vm4824_vm2, %v4363_v15, %v7895_v59  ;;  %v7854_v4 = vunpack.i.l.bf16 %v12265_v26  ;;  %v7864_v8 = vunpack.i.l.bf16 %v12277_v10  ;;  %v7859_v26 = vunpack.i.l.bf16 %v12274_v11 }
 0x8a7   :  { %v7885_v43 = vunpack.i.h.bf16 %v12327_v52  ;;  %v4675_v32 = vsel %vm4664_vm4, %v4672_v60, %v4674_v28  ;;  %v4677_v30 = vsel %vm4664_vm4, %v4674_v28, %v4676_v45  ;;  %v4517_v37 = vsel %vm4504_vm5, %v4514_v48, %v4516_v41 }
 0x8a8   :  { %5010 = vmatmul.f32.gmra.mxu0 %v4832_v63  ;;  %v4889_v12 = vsel %vm4824_vm2, %v4675_v32, %v7854_v4  ;;  %v4890_v19 = vsel %vm4824_vm2, %v4677_v30, %v7864_v8  ;;  %v4870_v29 = vsel %vm4824_vm2, %v4517_v37, %v7859_v26  ;;  %v4678_v56 = vrot.slane %v11854_v42, 6 }
 0x8a9   :  { %v4852_v55 = vsel %vm4824_vm2, %v4361_v22, %v7885_v43  ;;  %v7874_v49 = vunpack.i.l.bf16 %v12309_v38  ;;  %v7869_v10 = vunpack.i.l.bf16 %v12299_v5  ;;  %v4519_v25 = vsel %vm4504_vm5, %v4516_v41, %v4518_v9 }
 0x8aa   :  { %v4679_v11 = vsel %vm4664_vm4, %v4676_v45, %v4678_v56  ;;  %v4680_v63 = vrot.slane %v11874_v7, 6  ;;  %v7884_v42 = vunpack.i.l.bf16 %v12327_v52  ;;  %v7879_v38 = vunpack.i.l.bf16 %v12317_v17 }
 0x8ab   :  { %v4891_v14 = vsel %vm4824_vm2, %v4679_v11, %v7874_v49  ;;  %v4682_v52 = vrot.slane %v11893_v24, 6 }
 0x8ac   :  { %v12338_v2 = vpop.permute.xlu1 %7887  ;;  %v4681_v22 = vsel %vm4664_vm4, %v4678_v56, %v4680_v63 }
 0x8ad   :  { %5223 = vmatmul.f32.gmra.mxu3 %v4886_v21  ;;  %v7890_v44 = vunpack.i.h.bf16 %v12338_v2  ;;  %v4871_v21 = vsel %vm4824_vm2, %v4519_v25, %v7869_v10  ;;  %v4683_v15 = vsel %vm4664_vm4, %v4680_v63, %v4682_v52 }
 0x8ae   :  { %5146 = vmatmul.f32.gmra.mxu2 %v4866_v40  ;;  %5087 = vmatmul.f32.gmra.mxu1 %v4852_v55  ;;  %v4520_v40 = vrot.slane %v11874_v7, 4 }
 0x8af   :  { %v4833_v31 = vsel %vm4824_vm2, %v11874_v7, %v7890_v44  ;;  %v4892_v7 = vsel %vm4824_vm2, %v4681_v22, %v7884_v42  ;;  %v7894_v44 = vunpack.i.l.bf16 %v12341_v39 }
 0x8b0   :  { %5013 = vmatmul.f32.gmra.mxu0 %v4833_v31  ;;  %v4521_v43 = vsel %vm4504_vm5, %v4518_v9, %v4520_v40  ;;  %v4523_v31 = vsel %vm4504_vm5, %v4520_v40, %v4522_v0 }
 0x8b1   :  { %v4872_v17 = vsel %vm4824_vm2, %v4521_v43, %v7879_v38  ;;  %v4893_v6 = vsel %vm4824_vm2, %v4683_v15, %v7894_v44 }
 0x8b5   :  { %5226 = vmatmul.f32.gmra.mxu3 %v4887_v3 }
 0x8b6   :  { %5149 = vmatmul.f32.gmra.mxu2 %v4867_v62  ;;  %5090 = vmatmul.f32.gmra.mxu1 %v4853_v1  ;;  %v7889_v62 = vunpack.i.l.bf16 %v12338_v2 }
 0x8b8   :  { %v4873_v28 = vsel %vm4824_vm2, %v4523_v31, %v7889_v62 }
 0x8bd   :  { %5229 = vmatmul.f32.gmra.mxu3 %v4888_v53 }
 0x8be   :  { %5152 = vmatmul.f32.gmra.mxu2 %v4868_v36 }
 0x8c5   :  { %5232 = vmatmul.f32.gmra.mxu3 %v4889_v12 }
 0x8c6   :  { %5155 = vmatmul.f32.gmra.mxu2 %v4869_v34 }
 0x8cd   :  { %5235 = vmatmul.f32.gmra.mxu3 %v4890_v19 }
 0x8ce   :  { %5158 = vmatmul.f32.gmra.mxu2 %v4870_v29 }
 0x8d5   :  { %5238 = vmatmul.f32.gmra.mxu3 %v4891_v14 }
 0x8d6   :  { %5161 = vmatmul.f32.gmra.mxu2 %v4871_v21 }
 0x8d8   :  { %v4126_v16 = vpop.f32.mrf.mxu3 }
 0x8d9   :  { %v4079_v5 = vpop.f32.mrf.mxu2 }
 0x8da   :  { %v4127_v54 = vadd.f32 %v4126_v16, %v4079_v5 }
 0x8dc   :  { %v4170_v55 = vmul.f32 %v12393_v61, %v4127_v54 }
 0x8dd   :  { %5241 = vmatmul.f32.gmra.mxu3 %v4892_v7 }
 0x8de   :  { %v4194_v20 = vadd.f32 %v12403_v47, %v4170_v55  ;;  %5164 = vmatmul.f32.gmra.mxu2 %v4872_v17 }
 0x8e0   :  { %v12407_v3 = vmax.f32 %v4194_v20, 0.0  ;;  %v4129_v59 = vpop.f32.mrf.mxu3 }
 0x8e1   :  { %v4082_v60 = vpop.f32.mrf.mxu2 }
 0x8e2   :  { %v4130_v46 = vadd.f32 %v4129_v59, %v4082_v60  ;;  %v4264_v1 = vrot.slane %v12407_v3, 1  ;;  %v4584_v35 = vrot.slane %v12407_v3, 5  ;;  %v4424_v39 = vrot.slane %v12407_v3, 3 }
 0x8e3   :  { %v4744_v23 = vrot.slane %v12407_v3, 7 }
 0x8e4   :  { %v4171_v50 = vmul.f32 %v12393_v61, %v4130_v46  ;;  %v4265_v2 = vsel %vm4244_vm14, %v4262_v18, %v4264_v1  ;;  %v4585_v53 = vsel %vm4564_vm15, %v4582_v13, %v4584_v35  ;;  %v4425_v36 = vsel %vm4404_vm0, %v4422_v58, %v4424_v39 }
 0x8e5   :  { %5244 = vmatmul.f32.gmra.mxu3 %v4893_v6  ;;  %v7896_v48 = vpack.i.bf16 %v4265_v2, %v4585_v53  ;;  %v4745_v4 = vsel %vm4724_vm1, %v4742_v57, %v4744_v23 }
 0x8e6   :  { %v4195_v51 = vadd.f32 %v12403_v47, %v4171_v50  ;;  %5167 = vmatmul.f32.gmra.mxu2 %v4873_v28  ;;  %v7901_v18 = vpack.i.bf16 %v4425_v36, %v4745_v4 }
 0x8e7   :  { %7897 = vrot.lane.b32.xlu0 %v7896_v48, %s8048_s27 }
 0x8e8   :  { %v12437_v32 = vmax.f32 %v4195_v51, 0.0  ;;  %7902 = vrot.lane.b32.xlu1 %v7901_v18, %s8048_s27  ;;  %v4132_v13 = vpop.f32.mrf.mxu3 }
 0x8e9   :  { %v4085_v58 = vpop.f32.mrf.mxu2 }
 0x8ea   :  { %v4133_v33 = vadd.f32 %v4132_v13, %v4085_v58  ;;  %v4266_v12 = vrot.slane %v12437_v32, 1  ;;  %v4586_v34 = vrot.slane %v12437_v32, 5  ;;  %v4426_v45 = vrot.slane %v12437_v32, 3 }
 0x8eb   :  { %v4746_v57 = vrot.slane %v12437_v32, 7 }
 0x8ec   :  { %v4172_v41 = vmul.f32 %v12393_v61, %v4133_v33  ;;  %v4267_v8 = vsel %vm4244_vm14, %v4264_v1, %v4266_v12  ;;  %v4587_v26 = vsel %vm4564_vm15, %v4584_v35, %v4586_v34  ;;  %v4427_v30 = vsel %vm4404_vm0, %v4424_v39, %v4426_v45 }
 0x8ed   :  { %v7906_v37 = vpack.i.bf16 %v4267_v8, %v4587_v26  ;;  %v4747_v19 = vsel %vm4724_vm1, %v4744_v23, %v4746_v57 }
 0x8ee   :  { %v4196_v29 = vadd.f32 %v12403_v47, %v4172_v41  ;;  %v7911_v56 = vpack.i.bf16 %v4427_v30, %v4747_v19 }
 0x8ef   :  { %7907 = vrot.lane.b32.xlu2 %v7906_v37, %s8048_s27 }
 0x8f0   :  { %v12451_v9 = vmax.f32 %v4196_v29, 0.0  ;;  %7912 = vrot.lane.b32.xlu0 %v7911_v56, %s8048_s27  ;;  %v4135_v49 = vpop.f32.mrf.mxu3 }
 0x8f1   :  { %v4088_v10 = vpop.f32.mrf.mxu2 }
 0x8f2   :  { %v4136_v11 = vadd.f32 %v4135_v49, %v4088_v10  ;;  %v4428_v25 = vrot.slane %v12451_v9, 3  ;;  %v4748_v14 = vrot.slane %v12451_v9, 7  ;;  %v4268_v21 = vrot.slane %v12451_v9, 1 }
 0x8f3   :  { %v4588_v63 = vrot.slane %v12451_v9, 5 }
 0x8f4   :  { %v4173_v40 = vmul.f32 %v12393_v61, %v4136_v11  ;;  %v4429_v42 = vsel %vm4404_vm0, %v4426_v45, %v4428_v25  ;;  %v4749_v16 = vsel %vm4724_vm1, %v4746_v57, %v4748_v14  ;;  %v4269_v38 = vsel %vm4244_vm14, %v4266_v12, %v4268_v21 }
 0x8f5   :  { %v7921_v5 = vpack.i.bf16 %v4429_v42, %v4749_v16  ;;  %v4589_v22 = vsel %vm4564_vm15, %v4586_v34, %v4588_v63 }
 0x8f6   :  { %v4197_v54 = vadd.f32 %v12403_v47, %v4173_v40  ;;  %v7916_v43 = vpack.i.bf16 %v4269_v38, %v4589_v22 }
 0x8f7   :  { %7922 = vrot.lane.b32.xlu2 %v7921_v5, %s8048_s27 }
 0x8f8   :  { %v12465_v55 = vmax.f32 %v4197_v54, 0.0  ;;  %7917 = vrot.lane.b32.xlu1 %v7916_v43, %s8048_s27  ;;  %v4138_v7 = vpop.f32.mrf.mxu3 }
 0x8f9   :  { %v4091_v17 = vpop.f32.mrf.mxu2 }
 0x8fa   :  { %v4139_v20 = vadd.f32 %v4138_v7, %v4091_v17  ;;  %v4270_v44 = vrot.slane %v12465_v55, 1  ;;  %v4590_v59 = vrot.slane %v12465_v55, 5  ;;  %v4430_v15 = vrot.slane %v12465_v55, 3 }
 0x8fb   :  { %v4750_v62 = vrot.slane %v12465_v55, 7 }
 0x8fc   :  { %v4174_v60 = vmul.f32 %v12393_v61, %v4139_v20  ;;  %v4271_v31 = vsel %vm4244_vm14, %v4268_v21, %v4270_v44  ;;  %v4591_v46 = vsel %vm4564_vm15, %v4588_v63, %v4590_v59  ;;  %v4431_v1 = vsel %vm4404_vm0, %v4428_v25, %v4430_v15 }
 0x8fd   :  { %v7926_v35 = vpack.i.bf16 %v4271_v31, %v4591_v46  ;;  %v4751_v39 = vsel %vm4724_vm1, %v4748_v14, %v4750_v62 }
 0x8fe   :  { %v4198_v6 = vadd.f32 %v12403_v47, %v4174_v60  ;;  %v7931_v23 = vpack.i.bf16 %v4431_v1, %v4751_v39 }
 0x8ff   :  { %7927 = vrot.lane.b32.xlu0 %v7926_v35, %s8048_s27 }
 0x900   :  { %v12479_v50 = vmax.f32 %v4198_v6, 0.0  ;;  %7932 = vrot.lane.b32.xlu1 %v7931_v23, %s8048_s27  ;;  %v4141_v2 = vpop.f32.mrf.mxu3 }
 0x901   :  { %v4094_v53 = vpop.f32.mrf.mxu2 }
 0x902   :  { %v4142_v36 = vadd.f32 %v4141_v2, %v4094_v53  ;;  %v4272_v28 = vrot.slane %v12479_v50, 1  ;;  %v4592_v48 = vrot.slane %v12479_v50, 5  ;;  %v4432_v4 = vrot.slane %v12479_v50, 3 }
 0x903   :  { %v4752_v51 = vrot.slane %v12479_v50, 7 }
 0x904   :  { %v4175_v18 = vmul.f32 %v12393_v61, %v4142_v36  ;;  %v4273_v13 = vsel %vm4244_vm14, %v4270_v44, %v4272_v28  ;;  %v4593_v58 = vsel %vm4564_vm15, %v4590_v59, %v4592_v48  ;;  %v4433_v33 = vsel %vm4404_vm0, %v4430_v15, %v4432_v4 }
 0x905   :  { %v7936_v12 = vpack.i.bf16 %v4273_v13, %v4593_v58  ;;  %v4753_v34 = vsel %vm4724_vm1, %v4750_v62, %v4752_v51 }
 0x906   :  { %v4199_v45 = vadd.f32 %v12403_v47, %v4175_v18  ;;  %v7941_v57 = vpack.i.bf16 %v4433_v33, %v4753_v34 }
 0x907   :  { %7937 = vrot.lane.b32.xlu2 %v7936_v12, %s8048_s27 }
 0x908   :  { %v12493_v41 = vmax.f32 %v4199_v45, 0.0  ;;  %7942 = vrot.lane.b32.xlu0 %v7941_v57, %s8048_s27  ;;  %v4144_v8 = vpop.f32.mrf.mxu3 }
 0x909   :  { %v4097_v26 = vpop.f32.mrf.mxu2 }
 0x90a   :  { %v4145_v30 = vadd.f32 %v4144_v8, %v4097_v26  ;;  %v4434_v37 = vrot.slane %v12493_v41, 3  ;;  %v4754_v19 = vrot.slane %v12493_v41, 7  ;;  %v4274_v29 = vrot.slane %v12493_v41, 1 }
 0x90b   :  { %v4594_v56 = vrot.slane %v12493_v41, 5 }
 0x90c   :  { %v4176_v49 = vmul.f32 %v12393_v61, %v4145_v30  ;;  %v4435_v10 = vsel %vm4404_vm0, %v4432_v4, %v4434_v37  ;;  %v4755_v11 = vsel %vm4724_vm1, %v4752_v51, %v4754_v19  ;;  %v4275_v25 = vsel %vm4244_vm14, %v4272_v28, %v4274_v29 }
 0x90d   :  { %v7951_v14 = vpack.i.bf16 %v4435_v10, %v4755_v11  ;;  %v4595_v21 = vsel %vm4564_vm15, %v4592_v48, %v4594_v56 }
 0x90e   :  { %v4200_v63 = vadd.f32 %v12403_v47, %v4176_v49  ;;  %v7946_v40 = vpack.i.bf16 %v4275_v25, %v4595_v21 }
 0x90f   :  { %7952 = vrot.lane.b32.xlu2 %v7951_v14, %s8048_s27 }
 0x910   :  { %v12507_v42 = vmax.f32 %v4200_v63, 0.0  ;;  %7947 = vrot.lane.b32.xlu1 %v7946_v40, %s8048_s27  ;;  %v4147_v16 = vpop.f32.mrf.mxu3 }
 0x911   :  { %v4100_v38 = vpop.f32.mrf.mxu2 }
 0x912   :  { %v4148_v5 = vadd.f32 %v4147_v16, %v4100_v38  ;;  %v4276_v22 = vrot.slane %v12507_v42, 1  ;;  %v4596_v54 = vrot.slane %v12507_v42, 5  ;;  %v4436_v43 = vrot.slane %v12507_v42, 3 }
 0x913   :  { %v4756_v7 = vrot.slane %v12507_v42, 7 }
 0x914   :  { %v4177_v17 = vmul.f32 %v12393_v61, %v4148_v5  ;;  %v4277_v20 = vsel %vm4244_vm14, %v4274_v29, %v4276_v22  ;;  %v4597_v44 = vsel %vm4564_vm15, %v4594_v56, %v4596_v54  ;;  %v4437_v59 = vsel %vm4404_vm0, %v4434_v37, %v4436_v43 }
 0x915   :  { %v7956_v15 = vpack.i.bf16 %v4277_v20, %v4597_v44  ;;  %v4757_v62 = vsel %vm4724_vm1, %v4754_v19, %v4756_v7  ;;  %v4364_v20 = vrot.slane %v12407_v3, 2  ;;  %v4684_v44 = vrot.slane %v12407_v3, 6 }
 0x916   :  { %v4201_v60 = vadd.f32 %v12403_v47, %v4177_v17  ;;  %v7961_v31 = vpack.i.bf16 %v4437_v59, %v4757_v62  ;;  %v4524_v17 = vrot.slane %v12407_v3, 4 }
 0x917   :  { %7957 = vrot.lane.b32.xlu0 %v7956_v15, %s8048_s27 }
 0x918   :  { %v12521_v46 = vmax.f32 %v4201_v60, 0.0  ;;  %7962 = vrot.lane.b32.xlu1 %v7961_v31, %s8048_s27  ;;  %v4150_v1 = vpop.f32.mrf.mxu3 }
 0x919   :  { %v4103_v35 = vpop.f32.mrf.mxu2 }
 0x91a   :  { %v4151_v39 = vadd.f32 %v4150_v1, %v4103_v35  ;;  %v4278_v6 = vrot.slane %v12521_v46, 1  ;;  %v4598_v23 = vrot.slane %v12521_v46, 5  ;;  %v4438_v2 = vrot.slane %v12521_v46, 3 }
 0x91b   :  { %v4758_v53 = vrot.slane %v12521_v46, 7  ;;  %v4525_v35 = vsel %vm4504_vm5, %v4522_v0, %v4524_v17 }
 0x91c   :  { %v4178_v36 = vmul.f32 %v12393_v61, %v4151_v39  ;;  %v4279_v28 = vsel %vm4244_vm14, %v4276_v22, %v4278_v6  ;;  %v4599_v48 = vsel %vm4564_vm15, %v4596_v54, %v4598_v23  ;;  %v4439_v4 = vsel %vm4404_vm0, %v4436_v43, %v4438_v2 }
 0x91d   :  { %v7966_v51 = vpack.i.bf16 %v4279_v28, %v4599_v48  ;;  %v4759_v18 = vsel %vm4724_vm1, %v4756_v7, %v4758_v53  ;;  %v4526_v28 = vrot.slane %v12437_v32, 4 }
 0x91e   :  { %v4202_v13 = vadd.f32 %v12403_v47, %v4178_v36  ;;  %v7971_v58 = vpack.i.bf16 %v4439_v4, %v4759_v18 }
 0x91f   :  { %7967 = vrot.lane.b32.xlu2 %v7966_v51, %s8048_s27  ;;  %v4686_v51 = vrot.slane %v12437_v32, 6 }
 0x920   :  { %v12535_v33 = vmax.f32 %v4202_v13, 0.0  ;;  %7972 = vrot.lane.b32.xlu0 %v7971_v58, %s8048_s27  ;;  %v4153_v12 = vpop.f32.mrf.mxu3 }
 0x921   :  { %v4106_v34 = vpop.f32.mrf.mxu2 }
 0x922   :  { %v4154_v45 = vadd.f32 %v4153_v12, %v4106_v34  ;;  %v4440_v57 = vrot.slane %v12535_v33, 3  ;;  %v4760_v8 = vrot.slane %v12535_v33, 7  ;;  %v4280_v26 = vrot.slane %v12535_v33, 1 }
 0x923   :  { %v4600_v30 = vrot.slane %v12535_v33, 5 }
 0x924   :  { %v4179_v37 = vmul.f32 %v12393_v61, %v4154_v45  ;;  %v4441_v19 = vsel %vm4404_vm0, %v4438_v2, %v4440_v57  ;;  %v4761_v29 = vsel %vm4724_vm1, %v4758_v53, %v4760_v8  ;;  %v4281_v56 = vsel %vm4244_vm14, %v4278_v6, %v4280_v26 }
 0x925   :  { %v7981_v49 = vpack.i.bf16 %v4441_v19, %v4761_v29  ;;  %v4601_v10 = vsel %vm4564_vm15, %v4598_v23, %v4600_v30  ;;  %v4365_v23 = vsel %vm4344_vm3, %v4362_v27, %v4364_v20  ;;  %v4685_v53 = vsel %vm4664_vm4, %v4682_v52, %v4684_v44 }
 0x926   :  { %v4203_v11 = vadd.f32 %v12403_v47, %v4179_v37  ;;  %v7976_v25 = vpack.i.bf16 %v4281_v56, %v4601_v10  ;;  %v4366_v27 = vrot.slane %v12437_v32, 2  ;;  %v4527_v52 = vsel %vm4504_vm5, %v4524_v17, %v4526_v28 }
 0x927   :  { %7982 = vrot.lane.b32.xlu2 %v7981_v49, %s8048_s27  ;;  %v4687_v45 = vsel %vm4664_vm4, %v4684_v44, %v4686_v51  ;;  %v4528_v37 = vrot.slane %v12451_v9, 4  ;;  %v4688_v19 = vrot.slane %v12451_v9, 6 }
 0x928   :  { %v12549_v14 = vmax.f32 %v4203_v11, 0.0  ;;  %7977 = vrot.lane.b32.xlu1 %v7976_v25, %s8048_s27  ;;  %v4367_v12 = vsel %vm4344_vm3, %v4364_v20, %v4366_v27 }
 0x929   :  { %v4529_v25 = vsel %vm4504_vm5, %v4526_v28, %v4528_v37 }
 0x92a   :  { %v4282_v61 = vrot.slane %v12549_v14, 1  ;;  %v4602_v21 = vrot.slane %v12549_v14, 5  ;;  %v4442_v63 = vrot.slane %v12549_v14, 3  ;;  %v4762_v40 = vrot.slane %v12549_v14, 7 }
 0x92c   :  { %v7996_v16 = vpack.i.bf16 %v4282_v61, %v4602_v21  ;;  %v4283_v38 = vsel %vm4244_vm14, %v4280_v26, %v4282_v61  ;;  %v4603_v47 = vsel %vm4564_vm15, %v4600_v30, %v4602_v21  ;;  %v4443_v22 = vsel %vm4404_vm0, %v4440_v57, %v4442_v63 }
 0x92d   :  { %v7986_v5 = vpack.i.bf16 %v4283_v38, %v4603_v47  ;;  %v4763_v54 = vsel %vm4724_vm1, %v4760_v8, %v4762_v40  ;;  %v8001_v7 = vpack.i.bf16 %v4442_v63, %v4762_v40  ;;  %v4368_v30 = vrot.slane %v12451_v9, 2 }
 0x92e   :  { %v7991_v43 = vpack.i.bf16 %v4443_v22, %v4763_v54  ;;  %v4689_v40 = vsel %vm4664_vm4, %v4686_v51, %v4688_v19  ;;  %v4530_v38 = vrot.slane %v12465_v55, 4  ;;  %v4370_v47 = vrot.slane %v12465_v55, 2 }
 0x92f   :  { %7997 = vrot.lane.b32.xlu2 %v7996_v16, %s8048_s27  ;;  %7987 = vrot.lane.b32.xlu0 %v7986_v5, %s8048_s27  ;;  %v4369_v11 = vsel %vm4344_vm3, %v4366_v27, %v4368_v30  ;;  %v4690_v5 = vrot.slane %v12465_v55, 6 }
 0x930   :  { %7992 = vrot.lane.b32.xlu1 %v7991_v43, %s8048_s27  ;;  %v4531_v20 = vsel %vm4504_vm5, %v4528_v37, %v4530_v38 }
 0x937   :  { %8002 = vrot.lane.b32.xlu0 %v8001_v7, %s8048_s27 }
 0x949   :  { %v7908_v39 = vpop.permute.xlu2 %7907 }
 0x94a   :  { %v7910_v48 = vunpack.i.h.bf16 %v7908_v39  ;;  %v7909_v4 = vunpack.i.l.bf16 %v7908_v39  ;;  %v4692_v39 = vrot.slane %v12479_v50, 6 }
 0x94c   :  { %v4835_v58 = vsel %vm4824_vm2, %v12407_v3, %v7910_v48  ;;  %v4875_v34 = vsel %vm4824_vm2, %v4527_v52, %v7909_v4  ;;  %v4693_v28 = vsel %vm4664_vm4, %v4690_v5, %v4692_v39  ;;  %v4534_v52 = vrot.slane %v12493_v41, 4 }
 0x951   :  { %v7923_v26 = vpop.permute.xlu2 %7922 }
 0x952   :  { %v7925_v3 = vunpack.i.h.bf16 %v7923_v26  ;;  %v7924_v29 = vunpack.i.l.bf16 %v7923_v26 }
 0x954   :  { %v4856_v21 = vsel %vm4824_vm2, %v4369_v11, %v7925_v3  ;;  %v4896_v16 = vsel %vm4824_vm2, %v4689_v40, %v7924_v29  ;;  %v12641_v11 = vpop.f32.mrf.mxu2 }
 0x955   :  { %16399 = vst [vmem:[#allocation112_spill] sm:$0xff] %v12641_v11 }
 0x959   :  { %v7898_v59 = vpop.permute.xlu0 %7897 }
 0x95a   :  { %v7900_v15 = vunpack.i.h.bf16 %v7898_v59  ;;  %v7899_v62 = vunpack.i.l.bf16 %v7898_v59  ;;  %v7903_v60 = vpop.permute.xlu1 %7902 }
 0x95b   :  { %v7905_v31 = vunpack.i.h.bf16 %v7903_v60  ;;  %v7904_v1 = vunpack.i.l.bf16 %v7903_v60  ;;  %v4691_v60 = vsel %vm4664_vm4, %v4688_v19, %v4690_v5 }
 0x95c   :  { %v4834_v6 = vsel %vm4824_vm2, %v11893_v24, %v7900_v15  ;;  %v4874_v2 = vsel %vm4824_vm2, %v4525_v35, %v7899_v62  ;;  %v4371_v15 = vsel %vm4344_vm3, %v4368_v30, %v4370_v47  ;;  %v4372_v35 = vrot.slane %v12479_v50, 2 }
 0x95d   :  { %5016 = vmatmul.f32.gmra.mxu0 %v4834_v6  ;;  %v4854_v36 = vsel %vm4824_vm2, %v4365_v23, %v7905_v31  ;;  %5170 = vmatmul.f32.gmra.mxu2 %v4874_v2  ;;  %v4894_v0 = vsel %vm4824_vm2, %v4685_v53, %v7904_v1 }
 0x95e   :  { %5093 = vmatmul.f32.gmra.mxu1 %v4854_v36  ;;  %5247 = vmatmul.f32.gmra.mxu3 %v4894_v0  ;;  %v4373_v0 = vsel %vm4344_vm3, %v4370_v47, %v4372_v35 }
 0x961   :  { %v7938_v44 = vpop.permute.xlu2 %7937 }
 0x962   :  { %v7913_v18 = vpop.permute.xlu0 %7912  ;;  %v7940_v6 = vunpack.i.h.bf16 %v7938_v44  ;;  %v7939_v23 = vunpack.i.l.bf16 %v7938_v44 }
 0x963   :  { %v7915_v24 = vunpack.i.h.bf16 %v7913_v18  ;;  %v7914_v13 = vunpack.i.l.bf16 %v7913_v18 }
 0x964   :  { %v4838_v48 = vsel %vm4824_vm2, %v12465_v55, %v7940_v6  ;;  %v4694_v55 = vrot.slane %v12493_v41, 6 }
 0x965   :  { %5019 = vmatmul.f32.gmra.mxu0 %v4835_v58  ;;  %v4855_v57 = vsel %vm4824_vm2, %v4367_v12, %v7915_v24  ;;  %5173 = vmatmul.f32.gmra.mxu2 %v4875_v34  ;;  %v4895_v8 = vsel %vm4824_vm2, %v4687_v45, %v7914_v13  ;;  %v4374_v13 = vrot.slane %v12493_v41, 2  ;;  %v12628_v12 = vpop.f32.mrf.mxu0 }
 0x966   :  { %5096 = vmatmul.f32.gmra.mxu1 %v4855_v57  ;;  %5250 = vmatmul.f32.gmra.mxu3 %v4895_v8  ;;  %16397 = vst [vmem:[#allocation89_spill] sm:$0xff] %v12628_v12  ;;  %v12630_v57 = vpop.f32.mrf.mxu1 }
 0x967   :  { %16398 = vst [vmem:[#allocation55_spill] sm:$0xff] %v12630_v57  ;;  %v4375_v30 = vsel %vm4344_vm3, %v4372_v35, %v4374_v13 }
 0x969   :  { %v7953_v18 = vpop.permute.xlu2 %7952 }
 0x96a   :  { %v7918_v56 = vpop.permute.xlu1 %7917  ;;  %v7955_v58 = vunpack.i.h.bf16 %v7953_v18  ;;  %v7954_v34 = vunpack.i.l.bf16 %v7953_v18  ;;  %v4380_v18 = vrot.slane %v12535_v33, 2 }
 0x96b   :  { %v7920_v49 = vunpack.i.h.bf16 %v7918_v56  ;;  %v7919_v10 = vunpack.i.l.bf16 %v7918_v56  ;;  %v4695_v56 = vsel %vm4664_vm4, %v4692_v39, %v4694_v55 }
 0x96c   :  { %v4859_v19 = vsel %vm4824_vm2, %v4375_v30, %v7955_v58 }
 0x96d   :  { %v4836_v61 = vsel %vm4824_vm2, %v12437_v32, %v7920_v49  ;;  %v4876_v63 = vsel %vm4824_vm2, %v4529_v25, %v7919_v10  ;;  %v4899_v49 = vsel %vm4824_vm2, %v4695_v56, %v7954_v34  ;;  %v4536_v10 = vrot.slane %v12507_v42, 4 }
 0x96e   :  { %5022 = vmatmul.f32.gmra.mxu0 %v4836_v61  ;;  %5099 = vmatmul.f32.gmra.mxu1 %v4856_v21  ;;  %v4376_v25 = vrot.slane %v12507_v42, 2  ;;  %v12645_v61 = vpop.f32.mrf.mxu3 }
 0x96f   :  { %5176 = vmatmul.f32.gmra.mxu2 %v4876_v63  ;;  %5253 = vmatmul.f32.gmra.mxu3 %v4896_v16  ;;  %16400 = vst [vmem:[#allocation90_spill] sm:$0xff] %v12645_v61  ;;  %v4537_v5 = vsel %vm4504_vm5, %v4534_v52, %v4536_v10 }
 0x971   :  { %v7928_v22 = vpop.permute.xlu0 %7927 }
 0x972   :  { %v7930_v32 = vunpack.i.h.bf16 %v7928_v22  ;;  %v7929_v54 = vunpack.i.l.bf16 %v7928_v22  ;;  %v7933_v43 = vpop.permute.xlu1 %7932  ;;  %v12648_v22 = vpop.f32.mrf.mxu0 }
 0x973   :  { %v7935_v7 = vunpack.i.h.bf16 %v7933_v43  ;;  %v7934_v17 = vunpack.i.l.bf16 %v7933_v43  ;;  %v4377_v43 = vsel %vm4344_vm3, %v4374_v13, %v4376_v25  ;;  %v4700_v13 = vrot.slane %v12535_v33, 6 }
 0x974   :  { %v4837_v59 = vsel %vm4824_vm2, %v12451_v9, %v7930_v32  ;;  %v4877_v62 = vsel %vm4824_vm2, %v4531_v20, %v7929_v54  ;;  %v4532_v9 = vrot.slane %v12479_v50, 4  ;;  %v12655_v20 = vpop.f32.mrf.mxu1 }
 0x975   :  { %v4857_v31 = vsel %vm4824_vm2, %v4371_v15, %v7935_v7  ;;  %v4897_v1 = vsel %vm4824_vm2, %v4691_v60, %v7934_v17  ;;  %16401 = vst [vmem:[#allocation162_spill] sm:$0xff] %v12655_v20  ;;  %v4378_v15 = vrot.slane %v12521_v46, 2  ;;  %v4538_v60 = vrot.slane %v12521_v46, 4 }
 0x976   :  { %5025 = vmatmul.f32.gmra.mxu0 %v4837_v59  ;;  %5102 = vmatmul.f32.gmra.mxu1 %v4857_v31  ;;  %v4533_v27 = vsel %vm4504_vm5, %v4530_v38, %v4532_v9  ;;  %v4535_v37 = vsel %vm4504_vm5, %v4532_v9, %v4534_v52  ;;  %v12662_v31 = vpop.f32.mrf.mxu2  ;;  %v12664_v39 = vpop.f32.mrf.mxu3 }
 0x977   :  { %5179 = vmatmul.f32.gmra.mxu2 %v4877_v62  ;;  %5256 = vmatmul.f32.gmra.mxu3 %v4897_v1  ;;  %v4878_v24 = vsel %vm4824_vm2, %v4533_v27, %v7939_v23  ;;  %16402 = vst [vmem:[#allocation120_spill] sm:$0xff] %v12662_v31  ;;  %v4379_v23 = vsel %vm4344_vm3, %v4376_v25, %v4378_v15  ;;  %v4382_v25 = vrot.slane %v12549_v14, 2 }
 0x978   :  { %16403 = vst [vmem:[#allocation235_spill] sm:$0xff] %v12664_v39 }
 0x979   :  { %v7968_v32 = vpop.permute.xlu2 %7967 }
 0x97a   :  { %v7943_v2 = vpop.permute.xlu0 %7942  ;;  %v7970_v62 = vunpack.i.h.bf16 %v7968_v32  ;;  %v7969_v1 = vunpack.i.l.bf16 %v7968_v32 }
 0x97b   :  { %v7945_v53 = vunpack.i.h.bf16 %v7943_v2  ;;  %v7944_v36 = vunpack.i.l.bf16 %v7943_v2 }
 0x97d   :  { %v4858_v4 = vsel %vm4824_vm2, %v4373_v0, %v7945_v53  ;;  %v4898_v51 = vsel %vm4824_vm2, %v4693_v28, %v7944_v36  ;;  %v4841_v53 = vsel %vm4824_vm2, %v12507_v42, %v7970_v62  ;;  %v4539_v0 = vsel %vm4504_vm5, %v4536_v10, %v4538_v60 }
 0x97e   :  { %5028 = vmatmul.f32.gmra.mxu0 %v4838_v48  ;;  %5105 = vmatmul.f32.gmra.mxu1 %v4858_v4  ;;  %v12673_v48 = vpop.f32.mrf.mxu0  ;;  %v4881_v27 = vsel %vm4824_vm2, %v4539_v0, %v7969_v1  ;;  %v12685_v30 = vpop.f32.mrf.mxu3 }
 0x97f   :  { %5182 = vmatmul.f32.gmra.mxu2 %v4878_v24  ;;  %5259 = vmatmul.f32.gmra.mxu3 %v4898_v51  ;;  %v12676_v51 = vpop.f32.mrf.mxu1  ;;  %16406 = vst [vmem:[#allocation232_spill] sm:$0xff] %v12685_v30 }
 0x980   :  { %16404 = vst [vmem:[#allocation149_spill] sm:$0xff] %v12676_v51 }
 0x981   :  { %v7983_v4 = vpop.permute.xlu2 %7982 }
 0x982   :  { %v7948_v45 = vpop.permute.xlu1 %7947  ;;  %v7985_v24 = vunpack.i.h.bf16 %v7983_v4  ;;  %v7984_v52 = vunpack.i.l.bf16 %v7983_v4 }
 0x983   :  { %v7950_v8 = vunpack.i.h.bf16 %v7948_v45  ;;  %v7949_v26 = vunpack.i.l.bf16 %v7948_v45  ;;  %v12681_v45 = vpop.f32.mrf.mxu2 }
 0x984   :  { %16405 = vst [vmem:[#allocation238_spill] sm:$0xff] %v12681_v45 }
 0x985   :  { %v4839_v3 = vsel %vm4824_vm2, %v12479_v50, %v7950_v8  ;;  %v4879_v29 = vsel %vm4824_vm2, %v4535_v37, %v7949_v26  ;;  %v4696_v50 = vrot.slane %v12507_v42, 6  ;;  %v4540_v42 = vrot.slane %v12535_v33, 4 }
 0x986   :  { %5031 = vmatmul.f32.gmra.mxu0 %v4839_v3  ;;  %5108 = vmatmul.f32.gmra.mxu1 %v4859_v19  ;;  %v4381_v8 = vsel %vm4344_vm3, %v4378_v15, %v4380_v18  ;;  %v12694_v10 = vpop.f32.mrf.mxu0 }
 0x987   :  { %5185 = vmatmul.f32.gmra.mxu2 %v4879_v29  ;;  %5262 = vmatmul.f32.gmra.mxu3 %v4899_v49  ;;  %v4697_v17 = vsel %vm4664_vm4, %v4694_v55, %v4696_v50  ;;  %v4541_v26 = vsel %vm4504_vm5, %v4538_v60, %v4540_v42  ;;  %v4862_v3 = vsel %vm4824_vm2, %v4381_v8, %v7985_v24  ;;  %v4542_v49 = vrot.slane %v12549_v14, 4 }
 0x989   :  { %v7958_v21 = vpop.permute.xlu0 %7957  ;;  %v7998_v15 = vpop.permute.xlu2 %7997 }
 0x98a   :  { %v7960_v63 = vunpack.i.h.bf16 %v7958_v21  ;;  %v7959_v40 = vunpack.i.l.bf16 %v7958_v21  ;;  %v7963_v16 = vpop.permute.xlu1 %7962  ;;  %v7999_v1 = vunpack.i.l.bf16 %v7998_v15 }
 0x98b   :  { %v7965_v38 = vunpack.i.h.bf16 %v7963_v16  ;;  %v7964_v47 = vunpack.i.l.bf16 %v7963_v16 }
 0x98c   :  { %v4840_v54 = vsel %vm4824_vm2, %v12493_v41, %v7960_v63  ;;  %v4880_v7 = vsel %vm4824_vm2, %v4537_v5, %v7959_v40  ;;  %v4698_v41 = vrot.slane %v12521_v46, 6  ;;  %v4543_v5 = vsel %vm4504_vm5, %v4540_v42, %v4542_v49 }
 0x98d   :  { %v4860_v44 = vsel %vm4824_vm2, %v4377_v43, %v7965_v38  ;;  %v4900_v59 = vsel %vm4824_vm2, %v4697_v17, %v7964_v47 }
 0x98e   :  { %5034 = vmatmul.f32.gmra.mxu0 %v4840_v54  ;;  %5111 = vmatmul.f32.gmra.mxu1 %v4860_v44  ;;  %v4699_v2 = vsel %vm4664_vm4, %v4696_v50, %v4698_v41  ;;  %v4701_v29 = vsel %vm4664_vm4, %v4698_v41, %v4700_v13  ;;  %v12698_v50 = vpop.f32.mrf.mxu1  ;;  %v4383_v54 = vsel %vm4344_vm3, %v4380_v18, %v4382_v25  ;;  %v12710_v41 = vpop.f32.mrf.mxu3 }
 0x98f   :  { %5188 = vmatmul.f32.gmra.mxu2 %v4880_v7  ;;  %5265 = vmatmul.f32.gmra.mxu3 %v4900_v59  ;;  %v4902_v56 = vsel %vm4824_vm2, %v4701_v29, %v7984_v52  ;;  %v12708_v59 = vpop.f32.mrf.mxu2  ;;  %16408 = vst [vmem:[#allocation236_spill] sm:$0xff] %v12710_v41  ;;  %v12712_v60 = vpop.f32.mrf.mxu0 }
 0x990   :  { %16407 = vst [vmem:[#allocation233_spill] sm:$0xff] %v12708_v59 }
 0x992   :  { %v7973_v35 = vpop.permute.xlu0 %7972 }
 0x993   :  { %v7975_v6 = vunpack.i.h.bf16 %v7973_v35  ;;  %v7974_v9 = vunpack.i.l.bf16 %v7973_v35 }
 0x995   :  { %v4861_v36 = vsel %vm4824_vm2, %v4379_v23, %v7975_v6  ;;  %v4901_v28 = vsel %vm4824_vm2, %v4699_v2, %v7974_v9 }
 0x996   :  { %5037 = vmatmul.f32.gmra.mxu0 %v4841_v53  ;;  %5114 = vmatmul.f32.gmra.mxu1 %v4861_v36  ;;  %v12714_v9 = vpop.f32.mrf.mxu1  ;;  %v4884_v36 = vsel %vm4824_vm2, %v4542_v49, %v7999_v1 }
 0x997   :  { %5191 = vmatmul.f32.gmra.mxu2 %v4881_v27  ;;  %5268 = vmatmul.f32.gmra.mxu3 %v4901_v28  ;;  %v12721_v0 = vpop.f32.mrf.mxu2  ;;  %v12723_v28 = vpop.f32.mrf.mxu3 }
 0x998   :  { %16409 = vst [vmem:[#allocation240_spill] sm:$0xff] %v12723_v28  ;;  %v12725_v4 = vpop.f32.mrf.mxu0 }
 0x99a   :  { %v7978_v58 = vpop.permute.xlu1 %7977 }
 0x99b   :  { %v7980_v55 = vunpack.i.h.bf16 %v7978_v58  ;;  %v7979_v34 = vunpack.i.l.bf16 %v7978_v58 }
 0x99d   :  { %v4842_v37 = vsel %vm4824_vm2, %v12521_v46, %v7980_v55  ;;  %v4882_v19 = vsel %vm4824_vm2, %v4541_v26, %v7979_v34  ;;  %v4702_v46 = vrot.slane %v12549_v14, 6 }
 0x99e   :  { %5040 = vmatmul.f32.gmra.mxu0 %v4842_v37  ;;  %5117 = vmatmul.f32.gmra.mxu1 %v4862_v3  ;;  %v12727_v27 = vpop.f32.mrf.mxu1 }
 0x99f   :  { %5194 = vmatmul.f32.gmra.mxu2 %v4882_v19  ;;  %5271 = vmatmul.f32.gmra.mxu3 %v4902_v56  ;;  %v4703_v7 = vsel %vm4664_vm4, %v4700_v13, %v4702_v46  ;;  %v12729_v18 = vpop.f32.mrf.mxu2  ;;  %v12731_v42 = vpop.f32.mrf.mxu3 }
 0x9a0   :  { %16410 = vst [vmem:[#allocation245_spill] sm:$0xff] %v12731_v42  ;;  %v12733_v24 = vpop.f32.mrf.mxu0 }
 0x9a1   :  { %v7988_v21 = vpop.permute.xlu0 %7987 }
 0x9a2   :  { %v7990_v63 = vunpack.i.h.bf16 %v7988_v21  ;;  %v7989_v40 = vunpack.i.l.bf16 %v7988_v21  ;;  %v7993_v16 = vpop.permute.xlu1 %7992 }
 0x9a3   :  { %v7995_v38 = vunpack.i.h.bf16 %v7993_v16  ;;  %v7994_v47 = vunpack.i.l.bf16 %v7993_v16 }
 0x9a4   :  { %v4843_v32 = vsel %vm4824_vm2, %v12535_v33, %v7990_v63  ;;  %v4883_v43 = vsel %vm4824_vm2, %v4543_v5, %v7989_v40  ;;  %v8000_v33 = vunpack.i.h.bf16 %v7998_v15 }
 0x9a5   :  { %v4863_v17 = vsel %vm4824_vm2, %v4383_v54, %v7995_v38  ;;  %v4903_v44 = vsel %vm4824_vm2, %v4703_v7, %v7994_v47 }
 0x9a6   :  { %5043 = vmatmul.f32.gmra.mxu0 %v4843_v32  ;;  %5120 = vmatmul.f32.gmra.mxu1 %v4863_v17  ;;  %v4844_v53 = vsel %vm4824_vm2, %v12549_v14, %v8000_v33  ;;  %v12735_v14 = vpop.f32.mrf.mxu1 }
 0x9a7   :  { %5197 = vmatmul.f32.gmra.mxu2 %v4883_v43  ;;  %5274 = vmatmul.f32.gmra.mxu3 %v4903_v44  ;;  %v12737_v13 = vpop.f32.mrf.mxu2  ;;  %v12739_v52 = vpop.f32.mrf.mxu3 }
 0x9a8   :  { %v5011_v58 = vpop.f32.mrf.mxu0 }
 0x9a9   :  { %v8003_v62 = vpop.permute.xlu0 %8002 }
 0x9aa   :  { %v8005_v35 = vunpack.i.h.bf16 %v8003_v62  ;;  %v8004_v6 = vunpack.i.l.bf16 %v8003_v62 }
 0x9ac   :  { %v4864_v23 = vsel %vm4824_vm2, %v4382_v25, %v8005_v35  ;;  %v4904_v2 = vsel %vm4824_vm2, %v4702_v46, %v8004_v6  ;;  %v12760_v35 = vld [vmem:[%s15538_s7] ss:$0 sm:$0xff] }
 0x9ae   :  { %5046 = vmatmul.f32.gmra.mxu0 %v4844_v53  ;;  %5123 = vmatmul.f32.gmra.mxu1 %v4864_v23  ;;  %v12741_v55 = vpop.f32.mrf.mxu1 }
 0x9af   :  { %5200 = vmatmul.f32.gmra.mxu2 %v4884_v36  ;;  %5277 = vmatmul.f32.gmra.mxu3 %v4904_v2  ;;  %v12743_v34 = vpop.f32.mrf.mxu2  ;;  %v12745_v8 = vpop.f32.mrf.mxu3 }
 0x9b0   :  { %v5014_v26 = vpop.f32.mrf.mxu0 }
 0x9b6   :  { %v12747_v37 = vpop.f32.mrf.mxu1 }
 0x9b7   :  { %v12749_v3 = vpop.f32.mrf.mxu2  ;;  %v12751_v19 = vpop.f32.mrf.mxu3 }
 0x9da   :  { %v5017_v29 = vpop.f32.mrf.mxu0 }
 0x9db   :  { %v5094_v56 = vpop.f32.mrf.mxu1 }
 0x9e0   :  { %v5171_v49 = vpop.f32.mrf.mxu2 }
 0x9e1   :  { %v12753_v25 = vpop.f32.mrf.mxu3 }
 0x9e2   :  { %v5020_v46 = vpop.f32.mrf.mxu0 }
 0x9e3   :  { %v5097_v21 = vpop.f32.mrf.mxu1  ;;  %v5021_v42 = vadd.f32 %v12760_v35, %v5020_v46 }
 0x9e8   :  { %v5174_v63 = vpop.f32.mrf.mxu2 }
 0x9e9   :  { %v12755_v40 = vpop.f32.mrf.mxu3 }
 0x9eb   :  { %v5023_v16 = vpop.f32.mrf.mxu0  ;;  %v5100_v38 = vpop.f32.mrf.mxu1 }
 0x9ec   :  { %v5024_v41 = vadd.f32 %v12760_v35, %v5023_v16 }
 0x9f2   :  { %v5177_v47 = vpop.f32.mrf.mxu2  ;;  %v5254_v5 = vpop.f32.mrf.mxu3 }
 0x9f3   :  { %v5026_v32 = vpop.f32.mrf.mxu0  ;;  %v5103_v54 = vpop.f32.mrf.mxu1 }
 0x9f4   :  { %v5027_v30 = vadd.f32 %v12760_v35, %v5026_v32  ;;  %v5101_v32 = vadd.f32 %v5100_v38, %v5024_v41 }
 0x9f6   :  { %v5104_v59 = vadd.f32 %v5103_v54, %v5027_v30  ;;  %v5012_v30 = vadd.f32 %v12760_v35, %v5011_v58  ;;  %v5006_v58 = vadd.f32 %v12760_v35, %v12725_v4 }
 0x9fa   :  { %v5180_v43 = vpop.f32.mrf.mxu2  ;;  %v5257_v7 = vpop.f32.mrf.mxu3 }
 0x9fb   :  { %v5029_v17 = vpop.f32.mrf.mxu0  ;;  %v5106_v44 = vpop.f32.mrf.mxu1 }
 0x9fc   :  { %v5030_v61 = vadd.f32 %v12760_v35, %v5029_v17 }
 0x9fe   :  { %v5107_v31 = vadd.f32 %v5106_v44, %v5030_v61  ;;  %v5098_v61 = vadd.f32 %v5097_v21, %v5021_v42  ;;  %v5089_v21 = vadd.f32 %v12741_v55, %v5012_v30  ;;  %v5000_v55 = vadd.f32 %v12760_v35, %v12694_v10 }
 0xa02   :  { %v5183_v15 = vpop.f32.mrf.mxu2  ;;  %v5260_v33 = vpop.f32.mrf.mxu3 }
 0xa03   :  { %v5032_v62 = vpop.f32.mrf.mxu0  ;;  %v5109_v1 = vpop.f32.mrf.mxu1 }
 0xa04   :  { %v5033_v2 = vadd.f32 %v12760_v35, %v5032_v62  ;;  %v5184_v62 = vadd.f32 %v5183_v15, %v5107_v31 }
 0xa06   :  { %v5110_v11 = vadd.f32 %v5109_v1, %v5033_v2  ;;  %v5181_v1 = vadd.f32 %v5180_v43, %v5104_v59  ;;  %v5261_v44 = vadd.f32 %v5260_v33, %v5184_v62  ;;  %v16412_v62 = vld [vmem:[#allocation149_spill] sm:$0xff] }
 0xa08   :  { %v5294_v42 = vmax.f32 %v5261_v44, 0.0  ;;  %v16418_v44 = vld [vmem:[#allocation55_spill] sm:$0xff] }
 0xa0a   :  { %v5186_v6 = vpop.f32.mrf.mxu2  ;;  %v5263_v23 = vpop.f32.mrf.mxu3 }
 0xa0b   :  { %v5035_v53 = vpop.f32.mrf.mxu0  ;;  %v5112_v36 = vpop.f32.mrf.mxu1  ;;  %v5187_v57 = vadd.f32 %v5186_v6, %v5110_v11  ;;  %v5015_v11 = vadd.f32 %v12760_v35, %v5014_v26 }
 0xa0c   :  { %v5036_v39 = vadd.f32 %v12760_v35, %v5035_v53  ;;  %v5018_v53 = vadd.f32 %v12760_v35, %v5017_v29  ;;  %v5009_v29 = vadd.f32 %v12760_v35, %v12733_v24 }
 0xa0d   :  { %v5264_v2 = vadd.f32 %v5263_v23, %v5187_v57 }
 0xa0e   :  { %v5113_v28 = vadd.f32 %v5112_v36, %v5036_v39  ;;  %v5178_v39 = vadd.f32 %v5177_v47, %v5101_v32  ;;  %v5095_v31 = vadd.f32 %v5094_v56, %v5018_v53  ;;  %v5166_v47 = vadd.f32 %v12743_v34, %v5089_v21  ;;  %v16411_v36 = vld [vmem:[#allocation89_spill] sm:$0xff]  ;;  %v16422_v21 = vld [vmem:[#allocation232_spill] sm:$0xff] }
 0xa0f   :  { %v5295_v46 = vmax.f32 %v5264_v2, 0.0  ;;  %v16413_v53 = vld [vmem:[#allocation233_spill] sm:$0xff] }
 0xa10   :  { %v5255_v59 = vadd.f32 %v5254_v5, %v5178_v39  ;;  %v5243_v10 = vadd.f32 %v12745_v8, %v5166_v47 }
 0xa12   :  { %v5189_v45 = vpop.f32.mrf.mxu2  ;;  %v5266_v20 = vpop.f32.mrf.mxu3  ;;  %v5292_v4 = vmax.f32 %v5255_v59, 0.0 }
 0xa13   :  { %v5190_v51 = vadd.f32 %v5189_v45, %v5113_v28  ;;  %v12768_v12 = vpop.f32.mrf.mxu0  ;;  %v12770_v17 = vpop.f32.mrf.mxu1  ;;  %v5175_v45 = vadd.f32 %v5174_v63, %v5098_v61  ;;  %v5258_v28 = vadd.f32 %v5257_v7, %v5181_v1  ;;  %v16414_v1 = vld [vmem:[#allocation245_spill] sm:$0xff]  ;;  %v16417_v61 = vld [vmem:[#allocation240_spill] sm:$0xff] }
 0xa15   :  { %v5267_v16 = vadd.f32 %v5266_v20, %v5190_v51  ;;  %v5092_v20 = vadd.f32 %v12747_v37, %v5015_v11  ;;  %v5172_v51 = vadd.f32 %v5171_v49, %v5095_v31  ;;  %v5252_v63 = vadd.f32 %v12755_v40, %v5175_v45  ;;  %v16416_v11 = vld [vmem:[#allocation238_spill] sm:$0xff]  ;;  %v16419_v45 = vld [vmem:[#allocation120_spill] sm:$0xff] }
 0xa16   :  { %v5293_v38 = vmax.f32 %v5258_v28, 0.0  ;;  %v5003_v37 = vadd.f32 %v12760_v35, %v12712_v60  ;;  %v5086_v49 = vadd.f32 %v12735_v14, %v5009_v29  ;;  %v4997_v60 = vadd.f32 %v12760_v35, %v12673_v48 }
 0xa17   :  { %v5296_v6 = vmax.f32 %v5267_v16, 0.0  ;;  %v5169_v24 = vadd.f32 %v12749_v3, %v5092_v20  ;;  %v5249_v5 = vadd.f32 %v12753_v25, %v5172_v51  ;;  %v5083_v3 = vadd.f32 %v12727_v27, %v5006_v58  ;;  %v16415_v16 = vld [vmem:[#allocation162_spill] sm:$0xff] }
 0xa18   :  { %v5163_v40 = vadd.f32 %v12737_v13, %v5086_v49  ;;  %v5291_v43 = vmax.f32 %v5252_v63, 0.0  ;;  %v5080_v25 = vadd.f32 %v12714_v9, %v5003_v37  ;;  %v4994_v13 = vadd.f32 %v12760_v35, %v12648_v22  ;;  %v16423_v49 = vld [vmem:[#allocation235_spill] sm:$0xff] }
 0xa19   :  { %5335 = vmatpush.msra.mxu0 %v5296_v6  ;;  %v5246_v54 = vadd.f32 %v12751_v19, %v5169_v24  ;;  %v5160_v7 = vadd.f32 %v12729_v18, %v5083_v3  ;;  %v5290_v15 = vmax.f32 %v5249_v5, 0.0  ;;  %v5077_v19 = vadd.f32 %v12698_v50, %v5000_v55  ;;  %v16424_v3 = vld [vmem:[#allocation90_spill] sm:$0xff] }
 0xa1a   :  { %v12777_v41 = vpop.f32.mrf.mxu2  ;;  %v12779_v57 = vpop.f32.mrf.mxu3  ;;  %v5157_v33 = vadd.f32 %v12721_v0, %v5080_v25  ;;  %v5240_v48 = vadd.f32 %v12739_v52, %v5163_v40  ;;  %v4991_v9 = vadd.f32 %v12760_v35, %v16411_v36  ;;  %v5074_v8 = vadd.f32 %v16412_v62, %v4997_v60  ;;  %v5305_v62 = vld [vmem:[%s15539_s10 + $0x20] sm:$0xff] }
 0xa1b   :  { %5336 = vmatpush.msra.mxu0 %v5295_v46  ;;  %v5041_v26 = vpop.f32.mrf.mxu0  ;;  %v12784_v56 = vpop.f32.mrf.mxu1  ;;  %v5289_v23 = vmax.f32 %v5246_v54, 0.0  ;;  %v5154_v32 = vadd.f32 %v16413_v53, %v5077_v19  ;;  %v5237_v2 = vadd.f32 %v16414_v1, %v5160_v7  ;;  %v5288_v22 = vmax.f32 %v5243_v10, 0.0  ;;  %v16420_v46 = vld [vmem:[#allocation236_spill] sm:$0xff]  ;;  %v5550_v53 = vld [vmem:[%s15542_s11 + $0xe0] sm:$0xff] }
 0xa1c   :  { %v5071_v50 = vadd.f32 %v16415_v16, %v4994_v13  ;;  %v5151_v0 = vadd.f32 %v16416_v11, %v5074_v8  ;;  %v5234_v52 = vadd.f32 %v16417_v61, %v5157_v33  ;;  %v5287_v39 = vmax.f32 %v5240_v48, 0.0  ;;  %v5552_v8 = vld [vmem:[%s15542_s11 + $0xf0] sm:$0xff]  ;;  %v5582_v16 = vld [vmem:[%s15542_s11 + $0x1e0] sm:$0xff] }
 0xa1d   :  { %5337 = vmatpush.msra.mxu0 %v5294_v42  ;;  %v5068_v6 = vadd.f32 %v16418_v44, %v4991_v9  ;;  %v5231_v29 = vadd.f32 %v16420_v46, %v5154_v32  ;;  %v5286_v59 = vmax.f32 %v5237_v2, 0.0  ;;  %v16421_v42 = vld [vmem:[#allocation112_spill] sm:$0xff]  ;;  %v5042_v63 = vadd.f32 %v12760_v35, %v5041_v26  ;;  %5720 = vmatpush.msra.mxu2 %v5552_v8  ;;  %v5546_v11 = vld [vmem:[%s15542_s11 + $0xc0] sm:$0xff] }
 0xa1e   :  { %v5148_v28 = vadd.f32 %v16419_v45, %v5071_v50  ;;  %v5228_v24 = vadd.f32 %v16422_v21, %v5151_v0  ;;  %v5285_v37 = vmax.f32 %v5234_v52, 0.0  ;;  %v5039_v5 = vadd.f32 %v12760_v35, %v12768_v12  ;;  %v5548_v32 = vld [vmem:[%s15542_s11 + $0xd0] sm:$0xff]  ;;  %v5614_v50 = vld [vmem:[%s15542_s11 + $0x2e0] sm:$0xff]  ;;  %v5306_v52 = vld [vmem:[%s15539_s10 + $0x28] sm:$0xff] }
 0xa1f   :  { %5338 = vmatpush.msra.mxu0 %v5293_v38  ;;  %v5145_v58 = vadd.f32 %v16421_v42, %v5068_v6  ;;  %v5284_v55 = vmax.f32 %v5231_v29, 0.0  ;;  %v5584_v1 = vld [vmem:[%s15542_s11 + $0x1f0] sm:$0xff]  ;;  %5721 = vmatpush.msra.mxu2 %v5550_v53  ;;  %v5646_v0 = vld [vmem:[%s15542_s11 + $0x3e0] sm:$0xff] }
 0xa20   :  { %v5225_v47 = vadd.f32 %v16423_v49, %v5148_v28  ;;  %v5283_v26 = vmax.f32 %v5228_v24, 0.0  ;;  %v5116_v10 = vadd.f32 %v12770_v17, %v5039_v5  ;;  %v5616_v2 = vld [vmem:[%s15542_s11 + $0x2f0] sm:$0xff]  ;;  %5755 = vmatpush.msra.mxu3 %v5584_v1  ;;  %v5542_v45 = vld [vmem:[%s15542_s11 + $0xa0] sm:$0xff]  ;;  %v5308_v24 = vld [vmem:[%s15539_s10 + $0x38] sm:$0xff] }
 0xa21   :  { %5339 = vmatpush.msra.mxu0 %v5292_v4  ;;  %v5222_v40 = vadd.f32 %v16424_v3, %v5145_v58  ;;  %v5580_v61 = vld [vmem:[%s15542_s11 + $0x1d0] sm:$0xff]  ;;  %5722 = vmatpush.msra.mxu2 %v5548_v32  ;;  %v5610_v28 = vld [vmem:[%s15542_s11 + $0x2c0] sm:$0xff]  ;;  %v5310_v5 = vld [vmem:[%s15539_s10 + $0x48] sm:$0xff] }
 0xa22   :  { %v5195_v14 = vpop.f32.mrf.mxu2  ;;  %v12801_v34 = vpop.f32.mrf.mxu3  ;;  %v5282_v13 = vmax.f32 %v5225_v47, 0.0  ;;  %5756 = vmatpush.msra.mxu3 %v5582_v16  ;;  %v5544_v44 = vld [vmem:[%s15542_s11 + $0xb0] sm:$0xff]  ;;  %v5642_v46 = vld [vmem:[%s15542_s11 + $0x3c0] sm:$0xff] }
 0xa23   :  { %5340 = vmatpush.msra.mxu0 %v5291_v43  ;;  %v5044_v27 = vpop.f32.mrf.mxu0  ;;  %v5121_v18 = vpop.f32.mrf.mxu1  ;;  %v5119_v43 = vadd.f32 %v12784_v56, %v5042_v63  ;;  %v5281_v48 = vmax.f32 %v5222_v40, 0.0  ;;  %v5301_v56 = vld [vmem:[%s15539_s10] sm:$0xff]  ;;  %v5612_v6 = vld [vmem:[%s15542_s11 + $0x2d0] sm:$0xff]  ;;  %5723 = vmatpush.msra.mxu2 %v5546_v11 }
 0xa24   :  { %v5045_v20 = vadd.f32 %v12760_v35, %v5044_v27  ;;  %5757 = vmatpush.msra.mxu3 %v5580_v61  ;;  %v5576_v29 = vld [vmem:[%s15542_s11 + $0x1b0] sm:$0xff]  ;;  %v5574_v42 = vld [vmem:[%s15542_s11 + $0x1a0] sm:$0xff] }
 0xa25   :  { %5341 = vmatpush.msra.mxu0 %v5290_v15  ;;  %v5196_v15 = vadd.f32 %v5195_v14, %v5119_v43  ;;  %5724 = vmatpush.msra.mxu2 %v5544_v44  ;;  %v5538_v58 = vld [vmem:[%s15542_s11 + $0x80] sm:$0xff]  ;;  %v5532_v47 = vld [vmem:[%s15542_s11 + $0x50] sm:$0xff] }
 0xa26   :  { %v5122_v4 = vadd.f32 %v5121_v18, %v5045_v20  ;;  %v5302_v18 = vld [vmem:[%s15539_s10 + $0x8] sm:$0xff]  ;;  %v5540_v20 = vld [vmem:[%s15542_s11 + $0x90] sm:$0xff]  ;;  %v5606_v21 = vld [vmem:[%s15542_s11 + $0x2a0] sm:$0xff] }
 0xa27   :  { %5342 = vmatpush.msra.mxu0 %v5289_v23  ;;  %v5273_v23 = vadd.f32 %v12801_v34, %v5196_v15  ;;  %v5303_v34 = vld [vmem:[%s15539_s10 + $0x10] sm:$0xff]  ;;  %5725 = vmatpush.msra.mxu2 %v5542_v45  ;;  %v5309_v63 = vld [vmem:[%s15539_s10 + $0x40] sm:$0xff] }
 0xa28   :  { %v5534_v49 = vld [vmem:[%s15542_s11 + $0x60] sm:$0xff]  ;;  %v5572_v40 = vld [vmem:[%s15542_s11 + $0x190] sm:$0xff] }
 0xa29   :  { %5343 = vmatpush.msra.mxu0 %v5288_v22  ;;  %v5298_v9 = vmax.f32 %v5273_v23, 0.0  ;;  %v5648_v22 = vld [vmem:[%s15542_s11 + $0x3f0] sm:$0xff]  ;;  %5726 = vmatpush.msra.mxu2 %v5540_v20  ;;  %v5530_v3 = vld [vmem:[%s15542_s11 + $0x40] sm:$0xff] }
 0xa2a   :  { %v5198_v30 = vpop.f32.mrf.mxu2  ;;  %v5275_v31 = vpop.f32.mrf.mxu3  ;;  %v5636_v43 = vld [vmem:[%s15542_s11 + $0x390] sm:$0xff]  ;;  %v5622_v8 = vld [vmem:[%s15542_s11 + $0x320] sm:$0xff] }
 0xa2b   :  { %5344 = vmatpush.msra.mxu0 %v5287_v39  ;;  %v5047_v51 = vpop.f32.mrf.mxu0  ;;  %v5124_v54 = vpop.f32.mrf.mxu1  ;;  %v5199_v60 = vadd.f32 %v5198_v30, %v5122_v4  ;;  %v5307_v39 = vld [vmem:[%s15539_s10 + $0x30] sm:$0xff]  ;;  %5727 = vmatpush.msra.mxu2 %v5538_v58  ;;  %v5618_v16 = vld [vmem:[%s15542_s11 + $0x300] sm:$0xff] }
 0xa2c   :  { %v5048_v38 = vadd.f32 %v12760_v35, %v5047_v51  ;;  %v5193_v35 = vadd.f32 %v12777_v41, %v5116_v10  ;;  %v5644_v30 = vld [vmem:[%s15542_s11 + $0x3d0] sm:$0xff]  ;;  %v5526_v10 = vld [vmem:[%s15542_s11 + $0x20] sm:$0xff] }
 0xa2d   :  { %5345 = vmatpush.msra.mxu0 %v5286_v59  ;;  %v5276_v19 = vadd.f32 %v5275_v31, %v5199_v60  ;;  %v5578_v31 = vld [vmem:[%s15542_s11 + $0x1c0] sm:$0xff]  ;;  %v5608_v51 = vld [vmem:[%s15542_s11 + $0x2b0] sm:$0xff] }
 0xa2e   :  { %v5125_v25 = vadd.f32 %v5124_v54, %v5048_v38  ;;  %v5270_v17 = vadd.f32 %v12779_v57, %v5193_v35  ;;  %v5304_v57 = vld [vmem:[%s15539_s10 + $0x18] sm:$0xff]  ;;  %5758 = vmatpush.msra.mxu3 %v5578_v31  ;;  %v5640_v59 = vld [vmem:[%s15542_s11 + $0x3b0] sm:$0xff]  ;;  %v5566_v35 = vld [vmem:[%s15542_s11 + $0x160] sm:$0xff] }
 0xa2f   :  { %5346 = vmatpush.msra.mxu0 %v5285_v37  ;;  %v5299_v14 = vmax.f32 %v5276_v19, 0.0  ;;  %v5536_v38 = vld [vmem:[%s15542_s11 + $0x70] sm:$0xff]  ;;  %v5638_v37 = vld [vmem:[%s15542_s11 + $0x3a0] sm:$0xff] }
 0xa30   :  { %v5297_v41 = vmax.f32 %v5270_v17, 0.0  ;;  %5759 = vmatpush.msra.mxu3 %v5576_v29  ;;  %5728 = vmatpush.msra.mxu2 %v5536_v38  ;;  %v5311_v4 = vld [vmem:[%s15539_s10 + $0x50] sm:$0xff]  ;;  %v5598_v19 = vld [vmem:[%s15542_s11 + $0x260] sm:$0xff] }
 0xa31   :  { %5347 = vmatpush.msra.mxu0 %v5284_v55  ;;  %v5312_v55 = vld [vmem:[%s15539_s10 + $0x58] sm:$0xff]  ;;  %v5604_v54 = vld [vmem:[%s15542_s11 + $0x290] sm:$0xff]  ;;  %v5562_v17 = vld [vmem:[%s15542_s11 + $0x140] sm:$0xff] }
 0xa32   :  { %v5201_v7 = vpop.f32.mrf.mxu2  ;;  %v5278_v12 = vpop.f32.mrf.mxu3  ;;  %5760 = vmatpush.msra.mxu3 %v5574_v42  ;;  %5729 = vmatpush.msra.mxu2 %v5534_v49  ;;  %v5528_v60 = vld [vmem:[%s15542_s11 + $0x30] sm:$0xff]  ;;  %v13091_v31 = vld [vmem:[%s15541_s9] ss:$0 sm:$0xff] }
 0xa33   :  { %v5202_v27 = vadd.f32 %v5201_v7, %v5125_v25  ;;  %5348 = vmatpush.msra.mxu0 %v5283_v26  ;;  %v5570_v25 = vld [vmem:[%s15542_s11 + $0x180] sm:$0xff]  ;;  %v5568_v15 = vld [vmem:[%s15542_s11 + $0x170] sm:$0xff] }
 0xa34   :  { %5730 = vmatpush.msra.mxu2 %v5532_v47  ;;  %5761 = vmatpush.msra.mxu3 %v5572_v40  ;;  %v5602_v26 = vld [vmem:[%s15542_s11 + $0x280] sm:$0xff]  ;;  %v5596_v23 = vld [vmem:[%s15542_s11 + $0x250] sm:$0xff] }
 0xa35   :  { %v5279_v33 = vadd.f32 %v5278_v12, %v5202_v27  ;;  %5349 = vmatpush.msra.mxu0 %v5282_v13  ;;  %v5634_v7 = vld [vmem:[%s15542_s11 + $0x380] sm:$0xff]  ;;  %v5600_v27 = vld [vmem:[%s15542_s11 + $0x270] sm:$0xff] }
 0xa36   :  { %5731 = vmatpush.msra.mxu2 %v5530_v3  ;;  %5762 = vmatpush.msra.mxu3 %v5570_v25  ;;  %v5632_v13 = vld [vmem:[%s15542_s11 + $0x370] sm:$0xff]  ;;  %v5666_v49 = vld [vmem:[%s15542_s11 + $0x480] sm:$0xff] }
 0xa37   :  { %v5300_v36 = vmax.f32 %v5279_v33, 0.0  ;;  %5350 = vmatpush.msra.mxu0 %v5281_v48  ;;  %v5524_v12 = vld [vmem:[%s15542_s11 + $0x10] sm:$0xff]  ;;  %v5630_v33 = vld [vmem:[%s15542_s11 + $0x360] sm:$0xff] }
 0xa38   :  { %5351 = vmatmul.f32.vlgmr.msra.gmra.mxu0 %v5301_v56  ;;  %5732 = vmatpush.msra.mxu2 %v5528_v60  ;;  %v5522_v48 = vld [vmem:[%s15542_s11] sm:$0xff]  ;;  %v5564_v56 = vld [vmem:[%s15542_s11 + $0x150] sm:$0xff]  ;;  %v5579_v60 = vld [vmem:[%s15542_s11 + $0x1c8] sm:$0xff] }
 0xa39   :  { %7764 = vmatpush.msk.msra.mxu1 %vm4724_vm1, %v5300_v36  ;;  %5790 = vmatpush.msrb.mxu0 %v5616_v2  ;;  %v5628_v36 = vld [vmem:[%s15542_s11 + $0x350] sm:$0xff]  ;;  %v5554_v2 = vld [vmem:[%s15542_s11 + $0x100] sm:$0xff] }
 0xa3a   :  { %5733 = vmatpush.msra.mxu2 %v5526_v10  ;;  %5763 = vmatpush.msra.mxu3 %v5568_v15  ;;  %v5556_v53 = vld [vmem:[%s15542_s11 + $0x110] sm:$0xff]  ;;  %v5662_v25 = vld [vmem:[%s15542_s11 + $0x460] sm:$0xff]  ;;  %v5545_v10 = vld [vmem:[%s15542_s11 + $0xb8] sm:$0xff] }
 0xa3b   :  { %5383 = vmatpush.msra.mxu1 %v5299_v14  ;;  %5791 = vmatpush.msrb.mxu0 %v5614_v50  ;;  %v5594_v14 = vld [vmem:[%s15542_s11 + $0x240] sm:$0xff]  ;;  %v5588_v32 = vld [vmem:[%s15542_s11 + $0x210] sm:$0xff]  ;;  %v5577_v15 = vld [vmem:[%s15542_s11 + $0x1b8] sm:$0xff] }
 0xa3c   :  { %5734 = vmatpush.msra.mxu2 %v5524_v12  ;;  %5764 = vmatpush.msra.mxu3 %v5566_v35  ;;  %v5620_v1 = vld [vmem:[%s15542_s11 + $0x310] sm:$0xff]  ;;  %v5702_v12 = vld [vmem:[%s15542_s11 + $0x5a0] sm:$0xff]  ;;  %v5543_v35 = vld [vmem:[%s15542_s11 + $0xa8] sm:$0xff] }
 0xa3d   :  { %5384 = vmatpush.msra.mxu1 %v5298_v9  ;;  %5792 = vmatpush.msrb.mxu0 %v5612_v6  ;;  %v5626_v9 = vld [vmem:[%s15542_s11 + $0x340] sm:$0xff]  ;;  %v5680_v11 = vld [vmem:[%s15542_s11 + $0x4f0] sm:$0xff] }
 0xa3e   :  { %5735 = vmatpush.msra.mxu2 %v5522_v48  ;;  %5765 = vmatpush.msra.mxu3 %v5564_v56  ;;  %v5676_v61 = vld [vmem:[%s15542_s11 + $0x4d0] sm:$0xff]  ;;  %v5674_v6 = vld [vmem:[%s15542_s11 + $0x4c0] sm:$0xff] }
 0xa3f   :  { %5385 = vmatpush.msra.mxu1 %v5297_v41  ;;  %5793 = vmatpush.msrb.mxu0 %v5610_v28  ;;  %v5560_v41 = vld [vmem:[%s15542_s11 + $0x130] sm:$0xff] }
 0xa40   :  { %7765 = vmatmul.msk.f32.vlgmr.msra.gmra.mxu1 %vm5313_vm6, %v5302_v18  ;;  %5354 = vmatmul.f32.gmra.mxu0 %v5303_v34  ;;  %v5592_v18 = vld [vmem:[%s15542_s11 + $0x230] sm:$0xff] }
 0xa41   :  { %5825 = vmatpush.msrb.mxu1 %v5648_v22  ;;  %5794 = vmatpush.msrb.mxu0 %v5608_v51  ;;  %v5624_v34 = vld [vmem:[%s15542_s11 + $0x330] sm:$0xff]  ;;  %v5586_v22 = vld [vmem:[%s15542_s11 + $0x200] sm:$0xff]  ;;  %v5553_v51 = vld [vmem:[%s15542_s11 + $0xf8] sm:$0xff] }
 0xa42   :  { %5766 = vmatpush.msra.mxu3 %v5562_v17  ;;  %5860 = vmatpush.msrb.mxu2 %v5680_v11  ;;  %v5672_v45 = vld [vmem:[%s15542_s11 + $0x4b0] sm:$0xff]  ;;  %v5571_v11 = vld [vmem:[%s15542_s11 + $0x188] sm:$0xff] }
 0xa43   :  { %5826 = vmatpush.msrb.mxu1 %v5646_v0  ;;  %5795 = vmatpush.msrb.mxu0 %v5606_v21  ;;  %v5678_v0 = vld [vmem:[%s15542_s11 + $0x4e0] sm:$0xff]  ;;  %v5712_v20 = vld [vmem:[%s15542_s11 + $0x5f0] sm:$0xff] }
 0xa44   :  { %5767 = vmatpush.msra.mxu3 %v5560_v41  ;;  %5861 = vmatpush.msrb.mxu2 %v5678_v0  ;;  %v5668_v42 = vld [vmem:[%s15542_s11 + $0x490] sm:$0xff]  ;;  %v5710_v21 = vld [vmem:[%s15542_s11 + $0x5e0] sm:$0xff] }
 0xa45   :  { %5827 = vmatpush.msrb.mxu1 %v5644_v30  ;;  %5796 = vmatpush.msrb.mxu0 %v5604_v54  ;;  %v5664_v3 = vld [vmem:[%s15542_s11 + $0x470] sm:$0xff]  ;;  %v5706_v54 = vld [vmem:[%s15542_s11 + $0x5c0] sm:$0xff] }
 0xa46   :  { %5862 = vmatpush.msrb.mxu2 %v5676_v61  ;;  %v5654_v0 = vld [vmem:[%s15542_s11 + $0x420] sm:$0xff]  ;;  %v5696_v61 = vld [vmem:[%s15542_s11 + $0x570] sm:$0xff] }
 0xa47   :  { %5828 = vmatpush.msrb.mxu1 %v5642_v46  ;;  %5797 = vmatpush.msrb.mxu0 %v5602_v26  ;;  %v5670_v46 = vld [vmem:[%s15542_s11 + $0x4a0] sm:$0xff] }
 0xa48   :  { %7766 = vmatmul.msk.f32.gmra.mxu1 %vm5313_vm6, %v5304_v57  ;;  %5357 = vmatmul.f32.gmra.mxu0 %v5305_v62  ;;  %v5558_v57 = vld [vmem:[%s15542_s11 + $0x120] sm:$0xff] }
 0xa49   :  { %5829 = vmatpush.msrb.mxu1 %v5640_v59  ;;  %5798 = vmatpush.msrb.mxu0 %v5600_v27  ;;  %v5590_v62 = vld [vmem:[%s15542_s11 + $0x220] sm:$0xff]  ;;  %v5585_v59 = vld [vmem:[%s15542_s11 + $0x1f8] sm:$0xff]  ;;  %v5660_v27 = vld [vmem:[%s15542_s11 + $0x450] sm:$0xff] }
 0xa4a   :  { %5768 = vmatpush.msra.mxu3 %v5558_v57  ;;  %5863 = vmatpush.msrb.mxu2 %v5674_v6  ;;  %v5541_v57 = vld [vmem:[%s15542_s11 + $0x98] sm:$0xff] }
 0xa4b   :  { %5830 = vmatpush.msrb.mxu1 %v5638_v37  ;;  %5799 = vmatpush.msrb.mxu0 %v5598_v19  ;;  %v5575_v19 = vld [vmem:[%s15542_s11 + $0x1a8] sm:$0xff]  ;;  %v5569_v6 = vld [vmem:[%s15542_s11 + $0x178] sm:$0xff] }
 0xa4c   :  { %5769 = vmatpush.msra.mxu3 %v5556_v53  ;;  %5864 = vmatpush.msrb.mxu2 %v5672_v45  ;;  %v5652_v45 = vld [vmem:[%s15542_s11 + $0x410] sm:$0xff] }
 0xa4d   :  { %5831 = vmatpush.msrb.mxu1 %v5636_v43  ;;  %5800 = vmatpush.msrb.mxu0 %v5596_v23  ;;  %v5547_v43 = vld [vmem:[%s15542_s11 + $0xc8] sm:$0xff] }
 0xa4e   :  { %5770 = vmatpush.msra.mxu3 %v5554_v2  ;;  %5865 = vmatpush.msrb.mxu2 %v5670_v46  ;;  %v5656_v2 = vld [vmem:[%s15542_s11 + $0x430] sm:$0xff] }
 0xa4f   :  { %5832 = vmatpush.msrb.mxu1 %v5634_v7  ;;  %5801 = vmatpush.msrb.mxu0 %v5594_v14  ;;  %v5704_v7 = vld [vmem:[%s15542_s11 + $0x5b0] sm:$0xff] }
 0xa50   :  { %7767 = vmatmul.msk.f32.gmra.mxu1 %vm5313_vm6, %v5306_v52  ;;  %5360 = vmatmul.f32.gmra.mxu0 %v5307_v39  ;;  %v13083_v52 = vld [vmem:[%s15540_s8] ss:$0 sm:$0xff] }
 0xa51   :  { %5833 = vmatpush.msrb.mxu1 %v5632_v13  ;;  %5802 = vmatpush.msrb.mxu0 %v5592_v18  ;;  %v5700_v18 = vld [vmem:[%s15542_s11 + $0x590] sm:$0xff] }
 0xa52   :  { %5895 = vmatpush.msrb.mxu3 %v5712_v20  ;;  %5866 = vmatpush.msrb.mxu2 %v5668_v42 }
 0xa53   :  { %5834 = vmatpush.msrb.mxu1 %v5630_v33  ;;  %5803 = vmatpush.msrb.mxu0 %v5590_v62 }
 0xa54   :  { %5896 = vmatpush.msrb.mxu3 %v5710_v21  ;;  %5867 = vmatpush.msrb.mxu2 %v5666_v49  ;;  %v5650_v49 = vld [vmem:[%s15542_s11 + $0x400] sm:$0xff] }
 0xa55   :  { %5835 = vmatpush.msrb.mxu1 %v5628_v36  ;;  %5804 = vmatpush.msrb.mxu0 %v5588_v32  ;;  %v5658_v36 = vld [vmem:[%s15542_s11 + $0x440] sm:$0xff] }
 0xa56   :  { %5868 = vmatpush.msrb.mxu2 %v5664_v3  ;;  %v5690_v3 = vld [vmem:[%s15542_s11 + $0x540] sm:$0xff] }
 0xa57   :  { %5836 = vmatpush.msrb.mxu1 %v5626_v9  ;;  %5805 = vmatpush.msrb.mxu0 %v5586_v22  ;;  %v5698_v22 = vld [vmem:[%s15542_s11 + $0x580] sm:$0xff] }
 0xa58   :  { %7768 = vmatmul.msk.f32.gmra.mxu1 %vm5313_vm6, %v5308_v24  ;;  %5363 = vmatmul.f32.gmra.mxu0 %v5309_v63  ;;  %v5551_v24 = vld [vmem:[%s15542_s11 + $0xe8] sm:$0xff] }
 0xa59   :  { %5837 = vmatpush.msrb.mxu1 %v5624_v34  ;;  %5930 = vmatpush.msra.mxu0 %v5553_v51  ;;  %v5583_v63 = vld [vmem:[%s15542_s11 + $0x1e8] sm:$0xff]  ;;  %v5694_v51 = vld [vmem:[%s15542_s11 + $0x560] sm:$0xff] }
 0xa5a   :  { %5869 = vmatpush.msrb.mxu2 %v5662_v25  ;;  %v5688_v25 = vld [vmem:[%s15542_s11 + $0x530] sm:$0xff] }
 0xa5b   :  { %5838 = vmatpush.msrb.mxu1 %v5622_v8  ;;  %5931 = vmatpush.msra.mxu0 %v5551_v24 }
 0xa5c   :  { %5870 = vmatpush.msrb.mxu2 %v5660_v27  ;;  %v5529_v27 = vld [vmem:[%s15542_s11 + $0x38] sm:$0xff] }
 0xa5d   :  { %5839 = vmatpush.msrb.mxu1 %v5620_v1  ;;  %v5573_v1 = vld [vmem:[%s15542_s11 + $0x198] sm:$0xff] }
 0xa5e   :  { %5871 = vmatpush.msrb.mxu2 %v5658_v36 }
 0xa5f   :  { %5840 = vmatpush.msrb.mxu1 %v5618_v16  ;;  %v5539_v16 = vld [vmem:[%s15542_s11 + $0x88] sm:$0xff] }
 0xa60   :  { %7769 = vmatmul.msk.f32.gmra.mxu1 %vm5313_vm6, %v5310_v5  ;;  %5366 = vmatmul.f32.gmra.mxu0 %v5311_v4  ;;  %v5708_v5 = vld [vmem:[%s15542_s11 + $0x5d0] sm:$0xff]  ;;  %v5549_v4 = vld [vmem:[%s15542_s11 + $0xd8] sm:$0xff] }
 0xa61   :  { %5965 = vmatpush.msra.mxu1 %v5585_v59  ;;  %5897 = vmatpush.msrb.mxu3 %v5708_v5 }
 0xa62   :  { %5932 = vmatpush.msra.mxu0 %v5549_v4  ;;  %5872 = vmatpush.msrb.mxu2 %v5656_v2  ;;  %v5533_v4 = vld [vmem:[%s15542_s11 + $0x58] sm:$0xff] }
 0xa63   :  { %5966 = vmatpush.msra.mxu1 %v5583_v63  ;;  %5898 = vmatpush.msrb.mxu3 %v5706_v54  ;;  %v5535_v63 = vld [vmem:[%s15542_s11 + $0x68] sm:$0xff] }
 0xa64   :  { %5933 = vmatpush.msra.mxu0 %v5547_v43  ;;  %5873 = vmatpush.msrb.mxu2 %v5654_v0  ;;  %v5531_v54 = vld [vmem:[%s15542_s11 + $0x48] sm:$0xff] }
 0xa65   :  { %5899 = vmatpush.msrb.mxu3 %v5704_v7  ;;  %v5563_v43 = vld [vmem:[%s15542_s11 + $0x148] sm:$0xff] }
 0xa66   :  { %5934 = vmatpush.msra.mxu0 %v5545_v10  ;;  %5874 = vmatpush.msrb.mxu2 %v5652_v45 }
 0xa67   :  { %5900 = vmatpush.msrb.mxu3 %v5702_v12 }
 0xa68   :  { %7770 = vmatmul.msk.f32.gmra.mxu1 %vm5313_vm6, %v5312_v55  ;;  %v5581_v55 = vld [vmem:[%s15542_s11 + $0x1d8] sm:$0xff]  ;;  %5935 = vmatpush.msra.mxu0 %v5543_v35 }
 0xa69   :  { %5967 = vmatpush.msra.mxu1 %v5581_v55  ;;  %5901 = vmatpush.msrb.mxu3 %v5700_v18  ;;  %v5565_v55 = vld [vmem:[%s15542_s11 + $0x158] sm:$0xff] }
 0xa6a   :  { %5936 = vmatpush.msra.mxu0 %v5541_v57  ;;  %5875 = vmatpush.msrb.mxu2 %v5650_v49  ;;  %v5682_v57 = vld [vmem:[%s15542_s11 + $0x500] sm:$0xff]  ;;  %v5609_v49 = vld [vmem:[%s15542_s11 + $0x2b8] sm:$0xff] }
 0xa6b   :  { %5968 = vmatpush.msra.mxu1 %v5579_v60  ;;  %5902 = vmatpush.msrb.mxu3 %v5698_v22 }
 0xa6c   :  { %5937 = vmatpush.msra.mxu0 %v5539_v16 }
 0xa6d   :  { %5969 = vmatpush.msra.mxu1 %v5577_v15  ;;  %5903 = vmatpush.msrb.mxu3 %v5696_v61 }
 0xa6f   :  { %5970 = vmatpush.msra.mxu1 %v5575_v19  ;;  %5904 = vmatpush.msrb.mxu3 %v5694_v51  ;;  %v5611_v51 = vld [vmem:[%s15542_s11 + $0x2c8] sm:$0xff] }
 0xa71   :  { %5971 = vmatpush.msra.mxu1 %v5573_v1  ;;  %v5523_v1 = vld [vmem:[%s15542_s11 + $0x8] sm:$0xff] }
 0xa73   :  { %5972 = vmatpush.msra.mxu1 %v5571_v11  ;;  %v5617_v11 = vld [vmem:[%s15542_s11 + $0x2f8] sm:$0xff] }
 0xa75   :  { %5973 = vmatpush.msra.mxu1 %v5569_v6 }
 0xab5   :  { %v5352_v50 = vpop.f32.mrf.mxu0 }
 0xabd   :  { %v5387_v39 = vpop.f32.mrf.mxu1  ;;  %v5355_v44 = vpop.f32.mrf.mxu0 }
 0xabe   :  { %v5388_v30 = vadd.f32 %v5387_v39, %v5352_v50 }
 0xac0   :  { %v5409_v28 = vmul.f32 %v13083_v52, %v5388_v30 }
 0xac2   :  { %v5419_v29 = vadd.f32 %v13091_v31, %v5409_v28 }
 0xac4   :  { %v13113_v58 = vmax.f32 %v5419_v29, 0.0 }
 0xac5   :  { %v5390_v38 = vpop.f32.mrf.mxu1  ;;  %v5358_v37 = vpop.f32.mrf.mxu0 }
 0xac6   :  { %v5391_v47 = vadd.f32 %v5390_v38, %v5355_v44  ;;  %5736 = vmatmul.f32.vlgmr.msra.gmra.mxu2 %v13113_v58  ;;  %v5437_v48 = vrot.slane %v13113_v58, 1  ;;  %v5454_v56 = vrot.slane %v13113_v58, 2  ;;  %v5471_v23 = vrot.slane %v13113_v58, 3  ;;  %v5537_v44 = vld [vmem:[%s15542_s11 + $0x78] sm:$0xff]  ;;  %v5567_v38 = vld [vmem:[%s15542_s11 + $0x168] sm:$0xff] }
 0xac7   :  { %5938 = vmatpush.msra.mxu0 %v5537_v44  ;;  %5974 = vmatpush.msra.mxu1 %v5567_v38 }
 0xac8   :  { %v5410_v40 = vmul.f32 %v13083_v52, %v5391_v47  ;;  %v5692_v47 = vld [vmem:[%s15542_s11 + $0x550] sm:$0xff]  ;;  %6000 = vmatpush.msra.mxu2 %v5617_v11  ;;  %v5669_v11 = vld [vmem:[%s15542_s11 + $0x498] sm:$0xff] }
 0xac9   :  { %5939 = vmatpush.msra.mxu0 %v5535_v63  ;;  %5905 = vmatpush.msrb.mxu3 %v5692_v47  ;;  %v5649_v47 = vld [vmem:[%s15542_s11 + $0x3f8] sm:$0xff] }
 0xaca   :  { %v5420_v26 = vadd.f32 %v13091_v31, %v5410_v40  ;;  %5975 = vmatpush.msra.mxu1 %v5565_v55  ;;  %v5488_v55 = vrot.slane %v13113_v58, 4 }
 0xacb   :  { %5940 = vmatpush.msra.mxu0 %v5533_v4  ;;  %5906 = vmatpush.msrb.mxu3 %v5690_v3  ;;  %v5713_v4 = vld [vmem:[%s15542_s11 + $0x5f8] sm:$0xff]  ;;  %v5647_v3 = vld [vmem:[%s15542_s11 + $0x3e8] sm:$0xff] }
 0xacc   :  { %v13166_v13 = vmax.f32 %v5420_v26, 0.0  ;;  %5976 = vmatpush.msra.mxu1 %v5563_v43  ;;  %v5607_v43 = vld [vmem:[%s15542_s11 + $0x2a8] sm:$0xff] }
 0xacd   :  { %v5393_v33 = vpop.f32.mrf.mxu1  ;;  %v5361_v34 = vpop.f32.mrf.mxu0  ;;  %5941 = vmatpush.msra.mxu0 %v5531_v54  ;;  %5907 = vmatpush.msrb.mxu3 %v5688_v25  ;;  %v5679_v54 = vld [vmem:[%s15542_s11 + $0x4e8] sm:$0xff] }
 0xace   :  { %v5394_v17 = vadd.f32 %v5393_v33, %v5358_v37  ;;  %5739 = vmatmul.f32.gmra.mxu2 %v13166_v13  ;;  %v5438_v14 = vrot.slane %v13166_v13, 1  ;;  %v5455_v9 = vrot.slane %v13166_v13, 2  ;;  %v5472_v41 = vrot.slane %v13166_v13, 3 }
 0xacf   :  { %5942 = vmatpush.msra.mxu0 %v5529_v27  ;;  %v5643_v27 = vld [vmem:[%s15542_s11 + $0x3c8] sm:$0xff] }
 0xad0   :  { %v5411_v62 = vmul.f32 %v13083_v52, %v5394_v17  ;;  %v13195_v8 = vsel %vm4244_vm14, %v5437_v48, %v5438_v14  ;;  %v13198_v53 = vsel %vm4344_vm3, %v5454_v56, %v5455_v9  ;;  %v13201_v32 = vsel %vm4404_vm0, %v5471_v23, %v5472_v41  ;;  %v5561_v48 = vld [vmem:[%s15542_s11 + $0x138] sm:$0xff]  ;;  %v5686_v56 = vld [vmem:[%s15542_s11 + $0x520] sm:$0xff]  ;;  %v5527_v23 = vld [vmem:[%s15542_s11 + $0x28] sm:$0xff] }
 0xad1   :  { %5771 = vmatmul.f32.vlgmr.msra.gmra.mxu3 %v13195_v8  ;;  %5806 = vmatmul.f32.vlgmr.msrb.gmra.mxu0 %v13198_v53  ;;  %v5559_v17 = vld [vmem:[%s15542_s11 + $0x128] sm:$0xff] }
 0xad2   :  { %v5421_v50 = vadd.f32 %v13091_v31, %v5411_v62  ;;  %5841 = vmatmul.f32.vlgmr.msrb.gmra.mxu1 %v13201_v32  ;;  %5908 = vmatpush.msrb.mxu3 %v5686_v56  ;;  %v5603_v56 = vld [vmem:[%s15542_s11 + $0x288] sm:$0xff] }
 0xad3   :  { %5977 = vmatpush.msra.mxu1 %v5561_v48  ;;  %5943 = vmatpush.msra.mxu0 %v5527_v23  ;;  %v5707_v23 = vld [vmem:[%s15542_s11 + $0x5c8] sm:$0xff] }
 0xad4   :  { %v13228_v39 = vmax.f32 %v5421_v50, 0.0 }
 0xad5   :  { %v5396_v30 = vpop.f32.mrf.mxu1  ;;  %v5364_v37 = vpop.f32.mrf.mxu0  ;;  %5978 = vmatpush.msra.mxu1 %v5559_v17  ;;  %v5673_v17 = vld [vmem:[%s15542_s11 + $0x4b8] sm:$0xff] }
 0xad6   :  { %v5397_v28 = vadd.f32 %v5396_v30, %v5361_v34  ;;  %5742 = vmatmul.f32.gmra.mxu2 %v13228_v39  ;;  %v5440_v46 = vrot.slane %v13228_v39, 1  ;;  %v5457_v29 = vrot.slane %v13228_v39, 2  ;;  %v5474_v20 = vrot.slane %v13228_v39, 3  ;;  %v5557_v34 = vld [vmem:[%s15542_s11 + $0x118] sm:$0xff]  ;;  %v5555_v30 = vld [vmem:[%s15542_s11 + $0x108] sm:$0xff] }
 0xad7   :  { %5979 = vmatpush.msra.mxu1 %v5557_v34  ;;  %v5491_v48 = vrot.slane %v13228_v39, 4  ;;  %v5639_v34 = vld [vmem:[%s15542_s11 + $0x3a8] sm:$0xff] }
 0xad8   :  { %v5412_v59 = vmul.f32 %v13083_v52, %v5397_v28  ;;  %v13248_v42 = vsel %vm4244_vm14, %v5438_v14, %v5440_v46  ;;  %v13251_v21 = vsel %vm4344_vm3, %v5455_v9, %v5457_v29  ;;  %v13254_v24 = vsel %vm4404_vm0, %v5472_v41, %v5474_v20  ;;  %v5684_v14 = vld [vmem:[%s15542_s11 + $0x510] sm:$0xff]  ;;  %v5525_v41 = vld [vmem:[%s15542_s11 + $0x18] sm:$0xff] }
 0xad9   :  { %5774 = vmatmul.f32.gmra.mxu3 %v13248_v42  ;;  %5809 = vmatmul.f32.gmra.mxu0 %v13251_v21 }
 0xada   :  { %v5422_v5 = vadd.f32 %v13091_v31, %v5412_v59  ;;  %5844 = vmatmul.f32.gmra.mxu1 %v13254_v24  ;;  %5909 = vmatpush.msrb.mxu3 %v5684_v14  ;;  %v5705_v14 = vld [vmem:[%s15542_s11 + $0x5b8] sm:$0xff] }
 0xadb   :  { %5944 = vmatpush.msra.mxu0 %v5525_v41  ;;  %5980 = vmatpush.msra.mxu1 %v5555_v30  ;;  %v5601_v41 = vld [vmem:[%s15542_s11 + $0x278] sm:$0xff] }
 0xadc   :  { %v13281_v40 = vmax.f32 %v5422_v5, 0.0  ;;  %5910 = vmatpush.msrb.mxu3 %v5682_v57  ;;  %v5681_v5 = vld [vmem:[%s15542_s11 + $0x4f8] sm:$0xff] }
 0xadd   :  { %v5399_v60 = vpop.f32.mrf.mxu1  ;;  %v5367_v9 = vpop.f32.mrf.mxu0  ;;  %5945 = vmatpush.msra.mxu0 %v5523_v1  ;;  %6105 = vmatpush.msrb.mxu1 %v5713_v4  ;;  %v5703_v1 = vld [vmem:[%s15542_s11 + $0x5a8] sm:$0xff]  ;;  %v5597_v30 = vld [vmem:[%s15542_s11 + $0x258] sm:$0xff] }
 0xade   :  { %v5400_v26 = vadd.f32 %v5399_v60, %v5364_v37  ;;  %5745 = vmatmul.f32.gmra.mxu2 %v13281_v40  ;;  %v5442_v7 = vrot.slane %v13281_v40, 1  ;;  %v5459_v10 = vrot.slane %v13281_v40, 2  ;;  %v5476_v15 = vrot.slane %v13281_v40, 3  ;;  %6035 = vmatpush.msra.mxu3 %v5649_v47  ;;  %v5711_v60 = vld [vmem:[%s15542_s11 + $0x5e8] sm:$0xff]  ;;  %v5665_v47 = vld [vmem:[%s15542_s11 + $0x478] sm:$0xff] }
 0xadf   :  { %v5489_v37 = vrot.slane %v13166_v13, 4  ;;  %6070 = vmatpush.msrb.mxu0 %v5681_v5  ;;  %6106 = vmatpush.msrb.mxu1 %v5711_v60  ;;  %v5697_v5 = vld [vmem:[%s15542_s11 + $0x578] sm:$0xff]  ;;  %v5591_v60 = vld [vmem:[%s15542_s11 + $0x228] sm:$0xff] }
 0xae0   :  { %v5413_v12 = vmul.f32 %v13083_v52, %v5400_v26  ;;  %v13301_v35 = vsel %vm4244_vm14, %v5440_v46, %v5442_v7  ;;  %v13304_v19 = vsel %vm4344_vm3, %v5457_v29, %v5459_v10  ;;  %v13307_v33 = vsel %vm4404_vm0, %v5474_v20, %v5476_v15  ;;  %v5613_v46 = vld [vmem:[%s15542_s11 + $0x2d8] sm:$0xff]  ;;  %6036 = vmatpush.msra.mxu3 %v5647_v3  ;;  %v5631_v3 = vld [vmem:[%s15542_s11 + $0x368] sm:$0xff] }
 0xae1   :  { %5777 = vmatmul.f32.gmra.mxu3 %v13301_v35  ;;  %5812 = vmatmul.f32.gmra.mxu0 %v13304_v19  ;;  %v13429_v25 = vsel %vm4504_vm5, %v5488_v55, %v5489_v37  ;;  %v5645_v26 = vld [vmem:[%s15542_s11 + $0x3d8] sm:$0xff]  ;;  %v13477_v57 = vsel %vm4504_vm5, %v5489_v37, %v5491_v48 }
 0xae2   :  { %v5423_v36 = vadd.f32 %v13091_v31, %v5413_v12  ;;  %5847 = vmatmul.f32.gmra.mxu1 %v13307_v33  ;;  %6071 = vmatpush.msrb.mxu0 %v5679_v54  ;;  %v5675_v12 = vld [vmem:[%s15542_s11 + $0x4c8] sm:$0xff]  ;;  %v5633_v37 = vld [vmem:[%s15542_s11 + $0x378] sm:$0xff] }
 0xae3   :  { %6037 = vmatpush.msra.mxu3 %v5645_v26  ;;  %v5593_v4 = vld [vmem:[%s15542_s11 + $0x238] sm:$0xff]  ;;  %v5663_v54 = vld [vmem:[%s15542_s11 + $0x468] sm:$0xff] }
 0xae4   :  { %v13331_v18 = vmax.f32 %v5423_v36, 0.0  ;;  %v5641_v36 = vld [vmem:[%s15542_s11 + $0x3b8] sm:$0xff]  ;;  %v5695_v26 = vld [vmem:[%s15542_s11 + $0x568] sm:$0xff] }
 0xae5   :  { %v5402_v62 = vpop.f32.mrf.mxu1  ;;  %6038 = vmatpush.msra.mxu3 %v5643_v27  ;;  %v5627_v27 = vld [vmem:[%s15542_s11 + $0x348] sm:$0xff] }
 0xae6   :  { %v5403_v2 = vadd.f32 %v5402_v62, %v5367_v9  ;;  %5748 = vmatmul.f32.gmra.mxu2 %v13331_v18  ;;  %v5444_v22 = vrot.slane %v13331_v18, 1  ;;  %v5461_v16 = vrot.slane %v13331_v18, 2  ;;  %v5478_v50 = vrot.slane %v13331_v18, 3  ;;  %v5671_v62 = vld [vmem:[%s15542_s11 + $0x4a8] sm:$0xff] }
 0xae7   :  { %v5506_v9 = vrot.slane %v13166_v13, 5  ;;  %6039 = vmatpush.msra.mxu3 %v5641_v36 }
 0xae8   :  { %v5414_v0 = vmul.f32 %v13083_v52, %v5403_v2  ;;  %v13351_v61 = vsel %vm4244_vm14, %v5442_v7, %v5444_v22  ;;  %v13354_v44 = vsel %vm4344_vm3, %v5459_v10, %v5461_v16  ;;  %v13357_v6 = vsel %vm4404_vm0, %v5476_v15, %v5478_v50  ;;  %v5615_v52 = vld [vmem:[%s15542_s11 + $0x2e8] sm:$0xff]  ;;  %v5677_v7 = vld [vmem:[%s15542_s11 + $0x4d8] sm:$0xff] }
 0xae9   :  { %5780 = vmatmul.f32.gmra.mxu3 %v13351_v61  ;;  %5815 = vmatmul.f32.gmra.mxu0 %v13354_v44  ;;  %v5709_v10 = vld [vmem:[%s15542_s11 + $0x5d8] sm:$0xff]  ;;  %v5505_v2 = vrot.slane %v13113_v58, 5 }
 0xaea   :  { %v5424_v45 = vadd.f32 %v13091_v31, %v5414_v0  ;;  %5850 = vmatmul.f32.gmra.mxu1 %v13357_v6  ;;  %6001 = vmatpush.msra.mxu2 %v5615_v52  ;;  %v5605_v15 = vld [vmem:[%s15542_s11 + $0x298] sm:$0xff]  ;;  %v5493_v0 = vrot.slane %v13281_v40, 4 }
 0xaeb   :  { %6072 = vmatpush.msrb.mxu0 %v5677_v7  ;;  %6107 = vmatpush.msrb.mxu1 %v5709_v10  ;;  %v5701_v52 = vld [vmem:[%s15542_s11 + $0x598] sm:$0xff] }
 0xaec   :  { %v13369_v28 = vmax.f32 %v5424_v45, 0.0  ;;  %6002 = vmatpush.msra.mxu2 %v5613_v46  ;;  %6040 = vmatpush.msra.mxu3 %v5639_v34  ;;  %v5635_v45 = vld [vmem:[%s15542_s11 + $0x388] sm:$0xff]  ;;  %v5629_v7 = vld [vmem:[%s15542_s11 + $0x358] sm:$0xff] }
 0xaed   :  { %6073 = vmatpush.msrb.mxu0 %v5675_v12  ;;  %6108 = vmatpush.msrb.mxu1 %v5707_v23  ;;  %v5699_v46 = vld [vmem:[%s15542_s11 + $0x588] sm:$0xff]  ;;  %v5693_v10 = vld [vmem:[%s15542_s11 + $0x558] sm:$0xff] }
 0xaee   :  { %5751 = vmatmul.f32.gmra.mxu2 %v13369_v28  ;;  %v13376_v29 = vrot.slane %v13369_v28, 1  ;;  %v13379_v20 = vrot.slane %v13369_v28, 2  ;;  %v13382_v31 = vrot.slane %v13369_v28, 3  ;;  %v5587_v23 = vld [vmem:[%s15542_s11 + $0x208] sm:$0xff] }
 0xaef   :  { %6003 = vmatpush.msra.mxu2 %v5611_v51  ;;  %6074 = vmatpush.msrb.mxu0 %v5673_v17  ;;  %v5508_v51 = vrot.slane %v13228_v39, 5  ;;  %v5625_v17 = vld [vmem:[%s15542_s11 + $0x338] sm:$0xff]  ;;  %v5623_v34 = vld [vmem:[%s15542_s11 + $0x328] sm:$0xff] }
 0xaf0   :  { %v13389_v59 = vsel %vm4244_vm14, %v5444_v22, %v13376_v29  ;;  %v13393_v63 = vsel %vm4344_vm3, %v5461_v16, %v13379_v20  ;;  %v13397_v38 = vsel %vm4404_vm0, %v5478_v50, %v13382_v31  ;;  %6109 = vmatpush.msrb.mxu1 %v5705_v14  ;;  %v5599_v22 = vld [vmem:[%s15542_s11 + $0x268] sm:$0xff]  ;;  %v13491_v16 = vsel %vm4564_vm15, %v5505_v2, %v5506_v9  ;;  %v5637_v50 = vld [vmem:[%s15542_s11 + $0x398] sm:$0xff] }
 0xaf1   :  { %5783 = vmatmul.f32.gmra.mxu3 %v13389_v59  ;;  %5818 = vmatmul.f32.gmra.mxu0 %v13393_v63  ;;  %v13539_v55 = vsel %vm4564_vm15, %v5506_v9, %v5508_v51  ;;  %v5657_v14 = vld [vmem:[%s15542_s11 + $0x438] sm:$0xff]  ;;  %v13595_v9 = vrot.slane %v13369_v28, 4 }
 0xaf2   :  { %5853 = vmatmul.f32.gmra.mxu1 %v13397_v38  ;;  %6004 = vmatpush.msra.mxu2 %v5609_v49  ;;  %v13526_v49 = vsel %vm4504_vm5, %v5491_v48, %v5493_v0  ;;  %v5659_v48 = vld [vmem:[%s15542_s11 + $0x448] sm:$0xff]  ;;  %v5653_v2 = vld [vmem:[%s15542_s11 + $0x418] sm:$0xff] }
 0xaf3   :  { %6075 = vmatpush.msrb.mxu0 %v5671_v62  ;;  %6110 = vmatpush.msrb.mxu1 %v5703_v1  ;;  %v5655_v62 = vld [vmem:[%s15542_s11 + $0x428] sm:$0xff]  ;;  %v5512_v1 = vrot.slane %v13331_v18, 5 }
 0xaf4   :  { %6005 = vmatpush.msra.mxu2 %v5607_v43  ;;  %6041 = vmatpush.msra.mxu3 %v5637_v50  ;;  %v5495_v43 = vrot.slane %v13331_v18, 4  ;;  %v5685_v50 = vld [vmem:[%s15542_s11 + $0x518] sm:$0xff] }
 0xaf5   :  { %6076 = vmatpush.msrb.mxu0 %v5669_v11  ;;  %6111 = vmatpush.msrb.mxu1 %v5701_v52  ;;  %v5619_v11 = vld [vmem:[%s15542_s11 + $0x308] sm:$0xff] }
 0xaf6   :  { %5876 = vmatmul.f32.vlgmr.msrb.gmra.mxu2 %v13429_v25  ;;  %6042 = vmatpush.msra.mxu3 %v5635_v45  ;;  %v13574_v12 = vsel %vm4504_vm5, %v5493_v0, %v5495_v43  ;;  %v5683_v52 = vld [vmem:[%s15542_s11 + $0x508] sm:$0xff]  ;;  %v5514_v45 = vrot.slane %v13369_v28, 5 }
 0xaf7   :  { %6006 = vmatpush.msra.mxu2 %v5605_v15  ;;  %6112 = vmatpush.msrb.mxu1 %v5699_v46  ;;  %v5510_v15 = vrot.slane %v13281_v40, 5 }
 0xaf8   :  { %6043 = vmatpush.msra.mxu3 %v5633_v37 }
 0xaf9   :  { %5786 = vmatmul.f32.gmra.mxu3 %v13376_v29  ;;  %5821 = vmatmul.f32.gmra.mxu0 %v13379_v20  ;;  %v5511_v36 = vsel %vm4564_vm15, %v5508_v51, %v5510_v15  ;;  %v5513_v0 = vsel %vm4564_vm15, %v5510_v15, %v5512_v1 }
 0xafa   :  { %5856 = vmatmul.f32.gmra.mxu1 %v13382_v31  ;;  %6007 = vmatpush.msra.mxu2 %v5603_v56  ;;  %v5691_v56 = vld [vmem:[%s15542_s11 + $0x548] sm:$0xff] }
 0xafb   :  { %6113 = vmatpush.msrb.mxu1 %v5697_v5  ;;  %6044 = vmatpush.msra.mxu3 %v5631_v3 }
 0xafc   :  { %6008 = vmatpush.msra.mxu2 %v5601_v41  ;;  %v5689_v41 = vld [vmem:[%s15542_s11 + $0x538] sm:$0xff] }
 0xafd   :  { %6114 = vmatpush.msrb.mxu1 %v5695_v26  ;;  %6045 = vmatpush.msra.mxu3 %v5629_v7 }
 0xafe   :  { %5879 = vmatmul.f32.gmra.mxu2 %v13477_v57 }
 0xaff   :  { %6009 = vmatpush.msra.mxu2 %v5599_v22  ;;  %6115 = vmatpush.msrb.mxu1 %v5693_v10  ;;  %v5498_v22 = vsel %vm4504_vm5, %v5495_v43, %v13595_v9 }
 0xb00   :  { %6046 = vmatpush.msra.mxu3 %v5627_v27  ;;  %v13697_v27 = vld [vmem:[%s15543_s12] sm:$0x3] }
 0xb01   :  { %5911 = vmatmul.f32.vlgmr.msrb.gmra.mxu3 %v13491_v16  ;;  %5946 = vmatmul.f32.vlgmr.msra.gmra.mxu0 %v13113_v58  ;;  %v5667_v58 = vld [vmem:[%s15542_s11 + $0x488] sm:$0xff] }
 0xb02   :  { %5981 = vmatmul.f32.vlgmr.msra.gmra.mxu1 %v13195_v8  ;;  %6010 = vmatpush.msra.mxu2 %v5597_v30  ;;  %v5595_v8 = vld [vmem:[%s15542_s11 + $0x248] sm:$0xff] }
 0xb03   :  { %6077 = vmatpush.msrb.mxu0 %v5667_v58  ;;  %6116 = vmatpush.msrb.mxu1 %v5691_v56  ;;  %v5651_v30 = vld [vmem:[%s15542_s11 + $0x408] sm:$0xff]  ;;  %v5515_v58 = vsel %vm4564_vm15, %v5512_v1, %v5514_v45 }
 0xb04   :  { %6011 = vmatpush.msra.mxu2 %v5595_v8  ;;  %6047 = vmatpush.msra.mxu3 %v5625_v17 }
 0xb05   :  { %6078 = vmatpush.msrb.mxu0 %v5665_v47  ;;  %6117 = vmatpush.msrb.mxu1 %v5689_v41 }
 0xb06   :  { %5882 = vmatmul.f32.gmra.mxu2 %v13526_v49  ;;  %6048 = vmatpush.msra.mxu3 %v5623_v34 }
 0xb07   :  { %6012 = vmatpush.msra.mxu2 %v5593_v4  ;;  %6079 = vmatpush.msrb.mxu0 %v5663_v54 }
 0xb09   :  { %5914 = vmatmul.f32.gmra.mxu3 %v13539_v55  ;;  %5949 = vmatmul.f32.gmra.mxu0 %v13166_v13  ;;  %v5661_v13 = vld [vmem:[%s15542_s11 + $0x458] sm:$0xff] }
 0xb0a   :  { %5984 = vmatmul.f32.gmra.mxu1 %v13248_v42  ;;  %6013 = vmatpush.msra.mxu2 %v5591_v60  ;;  %v5589_v42 = vld [vmem:[%s15542_s11 + $0x218] sm:$0xff] }
 0xb0b   :  { %6080 = vmatpush.msrb.mxu0 %v5661_v13 }
 0xb0c   :  { %6014 = vmatpush.msra.mxu2 %v5589_v42 }
 0xb0d   :  { %6081 = vmatpush.msrb.mxu0 %v5659_v48  ;;  %v5716_v48 = vperm.slane %v13697_v27, 0 }
 0xb0e   :  { %5885 = vmatmul.f32.gmra.mxu2 %v13574_v12 }
 0xb0f   :  { %6015 = vmatpush.msra.mxu2 %v5587_v23  ;;  %6082 = vmatpush.msrb.mxu0 %v5657_v14 }
 0xb11   :  { %5917 = vmatmul.f32.gmra.mxu3 %v5511_v36  ;;  %5952 = vmatmul.f32.gmra.mxu0 %v13228_v39  ;;  %v5687_v39 = vld [vmem:[%s15542_s11 + $0x528] sm:$0xff] }
 0xb12   :  { %5987 = vmatmul.f32.gmra.mxu1 %v13301_v35  ;;  %v5621_v35 = vld [vmem:[%s15542_s11 + $0x318] sm:$0xff]  ;;  %6083 = vmatpush.msrb.mxu0 %v5655_v62 }
 0xb13   :  { %6118 = vmatpush.msrb.mxu1 %v5687_v39  ;;  %6049 = vmatpush.msra.mxu3 %v5621_v35 }
 0xb14   :  { %6084 = vmatpush.msrb.mxu0 %v5653_v2 }
 0xb15   :  { %6119 = vmatpush.msrb.mxu1 %v5685_v50  ;;  %6050 = vmatpush.msra.mxu3 %v5619_v11 }
 0xb16   :  { %5888 = vmatmul.f32.gmra.mxu2 %v5498_v22  ;;  %6085 = vmatpush.msrb.mxu0 %v5651_v30 }
 0xb17   :  { %6120 = vmatpush.msrb.mxu1 %v5683_v52 }
 0xb19   :  { %5920 = vmatmul.f32.gmra.mxu3 %v5513_v0  ;;  %5955 = vmatmul.f32.gmra.mxu0 %v13281_v40 }
 0xb1a   :  { %5990 = vmatmul.f32.gmra.mxu1 %v13351_v61 }
 0xb1e   :  { %5891 = vmatmul.f32.gmra.mxu2 %v13595_v9 }
 0xb21   :  { %5923 = vmatmul.f32.gmra.mxu3 %v5515_v58  ;;  %5958 = vmatmul.f32.gmra.mxu0 %v13331_v18 }
 0xb22   :  { %5993 = vmatmul.f32.gmra.mxu1 %v13389_v59 }
 0xb26   :  { %6016 = vmatmul.f32.vlgmr.msra.gmra.mxu2 %v13198_v53 }
 0xb29   :  { %5926 = vmatmul.f32.gmra.mxu3 %v5514_v45  ;;  %5961 = vmatmul.f32.gmra.mxu0 %v13369_v28 }
 0xb2a   :  { %5996 = vmatmul.f32.gmra.mxu1 %v13376_v29 }
 0xb2e   :  { %6019 = vmatmul.f32.gmra.mxu2 %v13251_v21 }
 0xb31   :  { %6051 = vmatmul.f32.vlgmr.msra.gmra.mxu3 %v13201_v32  ;;  %6086 = vmatmul.f32.vlgmr.msrb.gmra.mxu0 %v13429_v25 }
 0xb32   :  { %6121 = vmatmul.f32.vlgmr.msrb.gmra.mxu1 %v13491_v16 }
 0xb36   :  { %6022 = vmatmul.f32.gmra.mxu2 %v13304_v19 }
 0xb39   :  { %6054 = vmatmul.f32.gmra.mxu3 %v13254_v24  ;;  %6089 = vmatmul.f32.gmra.mxu0 %v13477_v57 }
 0xb3a   :  { %6124 = vmatmul.f32.gmra.mxu1 %v13539_v55 }
 0xb3e   :  { %6025 = vmatmul.f32.gmra.mxu2 %v13354_v44 }
 0xb41   :  { %6057 = vmatmul.f32.gmra.mxu3 %v13307_v33  ;;  %6092 = vmatmul.f32.gmra.mxu0 %v13526_v49 }
 0xb42   :  { %6127 = vmatmul.f32.gmra.mxu1 %v5511_v36 }
 0xb46   :  { %6028 = vmatmul.f32.gmra.mxu2 %v13393_v63 }
 0xb49   :  { %v13654_v53 = vpop.f32.mrf.mxu2  ;;  %6060 = vmatmul.f32.gmra.mxu3 %v13357_v6  ;;  %6095 = vmatmul.f32.gmra.mxu0 %v13574_v12 }
 0xb4a   :  { %6130 = vmatmul.f32.gmra.mxu1 %v5513_v0  ;;  %v5738_v11 = vadd.f32 %v13654_v53, %v5716_v48 }
 0xb4e   :  { %v13658_v32 = vpop.f32.mrf.mxu0  ;;  %6031 = vmatmul.f32.gmra.mxu2 %v13379_v20 }
 0xb4f   :  { %v13661_v21 = vpop.f32.mrf.mxu1 }
 0xb51   :  { %v5740_v24 = vpop.f32.mrf.mxu2  ;;  %6063 = vmatmul.f32.gmra.mxu3 %v13397_v38  ;;  %6098 = vmatmul.f32.gmra.mxu0 %v5498_v22 }
 0xb52   :  { %6133 = vmatmul.f32.gmra.mxu1 %v5515_v58  ;;  %v5741_v35 = vadd.f32 %v5740_v24, %v5716_v48 }
 0xb54   :  { %v13664_v40 = vpop.f32.mrf.mxu3 }
 0xb55   :  { %v5773_v58 = vadd.f32 %v13664_v40, %v5738_v11 }
 0xb56   :  { %v13666_v19 = vpop.f32.mrf.mxu0 }
 0xb57   :  { %v13668_v33 = vpop.f32.mrf.mxu1  ;;  %v5808_v53 = vadd.f32 %v13658_v32, %v5773_v58 }
 0xb59   :  { %v5743_v18 = vpop.f32.mrf.mxu2  ;;  %6066 = vmatmul.f32.gmra.mxu3 %v13382_v31  ;;  %6101 = vmatmul.f32.gmra.mxu0 %v13595_v9 }
 0xb5a   :  { %6136 = vmatmul.f32.gmra.mxu1 %v5514_v45  ;;  %v5744_v62 = vadd.f32 %v5743_v18, %v5716_v48 }
 0xb5c   :  { %v5775_v61 = vpop.f32.mrf.mxu3 }
 0xb5d   :  { %v5776_v30 = vadd.f32 %v5775_v61, %v5741_v35  ;;  %v13751_v35 = vld [vmem:[%s15544_s15 + $0x10] sm:$0x3] }
 0xb5e   :  { %v5813_v44 = vpop.f32.mrf.mxu0 }
 0xb5f   :  { %v13672_v6 = vpop.f32.mrf.mxu1  ;;  %v5811_v24 = vadd.f32 %v13666_v19, %v5776_v30  ;;  %v5843_v19 = vadd.f32 %v13661_v21, %v5808_v53  ;;  %v5717_v30 = vperm.slane %v13697_v27, 1 }
 0xb61   :  { %v5746_v28 = vpop.f32.mrf.mxu2  ;;  %v5846_v40 = vadd.f32 %v13668_v33, %v5811_v24 }
 0xb62   :  { %v5747_v14 = vadd.f32 %v5746_v28, %v5716_v48 }
 0xb64   :  { %v5778_v29 = vpop.f32.mrf.mxu3 }
 0xb65   :  { %v5779_v2 = vadd.f32 %v5778_v29, %v5744_v62 }
 0xb66   :  { %v5816_v20 = vpop.f32.mrf.mxu0 }
 0xb67   :  { %v5851_v59 = vpop.f32.mrf.mxu1  ;;  %v5814_v28 = vadd.f32 %v5813_v44, %v5779_v2 }
 0xb69   :  { %v5749_v63 = vpop.f32.mrf.mxu2  ;;  %v5849_v61 = vadd.f32 %v13672_v6, %v5814_v28 }
 0xb6a   :  { %v5750_v23 = vadd.f32 %v5749_v63, %v5716_v48 }
 0xb6c   :  { %v5781_v38 = vpop.f32.mrf.mxu3 }
 0xb6d   :  { %v5782_v39 = vadd.f32 %v5781_v38, %v5747_v14 }
 0xb6e   :  { %v5819_v25 = vpop.f32.mrf.mxu0 }
 0xb6f   :  { %v5854_v57 = vpop.f32.mrf.mxu1  ;;  %v5817_v52 = vadd.f32 %v5816_v20, %v5782_v39 }
 0xb71   :  { %v5752_v16 = vpop.f32.mrf.mxu2  ;;  %v5852_v29 = vadd.f32 %v5851_v59, %v5817_v52 }
 0xb72   :  { %v5753_v36 = vadd.f32 %v5752_v16, %v5716_v48 }
 0xb74   :  { %v5784_v46 = vpop.f32.mrf.mxu3 }
 0xb75   :  { %v5785_v9 = vadd.f32 %v5784_v46, %v5750_v23 }
 0xb76   :  { %v5822_v51 = vpop.f32.mrf.mxu0 }
 0xb77   :  { %v5857_v8 = vpop.f32.mrf.mxu1  ;;  %v5820_v22 = vadd.f32 %v5819_v25, %v5785_v9 }
 0xb79   :  { %v13674_v31 = vpop.f32.mrf.mxu2  ;;  %v5855_v63 = vadd.f32 %v5854_v57, %v5820_v22 }
 0xb7a   :  { %v5878_v6 = vadd.f32 %v13674_v31, %v5843_v19  ;;  %v13735_v31 = vld [vmem:[%s15544_s15] sm:$0xff] }
 0xb7c   :  { %v5787_v37 = vpop.f32.mrf.mxu3 }
 0xb7d   :  { %v5788_v41 = vadd.f32 %v5787_v37, %v5753_v36 }
 0xb7e   :  { %v13676_v49 = vpop.f32.mrf.mxu0 }
 0xb7f   :  { %v13678_v47 = vpop.f32.mrf.mxu1  ;;  %v5823_v50 = vadd.f32 %v5822_v51, %v5788_v41  ;;  %v5948_v27 = vadd.f32 %v13676_v49, %v5717_v30  ;;  %v6349_v49 = vld [vmem:[%s15545_s16 + $0x1a0] sm:$0xff] }
 0xb81   :  { %v5880_v5 = vpop.f32.mrf.mxu2  ;;  %v5858_v16 = vadd.f32 %v5857_v8, %v5823_v50 }
 0xb82   :  { %v5881_v59 = vadd.f32 %v5880_v5, %v5846_v40 }
 0xb84   :  { %v13680_v4 = vpop.f32.mrf.mxu3 }
 0xb86   :  { %v13682_v55 = vpop.f32.mrf.mxu0 }
 0xb87   :  { %v13684_v3 = vpop.f32.mrf.mxu1 }
 0xb89   :  { %v5883_v54 = vpop.f32.mrf.mxu2 }
 0xb8a   :  { %v5884_v44 = vadd.f32 %v5883_v54, %v5849_v61  ;;  %v5913_v54 = vadd.f32 %v13680_v4, %v5878_v6 }
 0xb8c   :  { %v5915_v43 = vpop.f32.mrf.mxu3 }
 0xb8e   :  { %v13686_v60 = vpop.f32.mrf.mxu0 }
 0xb8f   :  { %v13688_v26 = vpop.f32.mrf.mxu1 }
 0xb91   :  { %v5886_v7 = vpop.f32.mrf.mxu2 }
 0xb92   :  { %v5887_v20 = vadd.f32 %v5886_v7, %v5852_v29  ;;  %v5916_v7 = vadd.f32 %v5915_v43, %v5881_v59 }
 0xb94   :  { %v5918_v13 = vpop.f32.mrf.mxu3  ;;  %v6142_v21 = vmax.f32 %v5916_v7, 0.0 }
 0xb96   :  { %v13690_v10 = vpop.f32.mrf.mxu0 }
 0xb97   :  { %v13692_v15 = vpop.f32.mrf.mxu1  ;;  %v5957_v58 = vadd.f32 %v13690_v10, %v5717_v30  ;;  %v6357_v10 = vld [vmem:[%s15545_s16 + $0x1e0] sm:$0xff] }
 0xb99   :  { %v5889_v42 = vpop.f32.mrf.mxu2  ;;  %v5992_v53 = vadd.f32 %v13692_v15, %v5957_v58 }
 0xb9a   :  { %v5890_v38 = vadd.f32 %v5889_v42, %v5855_v63  ;;  %v5919_v42 = vadd.f32 %v5918_v13, %v5884_v44  ;;  %v6140_v13 = vmax.f32 %v5913_v54, 0.0 }
 0xb9c   :  { %v5921_v12 = vpop.f32.mrf.mxu3 }
 0xb9d   :  { %v5922_v57 = vadd.f32 %v5921_v12, %v5887_v20  ;;  %v6144_v12 = vmax.f32 %v5919_v42, 0.0  ;;  %v6485_v20 = vld [vmem:[%s15545_s16 + $0x5e0] sm:$0xff] }
 0xb9e   :  { %v13700_v56 = vpop.f32.mrf.mxu0  ;;  %6865 = vmatpush.msra.mxu0 %v6485_v20  ;;  %v6605_v20 = vld [vmem:[%s15545_s16 + $0x9a0] sm:$0xff] }
 0xb9f   :  { %v13702_v17 = vpop.f32.mrf.mxu1  ;;  %v6146_v14 = vmax.f32 %v5922_v57, 0.0  ;;  %v5960_v52 = vadd.f32 %v13700_v56, %v5717_v30 }
 0xba1   :  { %v5892_v34 = vpop.f32.mrf.mxu2  ;;  %v5995_v24 = vadd.f32 %v13702_v17, %v5960_v52 }
 0xba2   :  { %v5893_v25 = vadd.f32 %v5892_v34, %v5858_v16  ;;  %v13742_v34 = vld [vmem:[%s15544_s15 + $0x8] sm:$0xff]  ;;  %v5954_v16 = vadd.f32 %v13686_v60, %v5717_v30  ;;  %v6353_v60 = vld [vmem:[%s15545_s16 + $0x1c0] sm:$0xff] }
 0xba4   :  { %v5924_v1 = vpop.f32.mrf.mxu3  ;;  %v5989_v56 = vadd.f32 %v13688_v26, %v5954_v16  ;;  %v5983_v26 = vadd.f32 %v13678_v47, %v5948_v27  ;;  %v6461_v16 = vld [vmem:[%s15545_s16 + $0x520] sm:$0xff] }
 0xba5   :  { %v5925_v51 = vadd.f32 %v5924_v1, %v5890_v38  ;;  %v5951_v38 = vadd.f32 %v13682_v55, %v5717_v30  ;;  %v6449_v27 = vld [vmem:[%s15545_s16 + $0x4c0] sm:$0xff] }
 0xba6   :  { %v13705_v0 = vpop.f32.mrf.mxu0 }
 0xba7   :  { %v13707_v45 = vpop.f32.mrf.mxu1  ;;  %v6148_v32 = vmax.f32 %v5925_v51, 0.0  ;;  %v5963_v29 = vadd.f32 %v13705_v0, %v5717_v30  ;;  %v5986_v15 = vadd.f32 %v13684_v3, %v5951_v38  ;;  %v6345_v3 = vld [vmem:[%s15545_s16 + $0x180] sm:$0xff] }
 0xba9   :  { %v13710_v18 = vpop.f32.mrf.mxu2  ;;  %v5998_v17 = vadd.f32 %v13707_v45, %v5963_v29  ;;  %v6457_v29 = vld [vmem:[%s15545_s16 + $0x500] sm:$0xff] }
 0xbaa   :  { %v6018_v59 = vadd.f32 %v13710_v18, %v5983_v26  ;;  %v6481_v18 = vld [vmem:[%s15545_s16 + $0x5c0] sm:$0xff] }
 0xbab   :  { %6866 = vmatpush.msra.mxu0 %v6481_v18  ;;  %v6741_v26 = vld [vmem:[%s15545_s16 + $0xde0] sm:$0xff] }
 0xbac   :  { %v5927_v46 = vpop.f32.mrf.mxu3  ;;  %v6561_v18 = vld [vmem:[%s15545_s16 + $0x840] sm:$0xff] }
 0xbad   :  { %v5928_v37 = vadd.f32 %v5927_v46, %v5893_v25 }
 0xbae   :  { %v13715_v48 = vpop.f32.mrf.mxu0 }
 0xbaf   :  { %v6150_v8 = vmax.f32 %v5928_v37, 0.0  ;;  %v13718_v23 = vpop.f32.mrf.mxu1 }
 0xbb1   :  { %v13721_v36 = vpop.f32.mrf.mxu2  ;;  %7771 = vmatpush.msk.msrb.mxu2 %vm4564_vm15, %v6150_v8 }
 0xbb2   :  { %v6021_v44 = vadd.f32 %v13721_v36, %v5986_v15  ;;  %v6337_v36 = vld [vmem:[%s15545_s16 + $0x140] sm:$0xff] }
 0xbb3   :  { %6182 = vmatpush.msrb.mxu2 %v6148_v32  ;;  %v6341_v32 = vld [vmem:[%s15545_s16 + $0x160] sm:$0xff] }
 0xbb4   :  { %v13725_v33 = vpop.f32.mrf.mxu3  ;;  %v6609_v15 = vld [vmem:[%s15545_s16 + $0x9c0] sm:$0xff] }
 0xbb5   :  { %6183 = vmatpush.msrb.mxu2 %v6146_v14  ;;  %v6053_v14 = vadd.f32 %v13725_v33, %v6018_v59  ;;  %v6333_v33 = vld [vmem:[%s15545_s16 + $0x120] sm:$0xff] }
 0xbb6   :  { %v13728_v9 = vpop.f32.mrf.mxu0  ;;  %v6725_v59 = vld [vmem:[%s15545_s16 + $0xd60] sm:$0xff] }
 0xbb7   :  { %6184 = vmatpush.msrb.mxu2 %v6144_v12  ;;  %v13730_v5 = vpop.f32.mrf.mxu1 }
 0xbb9   :  { %6185 = vmatpush.msrb.mxu2 %v6142_v21  ;;  %v6023_v43 = vpop.f32.mrf.mxu2 }
 0xbba   :  { %v6024_v51 = vadd.f32 %v6023_v43, %v5989_v56  ;;  %v6477_v43 = vld [vmem:[%s15545_s16 + $0x5a0] sm:$0xff] }
 0xbbb   :  { %6186 = vmatpush.msrb.mxu2 %v6140_v13  ;;  %6867 = vmatpush.msra.mxu0 %v6477_v43  ;;  %v6301_v56 = vld [vmem:[%s15545_s16 + $0x20] sm:$0xff] }
 0xbbc   :  { %v6055_v41 = vpop.f32.mrf.mxu3  ;;  %7772 = vmatmul.msk.f32.vlgmr.msrb.gmra.mxu2 %vm6155_vm7, %v13735_v31  ;;  %v6405_v43 = vld [vmem:[%s15545_s16 + $0x360] sm:$0xff] }
 0xbbd   :  { %6819 = vmatpush.msra.mxu2 %v6357_v10  ;;  %v6056_v6 = vadd.f32 %v6055_v41, %v6021_v44  ;;  %v6417_v10 = vld [vmem:[%s15545_s16 + $0x3c0] sm:$0xff] }
 0xbbe   :  { %v6093_v4 = vpop.f32.mrf.mxu0  ;;  %v6589_v44 = vld [vmem:[%s15545_s16 + $0x920] sm:$0xff] }
 0xbbf   :  { %v13744_v62 = vpop.f32.mrf.mxu1  ;;  %6820 = vmatpush.msra.mxu2 %v6353_v60  ;;  %v6091_v41 = vadd.f32 %v13728_v9, %v6056_v6  ;;  %v6469_v9 = vld [vmem:[%s15545_s16 + $0x560] sm:$0xff] }
 0xbc0   :  { %v6445_v60 = vld [vmem:[%s15545_s16 + $0x4a0] sm:$0xff] }
 0xbc1   :  { %v6026_v39 = vpop.f32.mrf.mxu2  ;;  %6821 = vmatpush.msra.mxu2 %v6349_v49  ;;  %v6126_v58 = vadd.f32 %v13730_v5, %v6091_v41  ;;  %v6317_v5 = vld [vmem:[%s15545_s16 + $0xa0] sm:$0xff] }
 0xbc2   :  { %v6027_v55 = vadd.f32 %v6026_v39, %v5992_v53  ;;  %v6309_v53 = vld [vmem:[%s15545_s16 + $0x60] sm:$0xff] }
 0xbc3   :  { %6822 = vmatpush.msra.mxu2 %v6345_v3  ;;  %v6433_v49 = vld [vmem:[%s15545_s16 + $0x440] sm:$0xff] }
 0xbc4   :  { %v6058_v1 = vpop.f32.mrf.mxu3  ;;  %7773 = vmatmul.msk.f32.gmra.mxu2 %vm6155_vm7, %v13742_v34  ;;  %v6737_v3 = vld [vmem:[%s15545_s16 + $0xdc0] sm:$0xff] }
 0xbc5   :  { %v6059_v57 = vadd.f32 %v6058_v1, %v6024_v51  ;;  %6823 = vmatpush.msra.mxu2 %v6341_v32  ;;  %v6429_v51 = vld [vmem:[%s15545_s16 + $0x420] sm:$0xff] }
 0xbc6   :  { %v6096_v2 = vpop.f32.mrf.mxu0  ;;  %v6721_v32 = vld [vmem:[%s15545_s16 + $0xd40] sm:$0xff] }
 0xbc7   :  { %v6131_v22 = vpop.f32.mrf.mxu1  ;;  %v6094_v12 = vadd.f32 %v6093_v4, %v6059_v57  ;;  %6824 = vmatpush.msra.mxu2 %v6337_v36  ;;  %v6473_v4 = vld [vmem:[%s15545_s16 + $0x580] sm:$0xff] }
 0xbc8   :  { %6868 = vmatpush.msra.mxu0 %v6473_v4  ;;  %v6733_v57 = vld [vmem:[%s15545_s16 + $0xda0] sm:$0xff] }
 0xbc9   :  { %v6029_v11 = vpop.f32.mrf.mxu2  ;;  %v6129_v30 = vadd.f32 %v13744_v62, %v6094_v12  ;;  %6825 = vmatpush.msra.mxu2 %v6333_v33  ;;  %v6321_v62 = vld [vmem:[%s15545_s16 + $0xc0] sm:$0xff] }
 0xbca   :  { %v6030_v46 = vadd.f32 %v6029_v11, %v5995_v24  ;;  %6869 = vmatpush.msra.mxu0 %v6469_v9  ;;  %v6143_v24 = vmax.f32 %v6126_v58, 0.0  ;;  %v6573_v6 = vld [vmem:[%s15545_s16 + $0x8a0] sm:$0xff] }
 0xbcb   :  { %v6713_v36 = vld [vmem:[%s15545_s16 + $0xd00] sm:$0xff] }
 0xbcc   :  { %v6061_v50 = vpop.f32.mrf.mxu3  ;;  %7774 = vmatmul.msk.f32.gmra.mxu2 %vm6155_vm7, %v13751_v35  ;;  %v6409_v12 = vld [vmem:[%s15545_s16 + $0x380] sm:$0xff] }
 0xbcd   :  { %v6062_v37 = vadd.f32 %v6061_v50, %v6027_v55  ;;  %v6088_v50 = vadd.f32 %v13715_v48, %v6053_v14  ;;  %v6465_v48 = vld [vmem:[%s15545_s16 + $0x540] sm:$0xff] }
 0xbce   :  { %v6099_v28 = vpop.f32.mrf.mxu0  ;;  %6870 = vmatpush.msra.mxu0 %v6465_v48  ;;  %v6613_v55 = vld [vmem:[%s15545_s16 + $0x9e0] sm:$0xff] }
 0xbcf   :  { %v6134_v25 = vpop.f32.mrf.mxu1  ;;  %v6097_v47 = vadd.f32 %v6096_v2, %v6062_v37  ;;  %v6329_v2 = vld [vmem:[%s15545_s16 + $0x100] sm:$0xff] }
 0xbd0   :  { %6826 = vmatpush.msra.mxu2 %v6329_v2  ;;  %6871 = vmatpush.msra.mxu0 %v6461_v16  ;;  %v6425_v37 = vld [vmem:[%s15545_s16 + $0x400] sm:$0xff] }
 0xbd1   :  { %v6032_v61 = vpop.f32.mrf.mxu2  ;;  %v6132_v1 = vadd.f32 %v6131_v22, %v6097_v47  ;;  %v6325_v22 = vld [vmem:[%s15545_s16 + $0xe0] sm:$0xff] }
 0xbd2   :  { %v6033_v40 = vadd.f32 %v6032_v61, %v5998_v17  ;;  %6827 = vmatpush.msra.mxu2 %v6325_v22  ;;  %6872 = vmatpush.msra.mxu0 %v6457_v29  ;;  %v6305_v61 = vld [vmem:[%s15545_s16 + $0x40] sm:$0xff] }
 0xbd3   :  { %v6147_v52 = vmax.f32 %v6132_v1, 0.0  ;;  %v6297_v17 = vld [vmem:[%s15545_s16] sm:$0xff] }
 0xbd4   :  { %v6064_v63 = vpop.f32.mrf.mxu3  ;;  %6828 = vmatpush.msra.mxu2 %v6321_v62  ;;  %v6717_v47 = vld [vmem:[%s15545_s16 + $0xd20] sm:$0xff] }
 0xbd5   :  { %v6065_v0 = vadd.f32 %v6064_v63, %v6030_v46  ;;  %v6123_v63 = vadd.f32 %v13718_v23, %v6088_v50  ;;  %v6313_v23 = vld [vmem:[%s15545_s16 + $0x80] sm:$0xff] }
 0xbd6   :  { %v6102_v42 = vpop.f32.mrf.mxu0  ;;  %6829 = vmatpush.msra.mxu2 %v6317_v5  ;;  %v6421_v46 = vld [vmem:[%s15545_s16 + $0x3e0] sm:$0xff] }
 0xbd7   :  { %v6100_v8 = vadd.f32 %v6099_v28, %v6065_v0  ;;  %v6137_v54 = vpop.f32.mrf.mxu1  ;;  %v6145_v28 = vmax.f32 %v6129_v30, 0.0  ;;  %v6141_v38 = vmax.f32 %v6123_v63, 0.0  ;;  %v6437_v0 = vld [vmem:[%s15545_s16 + $0x460] sm:$0xff] }
 0xbd8   :  { %6830 = vmatpush.msra.mxu2 %v6313_v23  ;;  %v6565_v14 = vld [vmem:[%s15545_s16 + $0x860] sm:$0xff] }
 0xbd9   :  { %v6135_v13 = vadd.f32 %v6134_v25, %v6100_v8  ;;  %v6453_v25 = vld [vmem:[%s15545_s16 + $0x4e0] sm:$0xff] }
 0xbda   :  { %6873 = vmatpush.msra.mxu0 %v6453_v25  ;;  %6831 = vmatpush.msra.mxu2 %v6309_v53  ;;  %v6729_v8 = vld [vmem:[%s15545_s16 + $0xd80] sm:$0xff] }
 0xbdb   :  { %v6149_v11 = vmax.f32 %v6135_v13, 0.0  ;;  %v6557_v13 = vld [vmem:[%s15545_s16 + $0x820] sm:$0xff] }
 0xbdc   :  { %v6067_v45 = vpop.f32.mrf.mxu3  ;;  %6874 = vmatpush.msra.mxu0 %v6449_v27  ;;  %6832 = vmatpush.msra.mxu2 %v6305_v61  ;;  %v6705_v33 = vld [vmem:[%s15545_s16 + $0xcc0] sm:$0xff] }
 0xbdd   :  { %v6068_v19 = vadd.f32 %v6067_v45, %v6033_v40  ;;  %v6597_v40 = vld [vmem:[%s15545_s16 + $0x960] sm:$0xff] }
 0xbde   :  { %6875 = vmatpush.msra.mxu0 %v6445_v60  ;;  %6833 = vmatpush.msra.mxu2 %v6301_v56  ;;  %v6593_v45 = vld [vmem:[%s15545_s16 + $0x940] sm:$0xff] }
 0xbdf   :  { %v6103_v7 = vadd.f32 %v6102_v42, %v6068_v19  ;;  %v6581_v19 = vld [vmem:[%s15545_s16 + $0x8e0] sm:$0xff] }
 0xbe0   :  { %6834 = vmatpush.msra.mxu2 %v6297_v17  ;;  %v6577_v42 = vld [vmem:[%s15545_s16 + $0x8c0] sm:$0xff] }
 0xbe1   :  { %v6138_v21 = vadd.f32 %v6137_v54, %v6103_v7  ;;  %v6569_v7 = vld [vmem:[%s15545_s16 + $0x880] sm:$0xff] }
 0xbe2   :  { %6911 = vmatpush.msrb.mxu2 %v6613_v55  ;;  %v6413_v54 = vld [vmem:[%s15545_s16 + $0x3a0] sm:$0xff] }
 0xbe3   :  { %v6151_v39 = vmax.f32 %v6138_v21, 0.0  ;;  %v6709_v21 = vld [vmem:[%s15545_s16 + $0xce0] sm:$0xff] }
 0xbe4   :  { %6912 = vmatpush.msrb.mxu2 %v6609_v15  ;;  %v6553_v41 = vld [vmem:[%s15545_s16 + $0x800] sm:$0xff] }
 0xbe5   :  { %7775 = vmatpush.msk.msrb.mxu3 %vm4564_vm15, %v6151_v39  ;;  %v6401_v39 = vld [vmem:[%s15545_s16 + $0x340] sm:$0xff]  ;;  %vm7580_vm15 = vcmask 121856  }
 0xbe6   :  { %6913 = vmatpush.msrb.mxu2 %v6605_v20  ;;  %v6701_v1 = vld [vmem:[%s15545_s16 + $0xca0] sm:$0xff] }
 0xbe7   :  { %6208 = vmatpush.msrb.mxu3 %v6149_v11  ;;  %v6549_v4 = vld [vmem:[%s15545_s16 + $0x7e0] sm:$0xff] }
 0xbe8   :  { %6888 = vmatpush.msra.mxu1 %v6549_v4  ;;  %v6397_v2 = vld [vmem:[%s15545_s16 + $0x320] sm:$0xff] }
 0xbe9   :  { %6209 = vmatpush.msrb.mxu3 %v6147_v52  ;;  %v6697_v50 = vld [vmem:[%s15545_s16 + $0xc80] sm:$0xff] }
 0xbea   :  { %v6545_v11 = vld [vmem:[%s15545_s16 + $0x7c0] sm:$0xff] }
 0xbeb   :  { %6210 = vmatpush.msrb.mxu3 %v6145_v28  ;;  %6889 = vmatpush.msra.mxu1 %v6545_v11  ;;  %v6393_v30 = vld [vmem:[%s15545_s16 + $0x300] sm:$0xff] }
 0xbec   :  { %v6693_v9 = vld [vmem:[%s15545_s16 + $0xc60] sm:$0xff] }
 0xbed   :  { %6211 = vmatpush.msrb.mxu3 %v6143_v24  ;;  %v6541_v22 = vld [vmem:[%s15545_s16 + $0x7a0] sm:$0xff] }
 0xbee   :  { %6890 = vmatpush.msra.mxu1 %v6541_v22  ;;  %v6389_v52 = vld [vmem:[%s15545_s16 + $0x2e0] sm:$0xff] }
 0xbef   :  { %6212 = vmatpush.msrb.mxu3 %v6141_v38  ;;  %v6689_v58 = vld [vmem:[%s15545_s16 + $0xc40] sm:$0xff] }
 0xbf0   :  { %7776 = vmatmul.msk.f32.vlgmr.msrb.gmra.mxu3 %vm6155_vm7, %v13735_v31  ;;  %v6441_v31 = vld [vmem:[%s15545_s16 + $0x480] sm:$0xff] }
 0xbf1   :  { %6842 = vmatpush.msra.mxu3 %v6421_v46  ;;  %6876 = vmatpush.msra.mxu0 %v6441_v31  ;;  %v6537_v48 = vld [vmem:[%s15545_s16 + $0x780] sm:$0xff] }
 0xbf2   :  { %v6385_v62 = vld [vmem:[%s15545_s16 + $0x2c0] sm:$0xff]  ;;  %6891 = vmatpush.msra.mxu1 %v6537_v48 }
 0xbf3   :  { %6843 = vmatpush.msra.mxu3 %v6417_v10  ;;  %6877 = vmatpush.msra.mxu0 %v6437_v0  ;;  %v6685_v28 = vld [vmem:[%s15545_s16 + $0xc20] sm:$0xff] }
 0xbf4   :  { %v6533_v63 = vld [vmem:[%s15545_s16 + $0x760] sm:$0xff] }
 0xbf5   :  { %6878 = vmatpush.msra.mxu0 %v6433_v49  ;;  %6844 = vmatpush.msra.mxu3 %v6413_v54  ;;  %v6381_v16 = vld [vmem:[%s15545_s16 + $0x2a0] sm:$0xff] }
 0xbf6   :  { %v6681_v5 = vld [vmem:[%s15545_s16 + $0xc00] sm:$0xff]  ;;  %6892 = vmatpush.msra.mxu1 %v6533_v63 }
 0xbf7   :  { %6879 = vmatpush.msra.mxu0 %v6429_v51  ;;  %6845 = vmatpush.msra.mxu3 %v6409_v12  ;;  %v6529_v24 = vld [vmem:[%s15545_s16 + $0x740] sm:$0xff] }
 0xbf8   :  { %7777 = vmatmul.msk.f32.gmra.mxu3 %vm6155_vm7, %v13742_v34  ;;  %v6601_v34 = vld [vmem:[%s15545_s16 + $0x980] sm:$0xff]  ;;  %6893 = vmatpush.msra.mxu1 %v6529_v24 }
 0xbf9   :  { %6914 = vmatpush.msrb.mxu2 %v6601_v34  ;;  %6880 = vmatpush.msra.mxu0 %v6425_v37  ;;  %v6377_v29 = vld [vmem:[%s15545_s16 + $0x280] sm:$0xff] }
 0xbfa   :  { %6846 = vmatpush.msra.mxu3 %v6405_v43  ;;  %v6525_v23 = vld [vmem:[%s15545_s16 + $0x720] sm:$0xff]  ;;  %v6342_v43 = vld [vmem:[%s15545_s16 + $0x168] sm:$0xff] }
 0xbfb   :  { %6915 = vmatpush.msrb.mxu2 %v6597_v40  ;;  %6957 = vmatpush.msrb.mxu0 %v6741_v26  ;;  %v6373_v38 = vld [vmem:[%s15545_s16 + $0x260] sm:$0xff] }
 0xbfc   :  { %6847 = vmatpush.msra.mxu3 %v6401_v39  ;;  %6894 = vmatpush.msra.mxu1 %v6525_v23  ;;  %v6521_v25 = vld [vmem:[%s15545_s16 + $0x700] sm:$0xff] }
 0xbfd   :  { %6916 = vmatpush.msrb.mxu2 %v6593_v45  ;;  %6958 = vmatpush.msrb.mxu0 %v6737_v3  ;;  %v6369_v53 = vld [vmem:[%s15545_s16 + $0x240] sm:$0xff] }
 0xbfe   :  { %6848 = vmatpush.msra.mxu3 %v6397_v2  ;;  %6895 = vmatpush.msra.mxu1 %v6521_v25  ;;  %v6517_v46 = vld [vmem:[%s15545_s16 + $0x6e0] sm:$0xff] }
 0xbff   :  { %6917 = vmatpush.msrb.mxu2 %v6589_v44  ;;  %6959 = vmatpush.msrb.mxu0 %v6733_v57  ;;  %v6365_v27 = vld [vmem:[%s15545_s16 + $0x220] sm:$0xff] }
 0xc00   :  { %7778 = vmatmul.msk.f32.gmra.mxu3 %vm6155_vm7, %v13751_v35  ;;  %v6585_v35 = vld [vmem:[%s15545_s16 + $0x900] sm:$0xff]  ;;  %6896 = vmatpush.msra.mxu1 %v6517_v46 }
 0xc01   :  { %6918 = vmatpush.msrb.mxu2 %v6585_v35  ;;  %6960 = vmatpush.msrb.mxu0 %v6729_v8  ;;  %v14050_v61 = vld [vmem:[%s15546_s13] sm:$0x3]  ;;  %v6358_v35 = vld [vmem:[%s15545_s16 + $0x1e8] sm:$0xff] }
 0xc02   :  { %6849 = vmatpush.msra.mxu3 %v6393_v30  ;;  %v6513_v10 = vld [vmem:[%s15545_s16 + $0x6c0] sm:$0xff]  ;;  %v14070_v55 = vperm.slane %v14050_v61, 0 }
 0xc03   :  { %6919 = vmatpush.msrb.mxu2 %v6581_v19  ;;  %6961 = vmatpush.msrb.mxu0 %v6725_v59  ;;  %v6361_v60 = vld [vmem:[%s15545_s16 + $0x200] sm:$0xff]  ;;  %v6354_v59 = vld [vmem:[%s15545_s16 + $0x1c8] sm:$0xff] }
 0xc04   :  { %6850 = vmatpush.msra.mxu3 %v6389_v52  ;;  %6897 = vmatpush.msra.mxu1 %v6513_v10  ;;  %v14061_v56 = vld [vmem:[%s15547_s14] sm:$0x3]  ;;  %v6322_v10 = vld [vmem:[%s15545_s16 + $0xc8] sm:$0xff] }
 0xc05   :  { %6920 = vmatpush.msrb.mxu2 %v6577_v42  ;;  %6962 = vmatpush.msrb.mxu0 %v6721_v32  ;;  %v6509_v31 = vld [vmem:[%s15545_s16 + $0x6a0] sm:$0xff]  ;;  %v14079_v49 = vperm.slane %v14061_v56, 0 }
 0xc06   :  { %6851 = vmatpush.msra.mxu3 %v6385_v62  ;;  %v6677_v17 = vld [vmem:[%s15545_s16 + $0xbe0] sm:$0xff]  ;;  %6898 = vmatpush.msra.mxu1 %v6509_v31 }
 0xc07   :  { %6921 = vmatpush.msrb.mxu2 %v6573_v6  ;;  %6963 = vmatpush.msrb.mxu0 %v6717_v47  ;;  %v6505_v0 = vld [vmem:[%s15545_s16 + $0x680] sm:$0xff] }
 0xc08   :  { %6852 = vmatpush.msra.mxu3 %v6381_v16  ;;  %v6673_v15 = vld [vmem:[%s15545_s16 + $0xbc0] sm:$0xff]  ;;  %6899 = vmatpush.msra.mxu1 %v6505_v0  ;;  %v6330_v16 = vld [vmem:[%s15545_s16 + $0x108] sm:$0xff] }
 0xc09   :  { %6922 = vmatpush.msrb.mxu2 %v6569_v7  ;;  %6964 = vmatpush.msrb.mxu0 %v6713_v36  ;;  %v6501_v51 = vld [vmem:[%s15545_s16 + $0x660] sm:$0xff]  ;;  %v6350_v7 = vld [vmem:[%s15545_s16 + $0x1a8] sm:$0xff] }
 0xc0a   :  { %6853 = vmatpush.msra.mxu3 %v6377_v29  ;;  %v6669_v34 = vld [vmem:[%s15545_s16 + $0xba0] sm:$0xff]  ;;  %6900 = vmatpush.msra.mxu1 %v6501_v51  ;;  %v6478_v29 = vld [vmem:[%s15545_s16 + $0x5a8] sm:$0xff] }
 0xc0b   :  { %6923 = vmatpush.msrb.mxu2 %v6565_v14  ;;  %6965 = vmatpush.msrb.mxu0 %v6709_v21  ;;  %v6497_v40 = vld [vmem:[%s15545_s16 + $0x640] sm:$0xff]  ;;  %v6466_v0 = vld [vmem:[%s15545_s16 + $0x548] sm:$0xff] }
 0xc0c   :  { %6854 = vmatpush.msra.mxu3 %v6373_v38  ;;  %v6665_v26 = vld [vmem:[%s15545_s16 + $0xb80] sm:$0xff]  ;;  %6901 = vmatpush.msra.mxu1 %v6497_v40  ;;  %v6326_v38 = vld [vmem:[%s15545_s16 + $0xe8] sm:$0xff] }
 0xc0d   :  { %6924 = vmatpush.msrb.mxu2 %v6561_v18  ;;  %6966 = vmatpush.msrb.mxu0 %v6705_v33  ;;  %v6493_v3 = vld [vmem:[%s15545_s16 + $0x620] sm:$0xff]  ;;  %v6346_v18 = vld [vmem:[%s15545_s16 + $0x188] sm:$0xff] }
 0xc0e   :  { %6855 = vmatpush.msra.mxu3 %v6369_v53  ;;  %v6661_v44 = vld [vmem:[%s15545_s16 + $0xb60] sm:$0xff]  ;;  %6902 = vmatpush.msra.mxu1 %v6493_v3  ;;  %v6474_v53 = vld [vmem:[%s15545_s16 + $0x588] sm:$0xff] }
 0xc0f   :  { %6925 = vmatpush.msrb.mxu2 %v6557_v13  ;;  %6967 = vmatpush.msrb.mxu0 %v6701_v1  ;;  %v6489_v8 = vld [vmem:[%s15545_s16 + $0x600] sm:$0xff]  ;;  %v6338_v1 = vld [vmem:[%s15545_s16 + $0x148] sm:$0xff] }
 0xc10   :  { %6856 = vmatpush.msra.mxu3 %v6365_v27  ;;  %v6657_v19 = vld [vmem:[%s15545_s16 + $0xb40] sm:$0xff]  ;;  %6903 = vmatpush.msra.mxu1 %v6489_v8  ;;  %v6462_v40 = vld [vmem:[%s15545_s16 + $0x528] sm:$0xff] }
 0xc11   :  { %6926 = vmatpush.msrb.mxu2 %v6553_v41  ;;  %6968 = vmatpush.msrb.mxu0 %v6697_v50  ;;  %v6805_v42 = vld [vmem:[%s15545_s16 + $0xfe0] sm:$0xff]  ;;  %v6486_v50 = vld [vmem:[%s15545_s16 + $0x5e8] sm:$0xff] }
 0xc12   :  { %6857 = vmatpush.msra.mxu3 %v6361_v60  ;;  %v6653_v32 = vld [vmem:[%s15545_s16 + $0xb20] sm:$0xff]  ;;  %6980 = vmatpush.msrb.mxu1 %v6805_v42  ;;  %v6470_v60 = vld [vmem:[%s15545_s16 + $0x568] sm:$0xff] }
 0xc13   :  { %6969 = vmatpush.msrb.mxu0 %v6693_v9  ;;  %v6801_v14 = vld [vmem:[%s15545_s16 + $0xfc0] sm:$0xff]  ;;  %v6306_v8 = vld [vmem:[%s15545_s16 + $0x48] sm:$0xff] }
 0xc14   :  { %6934 = vmatpush.msrb.mxu3 %v6677_v17  ;;  %v6649_v54 = vld [vmem:[%s15545_s16 + $0xb00] sm:$0xff]  ;;  %6981 = vmatpush.msrb.mxu1 %v6801_v14  ;;  %v6318_v17 = vld [vmem:[%s15545_s16 + $0xa8] sm:$0xff] }
 0xc15   :  { %6970 = vmatpush.msrb.mxu0 %v6689_v58  ;;  %v6797_v12 = vld [vmem:[%s15545_s16 + $0xfa0] sm:$0xff]  ;;  %v6334_v58 = vld [vmem:[%s15545_s16 + $0x128] sm:$0xff] }
 0xc16   :  { %6935 = vmatpush.msrb.mxu3 %v6673_v15  ;;  %v6645_v21 = vld [vmem:[%s15545_s16 + $0xae0] sm:$0xff]  ;;  %6982 = vmatpush.msrb.mxu1 %v6797_v12  ;;  %v6446_v14 = vld [vmem:[%s15545_s16 + $0x4a8] sm:$0xff] }
 0xc17   :  { %6971 = vmatpush.msrb.mxu0 %v6685_v28  ;;  %v6793_v41 = vld [vmem:[%s15545_s16 + $0xf80] sm:$0xff]  ;;  %v6482_v28 = vld [vmem:[%s15545_s16 + $0x5c8] sm:$0xff] }
 0xc18   :  { %6936 = vmatpush.msrb.mxu3 %v6669_v34  ;;  %v6641_v39 = vld [vmem:[%s15545_s16 + $0xac0] sm:$0xff]  ;;  %6983 = vmatpush.msrb.mxu1 %v6793_v41  ;;  %v6442_v12 = vld [vmem:[%s15545_s16 + $0x488] sm:$0xff] }
 0xc19   :  { %6972 = vmatpush.msrb.mxu0 %v6681_v5  ;;  %v6789_v2 = vld [vmem:[%s15545_s16 + $0xf60] sm:$0xff]  ;;  %v6606_v41 = vld [vmem:[%s15545_s16 + $0x9a8] sm:$0xff] }
 0xc1a   :  { %6937 = vmatpush.msrb.mxu3 %v6665_v26  ;;  %v6637_v9 = vld [vmem:[%s15545_s16 + $0xaa0] sm:$0xff]  ;;  %6984 = vmatpush.msrb.mxu1 %v6789_v2  ;;  %v6434_v2 = vld [vmem:[%s15545_s16 + $0x448] sm:$0xff] }
 0xc1b   :  { %v6785_v48 = vld [vmem:[%s15545_s16 + $0xf40] sm:$0xff] }
 0xc1c   :  { %6938 = vmatpush.msrb.mxu3 %v6661_v44  ;;  %v6633_v63 = vld [vmem:[%s15545_s16 + $0xa80] sm:$0xff]  ;;  %6985 = vmatpush.msrb.mxu1 %v6785_v48  ;;  %v6458_v44 = vld [vmem:[%s15545_s16 + $0x508] sm:$0xff] }
 0xc1d   :  { %v6781_v24 = vld [vmem:[%s15545_s16 + $0xf20] sm:$0xff]  ;;  %v6590_v48 = vld [vmem:[%s15545_s16 + $0x928] sm:$0xff] }
 0xc1e   :  { %6939 = vmatpush.msrb.mxu3 %v6657_v19  ;;  %v6629_v25 = vld [vmem:[%s15545_s16 + $0xa60] sm:$0xff]  ;;  %6986 = vmatpush.msrb.mxu1 %v6781_v24 }
 0xc1f   :  { %v6777_v27 = vld [vmem:[%s15545_s16 + $0xf00] sm:$0xff] }
 0xc20   :  { %6940 = vmatpush.msrb.mxu3 %v6653_v32  ;;  %v6625_v31 = vld [vmem:[%s15545_s16 + $0xa40] sm:$0xff]  ;;  %6987 = vmatpush.msrb.mxu1 %v6777_v27  ;;  %v6302_v32 = vld [vmem:[%s15545_s16 + $0x28] sm:$0xff] }
 0xc21   :  { %v6617_v26 = vld [vmem:[%s15545_s16 + $0xa00] sm:$0xff] }
 0xc22   :  { %6941 = vmatpush.msrb.mxu3 %v6649_v54  ;;  %v6765_v3 = vld [vmem:[%s15545_s16 + $0xea0] sm:$0xff]  ;;  %v6614_v54 = vld [vmem:[%s15545_s16 + $0x9e8] sm:$0xff] }
 0xc23   :  { %v6761_v42 = vld [vmem:[%s15545_s16 + $0xe80] sm:$0xff] }
 0xc24   :  { %6942 = vmatpush.msrb.mxu3 %v6645_v21  ;;  %v6610_v21 = vld [vmem:[%s15545_s16 + $0x9c8] sm:$0xff] }
 0xc26   :  { %6943 = vmatpush.msrb.mxu3 %v6641_v39  ;;  %v6745_v39 = vld [vmem:[%s15545_s16 + $0xe00] sm:$0xff] }
 0xc28   :  { %6944 = vmatpush.msrb.mxu3 %v6637_v9  ;;  %v6426_v9 = vld [vmem:[%s15545_s16 + $0x408] sm:$0xff] }
 0xc2a   :  { %6945 = vmatpush.msrb.mxu3 %v6633_v63  ;;  %v6586_v63 = vld [vmem:[%s15545_s16 + $0x908] sm:$0xff] }
 0xc2c   :  { %6946 = vmatpush.msrb.mxu3 %v6629_v25 }
 0xc2e   :  { %6947 = vmatpush.msrb.mxu3 %v6625_v31  ;;  %v6570_v31 = vld [vmem:[%s15545_s16 + $0x888] sm:$0xff] }
 0xc3f   :  { %v6188_v20 = vpop.f32.mrf.mxu2 }
 0xc40   :  { %v6229_v37 = vmul.f32 %v14070_v55, %v6188_v20  ;;  %v6314_v20 = vld [vmem:[%s15545_s16 + $0x88] sm:$0xff] }
 0xc42   :  { %v6241_v45 = vadd.f32 %v14079_v49, %v6229_v37  ;;  %v6769_v37 = vld [vmem:[%s15545_s16 + $0xec0] sm:$0xff] }
 0xc44   :  { %v14101_v57 = vmax.f32 %v6241_v45, 0.0  ;;  %v6310_v45 = vld [vmem:[%s15545_s16 + $0x68] sm:$0xff] }
 0xc46   :  { %6835 = vmatmul.f32.vlgmr.msra.gmra.mxu2 %v14101_v57  ;;  %v6257_v33 = vrot.slane %v14101_v57, 1  ;;  %v6269_v11 = vrot.slane %v14101_v57, 2  ;;  %v6283_v51 = vrot.slane %v14101_v57, 3 }
 0xc47   :  { %7003 = vmatpush.msra.mxu2 %v6358_v35  ;;  %v6191_v6 = vpop.f32.mrf.mxu2 }
 0xc48   :  { %v6231_v47 = vmul.f32 %v14070_v55, %v6191_v6  ;;  %v6450_v6 = vld [vmem:[%s15545_s16 + $0x4c8] sm:$0xff] }
 0xc49   :  { %7004 = vmatpush.msra.mxu2 %v6354_v59  ;;  %v6454_v59 = vld [vmem:[%s15545_s16 + $0x4e8] sm:$0xff] }
 0xc4a   :  { %v6243_v36 = vadd.f32 %v14079_v49, %v6231_v47  ;;  %v6757_v47 = vld [vmem:[%s15545_s16 + $0xe60] sm:$0xff] }
 0xc4b   :  { %7005 = vmatpush.msra.mxu2 %v6350_v7  ;;  %v6298_v7 = vld [vmem:[%s15545_s16 + $0x8] sm:$0xff] }
 0xc4c   :  { %v14142_v13 = vmax.f32 %v6243_v36, 0.0 }
 0xc4d   :  { %7006 = vmatpush.msra.mxu2 %v6346_v18  ;;  %v6753_v18 = vld [vmem:[%s15545_s16 + $0xe40] sm:$0xff] }
 0xc4e   :  { %v14158_v4 = vrot.slane %v14142_v13, 1  ;;  %6838 = vmatmul.f32.gmra.mxu2 %v14142_v13  ;;  %v6270_v30 = vrot.slane %v14142_v13, 2  ;;  %v6284_v34 = vrot.slane %v14142_v13, 3 }
 0xc4f   :  { %7007 = vmatpush.msra.mxu2 %v6342_v43  ;;  %v6194_v22 = vpop.f32.mrf.mxu2  ;;  %v6749_v43 = vld [vmem:[%s15545_s16 + $0xe20] sm:$0xff] }
 0xc50   :  { %v14174_v52 = vsel %vm4244_vm14, %v6257_v33, %v14158_v4  ;;  %v6233_v62 = vmul.f32 %v14070_v55, %v6194_v22  ;;  %v14205_v23 = vsel %vm4344_vm3, %v6269_v11, %v6270_v30  ;;  %v6773_v55 = vld [vmem:[%s15545_s16 + $0xee0] sm:$0xff]  ;;  %v14275_v19 = vsel %vm4404_vm0, %v6283_v51, %v6284_v34  ;;  %v6438_v33 = vld [vmem:[%s15545_s16 + $0x468] sm:$0xff] }
 0xc51   :  { %7008 = vmatpush.msra.mxu2 %v6338_v1  ;;  %6881 = vmatmul.f32.vlgmr.msra.gmra.mxu0 %v14174_v52  ;;  %v6430_v11 = vld [vmem:[%s15545_s16 + $0x428] sm:$0xff] }
 0xc52   :  { %7049 = vmatpush.msra.mxu0 %v6486_v50  ;;  %v14194_v5 = vadd.f32 %v14079_v49, %v6233_v62  ;;  %v6621_v49 = vld [vmem:[%s15545_s16 + $0xa20] sm:$0xff]  ;;  %6988 = vmatpush.msrb.mxu1 %v6773_v55  ;;  %v6602_v50 = vld [vmem:[%s15545_s16 + $0x988] sm:$0xff] }
 0xc53   :  { %7009 = vmatpush.msra.mxu2 %v6334_v58  ;;  %6948 = vmatpush.msrb.mxu3 %v6621_v49  ;;  %v6594_v22 = vld [vmem:[%s15545_s16 + $0x948] sm:$0xff] }
 0xc54   :  { %7050 = vmatpush.msra.mxu0 %v6482_v28  ;;  %v6251_v46 = vmax.f32 %v14194_v5, 0.0  ;;  %6989 = vmatpush.msrb.mxu1 %v6769_v37  ;;  %v6742_v58 = vld [vmem:[%s15545_s16 + $0xde8] sm:$0xff]  ;;  %v14357_v28 = vperm.slane %v14050_v61, 1 }
 0xc55   :  { %7010 = vmatpush.msra.mxu2 %v6330_v16  ;;  %6949 = vmatpush.msrb.mxu3 %v6617_v26  ;;  %v6738_v62 = vld [vmem:[%s15545_s16 + $0xdc8] sm:$0xff]  ;;  %v14364_v16 = vperm.slane %v14061_v56, 1 }
 0xc56   :  { %7051 = vmatpush.msra.mxu0 %v6478_v29  ;;  %6927 = vmatmul.f32.vlgmr.msrb.gmra.mxu2 %v14205_v23  ;;  %v6275_v15 = vrot.slane %v6251_v46, 2  ;;  %v6289_v36 = vrot.slane %v6251_v46, 3  ;;  %v6734_v5 = vld [vmem:[%s15545_s16 + $0xda8] sm:$0xff] }
 0xc57   :  { %7011 = vmatpush.msra.mxu2 %v6326_v38  ;;  %6990 = vmatpush.msrb.mxu1 %v6765_v3  ;;  %v6582_v61 = vld [vmem:[%s15545_s16 + $0x8e8] sm:$0xff] }
 0xc58   :  { %7052 = vmatpush.msra.mxu0 %v6474_v53  ;;  %v14269_v35 = vsel %vm4344_vm3, %v6270_v30, %v6275_v15  ;;  %v14325_v1 = vsel %vm4404_vm0, %v6284_v34, %v6289_v36  ;;  %v6598_v30 = vld [vmem:[%s15545_s16 + $0x968] sm:$0xff] }
 0xc59   :  { %7012 = vmatpush.msra.mxu2 %v6322_v10  ;;  %6884 = vmatmul.f32.gmra.mxu0 %v14158_v4  ;;  %v6730_v38 = vld [vmem:[%s15545_s16 + $0xd88] sm:$0xff] }
 0xc5a   :  { %7053 = vmatpush.msra.mxu0 %v6470_v60  ;;  %6991 = vmatpush.msrb.mxu1 %v6761_v42  ;;  %v6578_v56 = vld [vmem:[%s15545_s16 + $0x8c8] sm:$0xff] }
 0xc5b   :  { %7013 = vmatpush.msra.mxu2 %v6318_v17  ;;  %v6726_v53 = vld [vmem:[%s15545_s16 + $0xd68] sm:$0xff] }
 0xc5c   :  { %7054 = vmatpush.msra.mxu0 %v6466_v0  ;;  %6992 = vmatpush.msrb.mxu1 %v6757_v47  ;;  %v6574_v46 = vld [vmem:[%s15545_s16 + $0x8a8] sm:$0xff] }
 0xc5d   :  { %7014 = vmatpush.msra.mxu2 %v6314_v20  ;;  %v6422_v10 = vld [vmem:[%s15545_s16 + $0x3e8] sm:$0xff] }
 0xc5e   :  { %7055 = vmatpush.msra.mxu0 %v6462_v40  ;;  %6930 = vmatmul.f32.gmra.mxu2 %v14269_v35  ;;  %v6722_v60 = vld [vmem:[%s15545_s16 + $0xd48] sm:$0xff] }
 0xc5f   :  { %7015 = vmatpush.msra.mxu2 %v6310_v45  ;;  %6993 = vmatpush.msrb.mxu1 %v6753_v18  ;;  %v6418_v17 = vld [vmem:[%s15545_s16 + $0x3c8] sm:$0xff] }
 0xc60   :  { %7056 = vmatpush.msra.mxu0 %v6458_v44  ;;  %v6718_v55 = vld [vmem:[%s15545_s16 + $0xd28] sm:$0xff] }
 0xc61   :  { %7016 = vmatpush.msra.mxu2 %v6306_v8  ;;  %6973 = vmatmul.f32.vlgmr.msrb.gmra.mxu0 %v14275_v19  ;;  %v6566_v15 = vld [vmem:[%s15545_s16 + $0x868] sm:$0xff] }
 0xc62   :  { %7057 = vmatpush.msra.mxu0 %v6454_v59  ;;  %6994 = vmatpush.msrb.mxu1 %v6749_v43  ;;  %v6414_v20 = vld [vmem:[%s15545_s16 + $0x3a8] sm:$0xff] }
 0xc63   :  { %7017 = vmatpush.msra.mxu2 %v6302_v32  ;;  %v6714_v51 = vld [vmem:[%s15545_s16 + $0xd08] sm:$0xff] }
 0xc64   :  { %7058 = vmatpush.msra.mxu0 %v6450_v6  ;;  %6995 = vmatpush.msrb.mxu1 %v6745_v39  ;;  %v6562_v34 = vld [vmem:[%s15545_s16 + $0x848] sm:$0xff] }
 0xc65   :  { %7018 = vmatpush.msra.mxu2 %v6298_v7  ;;  %v6410_v40 = vld [vmem:[%s15545_s16 + $0x388] sm:$0xff]  ;;  %v6359_v7 = vld [vmem:[%s15545_s16 + $0x1f0] sm:$0xff] }
 0xc66   :  { %7059 = vmatpush.msra.mxu0 %v6446_v14  ;;  %7019 = vmatmul.f32.vlgmr.msra.gmra.mxu2 %v14101_v57  ;;  %v6710_v26 = vld [vmem:[%s15545_s16 + $0xce8] sm:$0xff] }
 0xc67   :  { %7095 = vmatpush.msrb.mxu2 %v6614_v54  ;;  %v6558_v45 = vld [vmem:[%s15545_s16 + $0x828] sm:$0xff] }
 0xc68   :  { %7060 = vmatpush.msra.mxu0 %v6442_v12  ;;  %v6406_v44 = vld [vmem:[%s15545_s16 + $0x368] sm:$0xff]  ;;  %v6355_v12 = vld [vmem:[%s15545_s16 + $0x1d0] sm:$0xff] }
 0xc69   :  { %7096 = vmatpush.msrb.mxu2 %v6610_v21  ;;  %6976 = vmatmul.f32.gmra.mxu0 %v14325_v1  ;;  %v6706_v8 = vld [vmem:[%s15545_s16 + $0xcc8] sm:$0xff] }
 0xc6a   :  { %7061 = vmatpush.msra.mxu0 %v6438_v33  ;;  %v6554_v59 = vld [vmem:[%s15545_s16 + $0x808] sm:$0xff] }
 0xc6b   :  { %7097 = vmatpush.msrb.mxu2 %v6606_v41  ;;  %v6402_v42 = vld [vmem:[%s15545_s16 + $0x348] sm:$0xff]  ;;  %v6351_v41 = vld [vmem:[%s15545_s16 + $0x1b0] sm:$0xff] }
 0xc6c   :  { %7062 = vmatpush.msra.mxu0 %v6434_v2  ;;  %v6702_v32 = vld [vmem:[%s15545_s16 + $0xca8] sm:$0xff] }
 0xc6d   :  { %7098 = vmatpush.msrb.mxu2 %v6602_v50  ;;  %v6550_v54 = vld [vmem:[%s15545_s16 + $0x7e8] sm:$0xff] }
 0xc6e   :  { %7063 = vmatpush.msra.mxu0 %v6430_v11  ;;  %7022 = vmatmul.f32.gmra.mxu2 %v14142_v13  ;;  %v6398_v36 = vld [vmem:[%s15545_s16 + $0x328] sm:$0xff]  ;;  %v6347_v11 = vld [vmem:[%s15545_s16 + $0x190] sm:$0xff] }
 0xc6f   :  { %7099 = vmatpush.msrb.mxu2 %v6598_v30  ;;  %v6698_v18 = vld [vmem:[%s15545_s16 + $0xc88] sm:$0xff] }
 0xc70   :  { %7064 = vmatpush.msra.mxu0 %v6426_v9  ;;  %v6546_v21 = vld [vmem:[%s15545_s16 + $0x7c8] sm:$0xff] }
 0xc71   :  { %7100 = vmatpush.msrb.mxu2 %v6594_v22  ;;  %7065 = vmatmul.f32.vlgmr.msra.gmra.mxu0 %v14174_v52  ;;  %v6394_v43 = vld [vmem:[%s15545_s16 + $0x308] sm:$0xff] }
 0xc72   :  { %7141 = vmatpush.msrb.mxu0 %v6742_v58  ;;  %v6694_v33 = vld [vmem:[%s15545_s16 + $0xc68] sm:$0xff]  ;;  %v6343_v58 = vld [vmem:[%s15545_s16 + $0x170] sm:$0xff] }
 0xc73   :  { %7101 = vmatpush.msrb.mxu2 %v6590_v48  ;;  %v6214_v24 = vpop.f32.mrf.mxu3  ;;  %v6542_v39 = vld [vmem:[%s15545_s16 + $0x7a8] sm:$0xff] }
 0xc74   :  { %7142 = vmatpush.msrb.mxu0 %v6738_v62  ;;  %v6230_v29 = vmul.f32 %v14357_v28, %v6214_v24  ;;  %v6390_v2 = vld [vmem:[%s15545_s16 + $0x2e8] sm:$0xff] }
 0xc75   :  { %7102 = vmatpush.msrb.mxu2 %v6586_v63  ;;  %v6690_v50 = vld [vmem:[%s15545_s16 + $0xc48] sm:$0xff] }
 0xc76   :  { %7143 = vmatpush.msrb.mxu0 %v6734_v5  ;;  %v6242_v25 = vadd.f32 %v14364_v16, %v6230_v29  ;;  %v6538_v30 = vld [vmem:[%s15545_s16 + $0x788] sm:$0xff]  ;;  %v6339_v5 = vld [vmem:[%s15545_s16 + $0x150] sm:$0xff] }
 0xc77   :  { %7103 = vmatpush.msrb.mxu2 %v6582_v61  ;;  %v6386_v9 = vld [vmem:[%s15545_s16 + $0x2c8] sm:$0xff]  ;;  %v6487_v61 = vld [vmem:[%s15545_s16 + $0x5f0] sm:$0xff] }
 0xc78   :  { %7144 = vmatpush.msrb.mxu0 %v6730_v38  ;;  %v14387_v27 = vmax.f32 %v6242_v25, 0.0  ;;  %v6686_v22 = vld [vmem:[%s15545_s16 + $0xc28] sm:$0xff]  ;;  %v6335_v38 = vld [vmem:[%s15545_s16 + $0x130] sm:$0xff] }
 0xc79   :  { %7104 = vmatpush.msrb.mxu2 %v6578_v56  ;;  %7068 = vmatmul.f32.gmra.mxu0 %v14158_v4  ;;  %v6534_v48 = vld [vmem:[%s15545_s16 + $0x768] sm:$0xff]  ;;  %v6483_v25 = vld [vmem:[%s15545_s16 + $0x5d0] sm:$0xff] }
 0xc7a   :  { %7145 = vmatpush.msrb.mxu0 %v6726_v53  ;;  %6858 = vmatmul.f32.vlgmr.msra.gmra.mxu3 %v14387_v27  ;;  %v6260_v6 = vrot.slane %v14387_v27, 1  ;;  %v6382_v62 = vld [vmem:[%s15545_s16 + $0x2a8] sm:$0xff] }
 0xc7b   :  { %7105 = vmatpush.msrb.mxu2 %v6574_v46  ;;  %7026 = vmatpush.msra.mxu3 %v6422_v10  ;;  %v6217_v0 = vpop.f32.mrf.mxu3  ;;  %v6682_v63 = vld [vmem:[%s15545_s16 + $0xc08] sm:$0xff]  ;;  %v6331_v10 = vld [vmem:[%s15545_s16 + $0x110] sm:$0xff] }
 0xc7c   :  { %7146 = vmatpush.msrb.mxu0 %v6722_v60  ;;  %v6232_v49 = vmul.f32 %v14357_v28, %v6217_v0  ;;  %v6530_v24 = vld [vmem:[%s15545_s16 + $0x748] sm:$0xff] }
 0xc7d   :  { %7106 = vmatpush.msrb.mxu2 %v6570_v31  ;;  %7027 = vmatpush.msra.mxu3 %v6418_v17  ;;  %v6378_v29 = vld [vmem:[%s15545_s16 + $0x288] sm:$0xff]  ;;  %v6479_v31 = vld [vmem:[%s15545_s16 + $0x5b0] sm:$0xff] }
 0xc7e   :  { %7147 = vmatpush.msrb.mxu0 %v6718_v55  ;;  %v6244_v37 = vadd.f32 %v14364_v16, %v6232_v49  ;;  %v6526_v56 = vld [vmem:[%s15545_s16 + $0x728] sm:$0xff]  ;;  %v6327_v55 = vld [vmem:[%s15545_s16 + $0xf0] sm:$0xff] }
 0xc7f   :  { %7107 = vmatpush.msrb.mxu2 %v6566_v15  ;;  %7028 = vmatpush.msra.mxu3 %v6414_v20  ;;  %v6374_v46 = vld [vmem:[%s15545_s16 + $0x268] sm:$0xff]  ;;  %v6475_v49 = vld [vmem:[%s15545_s16 + $0x590] sm:$0xff] }
 0xc80   :  { %7148 = vmatpush.msrb.mxu0 %v6714_v51  ;;  %v14429_v3 = vmax.f32 %v6244_v37, 0.0  ;;  %v6522_v60 = vld [vmem:[%s15545_s16 + $0x708] sm:$0xff] }
 0xc81   :  { %7108 = vmatpush.msrb.mxu2 %v6562_v34  ;;  %7029 = vmatpush.msra.mxu3 %v6410_v40  ;;  %v6370_v17 = vld [vmem:[%s15545_s16 + $0x248] sm:$0xff]  ;;  %v6471_v34 = vld [vmem:[%s15545_s16 + $0x570] sm:$0xff] }
 0xc82   :  { %7149 = vmatpush.msrb.mxu0 %v6710_v26  ;;  %v14448_v47 = vrot.slane %v14429_v3, 1  ;;  %6861 = vmatmul.f32.gmra.mxu3 %v14429_v3  ;;  %v6518_v15 = vld [vmem:[%s15545_s16 + $0x6e8] sm:$0xff]  ;;  %v6273_v37 = vrot.slane %v14429_v3, 2 }
 0xc83   :  { %7109 = vmatpush.msrb.mxu2 %v6558_v45  ;;  %7030 = vmatpush.msra.mxu3 %v6406_v44  ;;  %v6220_v53 = vpop.f32.mrf.mxu3  ;;  %v6366_v20 = vld [vmem:[%s15545_s16 + $0x228] sm:$0xff]  ;;  %v6319_v45 = vld [vmem:[%s15545_s16 + $0xb0] sm:$0xff]  ;;  %v6272_v44 = vrot.slane %v14387_v27, 2 }
 0xc84   :  { %7150 = vmatpush.msrb.mxu0 %v6706_v8  ;;  %v14456_v14 = vsel %vm4244_vm14, %v6260_v6, %v14448_v47  ;;  %v6234_v0 = vmul.f32 %v14357_v28, %v6220_v53  ;;  %v6323_v28 = vld [vmem:[%s15545_s16 + $0xd0] sm:$0xff]  ;;  %v6514_v51 = vld [vmem:[%s15545_s16 + $0x6c8] sm:$0xff] }
 0xc85   :  { %7110 = vmatpush.msrb.mxu2 %v6554_v59  ;;  %7031 = vmatpush.msra.mxu3 %v6402_v42  ;;  %v6362_v26 = vld [vmem:[%s15545_s16 + $0x208] sm:$0xff]  ;;  %v6467_v59 = vld [vmem:[%s15545_s16 + $0x550] sm:$0xff]  ;;  %v14595_v42 = vsel %vm4344_vm3, %v6272_v44, %v6273_v37 }
 0xc86   :  { %7151 = vmatpush.msrb.mxu0 %v6702_v32  ;;  %6904 = vmatmul.f32.vlgmr.msra.gmra.mxu1 %v14456_v14  ;;  %v14576_v40 = vadd.f32 %v14364_v16, %v6234_v0  ;;  %v6510_v8 = vld [vmem:[%s15545_s16 + $0x6a8] sm:$0xff]  ;;  %v6315_v32 = vld [vmem:[%s15545_s16 + $0x90] sm:$0xff] }
 0xc87   :  { %7187 = vmatpush.msra.mxu2 %v6359_v7  ;;  %7072 = vmatpush.msra.mxu1 %v6550_v54  ;;  %v6678_v16 = vld [vmem:[%s15545_s16 + $0xbe8] sm:$0xff]  ;;  %v6443_v53 = vld [vmem:[%s15545_s16 + $0x490] sm:$0xff] }
 0xc88   :  { %7032 = vmatpush.msra.mxu3 %v6398_v36  ;;  %7152 = vmatpush.msrb.mxu0 %v6698_v18  ;;  %v6252_v6 = vmax.f32 %v14576_v40, 0.0  ;;  %v6506_v7 = vld [vmem:[%s15545_s16 + $0x688] sm:$0xff]  ;;  %v6463_v36 = vld [vmem:[%s15545_s16 + $0x530] sm:$0xff] }
 0xc89   :  { %7188 = vmatpush.msra.mxu2 %v6355_v12  ;;  %7073 = vmatpush.msra.mxu1 %v6546_v21  ;;  %v6674_v54 = vld [vmem:[%s15545_s16 + $0xbc8] sm:$0xff]  ;;  %v6311_v18 = vld [vmem:[%s15545_s16 + $0x70] sm:$0xff] }
 0xc8a   :  { %7033 = vmatpush.msra.mxu3 %v6394_v43  ;;  %7153 = vmatpush.msrb.mxu0 %v6694_v33  ;;  %v6502_v12 = vld [vmem:[%s15545_s16 + $0x668] sm:$0xff]  ;;  %v6459_v43 = vld [vmem:[%s15545_s16 + $0x510] sm:$0xff] }
 0xc8b   :  { %7189 = vmatpush.msra.mxu2 %v6351_v41  ;;  %7074 = vmatpush.msra.mxu1 %v6542_v39  ;;  %v6670_v21 = vld [vmem:[%s15545_s16 + $0xba8] sm:$0xff]  ;;  %v6307_v33 = vld [vmem:[%s15545_s16 + $0x50] sm:$0xff]  ;;  %v6277_v41 = vrot.slane %v6252_v6, 2 }
 0xc8c   :  { %7034 = vmatpush.msra.mxu3 %v6390_v2  ;;  %7154 = vmatpush.msrb.mxu0 %v6690_v50  ;;  %v6498_v39 = vld [vmem:[%s15545_s16 + $0x648] sm:$0xff]  ;;  %v6455_v50 = vld [vmem:[%s15545_s16 + $0x4f0] sm:$0xff] }
 0xc8d   :  { %7190 = vmatpush.msra.mxu2 %v6347_v11  ;;  %7075 = vmatpush.msra.mxu1 %v6538_v30  ;;  %v6666_v2 = vld [vmem:[%s15545_s16 + $0xb88] sm:$0xff]  ;;  %v6303_v11 = vld [vmem:[%s15545_s16 + $0x30] sm:$0xff] }
 0xc8e   :  { %7035 = vmatpush.msra.mxu3 %v6386_v9  ;;  %7155 = vmatpush.msrb.mxu0 %v6686_v22  ;;  %v6494_v30 = vld [vmem:[%s15545_s16 + $0x628] sm:$0xff]  ;;  %v6287_v9 = vrot.slane %v14429_v3, 3  ;;  %v6435_v0 = vld [vmem:[%s15545_s16 + $0x450] sm:$0xff] }
 0xc8f   :  { %7191 = vmatpush.msra.mxu2 %v6343_v58  ;;  %7076 = vmatpush.msra.mxu1 %v6534_v48  ;;  %v6662_v22 = vld [vmem:[%s15545_s16 + $0xb68] sm:$0xff]  ;;  %v6451_v58 = vld [vmem:[%s15545_s16 + $0x4d0] sm:$0xff]  ;;  %v14652_v48 = vsel %vm4344_vm3, %v6273_v37, %v6277_v41 }
 0xc90   :  { %7036 = vmatpush.msra.mxu3 %v6382_v62  ;;  %7156 = vmatpush.msrb.mxu0 %v6682_v63  ;;  %v6299_v62 = vld [vmem:[%s15545_s16 + $0x10] sm:$0xff]  ;;  %v6286_v63 = vrot.slane %v14387_v27, 3  ;;  %v6790_v40 = vld [vmem:[%s15545_s16 + $0xf68] sm:$0xff] }
 0xc91   :  { %7192 = vmatpush.msra.mxu2 %v6339_v5  ;;  %7077 = vmatpush.msra.mxu1 %v6530_v24  ;;  %v6490_v5 = vld [vmem:[%s15545_s16 + $0x608] sm:$0xff]  ;;  %v6599_v37 = vld [vmem:[%s15545_s16 + $0x970] sm:$0xff] }
 0xc92   :  { %7233 = vmatpush.msra.mxu0 %v6487_v61  ;;  %7037 = vmatpush.msra.mxu3 %v6378_v29  ;;  %v14663_v24 = vsel %vm4404_vm0, %v6286_v63, %v6287_v9  ;;  %v6658_v61 = vld [vmem:[%s15545_s16 + $0xb48] sm:$0xff]  ;;  %v6447_v29 = vld [vmem:[%s15545_s16 + $0x4b0] sm:$0xff] }
 0xc93   :  { %7193 = vmatpush.msra.mxu2 %v6335_v38  ;;  %7078 = vmatpush.msra.mxu1 %v6526_v56  ;;  %v6615_v38 = vld [vmem:[%s15545_s16 + $0x9f0] sm:$0xff]  ;;  %v6806_v56 = vld [vmem:[%s15545_s16 + $0xfe8] sm:$0xff] }
 0xc94   :  { %7234 = vmatpush.msra.mxu0 %v6483_v25  ;;  %7038 = vmatpush.msra.mxu3 %v6374_v46  ;;  %v6654_v25 = vld [vmem:[%s15545_s16 + $0xb28] sm:$0xff]  ;;  %v6611_v46 = vld [vmem:[%s15545_s16 + $0x9d0] sm:$0xff] }
 0xc95   :  { %7194 = vmatpush.msra.mxu2 %v6331_v10  ;;  %7079 = vmatpush.msra.mxu1 %v6522_v60  ;;  %v6802_v10 = vld [vmem:[%s15545_s16 + $0xfc8] sm:$0xff]  ;;  %v6595_v44 = vld [vmem:[%s15545_s16 + $0x950] sm:$0xff] }
 0xc96   :  { %7235 = vmatpush.msra.mxu0 %v6479_v31  ;;  %7039 = vmatpush.msra.mxu3 %v6370_v17  ;;  %v6650_v60 = vld [vmem:[%s15545_s16 + $0xb08] sm:$0xff]  ;;  %v6439_v31 = vld [vmem:[%s15545_s16 + $0x470] sm:$0xff] }
 0xc97   :  { %7195 = vmatpush.msra.mxu2 %v6327_v55  ;;  %7080 = vmatpush.msra.mxu1 %v6518_v15  ;;  %v6607_v17 = vld [vmem:[%s15545_s16 + $0x9b0] sm:$0xff]  ;;  %v6798_v55 = vld [vmem:[%s15545_s16 + $0xfa8] sm:$0xff]  ;;  %v6291_v15 = vrot.slane %v6252_v6, 3 }
 0xc98   :  { %7236 = vmatpush.msra.mxu0 %v6475_v49  ;;  %7040 = vmatpush.msra.mxu3 %v6366_v20  ;;  %v6646_v49 = vld [vmem:[%s15545_s16 + $0xae8] sm:$0xff]  ;;  %v6603_v20 = vld [vmem:[%s15545_s16 + $0x990] sm:$0xff] }
 0xc99   :  { %7196 = vmatpush.msra.mxu2 %v6323_v28  ;;  %7081 = vmatpush.msra.mxu1 %v6514_v51  ;;  %v6794_v28 = vld [vmem:[%s15545_s16 + $0xf88] sm:$0xff]  ;;  %v6431_v51 = vld [vmem:[%s15545_s16 + $0x430] sm:$0xff] }
 0xc9a   :  { %7237 = vmatpush.msra.mxu0 %v6471_v34  ;;  %7041 = vmatpush.msra.mxu3 %v6362_v26  ;;  %v6642_v34 = vld [vmem:[%s15545_s16 + $0xac8] sm:$0xff]  ;;  %v14731_v26 = vsel %vm4404_vm0, %v6287_v9, %v6291_v15  ;;  %v6591_v6 = vld [vmem:[%s15545_s16 + $0x930] sm:$0xff] }
 0xc9b   :  { %7197 = vmatpush.msra.mxu2 %v6319_v45  ;;  %6950 = vmatmul.f32.vlgmr.msrb.gmra.mxu3 %v14595_v42  ;;  %v6638_v45 = vld [vmem:[%s15545_s16 + $0xaa8] sm:$0xff]  ;;  %v6723_v63 = vld [vmem:[%s15545_s16 + $0xd50] sm:$0xff] }
 0xc9c   :  { %7082 = vmatpush.msra.mxu1 %v6510_v8  ;;  %7118 = vmatpush.msrb.mxu3 %v6678_v16  ;;  %v6427_v8 = vld [vmem:[%s15545_s16 + $0x410] sm:$0xff]  ;;  %v6786_v16 = vld [vmem:[%s15545_s16 + $0xf48] sm:$0xff] }
 0xc9d   :  { %7238 = vmatpush.msra.mxu0 %v6467_v59  ;;  %7198 = vmatpush.msra.mxu2 %v6315_v32  ;;  %v6743_v59 = vld [vmem:[%s15545_s16 + $0xdf0] sm:$0xff]  ;;  %v6634_v32 = vld [vmem:[%s15545_s16 + $0xa88] sm:$0xff] }
 0xc9e   :  { %6907 = vmatmul.f32.gmra.mxu1 %v14448_v47  ;;  %7119 = vmatpush.msrb.mxu3 %v6674_v54  ;;  %v6739_v54 = vld [vmem:[%s15545_s16 + $0xdd0] sm:$0xff]  ;;  %v6774_v41 = vld [vmem:[%s15545_s16 + $0xee8] sm:$0xff] }
 0xc9f   :  { %7083 = vmatpush.msra.mxu1 %v6506_v7  ;;  %7239 = vmatpush.msra.mxu0 %v6463_v36  ;;  %v6782_v7 = vld [vmem:[%s15545_s16 + $0xf28] sm:$0xff]  ;;  %v6407_v15 = vld [vmem:[%s15545_s16 + $0x370] sm:$0xff] }
 0xca0   :  { %7199 = vmatpush.msra.mxu2 %v6311_v18  ;;  %7120 = vmatpush.msrb.mxu3 %v6670_v21  ;;  %v6630_v36 = vld [vmem:[%s15545_s16 + $0xa68] sm:$0xff]  ;;  %v6587_v18 = vld [vmem:[%s15545_s16 + $0x910] sm:$0xff] }
 0xca1   :  { %7084 = vmatpush.msra.mxu1 %v6502_v12  ;;  %7240 = vmatpush.msra.mxu0 %v6459_v43  ;;  %v6778_v12 = vld [vmem:[%s15545_s16 + $0xf08] sm:$0xff]  ;;  %v6735_v21 = vld [vmem:[%s15545_s16 + $0xdb0] sm:$0xff] }
 0xca2   :  { %7200 = vmatpush.msra.mxu2 %v6307_v33  ;;  %7121 = vmatpush.msrb.mxu3 %v6666_v2  ;;  %v6626_v43 = vld [vmem:[%s15545_s16 + $0xa48] sm:$0xff]  ;;  %v6583_v33 = vld [vmem:[%s15545_s16 + $0x8f0] sm:$0xff] }
 0xca3   :  { %7085 = vmatpush.msra.mxu1 %v6498_v39  ;;  %7241 = vmatpush.msra.mxu0 %v6455_v50  ;;  %v6731_v39 = vld [vmem:[%s15545_s16 + $0xd90] sm:$0xff]  ;;  %v6622_v2 = vld [vmem:[%s15545_s16 + $0xa28] sm:$0xff] }
 0xca4   :  { %7201 = vmatpush.msra.mxu2 %v6303_v11  ;;  %6953 = vmatmul.f32.gmra.mxu3 %v14652_v48  ;;  %v6579_v50 = vld [vmem:[%s15545_s16 + $0x8d0] sm:$0xff]  ;;  %v6770_v11 = vld [vmem:[%s15545_s16 + $0xec8] sm:$0xff] }
 0xca5   :  { %7086 = vmatpush.msra.mxu1 %v6494_v30  ;;  %7122 = vmatpush.msrb.mxu3 %v6662_v22  ;;  %v6727_v30 = vld [vmem:[%s15545_s16 + $0xd70] sm:$0xff]  ;;  %v6618_v9 = vld [vmem:[%s15545_s16 + $0xa08] sm:$0xff] }
 0xca6   :  { %7242 = vmatpush.msra.mxu0 %v6451_v58  ;;  %7202 = vmatpush.msra.mxu2 %v6299_v62  ;;  %v6575_v22 = vld [vmem:[%s15545_s16 + $0x8b0] sm:$0xff]  ;;  %v6766_v58 = vld [vmem:[%s15545_s16 + $0xea8] sm:$0xff] }
 0xca7   :  { %6996 = vmatmul.f32.vlgmr.msrb.gmra.mxu1 %v14663_v24  ;;  %7111 = vmatmul.f32.vlgmr.msrb.gmra.mxu2 %v14205_v23  ;;  %v6423_v62 = vld [vmem:[%s15545_s16 + $0x3f0] sm:$0xff] }
 0xca8   :  { %7087 = vmatpush.msra.mxu1 %v6490_v5  ;;  %7123 = vmatpush.msrb.mxu3 %v6658_v61  ;;  %v6571_v5 = vld [vmem:[%s15545_s16 + $0x890] sm:$0xff]  ;;  %v6762_v61 = vld [vmem:[%s15545_s16 + $0xe88] sm:$0xff] }
 0xca9   :  { %7243 = vmatpush.msra.mxu0 %v6447_v29  ;;  %7279 = vmatpush.msrb.mxu2 %v6615_v38  ;;  %v6419_v29 = vld [vmem:[%s15545_s16 + $0x3d0] sm:$0xff] }
 0xcaa   :  { %7164 = vmatpush.msrb.mxu1 %v6806_v56  ;;  %7124 = vmatpush.msrb.mxu3 %v6654_v25  ;;  %v6719_v38 = vld [vmem:[%s15545_s16 + $0xd30] sm:$0xff]  ;;  %v6758_v25 = vld [vmem:[%s15545_s16 + $0xe68] sm:$0xff] }
 0xcab   :  { %7244 = vmatpush.msra.mxu0 %v6443_v53  ;;  %7280 = vmatpush.msrb.mxu2 %v6611_v46  ;;  %v6567_v56 = vld [vmem:[%s15545_s16 + $0x870] sm:$0xff] }
 0xcac   :  { %7165 = vmatpush.msrb.mxu1 %v6802_v10  ;;  %7125 = vmatpush.msrb.mxu3 %v6650_v60  ;;  %v6415_v53 = vld [vmem:[%s15545_s16 + $0x3b0] sm:$0xff]  ;;  %v6754_v60 = vld [vmem:[%s15545_s16 + $0xe48] sm:$0xff] }
 0xcad   :  { %7245 = vmatpush.msra.mxu0 %v6439_v31  ;;  %7281 = vmatpush.msrb.mxu2 %v6607_v17  ;;  %v6715_v46 = vld [vmem:[%s15545_s16 + $0xd10] sm:$0xff] }
 0xcae   :  { %7166 = vmatpush.msrb.mxu1 %v6798_v55  ;;  %7042 = vmatmul.f32.vlgmr.msra.gmra.mxu3 %v14387_v27  ;;  %v6563_v10 = vld [vmem:[%s15545_s16 + $0x850] sm:$0xff] }
 0xcaf   :  { %7246 = vmatpush.msra.mxu0 %v6435_v0  ;;  %7126 = vmatpush.msrb.mxu3 %v6646_v49  ;;  %v6411_v31 = vld [vmem:[%s15545_s16 + $0x390] sm:$0xff]  ;;  %v6750_v0 = vld [vmem:[%s15545_s16 + $0xe28] sm:$0xff] }
 0xcb0   :  { %7282 = vmatpush.msrb.mxu2 %v6603_v20  ;;  %7167 = vmatpush.msrb.mxu1 %v6794_v28  ;;  %v6711_v17 = vld [vmem:[%s15545_s16 + $0xcf0] sm:$0xff]  ;;  %v6746_v28 = vld [vmem:[%s15545_s16 + $0xe08] sm:$0xff] }
 0xcb1   :  { %7247 = vmatpush.msra.mxu0 %v6431_v51  ;;  %6999 = vmatmul.f32.gmra.mxu1 %v14731_v26  ;;  %v6559_v55 = vld [vmem:[%s15545_s16 + $0x830] sm:$0xff] }
 0xcb2   :  { %7127 = vmatpush.msrb.mxu3 %v6642_v34  ;;  %7283 = vmatpush.msrb.mxu2 %v6599_v37  ;;  %v6707_v49 = vld [vmem:[%s15545_s16 + $0xcd0] sm:$0xff]  ;;  %v6360_v37 = vld [vmem:[%s15545_s16 + $0x1f8] sm:$0xff] }
 0xcb3   :  { %7168 = vmatpush.msrb.mxu1 %v6790_v40  ;;  %7114 = vmatmul.f32.gmra.mxu2 %v14269_v35  ;;  %v6555_v20 = vld [vmem:[%s15545_s16 + $0x810] sm:$0xff] }
 0xcb4   :  { %7128 = vmatpush.msrb.mxu3 %v6638_v45  ;;  %7157 = vmatmul.f32.vlgmr.msrb.gmra.mxu0 %v14275_v19  ;;  %v6403_v51 = vld [vmem:[%s15545_s16 + $0x350] sm:$0xff] }
 0xcb5   :  { %7284 = vmatpush.msrb.mxu2 %v6595_v44  ;;  %7248 = vmatpush.msra.mxu0 %v6427_v8  ;;  %v6703_v34 = vld [vmem:[%s15545_s16 + $0xcb0] sm:$0xff]  ;;  %v6356_v8 = vld [vmem:[%s15545_s16 + $0x1d8] sm:$0xff] }
 0xcb6   :  { %7169 = vmatpush.msrb.mxu1 %v6786_v16  ;;  %7129 = vmatpush.msrb.mxu3 %v6634_v32  ;;  %v6399_v40 = vld [vmem:[%s15545_s16 + $0x330] sm:$0xff] }
 0xcb7   :  { %7325 = vmatpush.msrb.mxu0 %v6743_v59  ;;  %7285 = vmatpush.msrb.mxu2 %v6591_v6  ;;  %v6551_v45 = vld [vmem:[%s15545_s16 + $0x7f0] sm:$0xff]  ;;  %v6352_v6 = vld [vmem:[%s15545_s16 + $0x1b8] sm:$0xff] }
 0xcb8   :  { %7170 = vmatpush.msrb.mxu1 %v6782_v7  ;;  %7045 = vmatmul.f32.gmra.mxu3 %v14429_v3  ;;  %v6699_v44 = vld [vmem:[%s15545_s16 + $0xc90] sm:$0xff] }
 0xcb9   :  { %7326 = vmatpush.msrb.mxu0 %v6739_v54  ;;  %7130 = vmatpush.msrb.mxu3 %v6630_v36  ;;  %v6547_v16 = vld [vmem:[%s15545_s16 + $0x7d0] sm:$0xff] }
 0xcba   :  { %7286 = vmatpush.msrb.mxu2 %v6587_v18  ;;  %7171 = vmatpush.msrb.mxu1 %v6778_v12  ;;  %v6395_v59 = vld [vmem:[%s15545_s16 + $0x310] sm:$0xff]  ;;  %v6348_v18 = vld [vmem:[%s15545_s16 + $0x198] sm:$0xff] }
 0xcbb   :  { %7327 = vmatpush.msrb.mxu0 %v6735_v21  ;;  %7088 = vmatmul.f32.vlgmr.msra.gmra.mxu1 %v14456_v14  ;;  %v6695_v32 = vld [vmem:[%s15545_s16 + $0xc70] sm:$0xff] }
 0xcbc   :  { %7131 = vmatpush.msrb.mxu3 %v6626_v43  ;;  %7287 = vmatpush.msrb.mxu2 %v6583_v33  ;;  %v6543_v7 = vld [vmem:[%s15545_s16 + $0x7b0] sm:$0xff]  ;;  %v6344_v33 = vld [vmem:[%s15545_s16 + $0x178] sm:$0xff] }
 0xcbd   :  { %7172 = vmatpush.msrb.mxu1 %v6774_v41  ;;  %7328 = vmatpush.msrb.mxu0 %v6731_v39  ;;  %v6391_v54 = vld [vmem:[%s15545_s16 + $0x2f0] sm:$0xff] }
 0xcbe   :  { %7132 = vmatpush.msrb.mxu3 %v6622_v2  ;;  %7160 = vmatmul.f32.gmra.mxu0 %v14325_v1  ;;  %v6691_v36 = vld [vmem:[%s15545_s16 + $0xc50] sm:$0xff] }
 0xcbf   :  { %7203 = vmatmul.f32.vlgmr.msra.gmra.mxu2 %v14101_v57  ;;  %7173 = vmatpush.msrb.mxu1 %v6770_v11  ;;  %v6539_v12 = vld [vmem:[%s15545_s16 + $0x790] sm:$0xff] }
 0xcc0   :  { %7288 = vmatpush.msrb.mxu2 %v6579_v50  ;;  %7329 = vmatpush.msrb.mxu0 %v6727_v30  ;;  %v6387_v21 = vld [vmem:[%s15545_s16 + $0x2d0] sm:$0xff]  ;;  %v6340_v50 = vld [vmem:[%s15545_s16 + $0x158] sm:$0xff] }
 0xcc1   :  { %7133 = vmatpush.msrb.mxu3 %v6618_v9  ;;  %7174 = vmatpush.msrb.mxu1 %v6766_v58  ;;  %v6687_v43 = vld [vmem:[%s15545_s16 + $0xc30] sm:$0xff]  ;;  %v6488_v9 = vld [vmem:[%s15545_s16 + $0x5f8] sm:$0xff] }
 0xcc2   :  { %7289 = vmatpush.msrb.mxu2 %v6575_v22  ;;  %7330 = vmatpush.msrb.mxu0 %v6723_v63  ;;  %v6535_v41 = vld [vmem:[%s15545_s16 + $0x770] sm:$0xff]  ;;  %v6336_v22 = vld [vmem:[%s15545_s16 + $0x138] sm:$0xff] }
 0xcc3   :  { %7210 = vmatpush.msra.mxu3 %v6423_v62  ;;  %7175 = vmatpush.msrb.mxu1 %v6762_v61  ;;  %v6383_v39 = vld [vmem:[%s15545_s16 + $0x2b0] sm:$0xff]  ;;  %v6484_v63 = vld [vmem:[%s15545_s16 + $0x5d8] sm:$0xff] }
 0xcc4   :  { %7134 = vmatmul.f32.vlgmr.msrb.gmra.mxu3 %v14595_v42  ;;  %7290 = vmatpush.msrb.mxu2 %v6571_v5  ;;  %v6683_v2 = vld [vmem:[%s15545_s16 + $0xc10] sm:$0xff]  ;;  %v6332_v5 = vld [vmem:[%s15545_s16 + $0x118] sm:$0xff] }
 0xcc5   :  { %7211 = vmatpush.msra.mxu3 %v6419_v29  ;;  %7331 = vmatpush.msrb.mxu0 %v6719_v38  ;;  %v6531_v11 = vld [vmem:[%s15545_s16 + $0x750] sm:$0xff]  ;;  %v6480_v38 = vld [vmem:[%s15545_s16 + $0x5b8] sm:$0xff] }
 0xcc6   :  { %7091 = vmatmul.f32.gmra.mxu1 %v14448_v47  ;;  %7291 = vmatpush.msrb.mxu2 %v6567_v56  ;;  %v6379_v30 = vld [vmem:[%s15545_s16 + $0x290] sm:$0xff]  ;;  %v6328_v56 = vld [vmem:[%s15545_s16 + $0xf8] sm:$0xff] }
 0xcc7   :  { %7176 = vmatpush.msrb.mxu1 %v6758_v25  ;;  %7212 = vmatpush.msra.mxu3 %v6415_v53  ;;  %v6527_v58 = vld [vmem:[%s15545_s16 + $0x730] sm:$0xff] }
 0xcc8   :  { %7332 = vmatpush.msrb.mxu0 %v6715_v46  ;;  %7206 = vmatmul.f32.gmra.mxu2 %v14142_v13  ;;  %v6375_v62 = vld [vmem:[%s15545_s16 + $0x270] sm:$0xff]  ;;  %v6476_v46 = vld [vmem:[%s15545_s16 + $0x598] sm:$0xff] }
 0xcc9   :  { %7249 = vmatmul.f32.vlgmr.msra.gmra.mxu0 %v14174_v52  ;;  %7292 = vmatpush.msrb.mxu2 %v6563_v10  ;;  %v6523_v61 = vld [vmem:[%s15545_s16 + $0x710] sm:$0xff]  ;;  %v6324_v10 = vld [vmem:[%s15545_s16 + $0xd8] sm:$0xff] }
 0xcca   :  { %7177 = vmatpush.msrb.mxu1 %v6754_v60  ;;  %7213 = vmatpush.msra.mxu3 %v6411_v31  ;;  %v6371_v29 = vld [vmem:[%s15545_s16 + $0x250] sm:$0xff]  ;;  %v6472_v31 = vld [vmem:[%s15545_s16 + $0x578] sm:$0xff] }
 0xccb   :  { %7333 = vmatpush.msrb.mxu0 %v6711_v17  ;;  %7293 = vmatpush.msrb.mxu2 %v6559_v55  ;;  %v6519_v25 = vld [vmem:[%s15545_s16 + $0x6f0] sm:$0xff]  ;;  %v6320_v55 = vld [vmem:[%s15545_s16 + $0xb8] sm:$0xff] }
 0xccc   :  { %7178 = vmatpush.msrb.mxu1 %v6750_v0  ;;  %7214 = vmatpush.msra.mxu3 %v6407_v15  ;;  %v6367_v53 = vld [vmem:[%s15545_s16 + $0x230] sm:$0xff] }
 0xccd   :  { %7334 = vmatpush.msrb.mxu0 %v6707_v49  ;;  %7137 = vmatmul.f32.gmra.mxu3 %v14652_v48  ;;  %v6515_v60 = vld [vmem:[%s15545_s16 + $0x6d0] sm:$0xff]  ;;  %v6468_v49 = vld [vmem:[%s15545_s16 + $0x558] sm:$0xff] }
 0xcce   :  { %7294 = vmatpush.msrb.mxu2 %v6555_v20  ;;  %7179 = vmatpush.msrb.mxu1 %v6746_v28  ;;  %v6363_v17 = vld [vmem:[%s15545_s16 + $0x210] sm:$0xff]  ;;  %v6316_v20 = vld [vmem:[%s15545_s16 + $0x98] sm:$0xff] }
 0xccf   :  { %7215 = vmatpush.msra.mxu3 %v6403_v51  ;;  %7335 = vmatpush.msrb.mxu0 %v6703_v34  ;;  %v6511_v0 = vld [vmem:[%s15545_s16 + $0x6b0] sm:$0xff]  ;;  %v6464_v34 = vld [vmem:[%s15545_s16 + $0x538] sm:$0xff] }
 0xcd0   :  { %7371 = vmatpush.msra.mxu2 %v6360_v37  ;;  %7180 = vmatmul.f32.vlgmr.msrb.gmra.mxu1 %v14663_v24  ;;  %v6679_v15 = vld [vmem:[%s15545_s16 + $0xbf0] sm:$0xff]  ;;  %v6312_v37 = vld [vmem:[%s15545_s16 + $0x78] sm:$0xff] }
 0xcd1   :  { %7216 = vmatpush.msra.mxu3 %v6399_v40  ;;  %7256 = vmatpush.msra.mxu1 %v6551_v45  ;;  %v6507_v28 = vld [vmem:[%s15545_s16 + $0x690] sm:$0xff] }
 0xcd2   :  { %7336 = vmatpush.msrb.mxu0 %v6699_v44  ;;  %7372 = vmatpush.msra.mxu2 %v6356_v8  ;;  %v6675_v51 = vld [vmem:[%s15545_s16 + $0xbd0] sm:$0xff]  ;;  %v6460_v44 = vld [vmem:[%s15545_s16 + $0x518] sm:$0xff] }
 0xcd3   :  { %7252 = vmatmul.f32.gmra.mxu0 %v14158_v4  ;;  %7257 = vmatpush.msra.mxu1 %v6547_v16  ;;  %v6503_v40 = vld [vmem:[%s15545_s16 + $0x670] sm:$0xff]  ;;  %v6308_v8 = vld [vmem:[%s15545_s16 + $0x58] sm:$0xff] }
 0xcd4   :  { %7295 = vmatmul.f32.vlgmr.msrb.gmra.mxu2 %v14205_v23  ;;  %7217 = vmatpush.msra.mxu3 %v6395_v59  ;;  %v6671_v45 = vld [vmem:[%s15545_s16 + $0xbb0] sm:$0xff] }
 0xcd5   :  { %7337 = vmatpush.msrb.mxu0 %v6695_v32  ;;  %7373 = vmatpush.msra.mxu2 %v6352_v6  ;;  %v6499_v16 = vld [vmem:[%s15545_s16 + $0x650] sm:$0xff]  ;;  %v6456_v32 = vld [vmem:[%s15545_s16 + $0x4f8] sm:$0xff] }
 0xcd6   :  { %7258 = vmatpush.msra.mxu1 %v6543_v7  ;;  %7218 = vmatpush.msra.mxu3 %v6391_v54  ;;  %v6667_v59 = vld [vmem:[%s15545_s16 + $0xb90] sm:$0xff]  ;;  %v6304_v6 = vld [vmem:[%s15545_s16 + $0x38] sm:$0xff] }
 0xcd7   :  { %7338 = vmatpush.msrb.mxu0 %v6691_v36  ;;  %7374 = vmatpush.msra.mxu2 %v6348_v18  ;;  %v6495_v7 = vld [vmem:[%s15545_s16 + $0x630] sm:$0xff]  ;;  %v6452_v36 = vld [vmem:[%s15545_s16 + $0x4d8] sm:$0xff] }
 0xcd8   :  { %7259 = vmatpush.msra.mxu1 %v6539_v12  ;;  %7219 = vmatpush.msra.mxu3 %v6387_v21  ;;  %v6663_v54 = vld [vmem:[%s15545_s16 + $0xb70] sm:$0xff]  ;;  %v6300_v18 = vld [vmem:[%s15545_s16 + $0x18] sm:$0xff] }
 0xcd9   :  { %7339 = vmatpush.msrb.mxu0 %v6687_v43  ;;  %7375 = vmatpush.msra.mxu2 %v6344_v33  ;;  %v6491_v12 = vld [vmem:[%s15545_s16 + $0x610] sm:$0xff]  ;;  %v6448_v43 = vld [vmem:[%s15545_s16 + $0x4b8] sm:$0xff] }
 0xcda   :  { %7183 = vmatmul.f32.gmra.mxu1 %v14731_v26  ;;  %7220 = vmatpush.msra.mxu3 %v6383_v39  ;;  %v6659_v21 = vld [vmem:[%s15545_s16 + $0xb50] sm:$0xff]  ;;  %v6616_v33 = vld [vmem:[%s15545_s16 + $0x9f8] sm:$0xff] }
 0xcdb   :  { %7260 = vmatpush.msra.mxu1 %v6535_v41  ;;  %7340 = vmatpush.msrb.mxu0 %v6683_v2  ;;  %v6655_v41 = vld [vmem:[%s15545_s16 + $0xb30] sm:$0xff]  ;;  %v6444_v2 = vld [vmem:[%s15545_s16 + $0x498] sm:$0xff] }
 0xcdc   :  { %7376 = vmatpush.msra.mxu2 %v6340_v50  ;;  %7341 = vmatmul.f32.vlgmr.msrb.gmra.mxu0 %v14275_v19  ;;  %v6807_v39 = vld [vmem:[%s15545_s16 + $0xff0] sm:$0xff]  ;;  %v6612_v50 = vld [vmem:[%s15545_s16 + $0x9d8] sm:$0xff] }
 0xcdd   :  { %7261 = vmatpush.msra.mxu1 %v6531_v11  ;;  %7298 = vmatmul.f32.gmra.mxu2 %v14269_v35  ;;  %v6651_v11 = vld [vmem:[%s15545_s16 + $0xb10] sm:$0xff] }
 0xcde   :  { %7221 = vmatpush.msra.mxu3 %v6379_v30  ;;  %7417 = vmatpush.msra.mxu0 %v6488_v9  ;;  %v6440_v30 = vld [vmem:[%s15545_s16 + $0x478] sm:$0xff] }
 0xcdf   :  { %7377 = vmatpush.msra.mxu2 %v6336_v22  ;;  %7262 = vmatpush.msra.mxu1 %v6527_v58  ;;  %v6608_v9 = vld [vmem:[%s15545_s16 + $0x9b8] sm:$0xff]  ;;  %v6647_v22 = vld [vmem:[%s15545_s16 + $0xaf0] sm:$0xff] }
 0xce0   :  { %7222 = vmatpush.msra.mxu3 %v6375_v62  ;;  %7418 = vmatpush.msra.mxu0 %v6484_v63  ;;  %v6799_v58 = vld [vmem:[%s15545_s16 + $0xfb0] sm:$0xff]  ;;  %v6436_v62 = vld [vmem:[%s15545_s16 + $0x458] sm:$0xff] }
 0xce1   :  { %7378 = vmatpush.msra.mxu2 %v6332_v5  ;;  %7263 = vmatpush.msra.mxu1 %v6523_v61  ;;  %v6604_v63 = vld [vmem:[%s15545_s16 + $0x998] sm:$0xff]  ;;  %v6643_v5 = vld [vmem:[%s15545_s16 + $0xad0] sm:$0xff] }
 0xce2   :  { %7223 = vmatpush.msra.mxu3 %v6371_v29  ;;  %7419 = vmatpush.msra.mxu0 %v6480_v38  ;;  %v6795_v61 = vld [vmem:[%s15545_s16 + $0xf90] sm:$0xff]  ;;  %v6432_v29 = vld [vmem:[%s15545_s16 + $0x438] sm:$0xff] }
 0xce3   :  { %7379 = vmatpush.msra.mxu2 %v6328_v56  ;;  %7264 = vmatpush.msra.mxu1 %v6519_v25  ;;  %v6600_v38 = vld [vmem:[%s15545_s16 + $0x978] sm:$0xff]  ;;  %v6639_v56 = vld [vmem:[%s15545_s16 + $0xab0] sm:$0xff] }
 0xce4   :  { %7224 = vmatpush.msra.mxu3 %v6367_v53  ;;  %7420 = vmatpush.msra.mxu0 %v6476_v46  ;;  %v6791_v25 = vld [vmem:[%s15545_s16 + $0xf70] sm:$0xff]  ;;  %v6428_v53 = vld [vmem:[%s15545_s16 + $0x418] sm:$0xff] }
 0xce5   :  { %7380 = vmatpush.msra.mxu2 %v6324_v10  ;;  %7265 = vmatpush.msra.mxu1 %v6515_v60  ;;  %v6596_v46 = vld [vmem:[%s15545_s16 + $0x958] sm:$0xff]  ;;  %v6635_v60 = vld [vmem:[%s15545_s16 + $0xa90] sm:$0xff] }
 0xce6   :  { %7344 = vmatmul.f32.gmra.mxu0 %v14325_v1  ;;  %7225 = vmatpush.msra.mxu3 %v6363_v17  ;;  %v6744_v10 = vld [vmem:[%s15545_s16 + $0xdf8] sm:$0xff]  ;;  %v6783_v17 = vld [vmem:[%s15545_s16 + $0xf30] sm:$0xff] }
 0xce7   :  { %7421 = vmatpush.msra.mxu0 %v6472_v31  ;;  %7381 = vmatpush.msra.mxu2 %v6320_v55  ;;  %v6592_v31 = vld [vmem:[%s15545_s16 + $0x938] sm:$0xff] }
 0xce8   :  { %7226 = vmatmul.f32.vlgmr.msra.gmra.mxu3 %v14387_v27  ;;  %7266 = vmatpush.msra.mxu1 %v6511_v0  ;;  %v6740_v55 = vld [vmem:[%s15545_s16 + $0xdd8] sm:$0xff]  ;;  %v6631_v0 = vld [vmem:[%s15545_s16 + $0xa70] sm:$0xff] }
 0xce9   :  { %7302 = vmatpush.msrb.mxu3 %v6679_v15  ;;  %7422 = vmatpush.msra.mxu0 %v6468_v49  ;;  %v6588_v15 = vld [vmem:[%s15545_s16 + $0x918] sm:$0xff] }
 0xcea   :  { %7382 = vmatpush.msra.mxu2 %v6316_v20  ;;  %7267 = vmatpush.msra.mxu1 %v6507_v28  ;;  %v6736_v49 = vld [vmem:[%s15545_s16 + $0xdb8] sm:$0xff]  ;;  %v6627_v20 = vld [vmem:[%s15545_s16 + $0xa50] sm:$0xff] }
 0xceb   :  { %7303 = vmatpush.msrb.mxu3 %v6675_v51  ;;  %7423 = vmatpush.msra.mxu0 %v6464_v34  ;;  %v6584_v28 = vld [vmem:[%s15545_s16 + $0x8f8] sm:$0xff]  ;;  %v6775_v51 = vld [vmem:[%s15545_s16 + $0xef0] sm:$0xff] }
 0xcec   :  { %7383 = vmatpush.msra.mxu2 %v6312_v37  ;;  %7268 = vmatpush.msra.mxu1 %v6503_v40  ;;  %v6732_v34 = vld [vmem:[%s15545_s16 + $0xd98] sm:$0xff]  ;;  %v6623_v37 = vld [vmem:[%s15545_s16 + $0xa30] sm:$0xff] }
 0xced   :  { %7304 = vmatpush.msrb.mxu3 %v6671_v45  ;;  %7424 = vmatpush.msra.mxu0 %v6460_v44  ;;  %v6580_v40 = vld [vmem:[%s15545_s16 + $0x8d8] sm:$0xff]  ;;  %v6771_v45 = vld [vmem:[%s15545_s16 + $0xed0] sm:$0xff] }
 0xcee   :  { %7384 = vmatpush.msra.mxu2 %v6308_v8  ;;  %7269 = vmatpush.msra.mxu1 %v6499_v16  ;;  %v6728_v44 = vld [vmem:[%s15545_s16 + $0xd78] sm:$0xff]  ;;  %v6619_v8 = vld [vmem:[%s15545_s16 + $0xa10] sm:$0xff]  ;;  %v6836_v16 = vpop.f32.mrf.mxu2 }
 0xcef   :  { %7305 = vmatpush.msrb.mxu3 %v6667_v59  ;;  %7425 = vmatpush.msra.mxu0 %v6456_v32  ;;  %v6576_v59 = vld [vmem:[%s15545_s16 + $0x8b8] sm:$0xff]  ;;  %v6767_v32 = vld [vmem:[%s15545_s16 + $0xeb0] sm:$0xff] }
 0xcf0   :  { %7385 = vmatpush.msra.mxu2 %v6304_v6  ;;  %7229 = vmatmul.f32.gmra.mxu3 %v14429_v3  ;;  %v6424_v6 = vld [vmem:[%s15545_s16 + $0x3f8] sm:$0xff] }
 0xcf1   :  { %7270 = vmatpush.msra.mxu1 %v6495_v7  ;;  %7306 = vmatpush.msrb.mxu3 %v6663_v54  ;;  %v6724_v7 = vld [vmem:[%s15545_s16 + $0xd58] sm:$0xff] }
 0xcf2   :  { %7426 = vmatpush.msra.mxu0 %v6452_v36  ;;  %7386 = vmatpush.msra.mxu2 %v6300_v18  ;;  %v6572_v54 = vld [vmem:[%s15545_s16 + $0x898] sm:$0xff] }
 0xcf3   :  { %7271 = vmatpush.msra.mxu1 %v6491_v12  ;;  %7307 = vmatpush.msrb.mxu3 %v6659_v21  ;;  %v6420_v18 = vld [vmem:[%s15545_s16 + $0x3d8] sm:$0xff] }
 0xcf4   :  { %7387 = vmatmul.f32.vlgmr.msra.gmra.mxu2 %v14101_v57  ;;  %7427 = vmatpush.msra.mxu0 %v6448_v43  ;;  %v6803_v57 = vld [vmem:[%s15545_s16 + $0xfd0] sm:$0xff]  ;;  %v6720_v12 = vld [vmem:[%s15545_s16 + $0xd38] sm:$0xff]  ;;  %v15238_v43 = vpop.f32.mrf.mxu0 }
 0xcf5   :  { %7463 = vmatpush.msrb.mxu2 %v6616_v33  ;;  %7272 = vmatmul.f32.vlgmr.msra.gmra.mxu1 %v14456_v14  ;;  %v6568_v21 = vld [vmem:[%s15545_s16 + $0x878] sm:$0xff]  ;;  %v15243_v33 = vld [vmem:[%s15548_s17] sm:$0xf] }
 0xcf6   :  { %7308 = vmatpush.msrb.mxu3 %v6655_v41  ;;  %7348 = vmatpush.msrb.mxu1 %v6807_v39  ;;  %v6759_v41 = vld [vmem:[%s15545_s16 + $0xe70] sm:$0xff]  ;;  %v6416_v39 = vld [vmem:[%s15545_s16 + $0x3b8] sm:$0xff] }
 0xcf7   :  { %7428 = vmatpush.msra.mxu0 %v6444_v2  ;;  %7464 = vmatpush.msrb.mxu2 %v6612_v50  ;;  %v6716_v2 = vld [vmem:[%s15545_s16 + $0xd18] sm:$0xff] }
 0xcf8   :  { %7309 = vmatpush.msrb.mxu3 %v6651_v11  ;;  %7349 = vmatpush.msrb.mxu1 %v6803_v57  ;;  %v6564_v50 = vld [vmem:[%s15545_s16 + $0x858] sm:$0xff]  ;;  %v6755_v11 = vld [vmem:[%s15545_s16 + $0xe50] sm:$0xff] }
 0xcf9   :  { %7429 = vmatpush.msra.mxu0 %v6440_v30  ;;  %7465 = vmatpush.msrb.mxu2 %v6608_v9  ;;  %v6412_v57 = vld [vmem:[%s15545_s16 + $0x398] sm:$0xff]  ;;  %v6811_v30 = vperm.slane %v15243_v33, 0 }
 0xcfa   :  { %7310 = vmatpush.msrb.mxu3 %v6647_v22  ;;  %7350 = vmatpush.msrb.mxu1 %v6799_v58  ;;  %v6712_v9 = vld [vmem:[%s15545_s16 + $0xcf8] sm:$0xff] }
 0xcfb   :  { %7430 = vmatpush.msra.mxu0 %v6436_v62  ;;  %7466 = vmatpush.msrb.mxu2 %v6604_v63  ;;  %v6560_v22 = vld [vmem:[%s15545_s16 + $0x838] sm:$0xff]  ;;  %v6751_v62 = vld [vmem:[%s15545_s16 + $0xe30] sm:$0xff]  ;;  %v6839_v63 = vpop.f32.mrf.mxu2 }
 0xcfc   :  { %7311 = vmatpush.msrb.mxu3 %v6643_v5  ;;  %7351 = vmatpush.msrb.mxu1 %v6795_v61  ;;  %v6408_v5 = vld [vmem:[%s15545_s16 + $0x378] sm:$0xff] }
 0xcfd   :  { %7390 = vmatmul.f32.gmra.mxu2 %v14142_v13  ;;  %7431 = vmatpush.msra.mxu0 %v6432_v29  ;;  %v6787_v13 = vld [vmem:[%s15545_s16 + $0xf50] sm:$0xff]  ;;  %v6859_v36 = vpop.f32.mrf.mxu3  ;;  %v6708_v61 = vld [vmem:[%s15545_s16 + $0xcd8] sm:$0xff] }
 0xcfe   :  { %7467 = vmatpush.msrb.mxu2 %v6600_v38  ;;  %7275 = vmatmul.f32.gmra.mxu1 %v14448_v47  ;;  %v6556_v29 = vld [vmem:[%s15545_s16 + $0x818] sm:$0xff]  ;;  %v6747_v38 = vld [vmem:[%s15545_s16 + $0xe10] sm:$0xff] }
 0xcff   :  { %7312 = vmatpush.msrb.mxu3 %v6639_v56  ;;  %7352 = vmatpush.msrb.mxu1 %v6791_v25  ;;  %v6837_v56 = vadd.f32 %v6836_v16, %v6811_v30  ;;  %v6404_v25 = vld [vmem:[%s15545_s16 + $0x358] sm:$0xff] }
 0xd00   :  { %7432 = vmatpush.msra.mxu0 %v6428_v53  ;;  %7468 = vmatpush.msrb.mxu2 %v6596_v46  ;;  %v6704_v46 = vld [vmem:[%s15545_s16 + $0xcb8] sm:$0xff] }
 0xd01   :  { %7433 = vmatmul.f32.vlgmr.msra.gmra.mxu0 %v14174_v52  ;;  %7353 = vmatpush.msrb.mxu1 %v6787_v13  ;;  %v6779_v52 = vld [vmem:[%s15545_s16 + $0xf10] sm:$0xff]  ;;  %v6840_v13 = vadd.f32 %v6839_v63, %v6811_v30  ;;  %v6680_v63 = vld [vmem:[%s15545_s16 + $0xbf8] sm:$0xff] }
 0xd02   :  { %7509 = vmatpush.msrb.mxu0 %v6744_v10  ;;  %7313 = vmatpush.msrb.mxu3 %v6635_v60  ;;  %v6552_v10 = vld [vmem:[%s15545_s16 + $0x7f8] sm:$0xff]  ;;  %v6885_v60 = vpop.f32.mrf.mxu0 }
 0xd03   :  { %7469 = vmatpush.msrb.mxu2 %v6592_v31  ;;  %7354 = vmatpush.msrb.mxu1 %v6783_v17  ;;  %v15270_v58 = vpop.f32.mrf.mxu1  ;;  %v6400_v31 = vld [vmem:[%s15545_s16 + $0x338] sm:$0xff] }
 0xd04   :  { %7510 = vmatpush.msrb.mxu0 %v6740_v55  ;;  %7314 = vmatpush.msrb.mxu3 %v6631_v0  ;;  %v6700_v17 = vld [vmem:[%s15545_s16 + $0xc98] sm:$0xff] }
 0xd05   :  { %7470 = vmatpush.msrb.mxu2 %v6588_v15  ;;  %7355 = vmatpush.msrb.mxu1 %v6779_v52  ;;  %v6862_v53 = vpop.f32.mrf.mxu3  ;;  %v6548_v55 = vld [vmem:[%s15545_s16 + $0x7d8] sm:$0xff]  ;;  %v6860_v15 = vadd.f32 %v6859_v36, %v6837_v56 }
 0xd06   :  { %7511 = vmatpush.msrb.mxu0 %v6736_v49  ;;  %7315 = vmatpush.msrb.mxu3 %v6627_v20  ;;  %v6396_v0 = vld [vmem:[%s15545_s16 + $0x318] sm:$0xff]  ;;  %v6863_v20 = vadd.f32 %v6862_v53, %v6840_v13 }
 0xd07   :  { %7471 = vmatpush.msrb.mxu2 %v6584_v28  ;;  %7356 = vmatpush.msrb.mxu1 %v6775_v51  ;;  %v6544_v52 = vld [vmem:[%s15545_s16 + $0x7b8] sm:$0xff] }
 0xd08   :  { %7512 = vmatpush.msrb.mxu0 %v6732_v34  ;;  %7316 = vmatpush.msrb.mxu3 %v6623_v37  ;;  %v6392_v49 = vld [vmem:[%s15545_s16 + $0x2f8] sm:$0xff]  ;;  %v6928_v34 = vpop.f32.mrf.mxu2  ;;  %v6886_v16 = vadd.f32 %v6885_v60, %v6863_v20 }
 0xd09   :  { %7472 = vmatpush.msrb.mxu2 %v6580_v40  ;;  %7357 = vmatpush.msrb.mxu1 %v6771_v45  ;;  %v6692_v51 = vld [vmem:[%s15545_s16 + $0xc58] sm:$0xff]  ;;  %v6883_v45 = vadd.f32 %v15238_v43, %v6860_v15 }
 0xd0a   :  { %7436 = vmatmul.f32.gmra.mxu0 %v14158_v4  ;;  %7317 = vmatpush.msrb.mxu3 %v6619_v8  ;;  %v6763_v4 = vld [vmem:[%s15545_s16 + $0xe90] sm:$0xff]  ;;  %v6540_v37 = vld [vmem:[%s15545_s16 + $0x798] sm:$0xff] }
 0xd0b   :  { %7513 = vmatpush.msrb.mxu0 %v6728_v44  ;;  %7473 = vmatpush.msrb.mxu2 %v6576_v59  ;;  %v6388_v40 = vld [vmem:[%s15545_s16 + $0x2d8] sm:$0xff]  ;;  %v6906_v36 = vadd.f32 %v15270_v58, %v6883_v45 }
 0xd0c   :  { %7318 = vmatmul.f32.vlgmr.msrb.gmra.mxu3 %v14595_v42  ;;  %7358 = vmatpush.msrb.mxu1 %v6767_v32  ;;  %v6688_v44 = vld [vmem:[%s15545_s16 + $0xc38] sm:$0xff] }
 0xd0d   :  { %7394 = vmatpush.msra.mxu3 %v6424_v6  ;;  %7514 = vmatpush.msrb.mxu0 %v6724_v7  ;;  %v6384_v8 = vld [vmem:[%s15545_s16 + $0x2b8] sm:$0xff]  ;;  %v6974_v7 = vpop.f32.mrf.mxu0  ;;  %v6929_v43 = vadd.f32 %v6928_v34, %v6906_v36 }
 0xd0e   :  { %7474 = vmatpush.msrb.mxu2 %v6572_v54  ;;  %7359 = vmatpush.msrb.mxu1 %v6763_v4  ;;  %v6536_v32 = vld [vmem:[%s15545_s16 + $0x778] sm:$0xff] }
 0xd0f   :  { %7395 = vmatpush.msra.mxu3 %v6420_v18  ;;  %7515 = vmatpush.msrb.mxu0 %v6720_v12  ;;  %v6684_v6 = vld [vmem:[%s15545_s16 + $0xc18] sm:$0xff] }
 0xd10   :  { %7475 = vmatpush.msrb.mxu2 %v6568_v21  ;;  %7360 = vmatpush.msrb.mxu1 %v6759_v41  ;;  %v6380_v54 = vld [vmem:[%s15545_s16 + $0x298] sm:$0xff] }
 0xd11   :  { %7396 = vmatpush.msra.mxu3 %v6416_v39  ;;  %7516 = vmatpush.msrb.mxu0 %v6716_v2  ;;  %v6532_v4 = vld [vmem:[%s15545_s16 + $0x758] sm:$0xff]  ;;  %v6931_v2 = vpop.f32.mrf.mxu2 }
 0xd12   :  { %7476 = vmatpush.msrb.mxu2 %v6564_v50  ;;  %7361 = vmatpush.msrb.mxu1 %v6755_v11  ;;  %v6528_v12 = vld [vmem:[%s15545_s16 + $0x738] sm:$0xff] }
 0xd13   :  { %7397 = vmatpush.msra.mxu3 %v6412_v57  ;;  %7517 = vmatpush.msrb.mxu0 %v6712_v9  ;;  %v6372_v21 = vld [vmem:[%s15545_s16 + $0x258] sm:$0xff] }
 0xd14   :  { %7477 = vmatpush.msrb.mxu2 %v6560_v22  ;;  %7321 = vmatmul.f32.gmra.mxu3 %v14652_v48  ;;  %v6524_v39 = vld [vmem:[%s15545_s16 + $0x718] sm:$0xff] }
 0xd15   :  { %7362 = vmatpush.msrb.mxu1 %v6751_v62  ;;  %7398 = vmatpush.msra.mxu3 %v6408_v5  ;;  %v6520_v57 = vld [vmem:[%s15545_s16 + $0x6f8] sm:$0xff]  ;;  %v6977_v62 = vpop.f32.mrf.mxu0 }
 0xd16   :  { %7518 = vmatpush.msrb.mxu0 %v6708_v61  ;;  %7478 = vmatpush.msrb.mxu2 %v6556_v29  ;;  %v6364_v9 = vld [vmem:[%s15545_s16 + $0x218] sm:$0xff] }
 0xd17   :  { %7363 = vmatpush.msrb.mxu1 %v6747_v38  ;;  %7399 = vmatpush.msra.mxu3 %v6404_v25  ;;  %v6516_v58 = vld [vmem:[%s15545_s16 + $0x6d8] sm:$0xff] }
 0xd18   :  { %7479 = vmatmul.f32.vlgmr.msrb.gmra.mxu2 %v14205_v23  ;;  %7519 = vmatpush.msrb.mxu0 %v6704_v46  ;;  %v6696_v23 = vld [vmem:[%s15545_s16 + $0xc78] sm:$0xff] }
 0xd19   :  { %7364 = vmatmul.f32.vlgmr.msrb.gmra.mxu1 %v14663_v24  ;;  %7400 = vmatpush.msra.mxu3 %v6400_v31  ;;  %v6512_v61 = vld [vmem:[%s15545_s16 + $0x6b8] sm:$0xff]  ;;  %v7020_v13 = vpop.f32.mrf.mxu2 }
 0xd1a   :  { %7440 = vmatpush.msra.mxu1 %v6552_v10  ;;  %7520 = vmatpush.msrb.mxu0 %v6700_v17  ;;  %v6676_v38 = vld [vmem:[%s15545_s16 + $0xbd8] sm:$0xff] }
 0xd1b   :  { %v6908_v28 = vpop.f32.mrf.mxu1  ;;  %7401 = vmatpush.msra.mxu3 %v6396_v0  ;;  %v6508_v56 = vld [vmem:[%s15545_s16 + $0x698] sm:$0xff] }
 0xd1c   :  { %7441 = vmatpush.msra.mxu1 %v6548_v55  ;;  %7521 = vmatpush.msrb.mxu0 %v6696_v23  ;;  %v6909_v18 = vadd.f32 %v6908_v28, %v6886_v16  ;;  %v6668_v10 = vld [vmem:[%s15545_s16 + $0xb98] sm:$0xff] }
 0xd1d   :  { %7402 = vmatpush.msra.mxu3 %v6392_v49  ;;  %v6500_v60 = vld [vmem:[%s15545_s16 + $0x658] sm:$0xff]  ;;  %v7066_v20 = vpop.f32.mrf.mxu0 }
 0xd1e   :  { %7442 = vmatpush.msra.mxu1 %v6544_v52  ;;  %7522 = vmatpush.msrb.mxu0 %v6692_v51  ;;  %v6951_v59 = vpop.f32.mrf.mxu3  ;;  %v6932_v11 = vadd.f32 %v6931_v2, %v6909_v18  ;;  %v6664_v17 = vld [vmem:[%s15545_s16 + $0xb78] sm:$0xff] }
 0xd1f   :  { %7403 = vmatpush.msra.mxu3 %v6388_v40  ;;  %v6952_v50 = vadd.f32 %v6951_v59, %v6929_v43  ;;  %v6496_v0 = vld [vmem:[%s15545_s16 + $0x638] sm:$0xff] }
 0xd20   :  { %7443 = vmatpush.msra.mxu1 %v6540_v37  ;;  %7482 = vmatmul.f32.gmra.mxu2 %v14269_v35  ;;  %v6376_v35 = vld [vmem:[%s15545_s16 + $0x278] sm:$0xff]  ;;  %v6812_v37 = vperm.slane %v15243_v33, 1 }
 0xd21   :  { %7523 = vmatpush.msrb.mxu0 %v6688_v44  ;;  %7367 = vmatmul.f32.gmra.mxu1 %v14731_v26  ;;  %v6975_v5 = vadd.f32 %v6974_v7, %v6952_v50  ;;  %v6660_v23 = vld [vmem:[%s15545_s16 + $0xb58] sm:$0xff]  ;;  %v7023_v45 = vpop.f32.mrf.mxu2 }
 0xd22   :  { %7404 = vmatpush.msra.mxu3 %v6384_v8  ;;  %7444 = vmatpush.msra.mxu1 %v6536_v32  ;;  %v6492_v49 = vld [vmem:[%s15545_s16 + $0x618] sm:$0xff]  ;;  %v7021_v59 = vadd.f32 %v7020_v13, %v6812_v37  ;;  %v7024_v18 = vadd.f32 %v7023_v45, %v6812_v37 }
 0xd23   :  { %7524 = vmatpush.msrb.mxu0 %v6684_v6  ;;  %v6656_v28 = vld [vmem:[%s15545_s16 + $0xb38] sm:$0xff] }
 0xd24   :  { %7525 = vmatmul.f32.vlgmr.msrb.gmra.mxu0 %v14275_v19  ;;  %7405 = vmatpush.msra.mxu3 %v6380_v54  ;;  %v6997_v41 = vpop.f32.mrf.mxu1  ;;  %v6368_v19 = vld [vmem:[%s15545_s16 + $0x238] sm:$0xff] }
 0xd25   :  { %7445 = vmatpush.msra.mxu1 %v6532_v4  ;;  %v6998_v25 = vadd.f32 %v6997_v41, %v6975_v5  ;;  %v6652_v34 = vld [vmem:[%s15545_s16 + $0xb18] sm:$0xff]  ;;  %v7069_v4 = vpop.f32.mrf.mxu0 }
 0xd26   :  { %7406 = vmatpush.msra.mxu3 %v6376_v35  ;;  %v6804_v40 = vld [vmem:[%s15545_s16 + $0xfd8] sm:$0xff] }
 0xd27   :  { %7446 = vmatpush.msra.mxu1 %v6528_v12  ;;  %v6954_v30 = vpop.f32.mrf.mxu3  ;;  %v7563_v55 = vmul.f32 0.01, %v6998_v25  ;;  %vm7555_vm9 = vcmp.gt.f32.partialorder %v6998_v25, 0.0  ;;  %v6648_v44 = vld [vmem:[%s15545_s16 + $0xaf8] sm:$0xff] }
 0xd28   :  { %7407 = vmatpush.msra.mxu3 %v6372_v21  ;;  %v6955_v22 = vadd.f32 %v6954_v30, %v6932_v11  ;;  %v6800_v8 = vld [vmem:[%s15545_s16 + $0xfb8] sm:$0xff] }
 0xd29   :  { %7447 = vmatpush.msra.mxu1 %v6524_v39  ;;  %v7571_v51 = vsel %vm7555_vm9, %v6998_v25, %v7563_v55  ;;  %v6796_v32 = vld [vmem:[%s15545_s16 + $0xf98] sm:$0xff] }
 0xd2a   :  { %7408 = vmatpush.msra.mxu3 %v6368_v19  ;;  %v6978_v29 = vadd.f32 %v6977_v62, %v6955_v22  ;;  %v6640_v6 = vld [vmem:[%s15545_s16 + $0xab8] sm:$0xff]  ;;  %v7112_v2 = vpop.f32.mrf.mxu2 }
 0xd2b   :  { %7448 = vmatpush.msra.mxu1 %v6520_v57  ;;  %v6792_v54 = vld [vmem:[%s15545_s16 + $0xf78] sm:$0xff] }
 0xd2c   :  { %7528 = vmatmul.f32.gmra.mxu0 %v14325_v1  ;;  %7409 = vmatpush.msra.mxu3 %v6364_v9  ;;  %v6672_v1 = vld [vmem:[%s15545_s16 + $0xbb8] sm:$0xff] }
 0xd2d   :  { %7449 = vmatpush.msra.mxu1 %v6516_v58  ;;  %7410 = vmatmul.f32.vlgmr.msra.gmra.mxu3 %v14387_v27  ;;  %v6504_v27 = vld [vmem:[%s15545_s16 + $0x678] sm:$0xff] }
 0xd2e   :  { %7486 = vmatpush.msrb.mxu3 %v6680_v63  ;;  %v7000_v53 = vpop.f32.mrf.mxu1  ;;  %v6636_v35 = vld [vmem:[%s15545_s16 + $0xa98] sm:$0xff] }
 0xd2f   :  { %7450 = vmatpush.msra.mxu1 %v6512_v61  ;;  %v7001_v46 = vadd.f32 %v7000_v53, %v6978_v29  ;;  %v6788_v12 = vld [vmem:[%s15545_s16 + $0xf58] sm:$0xff] }
 0xd30   :  { %7487 = vmatpush.msrb.mxu3 %v6676_v38  ;;  %v6632_v21 = vld [vmem:[%s15545_s16 + $0xa78] sm:$0xff] }
 0xd31   :  { %7451 = vmatpush.msra.mxu1 %v6508_v56  ;;  %vm7559_vm8 = vcmp.gt.f32.partialorder %v7001_v46, 0.0  ;;  %v7567_v31 = vmul.f32 0.01, %v7001_v46  ;;  %v7043_v52 = vpop.f32.mrf.mxu3  ;;  %v6784_v43 = vld [vmem:[%s15545_s16 + $0xf38] sm:$0xff]  ;;  %v7158_v58 = vpop.f32.mrf.mxu0 }
 0xd32   :  { %7488 = vmatpush.msrb.mxu3 %v6672_v1  ;;  %v7044_v36 = vadd.f32 %v7043_v52, %v7021_v59  ;;  %v6780_v19 = vld [vmem:[%s15545_s16 + $0xf18] sm:$0xff] }
 0xd33   :  { %7452 = vmatpush.msra.mxu1 %v6504_v27  ;;  %v7575_v15 = vsel %vm7559_vm8, %v7001_v46, %v7567_v31  ;;  %v6624_v11 = vld [vmem:[%s15545_s16 + $0xa38] sm:$0xff] }
 0xd34   :  { %7489 = vmatpush.msrb.mxu3 %v6668_v10  ;;  %7779 = vmatpush.msk.msra.mxu2 %vm4244_vm14, %v7575_v15  ;;  %v7067_v41 = vadd.f32 %v7066_v20, %v7044_v36  ;;  %v6776_v9 = vld [vmem:[%s15545_s16 + $0xef8] sm:$0xff] }
 0xd35   :  { %7453 = vmatpush.msra.mxu1 %v6500_v60  ;;  %7413 = vmatmul.f32.gmra.mxu3 %v14429_v3  ;;  %v6808_v3 = vld [vmem:[%s15545_s16 + $0xff8] sm:$0xff] }
 0xd36   :  { %7490 = vmatpush.msrb.mxu3 %v6664_v17  ;;  %7611 = vmatpush.msra.mxu2 %v7571_v51  ;;  %v6620_v62 = vld [vmem:[%s15545_s16 + $0xa18] sm:$0xff]  ;;  %v7115_v25 = vpop.f32.mrf.mxu2 }
 0xd37   :  { %7454 = vmatpush.msra.mxu1 %v6496_v0  ;;  %v6772_v63 = vld [vmem:[%s15545_s16 + $0xed8] sm:$0xff] }
 0xd38   :  { %7491 = vmatpush.msrb.mxu3 %v6660_v23  ;;  %v7089_v16 = vpop.f32.mrf.mxu1  ;;  %v6768_v5 = vld [vmem:[%s15545_s16 + $0xeb8] sm:$0xff] }
 0xd39   :  { %7455 = vmatpush.msra.mxu1 %v6492_v49  ;;  %v7090_v30 = vadd.f32 %v7089_v16, %v7067_v41  ;;  %v6764_v38 = vld [vmem:[%s15545_s16 + $0xe98] sm:$0xff] }
 0xd3a   :  { %7456 = vmatmul.f32.vlgmr.msra.gmra.mxu1 %v14456_v14  ;;  %7492 = vmatpush.msrb.mxu3 %v6656_v28  ;;  %v6644_v14 = vld [vmem:[%s15545_s16 + $0xad8] sm:$0xff] }
 0xd3b   :  { %7532 = vmatpush.msrb.mxu1 %v6808_v3  ;;  %v7046_v7 = vpop.f32.mrf.mxu3  ;;  %v7113_v29 = vadd.f32 %v7112_v2, %v7090_v30  ;;  %v6760_v53 = vld [vmem:[%s15545_s16 + $0xe78] sm:$0xff]  ;;  %v7161_v60 = vpop.f32.mrf.mxu0 }
 0xd3c   :  { %7493 = vmatpush.msrb.mxu3 %v6652_v34  ;;  %v7047_v39 = vadd.f32 %v7046_v7, %v7024_v18  ;;  %v6756_v13 = vld [vmem:[%s15545_s16 + $0xe58] sm:$0xff]  ;;  %v6813_v34 = vperm.slane %v15243_v33, 2 }
 0xd3d   :  { %7533 = vmatpush.msrb.mxu1 %v6804_v40  ;;  %v6752_v31 = vld [vmem:[%s15545_s16 + $0xe38] sm:$0xff] }
 0xd3e   :  { %7494 = vmatpush.msrb.mxu3 %v6648_v44  ;;  %v7070_v22 = vadd.f32 %v7069_v4, %v7047_v39  ;;  %v6748_v55 = vld [vmem:[%s15545_s16 + $0xe18] sm:$0xff] }
 0xd3f   :  { %7534 = vmatpush.msrb.mxu1 %v6800_v8 }
 0xd40   :  { %7495 = vmatpush.msrb.mxu3 %v6644_v14 }
 0xd41   :  { %7535 = vmatpush.msrb.mxu1 %v6796_v32 }
 0xd42   :  { %7459 = vmatmul.f32.gmra.mxu1 %v14448_v47  ;;  %7496 = vmatpush.msrb.mxu3 %v6640_v6  ;;  %v6628_v47 = vld [vmem:[%s15545_s16 + $0xa58] sm:$0xff] }
 0xd43   :  { %7536 = vmatpush.msrb.mxu1 %v6792_v54  ;;  %v7092_v50 = vpop.f32.mrf.mxu1 }
 0xd44   :  { %7497 = vmatpush.msrb.mxu3 %v6636_v35  ;;  %v7093_v61 = vadd.f32 %v7092_v50, %v7070_v22 }
 0xd45   :  { %7537 = vmatpush.msrb.mxu1 %v6788_v12 }
 0xd46   :  { %7498 = vmatpush.msrb.mxu3 %v6632_v21  ;;  %v7116_v27 = vadd.f32 %v7115_v25, %v7093_v61  ;;  %v7250_v3 = vpop.f32.mrf.mxu0  ;;  %v6814_v61 = vperm.slane %v15243_v33, 3 }
 0xd47   :  { %7538 = vmatpush.msrb.mxu1 %v6784_v43  ;;  %v7135_v57 = vpop.f32.mrf.mxu3 }
 0xd48   :  { %7499 = vmatpush.msrb.mxu3 %v6628_v47  ;;  %v7136_v56 = vadd.f32 %v7135_v57, %v7113_v29 }
 0xd49   :  { %7539 = vmatpush.msrb.mxu1 %v6780_v19 }
 0xd4a   :  { %7500 = vmatpush.msrb.mxu3 %v6624_v11 }
 0xd4b   :  { %7540 = vmatpush.msrb.mxu1 %v6776_v9 }
 0xd4c   :  { %7501 = vmatpush.msrb.mxu3 %v6620_v62 }
 0xd4d   :  { %7541 = vmatpush.msrb.mxu1 %v6772_v63  ;;  %7502 = vmatmul.f32.vlgmr.msrb.gmra.mxu3 %v14595_v42  ;;  %v7181_v1 = vpop.f32.mrf.mxu1  ;;  %v7159_v42 = vadd.f32 %v7158_v58, %v7136_v56 }
 0xd4f   :  { %7542 = vmatpush.msrb.mxu1 %v6768_v5  ;;  %v7182_v0 = vadd.f32 %v7181_v1, %v7159_v42  ;;  %v7579_v1 = vld [vmem:[%s15549_s20] sm:$0x3f] }
 0xd50   :  { %v7138_v46 = vpop.f32.mrf.mxu3  ;;  %v7253_v16 = vpop.f32.mrf.mxu0  ;;  %7780 = vmatmul.msk.f32.vlgmr.msra.gmra.mxu2 %vm7580_vm15, %v7579_v1 }
 0xd51   :  { %7543 = vmatpush.msrb.mxu1 %v6764_v38  ;;  %v7139_v10 = vadd.f32 %v7138_v46, %v7116_v27  ;;  %v7564_v52 = vmul.f32 0.01, %v7182_v0  ;;  %vm7556_vm11 = vcmp.gt.f32.partialorder %v7182_v0, 0.0 }
 0xd53   :  { %7544 = vmatpush.msrb.mxu1 %v6760_v53  ;;  %v7162_v17 = vadd.f32 %v7161_v60, %v7139_v10  ;;  %v7572_v28 = vsel %vm7556_vm11, %v7182_v0, %v7564_v52 }
 0xd55   :  { %7545 = vmatpush.msrb.mxu1 %v6756_v13  ;;  %7505 = vmatmul.f32.gmra.mxu3 %v14652_v48  ;;  %v7204_v48 = vpop.f32.mrf.mxu2 }
 0xd56   :  { %v7205_v45 = vadd.f32 %v7204_v48, %v6813_v34 }
 0xd57   :  { %7546 = vmatpush.msrb.mxu1 %v6752_v31  ;;  %v7184_v15 = vpop.f32.mrf.mxu1 }
 0xd58   :  { %v7185_v23 = vadd.f32 %v7184_v15, %v7162_v17 }
 0xd59   :  { %7547 = vmatpush.msrb.mxu1 %v6748_v55 }
 0xd5a   :  { %7548 = vmatmul.f32.vlgmr.msrb.gmra.mxu1 %v14663_v24  ;;  %vm7560_vm10 = vcmp.gt.f32.partialorder %v7185_v23, 0.0  ;;  %v7568_v49 = vmul.f32 0.01, %v7185_v23 }
 0xd5c   :  { %v7576_v20 = vsel %vm7560_vm10, %v7185_v23, %v7568_v49 }
 0xd5d   :  { %7781 = vmatpush.msk.msra.mxu3 %vm4244_vm14, %v7576_v20  ;;  %v7207_v37 = vpop.f32.mrf.mxu2 }
 0xd5e   :  { %v7208_v8 = vadd.f32 %v7207_v37, %v6813_v34 }
 0xd5f   :  { %7631 = vmatpush.msra.mxu3 %v7572_v28 }
 0xd60   :  { %7782 = vmatmul.msk.f32.vlgmr.msra.gmra.mxu3 %vm7580_vm15, %v7579_v1 }
 0xd62   :  { %7551 = vmatmul.f32.gmra.mxu1 %v14731_v26  ;;  %v7342_v26 = vpop.f32.mrf.mxu0 }
 0xd65   :  { %v7296_v59 = vpop.f32.mrf.mxu2 }
 0xd6a   :  { %v7345_v47 = vpop.f32.mrf.mxu0 }
 0xd6b   :  { %v7227_v51 = vpop.f32.mrf.mxu3 }
 0xd6c   :  { %v7228_v44 = vadd.f32 %v7227_v51, %v7205_v45 }
 0xd6d   :  { %v7299_v18 = vpop.f32.mrf.mxu2 }
 0xd6e   :  { %v7251_v32 = vadd.f32 %v7250_v3, %v7228_v44 }
 0xd72   :  { %v7273_v40 = vpop.f32.mrf.mxu1 }
 0xd73   :  { %v7230_v24 = vpop.f32.mrf.mxu3  ;;  %v7274_v36 = vadd.f32 %v7273_v40, %v7251_v32 }
 0xd74   :  { %v7231_v14 = vadd.f32 %v7230_v24, %v7208_v8 }
 0xd75   :  { %v7297_v35 = vadd.f32 %v7296_v59, %v7274_v36  ;;  %v7702_v59 = vld [vmem:[%s15551_s19] sm:$0xf] }
 0xd76   :  { %v7254_v7 = vadd.f32 %v7253_v16, %v7231_v14  ;;  %v7688_v14 = vld [vmem:[%s15550_s18] sm:$0xf] }
 0xd77   :  { %v7388_v62 = vpop.f32.mrf.mxu2 }
 0xd78   :  { %v7389_v56 = vadd.f32 %v7388_v62, %v6814_v61 }
 0xd7b   :  { %v7276_v6 = vpop.f32.mrf.mxu1 }
 0xd7c   :  { %v7277_v4 = vadd.f32 %v7276_v6, %v7254_v7  ;;  %v7690_v6 = vperm.slane %v7688_v14, 0 }
 0xd7e   :  { %v7300_v43 = vadd.f32 %v7299_v18, %v7277_v4  ;;  %v7434_v5 = vpop.f32.mrf.mxu0  ;;  %v7704_v4 = vperm.slane %v7702_v59, 0 }
 0xd80   :  { %v7391_v29 = vpop.f32.mrf.mxu2 }
 0xd81   :  { %v7392_v27 = vadd.f32 %v7391_v29, %v6814_v61  ;;  %v7707_v61 = vperm.slane %v7702_v59, 3 }
 0xd87   :  { %v7437_v46 = vpop.f32.mrf.mxu0 }
 0xd8f   :  { %v7319_v54 = vpop.f32.mrf.mxu3 }
 0xd90   :  { %v7320_v12 = vadd.f32 %v7319_v54, %v7297_v35  ;;  %v7691_v54 = vperm.slane %v7688_v14, 1  ;;  %v7705_v35 = vperm.slane %v7702_v59, 1 }
 0xd92   :  { %v7343_v2 = vadd.f32 %v7342_v26, %v7320_v12 }
 0xd96   :  { %v7365_v21 = vpop.f32.mrf.mxu1 }
 0xd97   :  { %v7322_v41 = vpop.f32.mrf.mxu3  ;;  %v7366_v50 = vadd.f32 %v7365_v21, %v7343_v2 }
 0xd98   :  { %v7323_v39 = vadd.f32 %v7322_v41, %v7300_v43 }
 0xd99   :  { %v7565_v30 = vmul.f32 0.01, %v7366_v50  ;;  %vm7557_vm13 = vcmp.gt.f32.partialorder %v7366_v50, 0.0 }
 0xd9a   :  { %v7346_v19 = vadd.f32 %v7345_v47, %v7323_v39 }
 0xd9b   :  { %v7573_v58 = vsel %vm7557_vm13, %v7366_v50, %v7565_v30  ;;  %v7480_v42 = vpop.f32.mrf.mxu2  ;;  %v7692_v50 = vperm.slane %v7688_v14, 2 }
 0xd9e   :  { %v7368_v11 = vpop.f32.mrf.mxu1 }
 0xd9f   :  { %v7369_v57 = vadd.f32 %v7368_v11, %v7346_v19 }
 0xda1   :  { %vm7561_vm12 = vcmp.gt.f32.partialorder %v7369_v57, 0.0  ;;  %v7569_v9 = vmul.f32 0.01, %v7369_v57  ;;  %v7526_v55 = vpop.f32.mrf.mxu0 }
 0xda3   :  { %v7577_v22 = vsel %vm7561_vm12, %v7369_v57, %v7569_v9  ;;  %v7483_v23 = vpop.f32.mrf.mxu2  ;;  %v7706_v57 = vperm.slane %v7702_v59, 2 }
 0xda4   :  { %7783 = vmatpush.msk.msrb.mxu2 %vm4244_vm14, %v7577_v22 }
 0xda6   :  { %7651 = vmatpush.msrb.mxu2 %v7573_v58 }
 0xda7   :  { %7784 = vmatmul.msk.f32.vlgmr.msrb.gmra.mxu2 %vm7580_vm15, %v7579_v1 }
 0xda9   :  { %v7529_v3 = vpop.f32.mrf.mxu0 }
 0xdb0   :  { %v7411_v63 = vpop.f32.mrf.mxu3 }
 0xdb1   :  { %v7412_v25 = vadd.f32 %v7411_v63, %v7389_v56  ;;  %v7693_v63 = vperm.slane %v7688_v14, 3 }
 0xdb3   :  { %v7435_v10 = vadd.f32 %v7434_v5, %v7412_v25 }
 0xdb7   :  { %v7457_v38 = vpop.f32.mrf.mxu1 }
 0xdb8   :  { %v7414_v53 = vpop.f32.mrf.mxu3  ;;  %v7458_v31 = vadd.f32 %v7457_v38, %v7435_v10 }
 0xdb9   :  { %v7415_v13 = vadd.f32 %v7414_v53, %v7392_v27 }
 0xdba   :  { %v7481_v15 = vadd.f32 %v7480_v42, %v7458_v31 }
 0xdbb   :  { %v7438_v33 = vadd.f32 %v7437_v46, %v7415_v13 }
 0xdbf   :  { %v7460_v60 = vpop.f32.mrf.mxu1 }
 0xdc0   :  { %v7461_v0 = vadd.f32 %v7460_v60, %v7438_v33 }
 0xdc2   :  { %v7484_v20 = vadd.f32 %v7483_v23, %v7461_v0 }
 0xdd0   :  { %v7503_v17 = vpop.f32.mrf.mxu3 }
 0xdd1   :  { %v7504_v52 = vadd.f32 %v7503_v17, %v7481_v15 }
 0xdd3   :  { %v7527_v51 = vadd.f32 %v7526_v55, %v7504_v52  ;;  %v7613_v32 = vpop.f32.mrf.mxu2 }
 0xdd4   :  { %vm7676_vm2 = vcmp.gt.f32.partialorder %v7613_v32, 0.0  ;;  %v7680_v36 = vmul.f32 0.01, %v7613_v32 }
 0xdd6   :  { %v7684_v18 = vsel %vm7676_vm2, %v7613_v32, %v7680_v36 }
 0xdd7   :  { %v7549_v49 = vpop.f32.mrf.mxu1  ;;  %v7698_v21 = vmul.f32 %v7690_v6, %v7684_v18 }
 0xdd8   :  { %v7506_v28 = vpop.f32.mrf.mxu3  ;;  %v7550_v37 = vadd.f32 %v7549_v49, %v7527_v51 }
 0xdd9   :  { %v7507_v48 = vadd.f32 %v7506_v28, %v7484_v20  ;;  %v7712_v41 = vadd.f32 %v7704_v4, %v7698_v21 }
 0xdda   :  { %v7566_v24 = vmul.f32 0.01, %v7550_v37  ;;  %vm7558_vm1 = vcmp.gt.f32.partialorder %v7550_v37, 0.0 }
 0xddb   :  { %v7530_v34 = vadd.f32 %v7529_v3, %v7507_v48  ;;  %v7716_v2 = vmax.f32 %v7712_v41, 0.0 }
 0xddc   :  { %v7574_v16 = vsel %vm7558_vm1, %v7550_v37, %v7566_v24 }
 0xddd   :  { %7720 = vst [vmem:[%s15552_s21] sm:$0x3f] %v7716_v2 }
 0xddf   :  { %v7552_v40 = vpop.f32.mrf.mxu1 }
 0xde0   :  { %v7553_v45 = vadd.f32 %v7552_v40, %v7530_v34 }
 0xde2   :  { %vm7562_vm0 = vcmp.gt.f32.partialorder %v7553_v45, 0.0  ;;  %v7570_v44 = vmul.f32 0.01, %v7553_v45 }
 0xde3   :  { %v7633_v7 = vpop.f32.mrf.mxu3 }
 0xde4   :  { %v7578_v8 = vsel %vm7562_vm0, %v7553_v45, %v7570_v44  ;;  %vm7677_vm3 = vcmp.gt.f32.partialorder %v7633_v7, 0.0  ;;  %v7681_v26 = vmul.f32 0.01, %v7633_v7 }
 0xde5   :  { %7785 = vmatpush.msk.msrb.mxu3 %vm4244_vm14, %v7578_v8 }
 0xde6   :  { %v7685_v12 = vsel %vm7677_vm3, %v7633_v7, %v7681_v26 }
 0xde7   :  { %7671 = vmatpush.msrb.mxu3 %v7574_v16  ;;  %v7699_v43 = vmul.f32 %v7691_v54, %v7685_v12 }
 0xde8   :  { %7786 = vmatmul.msk.f32.vlgmr.msrb.gmra.mxu3 %vm7580_vm15, %v7579_v1 }
 0xde9   :  { %v7713_v39 = vadd.f32 %v7705_v35, %v7699_v43 }
 0xdeb   :  { %v7717_v47 = vmax.f32 %v7713_v39, 0.0 }
 0xded   :  { %7721 = vst [vmem:[%s15552_s21 + $0x8] sm:$0x3f] %v7717_v47 }
 0xe2a   :  { %v7653_v19 = vpop.f32.mrf.mxu2 }
 0xe2b   :  { %vm7678_vm14 = vcmp.gt.f32.partialorder %v7653_v19, 0.0  ;;  %v7682_v11 = vmul.f32 0.01, %v7653_v19 }
 0xe2d   :  { %v7686_v30 = vsel %vm7678_vm14, %v7653_v19, %v7682_v11 }
 0xe2e   :  { %v7700_v9 = vmul.f32 %v7692_v50, %v7686_v30 }
 0xe30   :  { %v7714_v22 = vadd.f32 %v7706_v57, %v7700_v9 }
 0xe32   :  { %v7718_v58 = vmax.f32 %v7714_v22, 0.0 }
 0xe34   :  { %7722 = vst [vmem:[%s15552_s21 + $0x10] sm:$0x3f] %v7718_v58 }
 0xe6b   :  { %v7673_v62 = vpop.f32.mrf.mxu3 }
 0xe6c   :  { %vm7679_vm4 = vcmp.gt.f32.partialorder %v7673_v62, 0.0  ;;  %v7683_v5 = vmul.f32 0.01, %v7673_v62 }
 0xe6e   :  { %v7687_v29 = vsel %vm7679_vm4, %v7673_v62, %v7683_v5 }
 0xe6f   :  { %v7701_v38 = vmul.f32 %v7693_v63, %v7687_v29 }
 0xe71   :  { %v7715_v56 = vadd.f32 %v7707_v61, %v7701_v38 }
 0xe73   :  { %v7719_v1 = vmax.f32 %v7715_v56, 0.0 }
 0xe75   :  { %7723 = vst [vmem:[%s15552_s21 + $0x18] sm:$0x3f] %v7719_v1 }

</bundles_post_ra>
